<compile_context>
chip_gen: v6e
topology: v6e:2x2x1
jax: 0.10.0
libtpu: 0.0.40
codegen_flags: <defaults>
</compile_context>

<pallas_src>
import functools

import jax
import jax.numpy as jnp
from jax.experimental import pallas as pl
from jax.experimental.pallas import tpu as pltpu

IMG_DIM = 28 * 28  # 784


def _leaky_relu(x, slope=0.2):
    return jnp.where(x > 0, x, slope * x)


def discriminator_kernel(xc_ref,
                         w1_ref, b1_ref,
                         w2_ref, b2_ref,
                         w3_ref, b3_ref,
                         w4_ref, b4_ref,
                         o_ref):
    """Whole MLP hot path: 3 bf16 MXU matmuls + VPU head, all in VMEM."""
    # Linear(784+embed_dim -> 1024): single fused dot (embedding cols are the
    # K tail of the same matmul).  bf16 inputs, f32 accumulation.
    h = jnp.dot(xc_ref[...], w1_ref[...],
                preferred_element_type=jnp.float32) + b1_ref[...]
    h = _leaky_relu(h)
    # Dropout(0.3): eval-mode identity.
    # TODO(synk): training-mode dropout (pltpu.prng_random_bits mask + 1/(1-p) scale).

    # Linear(1024 -> 512) + LeakyReLU(0.2)
    h = jnp.dot(h.astype(jnp.bfloat16), w2_ref[...],
                preferred_element_type=jnp.float32) + b2_ref[...]
    h = _leaky_relu(h)

    # Linear(512 -> 256) + LeakyReLU(0.2)
    h = jnp.dot(h.astype(jnp.bfloat16), w3_ref[...],
                preferred_element_type=jnp.float32) + b3_ref[...]
    h = _leaky_relu(h)

    # Linear(256 -> 1): N=1 would waste MXU lanes -> VPU multiply + row reduce.
    logit = jnp.sum(h * w4_ref[...], axis=-1, keepdims=True) + b4_ref[...]

    # Sigmoid
    o_ref[...] = 1.0 / (1.0 + jnp.exp(-logit))


def _round_up(x, m):
    return ((x + m - 1) // m) * m


@functools.partial(jax.jit, static_argnames=("embed_dim", "single_buffer_weights"))
def discriminator_forward(x, cond, params, embed_dim, single_buffer_weights=True):
    """x: (B, 1, 28, 28) float32, cond: (B,) int32 labels in [0, 10)."""
    B = x.shape[0]
    in_dim = IMG_DIM + embed_dim

    # Build the fused (B, 784+E) bf16 layer-1 input (concat is cheap: x_flat is
    # already materialized by the reshape+cast; no extra HBM round trip worth
    # splitting the matmul over).
    x_flat = x.reshape(B, -1).astype(jnp.bfloat16)                      # (B, 784)
    c = jnp.take(params["embed"], cond, axis=0).astype(jnp.bfloat16)   # (B, E)
    xc = jnp.concatenate([x_flat, c], axis=1)                           # (B, 784+E)

    # Static (trace-time) chip heuristic: 256-wide MXU M pass only on v6e/v7x.
    kind = jax.devices()[0].device_kind.lower()
    wide_mxu = ("v6" in kind) or ("v7" in kind)

    # Batch tile: bf16 packs 16 sublanes per vreg -> round small B to 16.
    if B <= 128:
        B_pad = _round_up(B, 16)
        TB = B_pad
    elif wide_mxu and B >= 256:
        B_pad = _round_up(B, 256)
        TB = 256
    else:
        B_pad = _round_up(B, 128)
        TB = 128

    if B_pad != B:
        xc = jnp.pad(xc, ((0, B_pad - B), (0, 0)))

    w1, b1 = params["w1"], params["b1"]
    w2, b2 = params["w2"], params["b2"]
    w3, b3 = params["w3"], params["b3"]
    w4, b4 = params["w4"], params["b4"]

    # Weights / biases: full-array blocks, constant block index -> VMEM-resident.
    # Single buffer (Buffered(1)): the block never changes, so a second buffer
    # is dead VMEM and risks redundant re-DMA.
    def resident(arr):
        nd = arr.ndim
        if single_buffer_weights:
            return pl.BlockSpec(arr.shape, lambda *_g, _nd=nd: (0,) * _nd,
                                pipeline_mode=pl.Buffered(1))
        return pl.BlockSpec(arr.shape, lambda *_g, _nd=nd: (0,) * _nd)

    flops = 2 * B_pad * (in_dim * 1024 + 1024 * 512 + 512 * 256 + 256)
    weight_bytes = sum(int(a.size) * a.dtype.itemsize
                       for a in (w1, b1, w2, b2, w3, b3, w4, b4))
    bytes_accessed = weight_bytes + int(xc.size) * 2 + B_pad * 4

    out = pl.pallas_call(
        discriminator_kernel,
        out_shape=jax.ShapeDtypeStruct((B_pad, 1), jnp.float32),
        grid=(B_pad // TB,),
        in_specs=[
            pl.BlockSpec((TB, in_dim), lambda i: (i, 0)),
            resident(w1), resident(b1),
            resident(w2), resident(b2),
            resident(w3), resident(b3),
            resident(w4), resident(b4),
        ],
        out_specs=pl.BlockSpec((TB, 1), lambda i: (i, 0)),
        compiler_params=pltpu.CompilerParams(
            dimension_semantics=("parallel",),
            vmem_limit_bytes=32 << 20,            # safe on v5e/v6e/v7x
        ),
        cost_estimate=pl.CostEstimate(
            flops=flops, transcendentals=B_pad, bytes_accessed=bytes_accessed),
    )(xc, w1, b1, w2, b2, w3, b3, w4, b4)

    return jnp.squeeze(out[:B])                                # matches out.squeeze()


def make_params(key, embed_dim):
    """Deterministic synthetic parameters matching the torch module shapes.

    Linear weights are stored as (in_features, out_features); the big layers
    are kept in bf16 (halves weight HBM traffic, native MXU dtype).  W1 is a
    single fused (784+embed_dim, 1024) matrix (image rows then embedding rows).
    """
    in_dim = IMG_DIM + embed_dim
    ks = jax.random.split(key, 9)

    def lin(kw, fan_in, fan_out, dtype=jnp.bfloat16):
        bound = 1.0 / jnp.sqrt(fan_in)
        w = jax.random.uniform(kw, (fan_in, fan_out), jnp.float32, -bound, bound)
        return w.astype(dtype)

    params = {
        "embed": jax.random.normal(ks[8], (10, embed_dim), jnp.float32),
        "w1": lin(ks[0], in_dim, 1024),                      # (784+E, 1024) bf16
        "b1": jax.random.uniform(ks[1], (1, 1024), jnp.float32, -0.03, 0.03),
        "w2": lin(ks[2], 1024, 512),
        "b2": jax.random.uniform(ks[3], (1, 512), jnp.float32, -0.03, 0.03),
        "w3": lin(ks[4], 512, 256),
        "b3": jax.random.uniform(ks[5], (1, 256), jnp.float32, -0.03, 0.03),
        # Final layer kept f32 as a (1, 256) row for the VPU reduce head.
        "w4": lin(ks[6], 256, 1, dtype=jnp.float32).reshape(1, 256),
        "b4": jax.random.uniform(ks[7], (1, 1), jnp.float32, -0.06, 0.06),
    }
    return params


def reference_forward(x, cond, params, embed_dim):
    """Pure-JAX reference mirroring the torch forward (eval-mode dropout),
    using the same bf16-input / f32-accumulate precision as the kernel."""
    B = x.shape[0]
    x_flat = x.reshape(B, -1).astype(jnp.bfloat16)
    c = jnp.take(params["embed"], cond, axis=0).astype(jnp.bfloat16)
    xc = jnp.concatenate([x_flat, c], axis=1)
    h = jnp.dot(xc, params["w1"], preferred_element_type=jnp.float32) + params["b1"]
    h = jnp.where(h > 0, h, 0.2 * h)
    h = jnp.dot(h.astype(jnp.bfloat16), params["w2"],
                preferred_element_type=jnp.float32) + params["b2"]
    h = jnp.where(h > 0, h, 0.2 * h)
    h = jnp.dot(h.astype(jnp.bfloat16), params["w3"],
                preferred_element_type=jnp.float32) + params["b3"]
    h = jnp.where(h > 0, h, 0.2 * h)
    logit = jnp.sum(h * params["w4"], axis=-1, keepdims=True) + params["b4"]
    return jnp.squeeze(jax.nn.sigmoid(logit))


if __name__ == "__main__":
    embed_dim = 32
    B = 8

    key = jax.random.PRNGKey(0)
    k_params, k_x, k_c = jax.random.split(key, 3)

    params = make_params(k_params, embed_dim)
    x = jax.random.normal(k_x, (B, 1, 28, 28), jnp.float32)
    cond = jax.random.randint(k_c, (B,), 0, 10, jnp.int32)

    try:
        out = jax.block_until_ready(
            discriminator_forward(x, cond, params, embed_dim, True))
    except Exception:
        # Fallback: default double-buffered weight specs.
        out = jax.block_until_ready(
            discriminator_forward(x, cond, params, embed_dim, False))

    ref = reference_forward(x, cond, params, embed_dim)
    assert out.shape == (B,), out.shape
    assert jnp.allclose(out, ref, atol=1e-4, rtol=1e-4), (out, ref)

    print("KERNEL_OK")
</pallas_src>

<mosaic_0001>
module attributes {stable_mosaic.version = 11 : i64} {
  func.func @discriminator_kernel(%arg0: i32, %arg1: memref<16x816xbf16, #tpu.memory_space<vmem>>, %arg2: memref<816x1024xbf16, #tpu.memory_space<vmem>>, %arg3: memref<1x1024xf32, #tpu.memory_space<vmem>>, %arg4: memref<1024x512xbf16, #tpu.memory_space<vmem>>, %arg5: memref<1x512xf32, #tpu.memory_space<vmem>>, %arg6: memref<512x256xbf16, #tpu.memory_space<vmem>>, %arg7: memref<1x256xf32, #tpu.memory_space<vmem>>, %arg8: memref<1x256xf32, #tpu.memory_space<vmem>>, %arg9: memref<1x1xf32, #tpu.memory_space<vmem>>, %arg10: memref<16x1xf32, #tpu.memory_space<vmem>>) attributes {dimension_semantics = [#tpu.dimension_semantics<parallel>], iteration_bounds = array<i64: 1>, scalar_prefetch = 0 : i64, scratch_operands = 0 : i64, tpu.core_type = #tpu.core_type<tc>, window_params = [{transform_indices = @transform_0, window_bounds = array<i64: 16, 816>}, {pipeline_mode = #tpu.pipeline_mode<synchronous>, transform_indices = @transform_1, window_bounds = array<i64: 816, 1024>}, {pipeline_mode = #tpu.pipeline_mode<synchronous>, transform_indices = @transform_2, window_bounds = array<i64: 1, 1024>}, {pipeline_mode = #tpu.pipeline_mode<synchronous>, transform_indices = @transform_3, window_bounds = array<i64: 1024, 512>}, {pipeline_mode = #tpu.pipeline_mode<synchronous>, transform_indices = @transform_4, window_bounds = array<i64: 1, 512>}, {pipeline_mode = #tpu.pipeline_mode<synchronous>, transform_indices = @transform_5, window_bounds = array<i64: 512, 256>}, {pipeline_mode = #tpu.pipeline_mode<synchronous>, transform_indices = @transform_6, window_bounds = array<i64: 1, 256>}, {pipeline_mode = #tpu.pipeline_mode<synchronous>, transform_indices = @transform_7, window_bounds = array<i64: 1, 256>}, {pipeline_mode = #tpu.pipeline_mode<synchronous>, transform_indices = @transform_8, window_bounds = array<i64: 1, 1>}, {transform_indices = @transform_9, window_bounds = array<i64: 16, 1>}]} {
    %c0 = arith.constant 0 : index
    %c0_0 = arith.constant 0 : index
    %0 = vector.load %arg1[%c0, %c0_0] : memref<16x816xbf16, #tpu.memory_space<vmem>>, vector<16x816xbf16>
    %c0_1 = arith.constant 0 : index
    %c0_2 = arith.constant 0 : index
    %1 = vector.load %arg2[%c0_1, %c0_2] : memref<816x1024xbf16, #tpu.memory_space<vmem>>, vector<816x1024xbf16>
    %cst = arith.constant dense<0.000000e+00> : vector<16x1024xf32>
    %2 = tpu.matmul %0, %1, %cst {dimension_numbers = #tpu.dot_dimension_numbers<[1], [0], [0], [1], [0, 0, 1, 1], [], []>} : vector<16x816xbf16>, vector<816x1024xbf16>, vector<16x1024xf32> -> vector<16x1024xf32>
    %c0_3 = arith.constant 0 : index
    %c0_4 = arith.constant 0 : index
    %3 = vector.load %arg3[%c0_3, %c0_4] : memref<1x1024xf32, #tpu.memory_space<vmem>>, vector<1x1024xf32>
    %4 = vector.broadcast %3 : vector<1x1024xf32> to vector<16x1024xf32>
    %5 = arith.addf %2, %4 : vector<16x1024xf32>
    %cst_5 = arith.constant 0.000000e+00 : f32
    %6 = vector.broadcast %cst_5 : f32 to vector<16x1024xf32>
    %7 = arith.cmpf ogt, %5, %6 : vector<16x1024xf32>
    %cst_6 = arith.constant 2.000000e-01 : f32
    %8 = vector.broadcast %cst_6 : f32 to vector<16x1024xf32>
    %9 = arith.mulf %8, %5 : vector<16x1024xf32>
    %10 = arith.select %7, %5, %9 : vector<16x1024xi1>, vector<16x1024xf32>
    %11 = arith.truncf %10 : vector<16x1024xf32> to vector<16x1024xbf16>
    %c0_7 = arith.constant 0 : index
    %c0_8 = arith.constant 0 : index
    %12 = vector.load %arg4[%c0_7, %c0_8] : memref<1024x512xbf16, #tpu.memory_space<vmem>>, vector<1024x512xbf16>
    %cst_9 = arith.constant dense<0.000000e+00> : vector<16x512xf32>
    %13 = tpu.matmul %11, %12, %cst_9 {dimension_numbers = #tpu.dot_dimension_numbers<[1], [0], [0], [1], [0, 0, 1, 1], [], []>} : vector<16x1024xbf16>, vector<1024x512xbf16>, vector<16x512xf32> -> vector<16x512xf32>
    %c0_10 = arith.constant 0 : index
    %c0_11 = arith.constant 0 : index
    %14 = vector.load %arg5[%c0_10, %c0_11] : memref<1x512xf32, #tpu.memory_space<vmem>>, vector<1x512xf32>
    %15 = vector.broadcast %14 : vector<1x512xf32> to vector<16x512xf32>
    %16 = arith.addf %13, %15 : vector<16x512xf32>
    %cst_12 = arith.constant 0.000000e+00 : f32
    %17 = vector.broadcast %cst_12 : f32 to vector<16x512xf32>
    %18 = arith.cmpf ogt, %16, %17 : vector<16x512xf32>
    %cst_13 = arith.constant 2.000000e-01 : f32
    %19 = vector.broadcast %cst_13 : f32 to vector<16x512xf32>
    %20 = arith.mulf %19, %16 : vector<16x512xf32>
    %21 = arith.select %18, %16, %20 : vector<16x512xi1>, vector<16x512xf32>
    %22 = arith.truncf %21 : vector<16x512xf32> to vector<16x512xbf16>
    %c0_14 = arith.constant 0 : index
    %c0_15 = arith.constant 0 : index
    %23 = vector.load %arg6[%c0_14, %c0_15] : memref<512x256xbf16, #tpu.memory_space<vmem>>, vector<512x256xbf16>
    %cst_16 = arith.constant dense<0.000000e+00> : vector<16x256xf32>
    %24 = tpu.matmul %22, %23, %cst_16 {dimension_numbers = #tpu.dot_dimension_numbers<[1], [0], [0], [1], [0, 0, 1, 1], [], []>} : vector<16x512xbf16>, vector<512x256xbf16>, vector<16x256xf32> -> vector<16x256xf32>
    %c0_17 = arith.constant 0 : index
    %c0_18 = arith.constant 0 : index
    %25 = vector.load %arg7[%c0_17, %c0_18] : memref<1x256xf32, #tpu.memory_space<vmem>>, vector<1x256xf32>
    %26 = vector.broadcast %25 : vector<1x256xf32> to vector<16x256xf32>
    %27 = arith.addf %24, %26 : vector<16x256xf32>
    %cst_19 = arith.constant 0.000000e+00 : f32
    %28 = vector.broadcast %cst_19 : f32 to vector<16x256xf32>
    %29 = arith.cmpf ogt, %27, %28 : vector<16x256xf32>
    %cst_20 = arith.constant 2.000000e-01 : f32
    %30 = vector.broadcast %cst_20 : f32 to vector<16x256xf32>
    %31 = arith.mulf %30, %27 : vector<16x256xf32>
    %32 = arith.select %29, %27, %31 : vector<16x256xi1>, vector<16x256xf32>
    %c0_21 = arith.constant 0 : index
    %c0_22 = arith.constant 0 : index
    %33 = vector.load %arg8[%c0_21, %c0_22] : memref<1x256xf32, #tpu.memory_space<vmem>>, vector<1x256xf32>
    %34 = vector.broadcast %33 : vector<1x256xf32> to vector<16x256xf32>
    %35 = arith.mulf %32, %34 : vector<16x256xf32>
    %cst_23 = arith.constant dense<0.000000e+00> : vector<16xf32>
    %36 = vector.multi_reduction <add>, %35, %cst_23 [1] : vector<16x256xf32> to vector<16xf32>
    %37 = vector.shape_cast %36 : vector<16xf32> to vector<16x1xf32>
    %c0_24 = arith.constant 0 : index
    %c0_25 = arith.constant 0 : index
    %38 = vector.load %arg9[%c0_24, %c0_25] : memref<1x1xf32, #tpu.memory_space<vmem>>, vector<1x1xf32>
    %39 = vector.broadcast %38 : vector<1x1xf32> to vector<16x1xf32>
    %40 = arith.addf %37, %39 : vector<16x1xf32>
    %cst_26 = arith.constant 0.000000e+00 : f32
    %41 = vector.broadcast %cst_26 : f32 to vector<16x1xf32>
    %42 = arith.subf %41, %40 : vector<16x1xf32>
    %43 = math.exp %42 : vector<16x1xf32>
    %cst_27 = arith.constant 1.000000e+00 : f32
    %44 = vector.broadcast %cst_27 : f32 to vector<16x1xf32>
    %45 = arith.addf %44, %43 : vector<16x1xf32>
    %cst_28 = arith.constant 1.000000e+00 : f32
    %46 = vector.broadcast %cst_28 : f32 to vector<16x1xf32>
    %47 = arith.divf %46, %45 : vector<16x1xf32>
    %c0_29 = arith.constant 0 : index
    %c0_30 = arith.constant 0 : index
    %48 = vector.load %arg10[%c0_29, %c0_30] : memref<16x1xf32, #tpu.memory_space<vmem>>, vector<16x1xf32>
    tpu.vector_store %arg10[%c0_29, %c0_30], %47 {strides = array<i32>} : memref<16x1xf32, #tpu.memory_space<vmem>>, vector<16x1xf32>,
    return
  }
  func.func @transform_0(%arg0: i32) -> (i32, i32) {
    %c0_i32 = arith.constant 0 : i32
    %c0_i32_0 = arith.constant 0 : i32
    return %arg0, %c0_i32 : i32, i32
  }
  func.func @transform_1(%arg0: i32) -> (i32, i32) {
    %c0_i32 = arith.constant 0 : i32
    %c0_i32_0 = arith.constant 0 : i32
    %c0_i32_1 = arith.constant 0 : i32
    return %c0_i32, %c0_i32_0 : i32, i32
  }
  func.func @transform_2(%arg0: i32) -> (i32, i32) {
    %c0_i32 = arith.constant 0 : i32
    %c0_i32_0 = arith.constant 0 : i32
    %c0_i32_1 = arith.constant 0 : i32
    return %c0_i32, %c0_i32_0 : i32, i32
  }
  func.func @transform_3(%arg0: i32) -> (i32, i32) {
    %c0_i32 = arith.constant 0 : i32
    %c0_i32_0 = arith.constant 0 : i32
    %c0_i32_1 = arith.constant 0 : i32
    return %c0_i32, %c0_i32_0 : i32, i32
  }
  func.func @transform_4(%arg0: i32) -> (i32, i32) {
    %c0_i32 = arith.constant 0 : i32
    %c0_i32_0 = arith.constant 0 : i32
    %c0_i32_1 = arith.constant 0 : i32
    return %c0_i32, %c0_i32_0 : i32, i32
  }
  func.func @transform_5(%arg0: i32) -> (i32, i32) {
    %c0_i32 = arith.constant 0 : i32
    %c0_i32_0 = arith.constant 0 : i32
    %c0_i32_1 = arith.constant 0 : i32
    return %c0_i32, %c0_i32_0 : i32, i32
  }
  func.func @transform_6(%arg0: i32) -> (i32, i32) {
    %c0_i32 = arith.constant 0 : i32
    %c0_i32_0 = arith.constant 0 : i32
    %c0_i32_1 = arith.constant 0 : i32
    return %c0_i32, %c0_i32_0 : i32, i32
  }
  func.func @transform_7(%arg0: i32) -> (i32, i32) {
    %c0_i32 = arith.constant 0 : i32
    %c0_i32_0 = arith.constant 0 : i32
    %c0_i32_1 = arith.constant 0 : i32
    return %c0_i32, %c0_i32_0 : i32, i32
  }
  func.func @transform_8(%arg0: i32) -> (i32, i32) {
    %c0_i32 = arith.constant 0 : i32
    %c0_i32_0 = arith.constant 0 : i32
    %c0_i32_1 = arith.constant 0 : i32
    return %c0_i32, %c0_i32_0 : i32, i32
  }
  func.func @transform_9(%arg0: i32) -> (i32, i32) {
    %c0_i32 = arith.constant 0 : i32
    %c0_i32_0 = arith.constant 0 : i32
    return %arg0, %c0_i32 : i32, i32
  }
}

module attributes {stable_mosaic.version = 11 : i64} {
  func.func @discriminator_kernel(%arg0: i32, %arg1: memref<16x816xbf16, #tpu.memory_space<vmem>>, %arg2: memref<816x1024xbf16, #tpu.memory_space<vmem>>, %arg3: memref<1x1024xf32, #tpu.memory_space<vmem>>, %arg4: memref<1024x512xbf16, #tpu.memory_space<vmem>>, %arg5: memref<1x512xf32, #tpu.memory_space<vmem>>, %arg6: memref<512x256xbf16, #tpu.memory_space<vmem>>, %arg7: memref<1x256xf32, #tpu.memory_space<vmem>>, %arg8: memref<1x256xf32, #tpu.memory_space<vmem>>, %arg9: memref<1x1xf32, #tpu.memory_space<vmem>>, %arg10: memref<16x1xf32, #tpu.memory_space<vmem>>) attributes {dimension_semantics = [#tpu.dimension_semantics<parallel>], iteration_bounds = array<i64: 1>, scalar_prefetch = 0 : i64, scratch_operands = 0 : i64, tpu.core_type = #tpu.core_type<tc>, window_params = [{transform_indices = @transform_0, window_bounds = array<i64: 16, 816>}, {pipeline_mode = #tpu.pipeline_mode<synchronous>, transform_indices = @transform_1, window_bounds = array<i64: 816, 1024>}, {pipeline_mode = #tpu.pipeline_mode<synchronous>, transform_indices = @transform_2, window_bounds = array<i64: 1, 1024>}, {pipeline_mode = #tpu.pipeline_mode<synchronous>, transform_indices = @transform_3, window_bounds = array<i64: 1024, 512>}, {pipeline_mode = #tpu.pipeline_mode<synchronous>, transform_indices = @transform_4, window_bounds = array<i64: 1, 512>}, {pipeline_mode = #tpu.pipeline_mode<synchronous>, transform_indices = @transform_5, window_bounds = array<i64: 512, 256>}, {pipeline_mode = #tpu.pipeline_mode<synchronous>, transform_indices = @transform_6, window_bounds = array<i64: 1, 256>}, {pipeline_mode = #tpu.pipeline_mode<synchronous>, transform_indices = @transform_7, window_bounds = array<i64: 1, 256>}, {pipeline_mode = #tpu.pipeline_mode<synchronous>, transform_indices = @transform_8, window_bounds = array<i64: 1, 1>}, {transform_indices = @transform_9, window_bounds = array<i64: 16, 1>}]} {
    %c0 = arith.constant 0 : index
    %c0_0 = arith.constant 0 : index
    %0 = vector.load %arg1[%c0, %c0_0] : memref<16x816xbf16, #tpu.memory_space<vmem>>, vector<16x816xbf16>
    %c0_1 = arith.constant 0 : index
    %c0_2 = arith.constant 0 : index
    %1 = vector.load %arg2[%c0_1, %c0_2] : memref<816x1024xbf16, #tpu.memory_space<vmem>>, vector<816x1024xbf16>
    %cst = arith.constant dense<0.000000e+00> : vector<16x1024xf32>
    %2 = tpu.matmul %0, %1, %cst {dimension_numbers = #tpu.dot_dimension_numbers<[1], [0], [0], [1], [0, 0, 1, 1], [], []>} : vector<16x816xbf16>, vector<816x1024xbf16>, vector<16x1024xf32> -> vector<16x1024xf32>
    %c0_3 = arith.constant 0 : index
    %c0_4 = arith.constant 0 : index
    %3 = vector.load %arg3[%c0_3, %c0_4] : memref<1x1024xf32, #tpu.memory_space<vmem>>, vector<1x1024xf32>
    %4 = vector.broadcast %3 : vector<1x1024xf32> to vector<16x1024xf32>
    %5 = arith.addf %2, %4 : vector<16x1024xf32>
    %cst_5 = arith.constant 0.000000e+00 : f32
    %6 = vector.broadcast %cst_5 : f32 to vector<16x1024xf32>
    %7 = arith.cmpf ogt, %5, %6 : vector<16x1024xf32>
    %cst_6 = arith.constant 2.000000e-01 : f32
    %8 = vector.broadcast %cst_6 : f32 to vector<16x1024xf32>
    %9 = arith.mulf %8, %5 : vector<16x1024xf32>
    %10 = arith.select %7, %5, %9 : vector<16x1024xi1>, vector<16x1024xf32>
    %11 = arith.truncf %10 : vector<16x1024xf32> to vector<16x1024xbf16>
    %c0_7 = arith.constant 0 : index
    %c0_8 = arith.constant 0 : index
    %12 = vector.load %arg4[%c0_7, %c0_8] : memref<1024x512xbf16, #tpu.memory_space<vmem>>, vector<1024x512xbf16>
    %cst_9 = arith.constant dense<0.000000e+00> : vector<16x512xf32>
    %13 = tpu.matmul %11, %12, %cst_9 {dimension_numbers = #tpu.dot_dimension_numbers<[1], [0], [0], [1], [0, 0, 1, 1], [], []>} : vector<16x1024xbf16>, vector<1024x512xbf16>, vector<16x512xf32> -> vector<16x512xf32>
    %c0_10 = arith.constant 0 : index
    %c0_11 = arith.constant 0 : index
    %14 = vector.load %arg5[%c0_10, %c0_11] : memref<1x512xf32, #tpu.memory_space<vmem>>, vector<1x512xf32>
    %15 = vector.broadcast %14 : vector<1x512xf32> to vector<16x512xf32>
    %16 = arith.addf %13, %15 : vector<16x512xf32>
    %cst_12 = arith.constant 0.000000e+00 : f32
    %17 = vector.broadcast %cst_12 : f32 to vector<16x512xf32>
    %18 = arith.cmpf ogt, %16, %17 : vector<16x512xf32>
    %cst_13 = arith.constant 2.000000e-01 : f32
    %19 = vector.broadcast %cst_13 : f32 to vector<16x512xf32>
    %20 = arith.mulf %19, %16 : vector<16x512xf32>
    %21 = arith.select %18, %16, %20 : vector<16x512xi1>, vector<16x512xf32>
    %22 = arith.truncf %21 : vector<16x512xf32> to vector<16x512xbf16>
    %c0_14 = arith.constant 0 : index
    %c0_15 = arith.constant 0 : index
    %23 = vector.load %arg6[%c0_14, %c0_15] : memref<512x256xbf16, #tpu.memory_space<vmem>>, vector<512x256xbf16>
    %cst_16 = arith.constant dense<0.000000e+00> : vector<16x256xf32>
    %24 = tpu.matmul %22, %23, %cst_16 {dimension_numbers = #tpu.dot_dimension_numbers<[1], [0], [0], [1], [0, 0, 1, 1], [], []>} : vector<16x512xbf16>, vector<512x256xbf16>, vector<16x256xf32> -> vector<16x256xf32>
    %c0_17 = arith.constant 0 : index
    %c0_18 = arith.constant 0 : index
    %25 = vector.load %arg7[%c0_17, %c0_18] : memref<1x256xf32, #tpu.memory_space<vmem>>, vector<1x256xf32>
    %26 = vector.broadcast %25 : vector<1x256xf32> to vector<16x256xf32>
    %27 = arith.addf %24, %26 : vector<16x256xf32>
    %cst_19 = arith.constant 0.000000e+00 : f32
    %28 = vector.broadcast %cst_19 : f32 to vector<16x256xf32>
    %29 = arith.cmpf ogt, %27, %28 : vector<16x256xf32>
    %cst_20 = arith.constant 2.000000e-01 : f32
    %30 = vector.broadcast %cst_20 : f32 to vector<16x256xf32>
    %31 = arith.mulf %30, %27 : vector<16x256xf32>
    %32 = arith.select %29, %27, %31 : vector<16x256xi1>, vector<16x256xf32>
    %c0_21 = arith.constant 0 : index
    %c0_22 = arith.constant 0 : index
    %33 = vector.load %arg8[%c0_21, %c0_22] : memref<1x256xf32, #tpu.memory_space<vmem>>, vector<1x256xf32>
    %34 = vector.broadcast %33 : vector<1x256xf32> to vector<16x256xf32>
    %35 = arith.mulf %32, %34 : vector<16x256xf32>
    %cst_23 = arith.constant dense<0.000000e+00> : vector<16xf32>
    %36 = vector.multi_reduction <add>, %35, %cst_23 [1] : vector<16x256xf32> to vector<16xf32>
    %37 = vector.shape_cast %36 : vector<16xf32> to vector<16x1xf32>
    %c0_24 = arith.constant 0 : index
    %c0_25 = arith.constant 0 : index
    %38 = vector.load %arg9[%c0_24, %c0_25] : memref<1x1xf32, #tpu.memory_space<vmem>>, vector<1x1xf32>
    %39 = vector.broadcast %38 : vector<1x1xf32> to vector<16x1xf32>
    %40 = arith.addf %37, %39 : vector<16x1xf32>
    %cst_26 = arith.constant 0.000000e+00 : f32
    %41 = vector.broadcast %cst_26 : f32 to vector<16x1xf32>
    %42 = arith.subf %41, %40 : vector<16x1xf32>
    %43 = math.exp %42 : vector<16x1xf32>
    %cst_27 = arith.constant 1.000000e+00 : f32
    %44 = vector.broadcast %cst_27 : f32 to vector<16x1xf32>
    %45 = arith.addf %44, %43 : vector<16x1xf32>
    %cst_28 = arith.constant 1.000000e+00 : f32
    %46 = vector.broadcast %cst_28 : f32 to vector<16x1xf32>
    %47 = arith.divf %46, %45 : vector<16x1xf32>
    %c0_29 = arith.constant 0 : index
    %c0_30 = arith.constant 0 : index
    %48 = vector.load %arg10[%c0_29, %c0_30] : memref<16x1xf32, #tpu.memory_space<vmem>>, vector<16x1xf32>
    tpu.vector_store %arg10[%c0_29, %c0_30], %47 {strides = array<i32>} : memref<16x1xf32, #tpu.memory_space<vmem>>, vector<16x1xf32>,
    return
  }
  func.func @transform_0(%arg0: i32) -> (i32, i32) {
    %c0_i32 = arith.constant 0 : i32
    %c0_i32_0 = arith.constant 0 : i32
    return %arg0, %c0_i32 : i32, i32
  }
  func.func @transform_1(%arg0: i32) -> (i32, i32) {
    %c0_i32 = arith.constant 0 : i32
    %c0_i32_0 = arith.constant 0 : i32
    %c0_i32_1 = arith.constant 0 : i32
    return %c0_i32, %c0_i32_0 : i32, i32
  }
  func.func @transform_2(%arg0: i32) -> (i32, i32) {
    %c0_i32 = arith.constant 0 : i32
    %c0_i32_0 = arith.constant 0 : i32
    %c0_i32_1 = arith.constant 0 : i32
    return %c0_i32, %c0_i32_0 : i32, i32
  }
  func.func @transform_3(%arg0: i32) -> (i32, i32) {
    %c0_i32 = arith.constant 0 : i32
    %c0_i32_0 = arith.constant 0 : i32
    %c0_i32_1 = arith.constant 0 : i32
    return %c0_i32, %c0_i32_0 : i32, i32
  }
  func.func @transform_4(%arg0: i32) -> (i32, i32) {
    %c0_i32 = arith.constant 0 : i32
    %c0_i32_0 = arith.constant 0 : i32
    %c0_i32_1 = arith.constant 0 : i32
    return %c0_i32, %c0_i32_0 : i32, i32
  }
  func.func @transform_5(%arg0: i32) -> (i32, i32) {
    %c0_i32 = arith.constant 0 : i32
    %c0_i32_0 = arith.constant 0 : i32
    %c0_i32_1 = arith.constant 0 : i32
    return %c0_i32, %c0_i32_0 : i32, i32
  }
  func.func @transform_6(%arg0: i32) -> (i32, i32) {
    %c0_i32 = arith.constant 0 : i32
    %c0_i32_0 = arith.constant 0 : i32
    %c0_i32_1 = arith.constant 0 : i32
    return %c0_i32, %c0_i32_0 : i32, i32
  }
  func.func @transform_7(%arg0: i32) -> (i32, i32) {
    %c0_i32 = arith.constant 0 : i32
    %c0_i32_0 = arith.constant 0 : i32
    %c0_i32_1 = arith.constant 0 : i32
    return %c0_i32, %c0_i32_0 : i32, i32
  }
  func.func @transform_8(%arg0: i32) -> (i32, i32) {
    %c0_i32 = arith.constant 0 : i32
    %c0_i32_0 = arith.constant 0 : i32
    %c0_i32_1 = arith.constant 0 : i32
    return %c0_i32, %c0_i32_0 : i32, i32
  }
  func.func @transform_9(%arg0: i32) -> (i32, i32) {
    %c0_i32 = arith.constant 0 : i32
    %c0_i32_0 = arith.constant 0 : i32
    return %arg0, %c0_i32 : i32, i32
  }
}

</mosaic_0001>

<bundles_post_ra>
// kernel: discriminator_forward.1
= control target key start
LH: loop header
LB: loop body
LE: loop exit
PB: predicated region body
PF: predicated region fallthrough
CT: control target
= control target key end

     0   :  { %s7603_s0 = inlined_call_operand.vmem [shape: bf16[16,816], index: 0, kind: input, shape index: {}]   ;;  %s7604_s1 = inlined_call_operand.hbm [shape: bf16[816,1024], index: 1, kind: input, shape index: {}]   ;;  %s7605_s2 = inlined_call_operand.hbm [shape: f32[1,1024], index: 2, kind: input, shape index: {}]   ;;  %s7606_s3 = inlined_call_operand.hbm [shape: bf16[1024,512], index: 3, kind: input, shape index: {}]   ;;  %s7607_s4 = inlined_call_operand.hbm [shape: f32[1,512], index: 4, kind: input, shape index: {}]   ;;  %s7608_s5 = inlined_call_operand.hbm [shape: bf16[512,256], index: 5, kind: input, shape index: {}]   ;;  %s7609_s6 = inlined_call_operand.hbm [shape: f32[1,256], index: 6, kind: input, shape index: {}]   ;;  %s7610_s7 = inlined_call_operand.hbm [shape: f32[1,256], index: 7, kind: input, shape index: {}]   ;;  %s7611_s8 = inlined_call_operand.<no memory space> [shape: f32[1,1], index: 8, kind: input, shape index: {}]   ;;  %s7612_s9 = inlined_call_operand.vmem [shape: f32[16,1], index: 9, kind: output, shape index: {}]  }
   0x1   :  { %v14_v0 = vstv %s7611_s8 }
   0x2   :  { %15 = vst [vmem:[#allocation2] sm:$0x1] %v14_v0 }
   0x3   :  { %16 = vsyncpa [#allocation4], 0 }
   0x4   :  { %17 = vsyncpa [#allocation6], 0 }
   0x5   :  { %18 = vsyncpa [#allocation9], 0 }
   0x6   :  { %19 = vsyncpa [#allocation12], 0  ;;  %s7291_s11 = smov [#allocation5]   ;;  %s7292_s13 = smov [#allocation8]  }
   0x7   :  { %s40_s12 = sshll.u32 %s7291_s11, 4  ;;  %s62_s14 = sshll.u32 %s7292_s13, 4  ;;  %s41_s12 = int_to_ptr.vmem [resolvable:$true] %s40_s12  ;;  %s63_s14 = int_to_ptr.vmem [resolvable:$true] %s62_s14 }
   0x8   :  { %s7151_s15 = scalar_lea.vmem %s41_s12, 128  ;;  %p7156_p1 = scmp.lt.s32.totalorder %s41_s12, %s41_s12 }
   0x9   :  { %p7152_p0 = scmp.ne.s32.totalorder %s41_s12, %s7151_s15  ;;  %p7157_p2 = scmp.lt.s32.totalorder %s7151_s15, %s7151_s15 }
   0xb   :  { %p7158_p3 = por %p7157_p2, %p7156_p1 }
   0xd   :  { %p7159_p4 = pnand %p7158_p3, %p7152_p0 }
   0xf   :  { %7162 = shalt.err (!%p7159_p4)
}
  0x10   :  { %43 = dma.hbm_to_vmem [thread:$0]  %s7605_s2, 128, %s41_s12, [#allocation6]  }
  0x11   :  { %s7171_s17 = scalar_lea.vmem %s63_s14, 64  ;;  %p7176_p6 = scmp.lt.s32.totalorder %s63_s14, %s63_s14 }
  0x12   :  { %p7172_p5 = scmp.ne.s32.totalorder %s63_s14, %s7171_s17  ;;  %p7177_p7 = scmp.lt.s32.totalorder %s7171_s17, %s7171_s17 }
  0x14   :  { %p7178_p8 = por %p7177_p7, %p7176_p6 }
  0x16   :  { %p7179_p9 = pnand %p7178_p8, %p7172_p5 }
  0x18   :  { %7182 = shalt.err (!%p7179_p9)
}
  0x19   :  { %65 = dma.hbm_to_vmem [thread:$0]  %s7607_s4, 64, %s63_s14, [#allocation9]  }
  0x1a   :  { %s7293_s20 = smov [#allocation11]   ;;  %s7294_s22 = smov [#allocation3]  }
  0x1b   :  { %s84_s21 = sshll.u32 %s7293_s20, 4  ;;  %s27_s23 = sshll.u32 %s7294_s22, 4  ;;  %s85_s21 = int_to_ptr.vmem [resolvable:$true] %s84_s21  ;;  %s28_s23 = int_to_ptr.vmem [resolvable:$true] %s27_s23 }
  0x1c   :  { %s7191_s24 = scalar_lea.vmem %s85_s21, 32  ;;  %p7196_p11 = scmp.lt.s32.totalorder %s85_s21, %s85_s21 }
  0x1d   :  { %p7192_p10 = scmp.ne.s32.totalorder %s85_s21, %s7191_s24  ;;  %p7197_p12 = scmp.lt.s32.totalorder %s7191_s24, %s7191_s24 }
  0x1f   :  { %p7198_p13 = por %p7197_p12, %p7196_p11 }
  0x21   :  { %p7199_p0 = pnand %p7198_p13, %p7192_p10 }
  0x23   :  { %7202 = shalt.err (!%p7199_p0)
}
  0x24   :  { %87 = dma.hbm_to_vmem [thread:$0]  %s7609_s6, 32, %s85_s21, [#allocation12]  }
  0x25   :  { %s7211_s26 = scalar_lea.vmem %s28_s23, 52224  ;;  %p7216_p2 = scmp.lt.s32.totalorder %s28_s23, %s28_s23 }
  0x26   :  { %p7212_p1 = scmp.ne.s32.totalorder %s28_s23, %s7211_s26  ;;  %p7217_p3 = scmp.lt.s32.totalorder %s7211_s26, %s7211_s26 }
  0x28   :  { %p7218_p4 = por %p7217_p3, %p7216_p2 }
  0x2a   :  { %p7219_p5 = pnand %p7218_p4, %p7212_p1 }
  0x2c   :  { %7222 = shalt.err (!%p7219_p5)
}
  0x2d   :  { %s7295_s4 = smov 512   ;;  %s7296_s27 = smov 32  }
  0x2e   :  { %33 = dma.hbm_to_vmem [thread:$0]  %s7604_s1, 52224, %s28_s23, [#allocation4], %s7295_s4, %s7295_s4, %s7296_s27  }
  0x2f   :  { %s7297_s30 = smov [#allocation7]  }
  0x30   :  { %s49_s10 = sshll.u32 %s7297_s30, 4  ;;  %s50_s10 = int_to_ptr.vmem [resolvable:$true] %s49_s10 }
  0x31   :  { %s7231_s11 = scalar_lea.vmem %s50_s10, 32768  ;;  %p7236_p7 = scmp.lt.s32.totalorder %s50_s10, %s50_s10 }
  0x32   :  { %p7232_p6 = scmp.ne.s32.totalorder %s50_s10, %s7231_s11  ;;  %p7237_p8 = scmp.lt.s32.totalorder %s7231_s11, %s7231_s11 }
  0x34   :  { %p7238_p9 = por %p7237_p8, %p7236_p7 }
  0x36   :  { %p7239_p10 = pnand %p7238_p9, %p7232_p6 }
  0x38   :  { %7242 = shalt.err (!%p7239_p10)
}
  0x39   :  { %s7298_s6 = smov 256   ;;  %s7299_s12 = smov 16  }
  0x3a   :  { %55 = dma.hbm_to_vmem [thread:$0]  %s7606_s3, 32768, %s50_s10, [#allocation6], %s7298_s6, %s7298_s6, %s7299_s12  }
  0x3b   :  { %s7300_s15 = smov [#allocation10]  }
  0x3c   :  { %s71_s16 = sshll.u32 %s7300_s15, 4  ;;  %s72_s16 = int_to_ptr.vmem [resolvable:$true] %s71_s16 }
  0x3d   :  { %s7251_s1 = scalar_lea.vmem %s72_s16, 8192  ;;  %p7256_p12 = scmp.lt.s32.totalorder %s72_s16, %s72_s16 }
  0x3e   :  { %p7252_p11 = scmp.ne.s32.totalorder %s72_s16, %s7251_s1  ;;  %p7257_p13 = scmp.lt.s32.totalorder %s7251_s1, %s7251_s1 }
  0x40   :  { %p7258_p0 = por %p7257_p13, %p7256_p12 }
  0x42   :  { %p7259_p1 = pnand %p7258_p0, %p7252_p11 }
  0x44   :  { %7262 = shalt.err (!%p7259_p1)
}
  0x45   :  { %s7301_s8 = smov 128   ;;  %s7302_s17 = smov 8  }
  0x46   :  { %77 = dma.hbm_to_vmem [thread:$0]  %s7608_s5, 8192, %s72_s16, [#allocation9], %s7301_s8, %s7301_s8, %s7302_s17  }
  0x47   :  { %s7303_s20 = smov [#allocation13]  }
  0x48   :  { %s94_s21 = sshll.u32 %s7303_s20, 4  ;;  %s95_s21 = int_to_ptr.vmem [resolvable:$true] %s94_s21 }
  0x49   :  { %s7271_s3 = scalar_lea.vmem %s95_s21, 32  ;;  %p7276_p3 = scmp.lt.s32.totalorder %s95_s21, %s95_s21 }
  0x4a   :  { %p7272_p2 = scmp.ne.s32.totalorder %s95_s21, %s7271_s3  ;;  %p7277_p4 = scmp.lt.s32.totalorder %s7271_s3, %s7271_s3 }
  0x4c   :  { %p7278_p5 = por %p7277_p4, %p7276_p3 }
  0x4e   :  { %p7279_p6 = pnand %p7278_p5, %p7272_p2 }
  0x50   :  { %7282 = shalt.err (!%p7279_p6)
}
  0x51   :  { %97 = dma.hbm_to_vmem [thread:$0]  %s7610_s7, 32, %s95_s21, [#allocation12]  }
  0x52   :  { %7283 = dma.done.wait [#allocation4], 52224  }
  0x53   :  { %7284 = vsyncadd [#allocation4], 4294915072 }
  0x54   :  { %7285 = dma.done.wait [#allocation6], 32896  }
  0x55   :  { %7286 = vsyncadd [#allocation6], 4294934400 }
  0x56   :  { %7287 = dma.done.wait [#allocation9], 8256  }
  0x57   :  { %7288 = vsyncadd [#allocation9], 4294959040 }
  0x58   :  { %7289 = dma.done.wait [#allocation12], 64  }
  0x59   :  { %7290 = vsyncadd [#allocation12], 4294967232  ;;  %v186_v1 = vld [vmem:[#allocation3 + $0x1c0] sm:$0xff]  ;;  %vm2655_vm0 = vcmask 392192  }
  0x5a   :  { %v190_v2 = vld [vmem:[#allocation3 + $0x1e0] sm:$0xff] }
  0x5b   :  { %v314_v3 = vld [vmem:[#allocation3 + $0x5c0] sm:$0xff]  ;;  %v5945_v4 = vcombine.high %v186_v1, %v190_v2  ;;  %v5944_v6 = vcombine.low %v186_v1, %v190_v2 }
  0x5c   :  { %v318_v5 = vld [vmem:[#allocation3 + $0x5e0] sm:$0xff] }
  0x5d   :  { %v178_v7 = vld [vmem:[#allocation3 + $0x180] sm:$0xff]  ;;  %v6073_v9 = vcombine.high %v314_v3, %v318_v5  ;;  %v6072_v10 = vcombine.low %v314_v3, %v318_v5  ;;  %2659 = vmatprep.subr.bf16.mxu0 %v5945_v4 }
  0x5e   :  { %v182_v8 = vld [vmem:[#allocation3 + $0x1a0] sm:$0xff]  ;;  %2660 = vmatpush1.bf16.msra.mxu0 %v5944_v6 }
  0x5f   :  { %v5937_v11 = vcombine.high %v178_v7, %v182_v8  ;;  %v306_v12 = vld [vmem:[#allocation3 + $0x580] sm:$0xff]  ;;  %2702 = vmatprep.subr.bf16.mxu1 %v6073_v9  ;;  %v5936_v19 = vcombine.low %v178_v7, %v182_v8 }
  0x60   :  { %v310_v13 = vld [vmem:[#allocation3 + $0x5a0] sm:$0xff]  ;;  %2703 = vmatpush1.bf16.msra.mxu1 %v6072_v10 }
  0x61   :  { %v170_v14 = vld [vmem:[#allocation3 + $0x140] sm:$0xff]  ;;  %v6065_v15 = vcombine.high %v306_v12, %v310_v13  ;;  %2661 = vmatprep.subr.bf16.mxu0 %v5937_v11  ;;  %v6064_v20 = vcombine.low %v306_v12, %v310_v13 }
  0x62   :  { %v174_v16 = vld [vmem:[#allocation3 + $0x160] sm:$0xff]  ;;  %2662 = vmatpush1.bf16.msra.mxu0 %v5936_v19 }
  0x63   :  { %v298_v17 = vld [vmem:[#allocation3 + $0x540] sm:$0xff]  ;;  %v5929_v21 = vcombine.high %v170_v14, %v174_v16  ;;  %2704 = vmatprep.subr.bf16.mxu1 %v6065_v15  ;;  %v5928_v27 = vcombine.low %v170_v14, %v174_v16 }
  0x64   :  { %v302_v18 = vld [vmem:[#allocation3 + $0x560] sm:$0xff]  ;;  %2705 = vmatpush1.bf16.msra.mxu1 %v6064_v20 }
  0x65   :  { %v6057_v22 = vcombine.high %v298_v17, %v302_v18  ;;  %v162_v23 = vld [vmem:[#allocation3 + $0x100] sm:$0xff]  ;;  %2663 = vmatprep.subr.bf16.mxu0 %v5929_v21  ;;  %v6056_v28 = vcombine.low %v298_v17, %v302_v18 }
  0x66   :  { %v166_v24 = vld [vmem:[#allocation3 + $0x120] sm:$0xff]  ;;  %2664 = vmatpush1.bf16.msra.mxu0 %v5928_v27 }
  0x67   :  { %v290_v25 = vld [vmem:[#allocation3 + $0x500] sm:$0xff]  ;;  %v5921_v29 = vcombine.high %v162_v23, %v166_v24  ;;  %2706 = vmatprep.subr.bf16.mxu1 %v6057_v22  ;;  %v5920_v35 = vcombine.low %v162_v23, %v166_v24 }
  0x68   :  { %v294_v26 = vld [vmem:[#allocation3 + $0x520] sm:$0xff]  ;;  %2707 = vmatpush1.bf16.msra.mxu1 %v6056_v28 }
  0x69   :  { %v6049_v30 = vcombine.high %v290_v25, %v294_v26  ;;  %v154_v31 = vld [vmem:[#allocation3 + $0xc0] sm:$0xff]  ;;  %2665 = vmatprep.subr.bf16.mxu0 %v5921_v29  ;;  %v6048_v36 = vcombine.low %v290_v25, %v294_v26 }
  0x6a   :  { %v158_v32 = vld [vmem:[#allocation3 + $0xe0] sm:$0xff]  ;;  %2666 = vmatpush1.bf16.msra.mxu0 %v5920_v35 }
  0x6b   :  { %v282_v33 = vld [vmem:[#allocation3 + $0x4c0] sm:$0xff]  ;;  %v5913_v37 = vcombine.high %v154_v31, %v158_v32  ;;  %2708 = vmatprep.subr.bf16.mxu1 %v6049_v30  ;;  %v5912_v43 = vcombine.low %v154_v31, %v158_v32 }
  0x6c   :  { %v286_v34 = vld [vmem:[#allocation3 + $0x4e0] sm:$0xff]  ;;  %2709 = vmatpush1.bf16.msra.mxu1 %v6048_v36 }
  0x6d   :  { %v6041_v38 = vcombine.high %v282_v33, %v286_v34  ;;  %v146_v39 = vld [vmem:[#allocation3 + $0x80] sm:$0xff]  ;;  %2667 = vmatprep.subr.bf16.mxu0 %v5913_v37  ;;  %v6040_v44 = vcombine.low %v282_v33, %v286_v34 }
  0x6e   :  { %v150_v40 = vld [vmem:[#allocation3 + $0xa0] sm:$0xff]  ;;  %2668 = vmatpush1.bf16.msra.mxu0 %v5912_v43 }
  0x6f   :  { %v274_v41 = vld [vmem:[#allocation3 + $0x480] sm:$0xff]  ;;  %v5905_v45 = vcombine.high %v146_v39, %v150_v40  ;;  %2710 = vmatprep.subr.bf16.mxu1 %v6041_v38  ;;  %v5904_v51 = vcombine.low %v146_v39, %v150_v40 }
  0x70   :  { %v278_v42 = vld [vmem:[#allocation3 + $0x4a0] sm:$0xff]  ;;  %2711 = vmatpush1.bf16.msra.mxu1 %v6040_v44 }
  0x71   :  { %v6033_v46 = vcombine.high %v274_v41, %v278_v42  ;;  %v138_v47 = vld [vmem:[#allocation3 + $0x40] sm:$0xff]  ;;  %2669 = vmatprep.subr.bf16.mxu0 %v5905_v45  ;;  %v6032_v53 = vcombine.low %v274_v41, %v278_v42 }
  0x72   :  { %v142_v48 = vld [vmem:[#allocation3 + $0x60] sm:$0xff]  ;;  %2670 = vmatpush1.bf16.msra.mxu0 %v5904_v51 }
  0x73   :  { %v266_v49 = vld [vmem:[#allocation3 + $0x440] sm:$0xff]  ;;  %v5897_v54 = vcombine.high %v138_v47, %v142_v48  ;;  %2712 = vmatprep.subr.bf16.mxu1 %v6033_v46  ;;  %v5896_v61 = vcombine.low %v138_v47, %v142_v48 }
  0x74   :  { %v270_v50 = vld [vmem:[#allocation3 + $0x460] sm:$0xff]  ;;  %2713 = vmatpush1.bf16.msra.mxu1 %v6032_v53 }
  0x75   :  { %v130_v52 = vld [vmem:[#allocation3] sm:$0xff]  ;;  %v6025_v56 = vcombine.high %v266_v49, %v270_v50  ;;  %2671 = vmatprep.subr.bf16.mxu0 %v5897_v54  ;;  %v6024_v62 = vcombine.low %v266_v49, %v270_v50 }
  0x76   :  { %v134_v55 = vld [vmem:[#allocation3 + $0x20] sm:$0xff]  ;;  %2672 = vmatpush1.bf16.msra.mxu0 %v5896_v61 }
  0x77   :  { %v7382_v57 = vld [vmem:[%s7603_s0 + $0x4] ss:$28 sps:$4 sm:$0xff]   ;;  %v7387_v60 = vld [vmem:[%s7603_s0 + $0xc] ss:$28 sps:$4 sm:$0xff]   ;;  %v5889_v63 = vcombine.high %v130_v52, %v134_v55  ;;  %2714 = vmatprep.subr.bf16.mxu1 %v6025_v56  ;;  %v5888_v5 = vcombine.low %v130_v52, %v134_v55 }
  0x78   :  { %v258_v58 = vld [vmem:[#allocation3 + $0x400] sm:$0xff]  ;;  %2691 = vmatprep.mubr.bf16.mxu0 %v7382_v57  ;;  %2734 = vmatprep.mubr.bf16.mxu1 %v7387_v60 }
  0x79   :  { %v262_v59 = vld [vmem:[#allocation3 + $0x420] sm:$0xff]  ;;  %2715 = vmatpush1.bf16.msra.mxu1 %v6024_v62  ;;  %2673 = vmatprep.subr.bf16.mxu0 %v5889_v63 }
  0x7a   :  { %v6017_v0 = vcombine.high %v258_v58, %v262_v59  ;;  %v250_v1 = vld [vmem:[#allocation3 + $0x3c0] sm:$0xff]  ;;  %v6016_v6 = vcombine.low %v258_v58, %v262_v59  ;;  %2674 = vmatpush1.bf16.msra.mxu0 %v5888_v5 }
  0x7b   :  { %v254_v2 = vld [vmem:[#allocation3 + $0x3e0] sm:$0xff] }
  0x7c   :  { %v378_v3 = vld [vmem:[#allocation3 + $0x7c0] sm:$0xff]  ;;  %v6009_v7 = vcombine.high %v250_v1, %v254_v2  ;;  %2716 = vmatprep.subr.bf16.mxu1 %v6017_v0  ;;  %v6008_v13 = vcombine.low %v250_v1, %v254_v2 }
  0x7d   :  { %v382_v4 = vld [vmem:[#allocation3 + $0x7e0] sm:$0xff]  ;;  %2717 = vmatpush1.bf16.msra.mxu1 %v6016_v6 }
  0x7e   :  { %v6137_v8 = vcombine.high %v378_v3, %v382_v4  ;;  %v242_v9 = vld [vmem:[#allocation3 + $0x380] sm:$0xff]  ;;  %2675 = vmatprep.subr.bf16.mxu0 %v6009_v7  ;;  %v6136_v14 = vcombine.low %v378_v3, %v382_v4 }
  0x7f   :  { %v246_v10 = vld [vmem:[#allocation3 + $0x3a0] sm:$0xff]  ;;  %2676 = vmatpush2.bf16.msra.mxu0 %v6008_v13 }
  0x80   :  { %v370_v11 = vld [vmem:[#allocation3 + $0x780] sm:$0xff]  ;;  %v6001_v15 = vcombine.high %v242_v9, %v246_v10  ;;  %2718 = vmatprep.subr.bf16.mxu1 %v6137_v8  ;;  %v6000_v21 = vcombine.low %v242_v9, %v246_v10 }
  0x81   :  { %v374_v12 = vld [vmem:[#allocation3 + $0x7a0] sm:$0xff]  ;;  %2719 = vmatpush2.bf16.msra.mxu1 %v6136_v14 }
  0x82   :  { %v6129_v16 = vcombine.high %v370_v11, %v374_v12  ;;  %v234_v17 = vld [vmem:[#allocation3 + $0x340] sm:$0xff]  ;;  %2677 = vmatprep.subr.bf16.mxu0 %v6001_v15  ;;  %v6128_v22 = vcombine.low %v370_v11, %v374_v12 }
  0x83   :  { %v238_v18 = vld [vmem:[#allocation3 + $0x360] sm:$0xff]  ;;  %2678 = vmatpush2.bf16.msra.mxu0 %v6000_v21 }
  0x84   :  { %v362_v19 = vld [vmem:[#allocation3 + $0x740] sm:$0xff]  ;;  %v5993_v23 = vcombine.high %v234_v17, %v238_v18  ;;  %2720 = vmatprep.subr.bf16.mxu1 %v6129_v16  ;;  %v5992_v29 = vcombine.low %v234_v17, %v238_v18 }
  0x85   :  { %v366_v20 = vld [vmem:[#allocation3 + $0x760] sm:$0xff]  ;;  %2721 = vmatpush2.bf16.msra.mxu1 %v6128_v22 }
  0x86   :  { %v6121_v24 = vcombine.high %v362_v19, %v366_v20  ;;  %v226_v25 = vld [vmem:[#allocation3 + $0x300] sm:$0xff]  ;;  %2679 = vmatprep.subr.bf16.mxu0 %v5993_v23  ;;  %v6120_v30 = vcombine.low %v362_v19, %v366_v20 }
  0x87   :  { %v230_v26 = vld [vmem:[#allocation3 + $0x320] sm:$0xff]  ;;  %2680 = vmatpush2.bf16.msra.mxu0 %v5992_v29 }
  0x88   :  { %v354_v27 = vld [vmem:[#allocation3 + $0x700] sm:$0xff]  ;;  %v5985_v31 = vcombine.high %v226_v25, %v230_v26  ;;  %2722 = vmatprep.subr.bf16.mxu1 %v6121_v24  ;;  %v5984_v37 = vcombine.low %v226_v25, %v230_v26  ;;  %v7403_v25 = vld [vmem:[%s7603_s0 + $0x14] ss:$28 sps:$4 sm:$0xff]  }
  0x89   :  { %v358_v28 = vld [vmem:[#allocation3 + $0x720] sm:$0xff]  ;;  %2723 = vmatpush2.bf16.msra.mxu1 %v6120_v30  ;;  %v7304_v30 = vmov 0  }
  0x8a   :  { %v6113_v32 = vcombine.high %v354_v27, %v358_v28  ;;  %v218_v33 = vld [vmem:[#allocation3 + $0x2c0] sm:$0xff]  ;;  %2681 = vmatprep.subr.bf16.mxu0 %v5985_v31  ;;  %v6112_v38 = vcombine.low %v354_v27, %v358_v28 }
  0x8b   :  { %v222_v34 = vld [vmem:[#allocation3 + $0x2e0] sm:$0xff]  ;;  %2682 = vmatpush2.bf16.msra.mxu0 %v5984_v37 }
  0x8c   :  { %v346_v35 = vld [vmem:[#allocation3 + $0x6c0] sm:$0xff]  ;;  %v5977_v39 = vcombine.high %v218_v33, %v222_v34  ;;  %2724 = vmatprep.subr.bf16.mxu1 %v6113_v32  ;;  %v5976_v45 = vcombine.low %v218_v33, %v222_v34  ;;  %v187_v33 = vld [vmem:[#allocation3 + $0x1c8] sm:$0xff] }
  0x8d   :  { %v350_v36 = vld [vmem:[#allocation3 + $0x6e0] sm:$0xff]  ;;  %2725 = vmatpush2.bf16.msra.mxu1 %v6112_v38  ;;  %v191_v34 = vld [vmem:[#allocation3 + $0x1e8] sm:$0xff] }
  0x8e   :  { %v210_v40 = vld [vmem:[#allocation3 + $0x280] sm:$0xff]  ;;  %v6105_v41 = vcombine.high %v346_v35, %v350_v36  ;;  %2683 = vmatprep.subr.bf16.mxu0 %v5977_v39  ;;  %v6104_v46 = vcombine.low %v346_v35, %v350_v36 }
  0x8f   :  { %v214_v42 = vld [vmem:[#allocation3 + $0x2a0] sm:$0xff]  ;;  %2684 = vmatpush2.bf16.msra.mxu0 %v5976_v45  ;;  %v5946_v45 = vcombine.low %v187_v33, %v191_v34 }
  0x90   :  { %v338_v43 = vld [vmem:[#allocation3 + $0x680] sm:$0xff]  ;;  %v5969_v47 = vcombine.high %v210_v40, %v214_v42  ;;  %2726 = vmatprep.subr.bf16.mxu1 %v6105_v41  ;;  %v5968_v53 = vcombine.low %v210_v40, %v214_v42  ;;  %v179_v40 = vld [vmem:[#allocation3 + $0x188] sm:$0xff]  ;;  %v6641_v41 = vld [vmem:[%s7603_s0 + $0x18] ss:$28 sps:$4 sm:$0xff]   ;;  %v5947_v42 = vcombine.high %v187_v33, %v191_v34 }
  0x91   :  { %v342_v44 = vld [vmem:[#allocation3 + $0x6a0] sm:$0xff]  ;;  %2727 = vmatpush2.bf16.msra.mxu1 %v6104_v46 }
  0x92   :  { %v6097_v48 = vcombine.high %v338_v43, %v342_v44  ;;  %v202_v49 = vld [vmem:[#allocation3 + $0x240] sm:$0xff]  ;;  %2685 = vmatprep.subr.bf16.mxu0 %v5969_v47  ;;  %v6096_v54 = vcombine.low %v338_v43, %v342_v44  ;;  %v183_v43 = vld [vmem:[#allocation3 + $0x1a8] sm:$0xff] }
  0x93   :  { %v206_v50 = vld [vmem:[#allocation3 + $0x260] sm:$0xff]  ;;  %2686 = vmatpush2.bf16.msra.mxu0 %v5968_v53  ;;  %v5938_v53 = vcombine.low %v179_v40, %v183_v43 }
  0x94   :  { %v330_v51 = vld [vmem:[#allocation3 + $0x640] sm:$0xff]  ;;  %v5961_v55 = vcombine.high %v202_v49, %v206_v50  ;;  %2728 = vmatprep.subr.bf16.mxu1 %v6097_v48  ;;  %v5960_v63 = vcombine.low %v202_v49, %v206_v50  ;;  %v171_v49 = vld [vmem:[#allocation3 + $0x148] sm:$0xff]  ;;  %v5939_v50 = vcombine.high %v179_v40, %v183_v43 }
  0x95   :  { %v334_v52 = vld [vmem:[#allocation3 + $0x660] sm:$0xff]  ;;  %2729 = vmatpush2.bf16.msra.mxu1 %v6096_v54 }
  0x96   :  { %v6089_v56 = vcombine.high %v330_v51, %v334_v52  ;;  %v194_v58 = vld [vmem:[#allocation3 + $0x200] sm:$0xff]  ;;  %2687 = vmatprep.subr.bf16.mxu0 %v5961_v55  ;;  %v6088_v0 = vcombine.low %v330_v51, %v334_v52  ;;  %v175_v51 = vld [vmem:[#allocation3 + $0x168] sm:$0xff] }
  0x97   :  { %v198_v59 = vld [vmem:[#allocation3 + $0x220] sm:$0xff]  ;;  %2688 = vmatpush2.bf16.msra.mxu0 %v5960_v63  ;;  %v5930_v63 = vcombine.low %v171_v49, %v175_v51 }
  0x98   :  { %v322_v61 = vld [vmem:[#allocation3 + $0x600] sm:$0xff]  ;;  %v5953_v1 = vcombine.high %v194_v58, %v198_v59  ;;  %2730 = vmatprep.subr.bf16.mxu1 %v6089_v56  ;;  %v5952_v7 = vcombine.low %v194_v58, %v198_v59  ;;  %v163_v58 = vld [vmem:[#allocation3 + $0x108] sm:$0xff]  ;;  %v5931_v59 = vcombine.high %v171_v49, %v175_v51 }
  0x99   :  { %v326_v62 = vld [vmem:[#allocation3 + $0x620] sm:$0xff]  ;;  %2731 = vmatpush2.bf16.msra.mxu1 %v6088_v0 }
  0x9a   :  { %v6081_v2 = vcombine.high %v322_v61, %v326_v62  ;;  %v442_v3 = vld [vmem:[#allocation3 + $0x9c0] sm:$0xff]  ;;  %2689 = vmatprep.subr.bf16.mxu0 %v5953_v1  ;;  %v6080_v8 = vcombine.low %v322_v61, %v326_v62  ;;  %v167_v61 = vld [vmem:[#allocation3 + $0x128] sm:$0xff] }
  0x9b   :  { %v446_v4 = vld [vmem:[#allocation3 + $0x9e0] sm:$0xff]  ;;  %2690 = vmatpush2.bf16.msra.mxu0 %v5952_v7  ;;  %v5922_v7 = vcombine.low %v163_v58, %v167_v61 }
  0x9c   :  { %v530_v5 = vld [vmem:[#allocation3 + $0xc80] sm:$0xff]  ;;  %v6201_v9 = vcombine.high %v442_v3, %v446_v4  ;;  %2732 = vmatprep.subr.bf16.mxu1 %v6081_v2  ;;  %v6200_v17 = vcombine.low %v442_v3, %v446_v4  ;;  %v155_v3 = vld [vmem:[#allocation3 + $0xc8] sm:$0xff]  ;;  %v5923_v4 = vcombine.high %v163_v58, %v167_v61 }
  0x9d   :  { %v534_v6 = vld [vmem:[#allocation3 + $0xca0] sm:$0xff]  ;;  %2733 = vmatpush2.bf16.msra.mxu1 %v6080_v8 }
  0x9e   :  { %v6289_v10 = vcombine.high %v530_v5, %v534_v6  ;;  %v434_v11 = vld [vmem:[#allocation3 + $0x980] sm:$0xff]  ;;  %2745 = vmatprep.subr.bf16.mxu0 %v6201_v9  ;;  %v6288_v18 = vcombine.low %v530_v5, %v534_v6  ;;  %v159_v5 = vld [vmem:[#allocation3 + $0xe8] sm:$0xff] }
  0x9f   :  { %v438_v12 = vld [vmem:[#allocation3 + $0x9a0] sm:$0xff] }
  0xa0   :  { %v7394_v13 = vld [vmem:[%s7603_s0] ss:$28 sps:$4 sm:$0xff]   ;;  %v6640_v16 = vld [vmem:[%s7603_s0 + $0x8] ss:$28 sps:$4 sm:$0xff]   ;;  %v6193_v19 = vcombine.high %v434_v11, %v438_v12  ;;  %2798 = vmatprep.subr.bf16.mxu1 %v6289_v10  ;;  %v6192_v26 = vcombine.low %v434_v11, %v438_v12  ;;  %v5915_v11 = vcombine.high %v155_v3, %v159_v5 }
  0xa1   :  { %v522_v14 = vld [vmem:[#allocation3 + $0xc40] sm:$0xff]  ;;  %2692 = vmatmul.mubr.bf16.vlgmr.msra.gmra.mxu0 %v7394_v13  ;;  %2735 = vmatmul.mubr.bf16.vlgmr.msra.gmra.mxu1 %v6640_v16  ;;  %v147_v10 = vld [vmem:[#allocation3 + $0x88] sm:$0xff] }
  0xa2   :  { %v526_v15 = vld [vmem:[#allocation3 + $0xc60] sm:$0xff]  ;;  %2746 = vmatpush1.bf16.msra.mxu0 %v6200_v17  ;;  %2799 = vmatpush1.bf16.msra.mxu1 %v6288_v18  ;;  %v151_v12 = vld [vmem:[#allocation3 + $0xa8] sm:$0xff] }
  0xa3   :  { %v6281_v20 = vcombine.high %v522_v14, %v526_v15  ;;  %v426_v21 = vld [vmem:[#allocation3 + $0x940] sm:$0xff]  ;;  %2747 = vmatprep.subr.bf16.mxu0 %v6193_v19  ;;  %v6280_v27 = vcombine.low %v522_v14, %v526_v15  ;;  %2820 = vmatprep.mubr.bf16.mxu1 %v7304_v30  ;;  %v5914_v15 = vcombine.low %v155_v3, %v159_v5  ;;  %v139_v19 = vld [vmem:[#allocation3 + $0x48] sm:$0xff] }
  0xa4   :  { %v430_v22 = vld [vmem:[#allocation3 + $0x960] sm:$0xff]  ;;  %2777 = vmatprep.mubr.bf16.mxu0 %v7403_v25 }
  0xa5   :  { %v514_v23 = vld [vmem:[#allocation3 + $0xc00] sm:$0xff]  ;;  %v6185_v28 = vcombine.high %v426_v21, %v430_v22  ;;  %2800 = vmatprep.subr.bf16.mxu1 %v6281_v20  ;;  %v6184_v35 = vcombine.low %v426_v21, %v430_v22  ;;  %v5907_v20 = vcombine.high %v147_v10, %v151_v12  ;;  %v143_v21 = vld [vmem:[#allocation3 + $0x68] sm:$0xff] }
  0xa6   :  { %v518_v24 = vld [vmem:[#allocation3 + $0xc20] sm:$0xff]  ;;  %2748 = vmatpush1.bf16.msra.mxu0 %v6192_v26  ;;  %2801 = vmatpush1.bf16.msra.mxu1 %v6280_v27  ;;  %v5898_v33 = vcombine.low %v139_v19, %v143_v21 }
  0xa7   :  { %v6273_v29 = vcombine.high %v514_v23, %v518_v24  ;;  %v418_v31 = vld [vmem:[#allocation3 + $0x900] sm:$0xff]  ;;  %2749 = vmatprep.subr.bf16.mxu0 %v6185_v28  ;;  %v6272_v36 = vcombine.low %v514_v23, %v518_v24  ;;  %v5906_v23 = vcombine.low %v147_v10, %v151_v12  ;;  %v131_v28 = vld [vmem:[#allocation3 + $0x8] sm:$0xff] }
  0xa8   :  { %v422_v32 = vld [vmem:[#allocation3 + $0x920] sm:$0xff]  ;;  %v211_v12 = vld [vmem:[#allocation3 + $0x288] sm:$0xff] }
  0xa9   :  { %v6177_v37 = vcombine.high %v418_v31, %v422_v32  ;;  %v410_v38 = vld [vmem:[#allocation3 + $0x8c0] sm:$0xff]  ;;  %2802 = vmatprep.subr.bf16.mxu1 %v6273_v29  ;;  %v6176_v44 = vcombine.low %v418_v31, %v422_v32  ;;  %v5899_v29 = vcombine.high %v139_v19, %v143_v21  ;;  %v135_v31 = vld [vmem:[#allocation3 + $0x28] sm:$0xff] }
  0xaa   :  { %v414_v39 = vld [vmem:[#allocation3 + $0x8e0] sm:$0xff]  ;;  %2750 = vmatpush1.bf16.msra.mxu0 %v6184_v35  ;;  %2803 = vmatpush1.bf16.msra.mxu1 %v6272_v36 }
  0xab   :  { %2751 = vmatprep.subr.bf16.mxu0 %v6177_v37  ;;  %v6169_v46 = vcombine.high %v410_v38, %v414_v39  ;;  %v402_v47 = vld [vmem:[#allocation3 + $0x880] sm:$0xff]  ;;  %2831 = vmatprep.subr.bf16.mxu1 %v5947_v42  ;;  %v6168_v52 = vcombine.low %v410_v38, %v414_v39  ;;  %v251_v37 = vld [vmem:[#allocation3 + $0x3c8] sm:$0xff]  ;;  %v5891_v38 = vcombine.high %v131_v28, %v135_v31 }
  0xac   :  { %v406_v48 = vld [vmem:[#allocation3 + $0x8a0] sm:$0xff]  ;;  %v255_v39 = vld [vmem:[#allocation3 + $0x3e8] sm:$0xff] }
  0xad   :  { %6296 = vmatmul.mubr.msk.bf16.vlgmr.msra.gmra.mxu1 %vm2655_vm0, %v6641_v41  ;;  %v6161_v54 = vcombine.high %v402_v47, %v406_v48  ;;  %v394_v55 = vld [vmem:[#allocation3 + $0x840] sm:$0xff]  ;;  %v6160_v62 = vcombine.low %v402_v47, %v406_v48  ;;  %v5890_v41 = vcombine.low %v131_v28, %v135_v31  ;;  %v247_v47 = vld [vmem:[#allocation3 + $0x3a8] sm:$0xff]  ;;  %v6010_v49 = vcombine.low %v251_v37, %v255_v39 }
  0xae   :  { %2752 = vmatpush1.bf16.msra.mxu0 %v6176_v44  ;;  %2832 = vmatpush1.bf16.msra.mxu1 %v5946_v45  ;;  %v398_v56 = vld [vmem:[#allocation3 + $0x860] sm:$0xff]  ;;  %v243_v45 = vld [vmem:[#allocation3 + $0x388] sm:$0xff] }
  0xaf   :  { %2753 = vmatprep.subr.bf16.mxu0 %v6169_v46  ;;  %2833 = vmatprep.subr.bf16.mxu1 %v5939_v50  ;;  %v6153_v0 = vcombine.high %v394_v55, %v398_v56  ;;  %v386_v1 = vld [vmem:[#allocation3 + $0x800] sm:$0xff]  ;;  %v6152_v6 = vcombine.low %v394_v55, %v398_v56  ;;  %v6011_v46 = vcombine.high %v251_v37, %v255_v39  ;;  %v239_v55 = vld [vmem:[#allocation3 + $0x368] sm:$0xff] }
  0xb0   :  { %2863 = vmatprep.mubr.bf16.mxu1 %v7382_v57  ;;  %v390_v2 = vld [vmem:[#allocation3 + $0x820] sm:$0xff]  ;;  %v6002_v58 = vcombine.low %v243_v45, %v247_v47 }
  0xb1   :  { %v6145_v8 = vcombine.high %v386_v1, %v390_v2  ;;  %v506_v9 = vld [vmem:[#allocation3 + $0xbc0] sm:$0xff]  ;;  %v6144_v14 = vcombine.low %v386_v1, %v390_v2  ;;  %v231_v1 = vld [vmem:[#allocation3 + $0x328] sm:$0xff] }
  0xb2   :  { %2754 = vmatpush1.bf16.msra.mxu0 %v6168_v52  ;;  %2834 = vmatpush1.bf16.msra.mxu1 %v5938_v53  ;;  %v510_v57 = vld [vmem:[#allocation3 + $0xbe0] sm:$0xff]  ;;  %v235_v53 = vld [vmem:[#allocation3 + $0x348] sm:$0xff] }
  0xb3   :  { %2755 = vmatprep.subr.bf16.mxu0 %v6161_v54  ;;  %2835 = vmatprep.subr.bf16.mxu1 %v5931_v59  ;;  %v6265_v16 = vcombine.high %v506_v9, %v510_v57  ;;  %v498_v17 = vld [vmem:[#allocation3 + $0xb80] sm:$0xff]  ;;  %v6264_v22 = vcombine.low %v506_v9, %v510_v57  ;;  %v6003_v54 = vcombine.high %v243_v45, %v247_v47  ;;  %v223_v9 = vld [vmem:[#allocation3 + $0x2e8] sm:$0xff] }
  0xb4   :  { %v502_v18 = vld [vmem:[#allocation3 + $0xba0] sm:$0xff]  ;;  %v5994_v3 = vcombine.low %v235_v53, %v239_v55 }
  0xb5   :  { %v6257_v24 = vcombine.high %v498_v17, %v502_v18  ;;  %v490_v26 = vld [vmem:[#allocation3 + $0xb40] sm:$0xff]  ;;  %v6256_v32 = vcombine.low %v498_v17, %v502_v18  ;;  %v319_v17 = vld [vmem:[#allocation3 + $0x5e8] sm:$0xff] }
  0xb6   :  { %2756 = vmatpush1.bf16.msra.mxu0 %v6160_v62  ;;  %2836 = vmatpush1.bf16.msra.mxu1 %v5930_v63  ;;  %v494_v27 = vld [vmem:[#allocation3 + $0xb60] sm:$0xff]  ;;  %v227_v63 = vld [vmem:[#allocation3 + $0x308] sm:$0xff] }
  0xb7   :  { %2757 = vmatprep.subr.bf16.mxu0 %v6153_v0  ;;  %2837 = vmatprep.subr.bf16.mxu1 %v5923_v4  ;;  %v6249_v34 = vcombine.high %v490_v26, %v494_v27  ;;  %v482_v35 = vld [vmem:[#allocation3 + $0xb00] sm:$0xff]  ;;  %v6248_v40 = vcombine.low %v490_v26, %v494_v27  ;;  %v5995_v0 = vcombine.high %v235_v53, %v239_v55  ;;  %v311_v27 = vld [vmem:[#allocation3 + $0x5a8] sm:$0xff] }
  0xb8   :  { %v486_v36 = vld [vmem:[#allocation3 + $0xb20] sm:$0xff]  ;;  %v5986_v10 = vcombine.low %v227_v63, %v231_v1  ;;  %v275_v55 = vld [vmem:[#allocation3 + $0x488] sm:$0xff] }
  0xb9   :  { %v6241_v42 = vcombine.high %v482_v35, %v486_v36  ;;  %v474_v43 = vld [vmem:[#allocation3 + $0xac0] sm:$0xff]  ;;  %v6240_v48 = vcombine.low %v482_v35, %v486_v36  ;;  %v299_v35 = vld [vmem:[#allocation3 + $0x548] sm:$0xff] }
  0xba   :  { %2758 = vmatpush1.bf16.msra.mxu0 %v6152_v6  ;;  %2838 = vmatpush1.bf16.msra.mxu1 %v5922_v7  ;;  %v478_v44 = vld [vmem:[#allocation3 + $0xae0] sm:$0xff]  ;;  %v219_v7 = vld [vmem:[#allocation3 + $0x2c8] sm:$0xff] }
  0xbb   :  { %2759 = vmatprep.subr.bf16.mxu0 %v6145_v8  ;;  %2839 = vmatprep.subr.bf16.mxu1 %v5915_v11  ;;  %v6233_v50 = vcombine.high %v474_v43, %v478_v44  ;;  %v466_v51 = vld [vmem:[#allocation3 + $0xa80] sm:$0xff]  ;;  %v6232_v56 = vcombine.low %v474_v43, %v478_v44  ;;  %v5987_v8 = vcombine.high %v227_v63, %v231_v1  ;;  %v303_v36 = vld [vmem:[#allocation3 + $0x568] sm:$0xff] }
  0xbc   :  { %v470_v52 = vld [vmem:[#allocation3 + $0xaa0] sm:$0xff]  ;;  %v5978_v19 = vcombine.low %v219_v7, %v223_v9  ;;  %v6059_v39 = vcombine.high %v299_v35, %v303_v36  ;;  %v447_v44 = vld [vmem:[#allocation3 + $0x9e8] sm:$0xff]  ;;  %v6058_v45 = vcombine.low %v299_v35, %v303_v36 }
  0xbd   :  { %v6225_v59 = vcombine.high %v466_v51, %v470_v52  ;;  %v458_v61 = vld [vmem:[#allocation3 + $0xa40] sm:$0xff]  ;;  %v6224_v2 = vcombine.low %v466_v51, %v470_v52  ;;  %v439_v51 = vld [vmem:[#allocation3 + $0x9a8] sm:$0xff] }
  0xbe   :  { %2760 = vmatpush1.bf16.msra.mxu0 %v6144_v14  ;;  %2840 = vmatpush1.bf16.msra.mxu1 %v5914_v15  ;;  %v462_v62 = vld [vmem:[#allocation3 + $0xa60] sm:$0xff]  ;;  %v215_v14 = vld [vmem:[#allocation3 + $0x2a8] sm:$0xff] }
  0xbf   :  { %2761 = vmatprep.subr.bf16.mxu0 %v6265_v16  ;;  %2841 = vmatprep.subr.bf16.mxu1 %v5907_v20  ;;  %v6217_v4 = vcombine.high %v458_v61, %v462_v62  ;;  %v450_v5 = vld [vmem:[#allocation3 + $0xa00] sm:$0xff]  ;;  %v6216_v57 = vcombine.low %v458_v61, %v462_v62  ;;  %v315_v15 = vld [vmem:[#allocation3 + $0x5c8] sm:$0xff]  ;;  %v5979_v16 = vcombine.high %v219_v7, %v223_v9 }
  0xc0   :  { %v454_v6 = vld [vmem:[#allocation3 + $0xa20] sm:$0xff]  ;;  %v7415_v20 = vld [vmem:[%s7603_s0 + $0x10] ss:$28 sps:$4 sm:$0xff]   ;;  %v6075_v21 = vcombine.high %v315_v15, %v319_v17  ;;  %v5971_v26 = vcombine.high %v211_v12, %v215_v14  ;;  %v6074_v28 = vcombine.low %v315_v15, %v319_v17 }
  0xc1   :  { %v6209_v11 = vcombine.high %v450_v5, %v454_v6  ;;  %v6208_v18 = vcombine.low %v450_v5, %v454_v6  ;;  %v431_v61 = vld [vmem:[#allocation3 + $0x968] sm:$0xff] }
  0xc2   :  { %2762 = vmatpush2.bf16.msra.mxu0 %v6264_v22  ;;  %2842 = vmatpush1.bf16.msra.mxu1 %v5906_v23  ;;  %v203_v22 = vld [vmem:[#allocation3 + $0x248] sm:$0xff] }
  0xc3   :  { %2763 = vmatprep.subr.bf16.mxu0 %v6257_v24  ;;  %2843 = vmatprep.subr.bf16.mxu1 %v5899_v29  ;;  %v207_v23 = vld [vmem:[#allocation3 + $0x268] sm:$0xff]  ;;  %v5970_v29 = vcombine.low %v211_v12, %v215_v14 }
  0xc4   :  { %v307_v24 = vld [vmem:[#allocation3 + $0x588] sm:$0xff] }
  0xc5   :  { %v6067_v31 = vcombine.high %v307_v24, %v311_v27  ;;  %v6066_v37 = vcombine.low %v307_v24, %v311_v27  ;;  %v267_v1 = vld [vmem:[#allocation3 + $0x448] sm:$0xff] }
  0xc6   :  { %2764 = vmatpush2.bf16.msra.mxu0 %v6256_v32  ;;  %2844 = vmatpush1.bf16.msra.mxu1 %v5898_v33  ;;  %v195_v32 = vld [vmem:[#allocation3 + $0x208] sm:$0xff] }
  0xc7   :  { %2765 = vmatprep.subr.bf16.mxu0 %v6249_v34  ;;  %2845 = vmatprep.subr.bf16.mxu1 %v5891_v38  ;;  %v199_v33 = vld [vmem:[#allocation3 + $0x228] sm:$0xff]  ;;  %v5963_v34 = vcombine.high %v203_v22, %v207_v23  ;;  %v5962_v38 = vcombine.low %v203_v22, %v207_v23 }
  0xc8   :  { %v5955_v43 = vcombine.high %v195_v32, %v199_v33  ;;  %v423_v5 = vld [vmem:[#allocation3 + $0x928] sm:$0xff] }
  0xc9   :  { %v263_v9 = vld [vmem:[#allocation3 + $0x428] sm:$0xff] }
  0xca   :  { %2766 = vmatpush2.bf16.msra.mxu0 %v6248_v40  ;;  %2846 = vmatpush1.bf16.msra.mxu1 %v5890_v41  ;;  %v291_v40 = vld [vmem:[#allocation3 + $0x508] sm:$0xff] }
  0xcb   :  { %2767 = vmatprep.subr.bf16.mxu0 %v6241_v42  ;;  %2847 = vmatprep.subr.bf16.mxu1 %v6011_v46  ;;  %v295_v41 = vld [vmem:[#allocation3 + $0x528] sm:$0xff]  ;;  %v5954_v46 = vcombine.low %v195_v32, %v199_v33 }
  0xcc   :  { %v443_v42 = vld [vmem:[#allocation3 + $0x9c8] sm:$0xff]  ;;  %v6051_v47 = vcombine.high %v291_v40, %v295_v41  ;;  %v6050_v52 = vcombine.low %v291_v40, %v295_v41 }
  0xcd   :  { %v6202_v53 = vcombine.low %v443_v42, %v447_v44  ;;  %v403_v17 = vld [vmem:[#allocation3 + $0x888] sm:$0xff] }
  0xce   :  { %2768 = vmatpush2.bf16.msra.mxu0 %v6240_v48  ;;  %2848 = vmatpush2.bf16.msra.mxu1 %v6010_v49  ;;  %v283_v48 = vld [vmem:[#allocation3 + $0x4c8] sm:$0xff] }
  0xcf   :  { %2769 = vmatprep.subr.bf16.mxu0 %v6233_v50  ;;  %2849 = vmatprep.subr.bf16.mxu1 %v6003_v54  ;;  %v287_v49 = vld [vmem:[#allocation3 + $0x4e8] sm:$0xff] }
  0xd0   :  { %v435_v50 = vld [vmem:[#allocation3 + $0x988] sm:$0xff]  ;;  %v6043_v54 = vcombine.high %v283_v48, %v287_v49  ;;  %v6042_v62 = vcombine.low %v283_v48, %v287_v49 }
  0xd1   :  { %v6194_v63 = vcombine.low %v435_v50, %v439_v51  ;;  %v371_v24 = vld [vmem:[#allocation3 + $0x788] sm:$0xff] }
  0xd2   :  { %2770 = vmatpush2.bf16.msra.mxu0 %v6232_v56  ;;  %2850 = vmatpush2.bf16.msra.mxu1 %v6002_v58  ;;  %v279_v56 = vld [vmem:[#allocation3 + $0x4a8] sm:$0xff] }
  0xd3   :  { %2771 = vmatprep.subr.bf16.mxu0 %v6225_v59  ;;  %2851 = vmatprep.subr.bf16.mxu1 %v5995_v0  ;;  %v427_v58 = vld [vmem:[#allocation3 + $0x948] sm:$0xff]  ;;  %v6195_v59 = vcombine.high %v435_v50, %v439_v51  ;;  %v6035_v0 = vcombine.high %v275_v55, %v279_v56  ;;  %v6034_v6 = vcombine.low %v275_v55, %v279_v56 }
  0xd4   :  { %v6186_v7 = vcombine.low %v427_v58, %v431_v61  ;;  %v395_v27 = vld [vmem:[#allocation3 + $0x848] sm:$0xff] }
  0xd5   :  { %v367_v35 = vld [vmem:[#allocation3 + $0x768] sm:$0xff] }
  0xd6   :  { %2772 = vmatpush2.bf16.msra.mxu0 %v6224_v2  ;;  %2852 = vmatpush2.bf16.msra.mxu1 %v5994_v3  ;;  %v271_v2 = vld [vmem:[#allocation3 + $0x468] sm:$0xff] }
  0xd7   :  { %2773 = vmatprep.subr.bf16.mxu0 %v6217_v4  ;;  %2853 = vmatprep.subr.bf16.mxu1 %v5987_v8  ;;  %v419_v3 = vld [vmem:[#allocation3 + $0x908] sm:$0xff]  ;;  %v6187_v4 = vcombine.high %v427_v58, %v431_v61  ;;  %v6026_v12 = vcombine.low %v267_v1, %v271_v2 }
  0xd8   :  { %v259_v8 = vld [vmem:[#allocation3 + $0x408] sm:$0xff]  ;;  %v6178_v14 = vcombine.low %v419_v3, %v423_v5 }
  0xd9   :  { %v6019_v15 = vcombine.high %v259_v8, %v263_v9  ;;  %v387_v36 = vld [vmem:[#allocation3 + $0x808] sm:$0xff] }
  0xda   :  { %2774 = vmatpush2.bf16.msra.mxu0 %v6216_v57  ;;  %2854 = vmatpush2.bf16.msra.mxu1 %v5986_v10  ;;  %v411_v57 = vld [vmem:[#allocation3 + $0x8c8] sm:$0xff]  ;;  %v6179_v10 = vcombine.high %v419_v3, %v423_v5 }
  0xdb   :  { %2775 = vmatprep.subr.bf16.mxu0 %v6209_v11  ;;  %2855 = vmatprep.subr.bf16.mxu1 %v5979_v16  ;;  %v415_v11 = vld [vmem:[#allocation3 + $0x8e8] sm:$0xff] }
  0xdc   :  { %v379_v16 = vld [vmem:[#allocation3 + $0x7c8] sm:$0xff]  ;;  %v6170_v22 = vcombine.low %v411_v57, %v415_v11 }
  0xdd   :  { %v347_v50 = vld [vmem:[#allocation3 + $0x6c8] sm:$0xff] }
  0xde   :  { %2776 = vmatpush2.bf16.msra.mxu0 %v6208_v18  ;;  %2856 = vmatpush2.bf16.msra.mxu1 %v5978_v19  ;;  %v6171_v18 = vcombine.high %v411_v57, %v415_v11  ;;  %v407_v19 = vld [vmem:[#allocation3 + $0x8a8] sm:$0xff] }
  0xdf   :  { %2874 = vmatprep.subr.bf16.mxu0 %v6075_v21  ;;  %2857 = vmatprep.subr.bf16.mxu1 %v5971_v26  ;;  %v6018_v21 = vcombine.low %v259_v8, %v263_v9  ;;  %v375_v26 = vld [vmem:[#allocation3 + $0x7a8] sm:$0xff]  ;;  %v6162_v32 = vcombine.low %v403_v17, %v407_v19 }
  0xe0   :  { %v6131_v33 = vcombine.high %v371_v24, %v375_v26  ;;  %v499_v51 = vld [vmem:[#allocation3 + $0xb88] sm:$0xff] }
  0xe1   :  { %2778 = vmatmul.mubr.bf16.vlgmr.msra.gmra.mxu0 %v7415_v20  ;;  %v339_v58 = vld [vmem:[#allocation3 + $0x688] sm:$0xff] }
  0xe2   :  { %2875 = vmatpush1.bf16.msra.mxu0 %v6074_v28  ;;  %2906 = vmatprep.mubr.bf16.mxu0 %v7387_v60  ;;  %v6203_v60 = vcombine.high %v443_v42, %v447_v44  ;;  %v6163_v28 = vcombine.high %v403_v17, %v407_v19  ;;  %v355_v42 = vld [vmem:[#allocation3 + $0x708] sm:$0xff] }
  0xe3   :  { %2858 = vmatpush2.bf16.msra.mxu1 %v5970_v29  ;;  %2876 = vmatprep.subr.bf16.mxu0 %v6067_v31  ;;  %v399_v29 = vld [vmem:[#allocation3 + $0x868] sm:$0xff] }
  0xe4   :  { %2859 = vmatprep.subr.bf16.mxu1 %v5963_v34  ;;  %v363_v34 = vld [vmem:[#allocation3 + $0x748] sm:$0xff]  ;;  %v6154_v40 = vcombine.low %v395_v27, %v399_v29 }
  0xe5   :  { %v6123_v41 = vcombine.high %v363_v34, %v367_v35  ;;  %v507_v44 = vld [vmem:[#allocation3 + $0xbc8] sm:$0xff] }
  0xe6   :  { %2877 = vmatpush1.bf16.msra.mxu0 %v6066_v37  ;;  %v6155_v37 = vcombine.high %v395_v27, %v399_v29  ;;  %v491_v61 = vld [vmem:[#allocation3 + $0xb48] sm:$0xff] }
  0xe7   :  { %2860 = vmatpush2.bf16.msra.mxu1 %v5962_v38  ;;  %2878 = vmatprep.subr.bf16.mxu0 %v6059_v39  ;;  %v391_v38 = vld [vmem:[#allocation3 + $0x828] sm:$0xff]  ;;  %v6130_v39 = vcombine.low %v371_v24, %v375_v26 }
  0xe8   :  { %2861 = vmatprep.subr.bf16.mxu1 %v5955_v43  ;;  %v359_v43 = vld [vmem:[#allocation3 + $0x728] sm:$0xff]  ;;  %v6146_v48 = vcombine.low %v387_v36, %v391_v38 }
  0xe9   :  { %v6115_v49 = vcombine.high %v355_v42, %v359_v43  ;;  %v331_v3 = vld [vmem:[#allocation3 + $0x648] sm:$0xff] }
  0xea   :  { %2879 = vmatpush1.bf16.msra.mxu0 %v6058_v45  ;;  %v6147_v45 = vcombine.high %v387_v36, %v391_v38  ;;  %v483_v5 = vld [vmem:[#allocation3 + $0xb08] sm:$0xff] }
  0xeb   :  { %2862 = vmatpush2.bf16.msra.mxu1 %v5954_v46  ;;  %2880 = vmatprep.subr.bf16.mxu0 %v6051_v47  ;;  %v511_v46 = vld [vmem:[#allocation3 + $0xbe8] sm:$0xff]  ;;  %v6122_v47 = vcombine.low %v363_v34, %v367_v35 }
  0xec   :  { %2917 = vmatprep.subr.bf16.mxu1 %v6203_v60  ;;  %v351_v60 = vld [vmem:[#allocation3 + $0x6e8] sm:$0xff]  ;;  %v6266_v55 = vcombine.low %v507_v44, %v511_v46 }
  0xed   :  { %v6107_v56 = vcombine.high %v347_v50, %v351_v60  ;;  %v323_v57 = vld [vmem:[#allocation3 + $0x608] sm:$0xff] }
  0xee   :  { %2864 = vmatmul.mubr.bf16.vlgmr.msra.gmra.mxu1 %v7394_v13  ;;  %2881 = vmatpush1.bf16.msra.mxu0 %v6050_v52  ;;  %v6027_v13 = vcombine.high %v267_v1, %v271_v2  ;;  %v6267_v52 = vcombine.high %v507_v44, %v511_v46  ;;  %v475_v11 = vld [vmem:[#allocation3 + $0xac8] sm:$0xff]  ;;  %v192_v46 = vld [vmem:[#allocation3 + $0x1f0] sm:$0xff] }
  0xef   :  { %2918 = vmatpush1.bf16.msra.mxu1 %v6202_v53  ;;  %2882 = vmatprep.subr.bf16.mxu0 %v6043_v54  ;;  %v503_v53 = vld [vmem:[#allocation3 + $0xba8] sm:$0xff]  ;;  %v6114_v54 = vcombine.low %v355_v42, %v359_v43 }
  0xf0   :  { %2919 = vmatprep.subr.bf16.mxu1 %v6195_v59  ;;  %2949 = vmatprep.mubr.bf16.mxu1 %v7403_v25  ;;  %v383_v25 = vld [vmem:[#allocation3 + $0x7e8] sm:$0xff]  ;;  %v6258_v1 = vcombine.low %v499_v51, %v503_v53 }
  0xf1   :  { %v6139_v23 = vcombine.high %v379_v16, %v383_v25  ;;  %v6138_v31 = vcombine.low %v379_v16, %v383_v25  ;;  %v343_v59 = vld [vmem:[#allocation3 + $0x6a8] sm:$0xff] }
  0xf2   :  { %2883 = vmatpush1.bf16.msra.mxu0 %v6042_v62  ;;  %v6259_v62 = vcombine.high %v499_v51, %v503_v53  ;;  %v6099_v2 = vcombine.high %v339_v58, %v343_v59  ;;  %v467_v17 = vld [vmem:[#allocation3 + $0xa88] sm:$0xff]  ;;  %v184_v53 = vld [vmem:[#allocation3 + $0x1b0] sm:$0xff] }
  0xf3   :  { %2920 = vmatpush1.bf16.msra.mxu1 %v6194_v63  ;;  %2884 = vmatprep.subr.bf16.mxu0 %v6035_v0  ;;  %v495_v63 = vld [vmem:[#allocation3 + $0xb68] sm:$0xff]  ;;  %v6106_v0 = vcombine.low %v347_v50, %v351_v60 }
  0xf4   :  { %2921 = vmatprep.subr.bf16.mxu1 %v6187_v4  ;;  %v335_v4 = vld [vmem:[#allocation3 + $0x668] sm:$0xff]  ;;  %v6250_v8 = vcombine.low %v491_v61, %v495_v63 }
  0xf5   :  { %v6091_v9 = vcombine.high %v331_v3, %v335_v4  ;;  %v531_v19 = vld [vmem:[#allocation3 + $0xc88] sm:$0xff] }
  0xf6   :  { %2885 = vmatpush1.bf16.msra.mxu0 %v6034_v6  ;;  %v6251_v6 = vcombine.high %v491_v61, %v495_v63  ;;  %v459_v27 = vld [vmem:[#allocation3 + $0xa48] sm:$0xff]  ;;  %v176_v63 = vld [vmem:[#allocation3 + $0x170] sm:$0xff] }
  0xf7   :  { %2922 = vmatpush1.bf16.msra.mxu1 %v6186_v7  ;;  %2886 = vmatprep.subr.bf16.mxu0 %v6027_v13  ;;  %v487_v7 = vld [vmem:[#allocation3 + $0xb28] sm:$0xff]  ;;  %v6098_v13 = vcombine.low %v339_v58, %v343_v59 }
  0xf8   :  { %2923 = vmatprep.subr.bf16.mxu1 %v6179_v10  ;;  %v327_v10 = vld [vmem:[#allocation3 + $0x628] sm:$0xff]  ;;  %v6242_v16 = vcombine.low %v483_v5, %v487_v7 }
  0xf9   :  { %v6083_v25 = vcombine.high %v323_v57, %v327_v10  ;;  %v523_v29 = vld [vmem:[#allocation3 + $0xc48] sm:$0xff] }
  0xfa   :  { %2887 = vmatpush1.bf16.msra.mxu0 %v6026_v12  ;;  %v6243_v12 = vcombine.high %v483_v5, %v487_v7  ;;  %v451_v36 = vld [vmem:[#allocation3 + $0xa08] sm:$0xff]  ;;  %v164_v7 = vld [vmem:[#allocation3 + $0x110] sm:$0xff] }
  0xfb   :  { %2924 = vmatpush1.bf16.msra.mxu1 %v6178_v14  ;;  %2888 = vmatprep.subr.bf16.mxu0 %v6019_v15  ;;  %v479_v14 = vld [vmem:[#allocation3 + $0xae8] sm:$0xff]  ;;  %v6090_v15 = vcombine.low %v331_v3, %v335_v4  ;;  %v7431_v3 = vld [vmem:[%s7603_s0 + $0x18] ss:$28 sps:$4 sm:$0xff]  }
  0xfc   :  { %2925 = vmatprep.subr.bf16.mxu1 %v6171_v18  ;;  %v471_v18 = vld [vmem:[#allocation3 + $0xaa8] sm:$0xff]  ;;  %v6234_v24 = vcombine.low %v475_v11, %v479_v14 }
  0xfd   :  { %v6226_v34 = vcombine.low %v467_v17, %v471_v18  ;;  %v515_v38 = vld [vmem:[#allocation3 + $0xc08] sm:$0xff] }
  0xfe   :  { %2889 = vmatpush1.bf16.msra.mxu0 %v6018_v21  ;;  %v6235_v21 = vcombine.high %v475_v11, %v479_v14 }
  0xff   :  { %2926 = vmatpush1.bf16.msra.mxu1 %v6170_v22  ;;  %2890 = vmatprep.subr.bf16.mxu0 %v6139_v23  ;;  %v535_v22 = vld [vmem:[#allocation3 + $0xca8] sm:$0xff]  ;;  %v6082_v23 = vcombine.low %v323_v57, %v327_v10  ;;  %v296_v57 = vld [vmem:[#allocation3 + $0x530] sm:$0xff]  ;;  %v7439_v10 = vld [vmem:[%s7603_s0 + $0x4] ss:$28 sps:$4 sm:$0xff]  }
 0x100   :  { %2927 = vmatprep.subr.bf16.mxu1 %v6163_v28  ;;  %v6291_v26 = vcombine.high %v531_v19, %v535_v22  ;;  %v463_v28 = vld [vmem:[#allocation3 + $0xa68] sm:$0xff] }
 0x101   :  { %v6218_v43 = vcombine.low %v459_v27, %v463_v28 }
 0x102   :  { %2891 = vmatpush2.bf16.msra.mxu0 %v6138_v31  ;;  %v6227_v31 = vcombine.high %v467_v17, %v471_v18  ;;  %v288_v18 = vld [vmem:[#allocation3 + $0x4f0] sm:$0xff] }
 0x103   :  { %2928 = vmatpush1.bf16.msra.mxu1 %v6162_v32  ;;  %2892 = vmatprep.subr.bf16.mxu0 %v6131_v33  ;;  %v527_v32 = vld [vmem:[#allocation3 + $0xc68] sm:$0xff]  ;;  %v6290_v33 = vcombine.low %v531_v19, %v535_v22 }
 0x104   :  { %2929 = vmatprep.subr.bf16.mxu1 %v6155_v37  ;;  %v6283_v35 = vcombine.high %v523_v29, %v527_v32  ;;  %v455_v37 = vld [vmem:[#allocation3 + $0xa28] sm:$0xff]  ;;  %v6282_v42 = vcombine.low %v523_v29, %v527_v32 }
 0x105   :  { %v6210_v60 = vcombine.low %v451_v36, %v455_v37 }
 0x106   :  { %2893 = vmatpush2.bf16.msra.mxu0 %v6130_v39  ;;  %v6219_v39 = vcombine.high %v459_v27, %v463_v28  ;;  %v280_v28 = vld [vmem:[#allocation3 + $0x4b0] sm:$0xff] }
 0x107   :  { %2930 = vmatpush1.bf16.msra.mxu1 %v6154_v40  ;;  %2894 = vmatprep.subr.bf16.mxu0 %v6123_v41  ;;  %v519_v40 = vld [vmem:[#allocation3 + $0xc28] sm:$0xff] }
 0x108   :  { %2931 = vmatprep.subr.bf16.mxu1 %v6147_v45  ;;  %v7424_v41 = vld [vmem:[%s7603_s0 + $0x8] ss:$28 sps:$4 sm:$0xff]   ;;  %v6275_v44 = vcombine.high %v515_v38, %v519_v40  ;;  %v188_v45 = vld [vmem:[#allocation3 + $0x1d0] sm:$0xff]  ;;  %v6274_v50 = vcombine.low %v515_v38, %v519_v40 }
 0x109   :  { %v5949_v51 = vcombine.high %v188_v45, %v192_v46  ;;  %v5948_v58 = vcombine.low %v188_v45, %v192_v46  ;;  %v264_v46 = vld [vmem:[#allocation3 + $0x430] sm:$0xff] }
 0x10a   :  { %2895 = vmatpush2.bf16.msra.mxu0 %v6122_v47  ;;  %v316_v47 = vld [vmem:[#allocation3 + $0x5d0] sm:$0xff] }
 0x10b   :  { %2932 = vmatpush1.bf16.msra.mxu1 %v6146_v48  ;;  %2896 = vmatprep.subr.bf16.mxu0 %v6115_v49  ;;  %v6211_v48 = vcombine.high %v451_v36, %v455_v37  ;;  %v320_v49 = vld [vmem:[#allocation3 + $0x5f0] sm:$0xff] }
 0x10c   :  { %2933 = vmatprep.subr.bf16.mxu1 %v6267_v52  ;;  %v180_v52 = vld [vmem:[#allocation3 + $0x190] sm:$0xff]  ;;  %v6076_v59 = vcombine.low %v316_v47, %v320_v49 }
 0x10d   :  { %v5941_v61 = vcombine.high %v180_v52, %v184_v53  ;;  %v5940_v4 = vcombine.low %v180_v52, %v184_v53  ;;  %v272_v37 = vld [vmem:[#allocation3 + $0x470] sm:$0xff] }
 0x10e   :  { %2897 = vmatpush2.bf16.msra.mxu0 %v6114_v54  ;;  %v308_v54 = vld [vmem:[#allocation3 + $0x590] sm:$0xff] }
 0x10f   :  { %2934 = vmatpush2.bf16.msra.mxu1 %v6266_v55  ;;  %2898 = vmatprep.subr.bf16.mxu0 %v6107_v56  ;;  %v6077_v55 = vcombine.high %v316_v47, %v320_v49  ;;  %v312_v56 = vld [vmem:[#allocation3 + $0x5b0] sm:$0xff] }
 0x110   :  { %2935 = vmatprep.subr.bf16.mxu1 %v6259_v62  ;;  %v172_v62 = vld [vmem:[#allocation3 + $0x150] sm:$0xff]  ;;  %v6068_v5 = vcombine.low %v308_v54, %v312_v56 }
 0x111   :  { %v5932_v11 = vcombine.low %v172_v62, %v176_v63  ;;  %v384_v53 = vld [vmem:[#allocation3 + $0x7f0] sm:$0xff] }
 0x112   :  { %2899 = vmatpush2.bf16.msra.mxu0 %v6106_v0  ;;  %v300_v0 = vld [vmem:[#allocation3 + $0x550] sm:$0xff] }
 0x113   :  { %2936 = vmatpush2.bf16.msra.mxu1 %v6258_v1  ;;  %2900 = vmatprep.subr.bf16.mxu0 %v6099_v2  ;;  %v6069_v1 = vcombine.high %v308_v54, %v312_v56  ;;  %v304_v2 = vld [vmem:[#allocation3 + $0x570] sm:$0xff] }
 0x114   :  { %2937 = vmatprep.subr.bf16.mxu1 %v6251_v6  ;;  %v5933_v6 = vcombine.high %v172_v62, %v176_v63  ;;  %v372_v62 = vld [vmem:[#allocation3 + $0x790] sm:$0xff] }
 0x115   :  { %v376_v63 = vld [vmem:[#allocation3 + $0x7b0] sm:$0xff] }
 0x116   :  { %2901 = vmatpush2.bf16.msra.mxu0 %v6098_v13  ;;  %v168_v13 = vld [vmem:[#allocation3 + $0x130] sm:$0xff] }
 0x117   :  { %2938 = vmatpush2.bf16.msra.mxu1 %v6250_v8  ;;  %2902 = vmatprep.subr.bf16.mxu0 %v6091_v9  ;;  %v292_v8 = vld [vmem:[#allocation3 + $0x510] sm:$0xff]  ;;  %v6061_v9 = vcombine.high %v300_v0, %v304_v2  ;;  %v5925_v14 = vcombine.high %v164_v7, %v168_v13  ;;  %v5924_v19 = vcombine.low %v164_v7, %v168_v13 }
 0x118   :  { %2939 = vmatprep.subr.bf16.mxu1 %v6243_v12  ;;  %v6060_v12 = vcombine.low %v300_v0, %v304_v2  ;;  %v6053_v17 = vcombine.high %v292_v8, %v296_v57  ;;  %v364_v7 = vld [vmem:[#allocation3 + $0x750] sm:$0xff] }
 0x119   :  { %v368_v13 = vld [vmem:[#allocation3 + $0x770] sm:$0xff] }
 0x11a   :  { %2903 = vmatpush2.bf16.msra.mxu0 %v6090_v15  ;;  %v156_v15 = vld [vmem:[#allocation3 + $0xd0] sm:$0xff] }
 0x11b   :  { %2940 = vmatpush2.bf16.msra.mxu1 %v6242_v16  ;;  %2904 = vmatprep.subr.bf16.mxu0 %v6083_v25  ;;  %v160_v16 = vld [vmem:[#allocation3 + $0xf0] sm:$0xff] }
 0x11c   :  { %2941 = vmatprep.subr.bf16.mxu1 %v6235_v21  ;;  %v284_v25 = vld [vmem:[#allocation3 + $0x4d0] sm:$0xff]  ;;  %v6052_v21 = vcombine.low %v292_v8, %v296_v57  ;;  %v5917_v22 = vcombine.high %v156_v15, %v160_v16  ;;  %v5916_v29 = vcombine.low %v156_v15, %v160_v16 }
 0x11d   :  { %v6045_v27 = vcombine.high %v284_v25, %v288_v18  ;;  %v356_v15 = vld [vmem:[#allocation3 + $0x710] sm:$0xff] }
 0x11e   :  { %2905 = vmatpush2.bf16.msra.mxu0 %v6082_v23  ;;  %v148_v23 = vld [vmem:[#allocation3 + $0x90] sm:$0xff] }
 0x11f   :  { %2942 = vmatpush2.bf16.msra.mxu1 %v6234_v24  ;;  %2970 = vmatprep.subr.bf16.mxu0 %v6291_v26  ;;  %v152_v24 = vld [vmem:[#allocation3 + $0xb0] sm:$0xff] }
 0x120   :  { %2943 = vmatprep.subr.bf16.mxu1 %v6227_v31  ;;  %v276_v26 = vld [vmem:[#allocation3 + $0x490] sm:$0xff]  ;;  %v6044_v31 = vcombine.low %v284_v25, %v288_v18  ;;  %v5909_v32 = vcombine.high %v148_v23, %v152_v24  ;;  %v5908_v38 = vcombine.low %v148_v23, %v152_v24  ;;  %v6124_v18 = vcombine.low %v364_v7, %v368_v13 }
 0x121   :  { %2907 = vmatmul.mubr.bf16.vlgmr.msra.gmra.mxu0 %v7424_v41  ;;  %v6037_v36 = vcombine.high %v276_v26, %v280_v28  ;;  %v360_v16 = vld [vmem:[#allocation3 + $0x730] sm:$0xff] }
 0x122   :  { %2971 = vmatpush1.bf16.msra.mxu0 %v6290_v33  ;;  %2992 = vmatprep.mubr.bf16.mxu0 %v7304_v30  ;;  %v140_v33 = vld [vmem:[#allocation3 + $0x50] sm:$0xff] }
 0x123   :  { %2944 = vmatpush2.bf16.msra.mxu1 %v6226_v34  ;;  %2972 = vmatprep.subr.bf16.mxu0 %v6283_v35  ;;  %v144_v34 = vld [vmem:[#allocation3 + $0x70] sm:$0xff] }
 0x124   :  { %2945 = vmatprep.subr.bf16.mxu1 %v6219_v39  ;;  %v268_v35 = vld [vmem:[#allocation3 + $0x450] sm:$0xff]  ;;  %v6036_v39 = vcombine.low %v276_v26, %v280_v28  ;;  %v5901_v40 = vcombine.high %v140_v33, %v144_v34  ;;  %v5900_v47 = vcombine.low %v140_v33, %v144_v34 }
 0x125   :  { %v6029_v45 = vcombine.high %v268_v35, %v272_v37  ;;  %v224_v23 = vld [vmem:[#allocation3 + $0x2f0] sm:$0xff] }
 0x126   :  { %2973 = vmatpush1.bf16.msra.mxu0 %v6282_v42  ;;  %v132_v42 = vld [vmem:[#allocation3 + $0x10] sm:$0xff] }
 0x127   :  { %2946 = vmatpush2.bf16.msra.mxu1 %v6218_v43  ;;  %2974 = vmatprep.subr.bf16.mxu0 %v6275_v44  ;;  %v136_v43 = vld [vmem:[#allocation3 + $0x30] sm:$0xff] }
 0x128   :  { %2947 = vmatprep.subr.bf16.mxu1 %v6211_v48  ;;  %v260_v44 = vld [vmem:[#allocation3 + $0x410] sm:$0xff]  ;;  %v6028_v48 = vcombine.low %v268_v35, %v272_v37  ;;  %v5893_v49 = vcombine.high %v132_v42, %v136_v43  ;;  %v5892_v54 = vcombine.low %v132_v42, %v136_v43 }
 0x129   :  { %v6021_v52 = vcombine.high %v260_v44, %v264_v46  ;;  %v348_v24 = vld [vmem:[#allocation3 + $0x6d0] sm:$0xff] }
 0x12a   :  { %2975 = vmatpush1.bf16.msra.mxu0 %v6274_v50  ;;  %v252_v50 = vld [vmem:[#allocation3 + $0x3d0] sm:$0xff] }
 0x12b   :  { %2948 = vmatpush2.bf16.msra.mxu1 %v6210_v60  ;;  %3003 = vmatprep.subr.bf16.mxu0 %v5949_v51  ;;  %v256_v60 = vld [vmem:[#allocation3 + $0x3f0] sm:$0xff] }
 0x12c   :  { %3046 = vmatprep.subr.bf16.mxu1 %v6077_v55  ;;  %v380_v51 = vld [vmem:[#allocation3 + $0x7d0] sm:$0xff]  ;;  %v6020_v55 = vcombine.low %v260_v44, %v264_v46  ;;  %v6013_v56 = vcombine.high %v252_v50, %v256_v60  ;;  %v6012_v0 = vcombine.low %v252_v50, %v256_v60 }
 0x12d   :  { %6297 = vmatmul.mubr.msk.bf16.vlgmr.msra.gmra.mxu0 %vm2655_vm0, %v7431_v3  ;;  %v352_v26 = vld [vmem:[#allocation3 + $0x6f0] sm:$0xff] }
 0x12e   :  { %2950 = vmatmul.mubr.bf16.vlgmr.msra.gmra.mxu1 %v7415_v20  ;;  %3004 = vmatpush1.bf16.msra.mxu0 %v5948_v58  ;;  %v7445_v20 = vld [vmem:[%s7603_s0 + $0xc] ss:$28 sps:$4 sm:$0xff]   ;;  %v6141_v58 = vcombine.high %v380_v51, %v384_v53  ;;  %v212_v33 = vld [vmem:[#allocation3 + $0x290] sm:$0xff] }
 0x12f   :  { %3047 = vmatpush1.bf16.msra.mxu1 %v6076_v59  ;;  %3005 = vmatprep.subr.bf16.mxu0 %v5941_v61  ;;  %v244_v59 = vld [vmem:[#allocation3 + $0x390] sm:$0xff] }
 0x130   :  { %3048 = vmatprep.subr.bf16.mxu1 %v6069_v1  ;;  %3035 = vmatprep.mubr.bf16.mxu0 %v7439_v10  ;;  %v248_v61 = vld [vmem:[#allocation3 + $0x3b0] sm:$0xff]  ;;  %v6140_v1 = vcombine.low %v380_v51, %v384_v53 }
 0x131   :  { %3078 = vmatprep.mubr.bf16.mxu1 %v7445_v20  ;;  %v6005_v2 = vcombine.high %v244_v59, %v248_v61  ;;  %v6004_v8 = vcombine.low %v244_v59, %v248_v61  ;;  %v216_v34 = vld [vmem:[#allocation3 + $0x2b0] sm:$0xff] }
 0x132   :  { %3006 = vmatpush1.bf16.msra.mxu0 %v5940_v4  ;;  %v6133_v4 = vcombine.high %v372_v62, %v376_v63  ;;  %v340_v35 = vld [vmem:[#allocation3 + $0x690] sm:$0xff]  ;;  %v5973_v42 = vcombine.high %v212_v33, %v216_v34 }
 0x133   :  { %3049 = vmatpush1.bf16.msra.mxu1 %v6068_v5  ;;  %3007 = vmatprep.subr.bf16.mxu0 %v5933_v6  ;;  %v236_v5 = vld [vmem:[#allocation3 + $0x350] sm:$0xff] }
 0x134   :  { %3050 = vmatprep.subr.bf16.mxu1 %v6061_v9  ;;  %v240_v6 = vld [vmem:[#allocation3 + $0x370] sm:$0xff]  ;;  %v6132_v9 = vcombine.low %v372_v62, %v376_v63 }
 0x135   :  { %v5997_v57 = vcombine.high %v236_v5, %v240_v6  ;;  %v5996_v25 = vcombine.low %v236_v5, %v240_v6  ;;  %v204_v44 = vld [vmem:[#allocation3 + $0x250] sm:$0xff] }
 0x136   :  { %3008 = vmatpush1.bf16.msra.mxu0 %v5932_v11  ;;  %v6125_v11 = vcombine.high %v364_v7, %v368_v13  ;;  %v332_v46 = vld [vmem:[#allocation3 + $0x650] sm:$0xff] }
 0x137   :  { %3051 = vmatpush1.bf16.msra.mxu1 %v6060_v12  ;;  %3009 = vmatprep.subr.bf16.mxu0 %v5925_v14  ;;  %v228_v12 = vld [vmem:[#allocation3 + $0x310] sm:$0xff] }
 0x138   :  { %3052 = vmatprep.subr.bf16.mxu1 %v6053_v17  ;;  %v232_v14 = vld [vmem:[#allocation3 + $0x330] sm:$0xff]  ;;  %v540_v17 = vlaneseq }
 0x139   :  { %v200_v53 = vld [vmem:[#allocation3 + $0x230] sm:$0xff] }
 0x13a   :  { %3010 = vmatpush1.bf16.msra.mxu0 %v5924_v19  ;;  %v5989_v19 = vcombine.high %v228_v12, %v232_v14  ;;  %v7448_v28 = vshrl.u32 %v540_v17, 7  ;;  %v444_v5 = vld [vmem:[#allocation3 + $0x9d0] sm:$0xff] }
 0x13b   :  { %3053 = vmatpush1.bf16.msra.mxu1 %v6052_v21  ;;  %3011 = vmatprep.subr.bf16.mxu0 %v5917_v22  ;;  %v6117_v21 = vcombine.high %v356_v15, %v360_v16  ;;  %v220_v22 = vld [vmem:[#allocation3 + $0x2d0] sm:$0xff] }
 0x13c   :  { %3054 = vmatprep.subr.bf16.mxu1 %v6045_v27  ;;  %v5988_v27 = vcombine.low %v228_v12, %v232_v14  ;;  %v5980_v37 = vcombine.low %v220_v22, %v224_v23  ;;  %v448_v6 = vld [vmem:[#allocation3 + $0x9f0] sm:$0xff] }
 0x13d   :  { %v532_v13 = vld [vmem:[#allocation3 + $0xc90] sm:$0xff]  ;;  %v6205_v14 = vcombine.high %v444_v5, %v448_v6 }
 0x13e   :  { %3012 = vmatpush1.bf16.msra.mxu0 %v5916_v29  ;;  %v6116_v29 = vcombine.low %v356_v15, %v360_v16  ;;  %v440_v17 = vld [vmem:[#allocation3 + $0x9b0] sm:$0xff] }
 0x13f   :  { %3055 = vmatpush1.bf16.msra.mxu1 %v6044_v31  ;;  %3013 = vmatprep.subr.bf16.mxu0 %v5909_v32  ;;  %v5981_v31 = vcombine.high %v220_v22, %v224_v23  ;;  %v6109_v32 = vcombine.high %v348_v24, %v352_v26 }
 0x140   :  { %3056 = vmatprep.subr.bf16.mxu1 %v6037_v36  ;;  %v344_v36 = vld [vmem:[#allocation3 + $0x6b0] sm:$0xff] }
 0x141   :  { %v6101_v43 = vcombine.high %v340_v35, %v344_v36  ;;  %v6100_v50 = vcombine.low %v340_v35, %v344_v36 }
 0x142   :  { %3014 = vmatpush1.bf16.msra.mxu0 %v5908_v38  ;;  %v7451_v38 = vsub.s32 0, %v7448_v28 }
 0x143   :  { %3057 = vmatpush1.bf16.msra.mxu1 %v6036_v39  ;;  %3015 = vmatprep.subr.bf16.mxu0 %v5901_v40  ;;  %v6108_v39 = vcombine.low %v348_v24, %v352_v26  ;;  %v7453_v40 = vld [vmem:[#allocation5] sm:$0xff]  ;;  %v428_v26 = vld [vmem:[#allocation3 + $0x950] sm:$0xff] }
 0x144   :  { %3058 = vmatprep.subr.bf16.mxu1 %v6029_v45  ;;  %v208_v45 = vld [vmem:[#allocation3 + $0x270] sm:$0xff] }
 0x145   :  { %v5965_v60 = vcombine.high %v204_v44, %v208_v45  ;;  %v5964_v61 = vcombine.low %v204_v44, %v208_v45  ;;  %v7476_v44 = vld [vmem:[%s7603_s0 + $0x14] ss:$28 sps:$4 sm:$0xff]  }
 0x146   :  { %3016 = vmatpush1.bf16.msra.mxu0 %v5900_v47  ;;  %v336_v47 = vld [vmem:[#allocation3 + $0x670] sm:$0xff] }
 0x147   :  { %3059 = vmatpush1.bf16.msra.mxu1 %v6028_v48  ;;  %3017 = vmatprep.subr.bf16.mxu0 %v5893_v49  ;;  %v543_v48 = vrot.slane %v7453_v40, %v7451_v38  ;;  %v5972_v49 = vcombine.low %v212_v33, %v216_v34  ;;  %v6093_v51 = vcombine.high %v332_v46, %v336_v47 }
 0x148   :  { %3060 = vmatprep.subr.bf16.mxu1 %v6021_v52  ;;  %v196_v52 = vld [vmem:[#allocation3 + $0x210] sm:$0xff]  ;;  %v6092_v63 = vcombine.low %v332_v46, %v336_v47 }
 0x14a   :  { %3018 = vmatpush1.bf16.msra.mxu0 %v5892_v54 }
 0x14b   :  { %3061 = vmatpush1.bf16.msra.mxu1 %v6020_v55  ;;  %3019 = vmatprep.subr.bf16.mxu0 %v6013_v56  ;;  %v324_v55 = vld [vmem:[#allocation3 + $0x610] sm:$0xff] }
 0x14c   :  { %3062 = vmatprep.subr.bf16.mxu1 %v6141_v58  ;;  %v328_v56 = vld [vmem:[#allocation3 + $0x630] sm:$0xff] }
 0x14d   :  { %v6084_v12 = vcombine.low %v324_v55, %v328_v56 }
 0x14e   :  { %3020 = vmatpush2.bf16.msra.mxu0 %v6012_v0  ;;  %v5957_v0 = vcombine.high %v196_v52, %v200_v53 }
 0x14f   :  { %3063 = vmatpush2.bf16.msra.mxu1 %v6140_v1  ;;  %3021 = vmatprep.subr.bf16.mxu0 %v6005_v2 }
 0x150   :  { %3064 = vmatprep.subr.bf16.mxu1 %v6133_v4  ;;  %v6085_v4 = vcombine.high %v324_v55, %v328_v56  ;;  %v404_v55 = vld [vmem:[#allocation3 + $0x890] sm:$0xff] }
 0x151   :  { %v408_v56 = vld [vmem:[#allocation3 + $0x8b0] sm:$0xff] }
 0x152   :  { %3022 = vmatpush2.bf16.msra.mxu0 %v6004_v8  ;;  %v536_v8 = vld [vmem:[#allocation3 + $0xcb0] sm:$0xff] }
 0x153   :  { %3065 = vmatpush2.bf16.msra.mxu1 %v6132_v9  ;;  %3023 = vmatprep.subr.bf16.mxu0 %v5997_v57  ;;  %v5956_v57 = vcombine.low %v196_v52, %v200_v53  ;;  %v6293_v16 = vcombine.high %v532_v13, %v536_v8  ;;  %v6292_v22 = vcombine.low %v532_v13, %v536_v8  ;;  %v169_v13 = vld [vmem:[#allocation3 + $0x138] sm:$0xff] }
 0x154   :  { %3066 = vmatprep.subr.bf16.mxu1 %v6125_v11  ;;  %v6164_v8 = vcombine.low %v404_v55, %v408_v56 }
 0x156   :  { %3024 = vmatpush2.bf16.msra.mxu0 %v5996_v25  ;;  %v436_v25 = vld [vmem:[#allocation3 + $0x990] sm:$0xff] }
 0x157   :  { %3067 = vmatpush2.bf16.msra.mxu1 %v6124_v18  ;;  %3025 = vmatprep.subr.bf16.mxu0 %v5989_v19  ;;  %v524_v18 = vld [vmem:[#allocation3 + $0xc50] sm:$0xff]  ;;  %v6197_v23 = vcombine.high %v436_v25, %v440_v17  ;;  %v6196_v33 = vcombine.low %v436_v25, %v440_v17 }
 0x158   :  { %3068 = vmatprep.subr.bf16.mxu1 %v6117_v21  ;;  %v528_v19 = vld [vmem:[#allocation3 + $0xc70] sm:$0xff]  ;;  %v6204_v21 = vcombine.low %v444_v5, %v448_v6 }
 0x159   :  { %v6285_v24 = vcombine.high %v524_v18, %v528_v19  ;;  %v6284_v34 = vcombine.low %v524_v18, %v528_v19  ;;  %v396_v5 = vld [vmem:[#allocation3 + $0x850] sm:$0xff] }
 0x15a   :  { %3026 = vmatpush2.bf16.msra.mxu0 %v5988_v27  ;;  %v432_v27 = vld [vmem:[#allocation3 + $0x970] sm:$0xff] }
 0x15b   :  { %3069 = vmatpush2.bf16.msra.mxu1 %v6116_v29  ;;  %3027 = vmatprep.subr.bf16.mxu0 %v5981_v31  ;;  %v7468_v29 = vld [vmem:[%s7603_s0] ss:$28 sps:$4 sm:$0xff]   ;;  %v516_v31 = vld [vmem:[#allocation3 + $0xc10] sm:$0xff]  ;;  %v6189_v35 = vcombine.high %v428_v26, %v432_v27 }
 0x15c   :  { %3070 = vmatprep.subr.bf16.mxu1 %v6109_v32  ;;  %v520_v32 = vld [vmem:[#allocation3 + $0xc30] sm:$0xff] }
 0x15d   :  { %v6277_v36 = vcombine.high %v516_v31, %v520_v32  ;;  %v6276_v45 = vcombine.low %v516_v31, %v520_v32  ;;  %v400_v6 = vld [vmem:[#allocation3 + $0x870] sm:$0xff] }
 0x15e   :  { %3028 = vmatpush2.bf16.msra.mxu0 %v5980_v37  ;;  %v420_v37 = vld [vmem:[#allocation3 + $0x910] sm:$0xff]  ;;  %v6156_v25 = vcombine.low %v396_v5, %v400_v6 }
 0x15f   :  { %3071 = vmatpush2.bf16.msra.mxu1 %v6108_v39  ;;  %3029 = vmatprep.subr.bf16.mxu0 %v5973_v42  ;;  %v424_v39 = vld [vmem:[#allocation3 + $0x930] sm:$0xff]  ;;  %v189_v42 = vld [vmem:[#allocation3 + $0x1d8] sm:$0xff] }
 0x160   :  { %3072 = vmatprep.subr.bf16.mxu1 %v6101_v43  ;;  %v193_v43 = vld [vmem:[#allocation3 + $0x1f8] sm:$0xff]  ;;  %v6181_v46 = vcombine.high %v420_v37, %v424_v39  ;;  %v508_v19 = vld [vmem:[#allocation3 + $0xbd0] sm:$0xff] }
 0x161   :  { %v2693_v54 = vpop.f32.mrf.mxu0  ;;  %v2736_v59 = vpop.f32.mrf.mxu1  ;;  %v5951_v47 = vcombine.high %v189_v42, %v193_v43  ;;  %v5950_v52 = vcombine.low %v189_v42, %v193_v43  ;;  %v500_v32 = vld [vmem:[#allocation3 + $0xb90] sm:$0xff] }
 0x162   :  { %v2694_v58 = vadd.f32 %v2693_v54, %v543_v48  ;;  %3030 = vmatpush2.bf16.msra.mxu0 %v5972_v49  ;;  %v416_v49 = vld [vmem:[#allocation3 + $0x8f0] sm:$0xff] }
 0x163   :  { %3073 = vmatpush2.bf16.msra.mxu1 %v6100_v50  ;;  %v7457_v62 = vpop.f32.mrf.mxu0  ;;  %3031 = vmatprep.subr.bf16.mxu0 %v5965_v60  ;;  %v7461_v2 = vpop.f32.mrf.mxu1  ;;  %v181_v50 = vld [vmem:[#allocation3 + $0x198] sm:$0xff]  ;;  %v492_v43 = vld [vmem:[#allocation3 + $0xb50] sm:$0xff] }
 0x164   :  { %v7459_v1 = vadd.f32 %v2736_v59, %v2694_v58  ;;  %3074 = vmatprep.subr.bf16.mxu1 %v6093_v51  ;;  %v185_v60 = vld [vmem:[#allocation3 + $0x1b8] sm:$0xff]  ;;  %v6180_v51 = vcombine.low %v420_v37, %v424_v39 }
 0x165   :  { %v2697_v7 = vpop.f32.mrf.mxu0  ;;  %v2740_v11 = vpop.f32.mrf.mxu1  ;;  %v5943_v54 = vcombine.high %v181_v50, %v185_v60  ;;  %v173_v58 = vld [vmem:[#allocation3 + $0x158] sm:$0xff] }
 0x166   :  { %v2698_v9 = vadd.f32 %v2697_v7, %v543_v48  ;;  %3032 = vmatpush2.bf16.msra.mxu0 %v5964_v61  ;;  %v412_v48 = vld [vmem:[#allocation3 + $0x8d0] sm:$0xff]  ;;  %v177_v59 = vld [vmem:[#allocation3 + $0x178] sm:$0xff] }
 0x167   :  { %3075 = vmatpush2.bf16.msra.mxu1 %v6092_v63  ;;  %3033 = vmatprep.subr.bf16.mxu0 %v5957_v0  ;;  %v6173_v53 = vcombine.high %v412_v48, %v416_v49  ;;  %v6172_v61 = vcombine.low %v412_v48, %v416_v49  ;;  %v5942_v63 = vcombine.low %v181_v50, %v185_v60  ;;  %v165_v7 = vld [vmem:[#allocation3 + $0x118] sm:$0xff]  ;;  %v484_v60 = vld [vmem:[#allocation3 + $0xb10] sm:$0xff] }
 0x168   :  { %v7463_v15 = vadd.f32 %v2740_v11, %v2698_v9  ;;  %3076 = vmatprep.subr.bf16.mxu1 %v6085_v4  ;;  %v6165_v0 = vcombine.high %v404_v55, %v408_v56  ;;  %v5935_v4 = vcombine.high %v173_v58, %v177_v59  ;;  %v5934_v9 = vcombine.low %v173_v58, %v177_v59  ;;  %v388_v11 = vld [vmem:[#allocation3 + $0x810] sm:$0xff] }
 0x169   :  { %v5926_v17 = vcombine.low %v165_v7, %v169_v13  ;;  %v476_v59 = vld [vmem:[#allocation3 + $0xad0] sm:$0xff] }
 0x16a   :  { %3034 = vmatpush2.bf16.msra.mxu0 %v5956_v57  ;;  %v5927_v57 = vcombine.high %v165_v7, %v169_v13  ;;  %v468_v13 = vld [vmem:[#allocation3 + $0xa90] sm:$0xff] }
 0x16b   :  { %3077 = vmatpush2.bf16.msra.mxu1 %v6084_v12  ;;  %3089 = vmatprep.subr.bf16.mxu0 %v6205_v14  ;;  %v392_v12 = vld [vmem:[#allocation3 + $0x830] sm:$0xff]  ;;  %v157_v14 = vld [vmem:[#allocation3 + $0xd8] sm:$0xff] }
 0x16c   :  { %3142 = vmatprep.subr.bf16.mxu1 %v6293_v16  ;;  %v161_v16 = vld [vmem:[#allocation3 + $0xf8] sm:$0xff] }
 0x16d   :  { %3036 = vmatmul.mubr.bf16.vlgmr.msra.gmra.mxu0 %v7468_v29  ;;  %v5919_v18 = vcombine.high %v157_v14, %v161_v16 }
 0x16e   :  { %3079 = vmatmul.mubr.bf16.vlgmr.msra.gmra.mxu1 %v7424_v41  ;;  %3090 = vmatpush1.bf16.msra.mxu0 %v6204_v21  ;;  %v6188_v41 = vcombine.low %v428_v26, %v432_v27  ;;  %v512_v21 = vld [vmem:[#allocation3 + $0xbf0] sm:$0xff]  ;;  %v5918_v26 = vcombine.low %v157_v14, %v161_v16 }
 0x16f   :  { %3143 = vmatpush1.bf16.msra.mxu1 %v6292_v22  ;;  %3091 = vmatprep.subr.bf16.mxu0 %v6197_v23  ;;  %v149_v22 = vld [vmem:[#allocation3 + $0x98] sm:$0xff]  ;;  %v6269_v27 = vcombine.high %v508_v19, %v512_v21  ;;  %v460_v16 = vld [vmem:[#allocation3 + $0xa50] sm:$0xff] }
 0x170   :  { %3144 = vmatprep.subr.bf16.mxu1 %v6285_v24  ;;  %3164 = vmatprep.mubr.bf16.mxu1 %v7304_v30  ;;  %v153_v23 = vld [vmem:[#allocation3 + $0xb8] sm:$0xff]  ;;  %v6148_v24 = vcombine.low %v388_v11, %v392_v12 }
 0x171   :  { %3121 = vmatprep.mubr.bf16.mxu0 %v7476_v44  ;;  %v5911_v31 = vcombine.high %v149_v22, %v153_v23  ;;  %v5910_v37 = vcombine.low %v149_v22, %v153_v23 }
 0x172   :  { %3092 = vmatpush1.bf16.msra.mxu0 %v6196_v33  ;;  %v504_v33 = vld [vmem:[#allocation3 + $0xbb0] sm:$0xff] }
 0x173   :  { %3145 = vmatpush1.bf16.msra.mxu1 %v6284_v34  ;;  %3093 = vmatprep.subr.bf16.mxu0 %v6189_v35  ;;  %v141_v34 = vld [vmem:[#allocation3 + $0x58] sm:$0xff]  ;;  %v6261_v39 = vcombine.high %v500_v32, %v504_v33 }
 0x174   :  { %3146 = vmatprep.subr.bf16.mxu1 %v6277_v36  ;;  %v145_v35 = vld [vmem:[#allocation3 + $0x78] sm:$0xff]  ;;  %v6268_v36 = vcombine.low %v508_v19, %v512_v21  ;;  %v7484_v21 = vpop.f32.mrf.mxu0 }
 0x175   :  { %v5903_v42 = vcombine.high %v141_v34, %v145_v35  ;;  %v5902_v48 = vcombine.low %v141_v34, %v145_v35  ;;  %v225_v34 = vld [vmem:[#allocation3 + $0x2f8] sm:$0xff] }
 0x176   :  { %3094 = vmatpush1.bf16.msra.mxu0 %v6188_v41  ;;  %v496_v41 = vld [vmem:[#allocation3 + $0xb70] sm:$0xff] }
 0x177   :  { %3147 = vmatpush1.bf16.msra.mxu1 %v6276_v45  ;;  %3095 = vmatprep.subr.bf16.mxu0 %v6181_v46  ;;  %v133_v45 = vld [vmem:[#allocation3 + $0x18] sm:$0xff]  ;;  %v6253_v49 = vcombine.high %v492_v43, %v496_v41 }
 0x178   :  { %3175 = vmatprep.subr.bf16.mxu1 %v5951_v47  ;;  %v137_v46 = vld [vmem:[#allocation3 + $0x38] sm:$0xff]  ;;  %v6260_v47 = vcombine.low %v500_v32, %v504_v33 }
 0x179   :  { %v5895_v50 = vcombine.high %v133_v45, %v137_v46  ;;  %v5894_v55 = vcombine.low %v133_v45, %v137_v46  ;;  %v221_v33 = vld [vmem:[#allocation3 + $0x2d8] sm:$0xff] }
 0x17a   :  { %6298 = vmatmul.mubr.msk.bf16.vlgmr.msra.gmra.mxu1 %vm2655_vm0, %v7431_v3  ;;  %3096 = vmatpush1.bf16.msra.mxu0 %v6180_v51  ;;  %v6157_v3 = vcombine.high %v396_v5, %v400_v6  ;;  %v488_v51 = vld [vmem:[#allocation3 + $0xb30] sm:$0xff]  ;;  %v5983_v45 = vcombine.high %v221_v33, %v225_v34  ;;  %v317_v46 = vld [vmem:[#allocation3 + $0x5d8] sm:$0xff] }
 0x17b   :  { %3176 = vmatpush1.bf16.msra.mxu1 %v5950_v52  ;;  %3097 = vmatprep.subr.bf16.mxu0 %v6173_v53  ;;  %v253_v52 = vld [vmem:[#allocation3 + $0x3d8] sm:$0xff]  ;;  %v6245_v56 = vcombine.high %v484_v60, %v488_v51 }
 0x17c   :  { %3177 = vmatprep.subr.bf16.mxu1 %v5943_v54  ;;  %3207 = vmatprep.mubr.bf16.mxu1 %v7439_v10  ;;  %v6149_v10 = vcombine.high %v388_v11, %v392_v12  ;;  %v257_v53 = vld [vmem:[#allocation3 + $0x3f8] sm:$0xff]  ;;  %v6252_v54 = vcombine.low %v492_v43, %v496_v41 }
 0x17d   :  { %v6015_v58 = vcombine.high %v253_v52, %v257_v53  ;;  %v6014_v5 = vcombine.low %v253_v52, %v257_v53  ;;  %v5982_v52 = vcombine.low %v221_v33, %v225_v34  ;;  %v437_v33 = vld [vmem:[#allocation3 + $0x998] sm:$0xff] }
 0x17e   :  { %3098 = vmatpush1.bf16.msra.mxu0 %v6172_v61  ;;  %v480_v61 = vld [vmem:[#allocation3 + $0xaf0] sm:$0xff]  ;;  %v441_v34 = vld [vmem:[#allocation3 + $0x9b8] sm:$0xff] }
 0x17f   :  { %3178 = vmatpush1.bf16.msra.mxu1 %v5942_v63  ;;  %3099 = vmatprep.subr.bf16.mxu0 %v6165_v0  ;;  %v245_v63 = vld [vmem:[#allocation3 + $0x398] sm:$0xff]  ;;  %v6237_v6 = vcombine.high %v476_v59, %v480_v61 }
 0x180   :  { %3179 = vmatprep.subr.bf16.mxu1 %v5935_v4  ;;  %v249_v0 = vld [vmem:[#allocation3 + $0x3b8] sm:$0xff]  ;;  %v6244_v4 = vcombine.low %v484_v60, %v488_v51 }
 0x181   :  { %v6007_v7 = vcombine.high %v245_v63, %v249_v0  ;;  %v6006_v11 = vcombine.low %v245_v63, %v249_v0  ;;  %v209_v63 = vld [vmem:[#allocation3 + $0x278] sm:$0xff] }
 0x182   :  { %3100 = vmatpush1.bf16.msra.mxu0 %v6164_v8  ;;  %v472_v8 = vld [vmem:[#allocation3 + $0xab0] sm:$0xff] }
 0x183   :  { %3180 = vmatpush1.bf16.msra.mxu1 %v5934_v9  ;;  %3101 = vmatprep.subr.bf16.mxu0 %v6157_v3  ;;  %v237_v9 = vld [vmem:[#allocation3 + $0x358] sm:$0xff]  ;;  %v6229_v12 = vcombine.high %v468_v13, %v472_v8  ;;  %v6228_v19 = vcombine.low %v468_v13, %v472_v8 }
 0x184   :  { %3181 = vmatprep.subr.bf16.mxu1 %v5927_v57  ;;  %v241_v3 = vld [vmem:[#allocation3 + $0x378] sm:$0xff]  ;;  %v6236_v57 = vcombine.low %v476_v59, %v480_v61 }
 0x185   :  { %v5999_v14 = vcombine.high %v237_v9, %v241_v3  ;;  %v5998_v23 = vcombine.low %v237_v9, %v241_v3  ;;  %v313_v59 = vld [vmem:[#allocation3 + $0x5b8] sm:$0xff]  ;;  %v7495_v3 = vld [vmem:[%s7603_s0 + $0x10] ss:$28 sps:$4 sm:$0xff]  }
 0x186   :  { %3102 = vmatpush1.bf16.msra.mxu0 %v6156_v25  ;;  %v464_v25 = vld [vmem:[#allocation3 + $0xa70] sm:$0xff]  ;;  %v205_v61 = vld [vmem:[#allocation3 + $0x258] sm:$0xff] }
 0x187   :  { %3182 = vmatpush1.bf16.msra.mxu1 %v5926_v17  ;;  %3103 = vmatprep.subr.bf16.mxu0 %v6149_v10  ;;  %v7482_v17 = vpop.f32.mrf.mxu1  ;;  %v229_v10 = vld [vmem:[#allocation3 + $0x318] sm:$0xff]  ;;  %v5967_v13 = vcombine.high %v205_v61, %v209_v63 }
 0x188   :  { %3183 = vmatprep.subr.bf16.mxu1 %v5919_v18  ;;  %v233_v18 = vld [vmem:[#allocation3 + $0x338] sm:$0xff] }
 0x189   :  { %v2822_v22 = vpop.f32.mrf.mxu1  ;;  %v301_v8 = vld [vmem:[#allocation3 + $0x558] sm:$0xff] }
 0x18a   :  { %3104 = vmatpush1.bf16.msra.mxu0 %v6148_v24  ;;  %v6221_v24 = vcombine.high %v460_v16, %v464_v25  ;;  %v305_v9 = vld [vmem:[#allocation3 + $0x578] sm:$0xff] }
 0x18b   :  { %3184 = vmatpush1.bf16.msra.mxu1 %v5918_v26  ;;  %3105 = vmatprep.subr.bf16.mxu0 %v6269_v27  ;;  %v5991_v26 = vcombine.high %v229_v10, %v233_v18  ;;  %v452_v27 = vld [vmem:[#allocation3 + $0xa10] sm:$0xff] }
 0x18c   :  { %3185 = vmatprep.subr.bf16.mxu1 %v5911_v31  ;;  %v456_v31 = vld [vmem:[#allocation3 + $0xa30] sm:$0xff] }
 0x18d   :  { %v6213_v43 = vcombine.high %v452_v27, %v456_v31  ;;  %v6212_v60 = vcombine.low %v452_v27, %v456_v31 }
 0x18e   :  { %3106 = vmatpush2.bf16.msra.mxu0 %v6268_v36  ;;  %v6220_v36 = vcombine.low %v460_v16, %v464_v25  ;;  %v5966_v16 = vcombine.low %v205_v61, %v209_v63  ;;  %v6063_v25 = vcombine.high %v301_v8, %v305_v9  ;;  %v413_v61 = vld [vmem:[#allocation3 + $0x8d8] sm:$0xff] }
 0x18f   :  { %3186 = vmatpush1.bf16.msra.mxu1 %v5910_v37  ;;  %3107 = vmatprep.subr.bf16.mxu0 %v6261_v39  ;;  %v7487_v37 = vpop.f32.mrf.mxu1  ;;  %v417_v63 = vld [vmem:[#allocation3 + $0x8f8] sm:$0xff] }
 0x190   :  { %3187 = vmatprep.subr.bf16.mxu1 %v5903_v42  ;;  %v5990_v42 = vcombine.low %v229_v10, %v233_v18  ;;  %v293_v18 = vld [vmem:[#allocation3 + $0x518] sm:$0xff] }
 0x191   :  { %v2826_v51 = vpop.f32.mrf.mxu1 }
 0x192   :  { %3108 = vmatpush2.bf16.msra.mxu0 %v6260_v47  ;;  %v321_v47 = vld [vmem:[#allocation3 + $0x5f8] sm:$0xff] }
 0x193   :  { %3188 = vmatpush1.bf16.msra.mxu1 %v5902_v48  ;;  %3109 = vmatprep.subr.bf16.mxu0 %v6253_v49  ;;  %v213_v49 = vld [vmem:[#allocation3 + $0x298] sm:$0xff]  ;;  %v6079_v53 = vcombine.high %v317_v46, %v321_v47 }
 0x194   :  { %3189 = vmatprep.subr.bf16.mxu1 %v5895_v50  ;;  %v217_v50 = vld [vmem:[#allocation3 + $0x2b8] sm:$0xff] }
 0x196   :  { %3110 = vmatpush2.bf16.msra.mxu0 %v6252_v54 }
 0x197   :  { %3190 = vmatpush1.bf16.msra.mxu1 %v5894_v55  ;;  %3111 = vmatprep.subr.bf16.mxu0 %v6245_v56  ;;  %v5975_v56 = vcombine.high %v213_v49, %v217_v50 }
 0x198   :  { %3191 = vmatprep.subr.bf16.mxu1 %v6015_v58  ;;  %v309_v58 = vld [vmem:[#allocation3 + $0x598] sm:$0xff] }
 0x19a   :  { %3112 = vmatpush2.bf16.msra.mxu0 %v6244_v4  ;;  %v5974_v4 = vcombine.low %v213_v49, %v217_v50  ;;  %v6198_v49 = vcombine.low %v437_v33, %v441_v34 }
 0x19b   :  { %3192 = vmatpush2.bf16.msra.mxu1 %v6014_v5  ;;  %3113 = vmatprep.subr.bf16.mxu0 %v6237_v6  ;;  %v6071_v5 = vcombine.high %v309_v58, %v313_v59 }
 0x19c   :  { %3193 = vmatprep.subr.bf16.mxu1 %v6007_v7 }
 0x19e   :  { %3114 = vmatpush2.bf16.msra.mxu0 %v6236_v57  ;;  %v197_v57 = vld [vmem:[#allocation3 + $0x218] sm:$0xff] }
 0x19f   :  { %3194 = vmatpush2.bf16.msra.mxu1 %v6006_v11  ;;  %3115 = vmatprep.subr.bf16.mxu0 %v6229_v12  ;;  %v201_v11 = vld [vmem:[#allocation3 + $0x238] sm:$0xff] }
 0x1a0   :  { %3195 = vmatprep.subr.bf16.mxu1 %v5999_v14  ;;  %v6070_v14 = vcombine.low %v309_v58, %v313_v59  ;;  %v5959_v10 = vcombine.high %v197_v57, %v201_v11  ;;  %v261_v58 = vld [vmem:[#allocation3 + $0x418] sm:$0xff] }
 0x1a1   :  { %v2779_v32 = vpop.f32.mrf.mxu0  ;;  %v265_v59 = vld [vmem:[#allocation3 + $0x438] sm:$0xff] }
 0x1a2   :  { %v2780_v35 = vadd.f32 %v2779_v32, %v7459_v1  ;;  %3116 = vmatpush2.bf16.msra.mxu0 %v6228_v19  ;;  %v297_v19 = vld [vmem:[#allocation3 + $0x538] sm:$0xff] }
 0x1a3   :  { %3196 = vmatpush2.bf16.msra.mxu1 %v5998_v23  ;;  %v7489_v39 = vpop.f32.mrf.mxu0  ;;  %3117 = vmatprep.subr.bf16.mxu0 %v6221_v24  ;;  %v449_v23 = vld [vmem:[#allocation3 + $0x9f8] sm:$0xff]  ;;  %v6062_v24 = vcombine.low %v301_v8, %v305_v9  ;;  %v6055_v27 = vcombine.high %v293_v18, %v297_v19  ;;  %v6022_v8 = vcombine.low %v261_v58, %v265_v59 }
 0x1a4   :  { %v2823_v41 = vadd.f32 %v2822_v22, %v2780_v35  ;;  %3197 = vmatprep.subr.bf16.mxu1 %v5991_v26  ;;  %v445_v22 = vld [vmem:[#allocation3 + $0x9d8] sm:$0xff]  ;;  %v5958_v26 = vcombine.low %v197_v57, %v201_v11  ;;  %v6054_v35 = vcombine.low %v293_v18, %v297_v19  ;;  %v6174_v9 = vcombine.low %v413_v61, %v417_v63 }
 0x1a5   :  { %v2783_v48 = vpop.f32.mrf.mxu0  ;;  %v6207_v31 = vcombine.high %v445_v22, %v449_v23  ;;  %v285_v32 = vld [vmem:[#allocation3 + $0x4d8] sm:$0xff] }
 0x1a6   :  { %v2784_v1 = vadd.f32 %v2783_v48, %v7463_v15  ;;  %3118 = vmatpush2.bf16.msra.mxu0 %v6220_v36  ;;  %v3363_v54 = vmul.f32 0.2, %v2823_v41  ;;  %vm3347_vm1 = vcmp.gt.f32.partialorder %v2823_v41, 0.0  ;;  %v6078_v15 = vcombine.low %v317_v46, %v321_v47  ;;  %v429_v46 = vld [vmem:[#allocation3 + $0x958] sm:$0xff] }
 0x1a7   :  { %3198 = vmatpush2.bf16.msra.mxu1 %v5990_v42  ;;  %3119 = vmatprep.subr.bf16.mxu0 %v6213_v43  ;;  %v6206_v36 = vcombine.low %v445_v22, %v449_v23  ;;  %v6199_v43 = vcombine.high %v437_v33, %v441_v34  ;;  %v433_v47 = vld [vmem:[#allocation3 + $0x978] sm:$0xff] }
 0x1a8   :  { %v2827_v55 = vadd.f32 %v2826_v51, %v2784_v1  ;;  %3199 = vmatprep.subr.bf16.mxu1 %v5983_v45  ;;  %v3379_v6 = vsel %vm3347_vm1, %v2823_v41, %v3363_v54  ;;  %v277_v41 = vld [vmem:[#allocation3 + $0x498] sm:$0xff]  ;;  %v6191_v1 = vcombine.high %v429_v46, %v433_v47 }
 0x1a9   :  { %v281_v45 = vld [vmem:[#allocation3 + $0x4b8] sm:$0xff] }
 0x1aa   :  { %vm3355_vm2 = vcmp.gt.f32.partialorder %v2827_v55, 0.0  ;;  %v3371_v0 = vmul.f32 0.2, %v2827_v55  ;;  %3120 = vmatpush2.bf16.msra.mxu0 %v6212_v60  ;;  %v6039_v50 = vcombine.high %v277_v41, %v281_v45  ;;  %v269_v60 = vld [vmem:[#allocation3 + $0x458] sm:$0xff]  ;;  %v6038_v54 = vcombine.low %v277_v41, %v281_v45 }
 0x1ab   :  { %3200 = vmatpush2.bf16.msra.mxu1 %v5982_v52  ;;  %3218 = vmatprep.subr.bf16.mxu0 %v6079_v53  ;;  %v273_v51 = vld [vmem:[#allocation3 + $0x478] sm:$0xff] }
 0x1ac   :  { %v3387_v7 = vsel %vm3355_vm2, %v2827_v55, %v3371_v0  ;;  %3201 = vmatprep.subr.bf16.mxu1 %v5975_v56  ;;  %v421_v52 = vld [vmem:[#allocation3 + $0x918] sm:$0xff]  ;;  %v6190_v55 = vcombine.low %v429_v46, %v433_v47  ;;  %v6030_v0 = vcombine.low %v269_v60, %v273_v51 }
 0x1ad   :  { %3122 = vmatmul.mubr.bf16.vlgmr.msra.gmra.mxu0 %v7495_v3  ;;  %v7498_v12 = vpack.c.bf16 %v3387_v7, %v3379_v6  ;;  %v425_v53 = vld [vmem:[#allocation3 + $0x938] sm:$0xff] }
 0x1ae   :  { %3219 = vmatpush1.bf16.msra.mxu0 %v6078_v15  ;;  %3250 = vmatprep.mubr.bf16.mxu0 %v7445_v20  ;;  %v289_v20 = vld [vmem:[#allocation3 + $0x4f8] sm:$0xff]  ;;  %v6183_v56 = vcombine.high %v421_v52, %v425_v53  ;;  %v6182_v15 = vcombine.low %v421_v52, %v425_v53 }
 0x1af   :  { %3202 = vmatpush2.bf16.msra.mxu1 %v5974_v4  ;;  %3220 = vmatprep.subr.bf16.mxu0 %v6071_v5  ;;  %v6047_v42 = vcombine.high %v285_v32, %v289_v20  ;;  %v6046_v48 = vcombine.low %v285_v32, %v289_v20  ;;  %v6175_v4 = vcombine.high %v413_v61, %v417_v63  ;;  %v381_v5 = vld [vmem:[#allocation3 + $0x7d8] sm:$0xff] }
 0x1b0   :  { %3203 = vmatprep.subr.bf16.mxu1 %v5967_v13  ;;  %v385_v6 = vld [vmem:[#allocation3 + $0x7f8] sm:$0xff] }
 0x1b1   :  { %v405_v7 = vld [vmem:[#allocation3 + $0x898] sm:$0xff]  ;;  %v6143_v57 = vcombine.high %v381_v5, %v385_v6  ;;  %v6142_v18 = vcombine.low %v381_v5, %v385_v6 }
 0x1b2   :  { %3221 = vmatpush1.bf16.msra.mxu0 %v6070_v14  ;;  %v409_v13 = vld [vmem:[#allocation3 + $0x8b8] sm:$0xff] }
 0x1b3   :  { %3204 = vmatpush2.bf16.msra.mxu1 %v5966_v16  ;;  %3222 = vmatprep.subr.bf16.mxu0 %v6063_v25  ;;  %v6167_v11 = vcombine.high %v405_v7, %v409_v13  ;;  %v373_v14 = vld [vmem:[#allocation3 + $0x798] sm:$0xff]  ;;  %v6166_v19 = vcombine.low %v405_v7, %v409_v13 }
 0x1b4   :  { %3205 = vmatprep.subr.bf16.mxu1 %v5959_v10  ;;  %v377_v16 = vld [vmem:[#allocation3 + $0x7b8] sm:$0xff] }
 0x1b5   :  { %v397_v25 = vld [vmem:[#allocation3 + $0x858] sm:$0xff]  ;;  %v6135_v22 = vcombine.high %v373_v14, %v377_v16  ;;  %v6134_v32 = vcombine.low %v373_v14, %v377_v16 }
 0x1b6   :  { %3223 = vmatpush1.bf16.msra.mxu0 %v6062_v24  ;;  %v401_v10 = vld [vmem:[#allocation3 + $0x878] sm:$0xff] }
 0x1b7   :  { %3206 = vmatpush2.bf16.msra.mxu1 %v5958_v26  ;;  %3224 = vmatprep.subr.bf16.mxu0 %v6055_v27  ;;  %v6159_v23 = vcombine.high %v397_v25, %v401_v10  ;;  %v365_v24 = vld [vmem:[#allocation3 + $0x758] sm:$0xff]  ;;  %v6158_v20 = vcombine.low %v397_v25, %v401_v10 }
 0x1b8   :  { %3261 = vmatprep.subr.bf16.mxu1 %v6207_v31  ;;  %v369_v26 = vld [vmem:[#allocation3 + $0x778] sm:$0xff] }
 0x1b9   :  { %v389_v27 = vld [vmem:[#allocation3 + $0x818] sm:$0xff]  ;;  %v6127_v33 = vcombine.high %v365_v24, %v369_v26  ;;  %v6126_v41 = vcombine.low %v365_v24, %v369_v26 }
 0x1ba   :  { %3208 = vmatmul.mubr.bf16.vlgmr.msra.gmra.mxu1 %v7468_v29  ;;  %3225 = vmatpush1.bf16.msra.mxu0 %v6054_v35  ;;  %v6031_v29 = vcombine.high %v269_v60, %v273_v51  ;;  %v393_v31 = vld [vmem:[#allocation3 + $0x838] sm:$0xff]  ;;  %v7503_v51 = vpop.f32.mrf.mxu1 }
 0x1bb   :  { %3262 = vmatpush1.bf16.msra.mxu1 %v6206_v36  ;;  %3226 = vmatprep.subr.bf16.mxu0 %v6047_v42  ;;  %v6151_v34 = vcombine.high %v389_v27, %v393_v31  ;;  %v357_v35 = vld [vmem:[#allocation3 + $0x718] sm:$0xff]  ;;  %v6150_v45 = vcombine.low %v389_v27, %v393_v31 }
 0x1bc   :  { %3263 = vmatprep.subr.bf16.mxu1 %v6199_v43  ;;  %3293 = vmatprep.mubr.bf16.mxu1 %v7476_v44  ;;  %v6023_v44 = vcombine.high %v261_v58, %v265_v59  ;;  %v361_v36 = vld [vmem:[#allocation3 + $0x738] sm:$0xff]  ;;  %v2865_v58 = vpop.f32.mrf.mxu1 }
 0x1bd   :  { %v509_v42 = vld [vmem:[#allocation3 + $0xbd8] sm:$0xff]  ;;  %v6119_v46 = vcombine.high %v357_v35, %v361_v36  ;;  %v6118_v60 = vcombine.low %v357_v35, %v361_v36 }
 0x1be   :  { %3227 = vmatpush1.bf16.msra.mxu0 %v6046_v48  ;;  %v513_v43 = vld [vmem:[#allocation3 + $0xbf8] sm:$0xff]  ;;  %v7509_v7 = vpop.f32.mrf.mxu1 }
 0x1bf   :  { %3264 = vmatpush1.bf16.msra.mxu1 %v6198_v49  ;;  %3228 = vmatprep.subr.bf16.mxu0 %v6039_v50  ;;  %v6271_v47 = vcombine.high %v509_v42, %v513_v43  ;;  %v349_v48 = vld [vmem:[#allocation3 + $0x6d8] sm:$0xff]  ;;  %v6270_v52 = vcombine.low %v509_v42, %v513_v43 }
 0x1c0   :  { %3265 = vmatprep.subr.bf16.mxu1 %v6191_v1  ;;  %v353_v49 = vld [vmem:[#allocation3 + $0x6f8] sm:$0xff] }
 0x1c1   :  { %v501_v50 = vld [vmem:[#allocation3 + $0xb98] sm:$0xff]  ;;  %v6111_v53 = vcombine.high %v349_v48, %v353_v49  ;;  %v6110_v63 = vcombine.low %v349_v48, %v353_v49 }
 0x1c2   :  { %3229 = vmatpush1.bf16.msra.mxu0 %v6038_v54  ;;  %v505_v1 = vld [vmem:[#allocation3 + $0xbb8] sm:$0xff]  ;;  %v550_v54 = vsub.s32 2, %v7448_v28 }
 0x1c3   :  { %3266 = vmatpush1.bf16.msra.mxu1 %v6190_v55  ;;  %3230 = vmatprep.subr.bf16.mxu0 %v6031_v29  ;;  %v6263_v55 = vcombine.high %v501_v50, %v505_v1  ;;  %v341_v29 = vld [vmem:[#allocation3 + $0x698] sm:$0xff] }
 0x1c4   :  { %3267 = vmatprep.subr.bf16.mxu1 %v6183_v56  ;;  %v345_v56 = vld [vmem:[#allocation3 + $0x6b8] sm:$0xff] }
 0x1c5   :  { %v493_v59 = vld [vmem:[#allocation3 + $0xb58] sm:$0xff] }
 0x1c6   :  { %3231 = vmatpush1.bf16.msra.mxu0 %v6030_v0  ;;  %v497_v61 = vld [vmem:[#allocation3 + $0xb78] sm:$0xff]  ;;  %v6262_v0 = vcombine.low %v501_v50, %v505_v1 }
 0x1c7   :  { %3268 = vmatpush1.bf16.msra.mxu1 %v6182_v15  ;;  %3232 = vmatprep.subr.bf16.mxu0 %v6023_v44  ;;  %v6103_v15 = vcombine.high %v341_v29, %v345_v56  ;;  %v551_v44 = vrot.slane %v7453_v40, %v550_v54  ;;  %v333_v5 = vld [vmem:[#allocation3 + $0x658] sm:$0xff]  ;;  %v6254_v14 = vcombine.low %v493_v59, %v497_v61 }
 0x1c8   :  { %3269 = vmatprep.subr.bf16.mxu1 %v6175_v4  ;;  %v6255_v4 = vcombine.high %v493_v59, %v497_v61  ;;  %v337_v6 = vld [vmem:[#allocation3 + $0x678] sm:$0xff] }
 0x1c9   :  { %v485_v13 = vld [vmem:[#allocation3 + $0xb18] sm:$0xff]  ;;  %v6095_v16 = vcombine.high %v333_v5, %v337_v6  ;;  %v2866_v25 = vadd.f32 %v2865_v58, %v551_v44 }
 0x1ca   :  { %3233 = vmatpush1.bf16.msra.mxu0 %v6022_v8  ;;  %v489_v8 = vld [vmem:[#allocation3 + $0xb38] sm:$0xff] }
 0x1cb   :  { %3270 = vmatpush1.bf16.msra.mxu1 %v6174_v9  ;;  %3234 = vmatprep.subr.bf16.mxu0 %v6143_v57  ;;  %v7512_v9 = vsub.s32 1, %v7448_v28  ;;  %v6102_v57 = vcombine.low %v341_v29, %v345_v56  ;;  %v6247_v10 = vcombine.high %v485_v13, %v489_v8  ;;  %v477_v24 = vld [vmem:[#allocation3 + $0xad8] sm:$0xff] }
 0x1cc   :  { %3271 = vmatprep.subr.bf16.mxu1 %v6167_v11  ;;  %v2785_v11 = vpop.f32.mrf.mxu0  ;;  %v481_v26 = vld [vmem:[#allocation3 + $0xaf8] sm:$0xff] }
 0x1cd   :  { %v547_v27 = vrot.slane %v7453_v40, %v7512_v9  ;;  %v6239_v42 = vcombine.high %v477_v24, %v481_v26  ;;  %v533_v43 = vld [vmem:[#allocation3 + $0xc98] sm:$0xff] }
 0x1ce   :  { %3235 = vmatpush2.bf16.msra.mxu0 %v6142_v18  ;;  %v325_v18 = vld [vmem:[#allocation3 + $0x618] sm:$0xff] }
 0x1cf   :  { %3272 = vmatpush1.bf16.msra.mxu1 %v6166_v19  ;;  %3236 = vmatprep.subr.bf16.mxu0 %v6135_v22  ;;  %v329_v19 = vld [vmem:[#allocation3 + $0x638] sm:$0xff]  ;;  %v2869_v22 = vpop.f32.mrf.mxu1  ;;  %v2700_v35 = vadd.f32 %v7484_v21, %v547_v27  ;;  %v2696_v49 = vadd.f32 %v7457_v62, %v547_v27 }
 0x1d0   :  { %3273 = vmatprep.subr.bf16.mxu1 %v6159_v23  ;;  %v2870_v36 = vadd.f32 %v2869_v22, %v551_v44  ;;  %v473_v48 = vld [vmem:[#allocation3 + $0xab8] sm:$0xff]  ;;  %v6086_v1 = vcombine.low %v325_v18, %v329_v19 }
 0x1d1   :  { %v2743_v21 = vadd.f32 %v7482_v17, %v2700_v35  ;;  %v529_v29 = vld [vmem:[#allocation3 + $0xc78] sm:$0xff]  ;;  %v2739_v62 = vadd.f32 %v7461_v2, %v2696_v49  ;;  %v7140_v2 = vld [vmem:[%s7603_s0 + $0x8] ss:$28 sps:$4 sm:$0xff]  }
 0x1d2   :  { %3237 = vmatpush2.bf16.msra.mxu0 %v6134_v32  ;;  %v6094_v32 = vcombine.low %v333_v5, %v337_v6  ;;  %v461_v58 = vld [vmem:[#allocation3 + $0xa58] sm:$0xff] }
 0x1d3   :  { %3274 = vmatpush1.bf16.msra.mxu1 %v6158_v20  ;;  %3238 = vmatprep.subr.bf16.mxu0 %v6127_v33  ;;  %v6246_v33 = vcombine.low %v485_v13, %v489_v8  ;;  %v465_v59 = vld [vmem:[#allocation3 + $0xa78] sm:$0xff]  ;;  %v2786_v61 = vadd.f32 %v2785_v11, %v2743_v21  ;;  %v2782_v44 = vadd.f32 %v7489_v39, %v2739_v62 }
 0x1d4   :  { %3275 = vmatprep.subr.bf16.mxu1 %v6151_v34  ;;  %v6087_v34 = vcombine.high %v325_v18, %v329_v19  ;;  %v6223_v5 = vcombine.high %v461_v58, %v465_v59  ;;  %v517_v6 = vld [vmem:[#allocation3 + $0xc18] sm:$0xff]  ;;  %v6222_v39 = vcombine.low %v461_v58, %v465_v59 }
 0x1d5   :  { %v521_v13 = vld [vmem:[#allocation3 + $0xc38] sm:$0xff]  ;;  %v2825_v22 = vadd.f32 %v7487_v37, %v2782_v44 }
 0x1d6   :  { %3239 = vmatpush2.bf16.msra.mxu0 %v6126_v41  ;;  %v537_v41 = vld [vmem:[#allocation3 + $0xcb8] sm:$0xff]  ;;  %v6279_v19 = vcombine.high %v517_v6, %v521_v13 }
 0x1d7   :  { %3276 = vmatpush1.bf16.msra.mxu1 %v6150_v45  ;;  %3240 = vmatprep.subr.bf16.mxu0 %v6119_v46  ;;  %v554_v45 = vsub.s32 3, %v7448_v28  ;;  %v457_v11 = vld [vmem:[#allocation3 + $0xa38] sm:$0xff]  ;;  %vm3348_vm4 = vcmp.gt.f32.partialorder %v2825_v22, 0.0 }
 0x1d8   :  { %3277 = vmatprep.subr.bf16.mxu1 %v6271_v47  ;;  %v469_v47 = vld [vmem:[#allocation3 + $0xa98] sm:$0xff] }
 0x1d9   :  { %v555_v56 = vrot.slane %v7453_v40, %v554_v45  ;;  %v6647_v35 = vld [vmem:[#allocation7 + $0xe4] ss:$16 sps:$4 sm:$0xff]   ;;  %v6645_v49 = vld [vmem:[#allocation7 + $0xe0] ss:$16 sps:$4 sm:$0xff]  }
 0x1da   :  { %3241 = vmatpush2.bf16.msra.mxu0 %v6118_v60  ;;  %v6238_v60 = vcombine.low %v477_v24, %v481_v26  ;;  %v7141_v62 = vld [vmem:[%s7603_s0 + $0x18] ss:$28 sps:$4 sm:$0xff]  }
 0x1db   :  { %3278 = vmatpush2.bf16.msra.mxu1 %v6270_v52  ;;  %3242 = vmatprep.subr.bf16.mxu0 %v6111_v53  ;;  %v6295_v52 = vcombine.high %v533_v43, %v537_v41  ;;  %v6231_v53 = vcombine.high %v469_v47, %v473_v48  ;;  %v2868_v40 = vadd.f32 %v7509_v7, %v555_v56 }
 0x1dc   :  { %3279 = vmatprep.subr.bf16.mxu1 %v6263_v55  ;;  %v525_v55 = vld [vmem:[#allocation3 + $0xc58] sm:$0xff] }
 0x1dd   :  { %v6287_v17 = vcombine.high %v525_v55, %v529_v29 }
 0x1de   :  { %3243 = vmatpush2.bf16.msra.mxu0 %v6110_v63  ;;  %v6294_v63 = vcombine.low %v533_v43, %v537_v41  ;;  %v6650_v41 = vld [vmem:[#allocation7 + $0x2e4] ss:$16 sps:$4 sm:$0xff]  }
 0x1df   :  { %3280 = vmatpush2.bf16.msra.mxu1 %v6262_v0  ;;  %3244 = vmatprep.subr.bf16.mxu0 %v6103_v15  ;;  %v6230_v15 = vcombine.low %v469_v47, %v473_v48 }
 0x1e0   :  { %3281 = vmatprep.subr.bf16.mxu1 %v6255_v4  ;;  %v2871_v4 = vpop.f32.mrf.mxu1 }
 0x1e1   :  { %v2908_v23 = vpop.f32.mrf.mxu0 }
 0x1e2   :  { %v2909_v31 = vadd.f32 %v2908_v23, %v2866_v25  ;;  %3245 = vmatpush2.bf16.msra.mxu0 %v6102_v57  ;;  %v453_v57 = vld [vmem:[#allocation3 + $0xa18] sm:$0xff]  ;;  %v6286_v25 = vcombine.low %v525_v55, %v529_v29 }
 0x1e3   :  { %3282 = vmatpush2.bf16.msra.mxu1 %v6254_v14  ;;  %v2910_v20 = vpop.f32.mrf.mxu0  ;;  %3246 = vmatprep.subr.bf16.mxu0 %v6095_v16  ;;  %v2829_v14 = vadd.f32 %v7503_v51, %v2786_v61  ;;  %v6215_v24 = vcombine.high %v453_v57, %v457_v11  ;;  %v6653_v29 = vld [vmem:[#allocation7 + $0xc4] ss:$16 sps:$4 sm:$0xff]  }
 0x1e4   :  { %3283 = vmatprep.subr.bf16.mxu1 %v6247_v10  ;;  %v2911_v10 = vadd.f32 %v2910_v20, %v2868_v40  ;;  %v6657_v40 = vld [vmem:[#allocation7 + $0xa0] ss:$16 sps:$4 sm:$0xff]  }
 0x1e5   :  { %v2912_v46 = vpop.f32.mrf.mxu0  ;;  %v3372_v51 = vmul.f32 0.2, %v2829_v14  ;;  %vm3356_vm3 = vcmp.gt.f32.partialorder %v2829_v14, 0.0 }
 0x1e6   :  { %v2913_v50 = vadd.f32 %v2912_v46, %v2870_v36  ;;  %3247 = vmatpush2.bf16.msra.mxu0 %v6094_v32  ;;  %v2872_v32 = vadd.f32 %v2871_v4, %v555_v56  ;;  %v3364_v36 = vmul.f32 0.2, %v2825_v22  ;;  %v6656_v56 = vld [vmem:[#allocation7 + $0x2c4] ss:$16 sps:$4 sm:$0xff]  }
 0x1e7   :  { %3284 = vmatpush2.bf16.msra.mxu1 %v6246_v33  ;;  %3248 = vmatprep.subr.bf16.mxu0 %v6087_v34  ;;  %v2914_v0 = vpop.f32.mrf.mxu0  ;;  %v6278_v34 = vcombine.low %v517_v6, %v521_v13  ;;  %v6662_v6 = vld [vmem:[#allocation7 + $0x2a4] ss:$16 sps:$4 sm:$0xff]  }
 0x1e8   :  { %3285 = vmatprep.subr.bf16.mxu1 %v6239_v42  ;;  %v2915_v42 = vadd.f32 %v2914_v0, %v2872_v32  ;;  %v3380_v55 = vsel %vm3348_vm4, %v2825_v22, %v3364_v36  ;;  %v6683_v22 = vld [vmem:[#allocation7 + $0x24] ss:$16 sps:$4 sm:$0xff]   ;;  %v6687_v32 = vld [vmem:[#allocation7] ss:$16 sps:$4 sm:$0xff]  }
 0x1e9   :  { %v6704_v36 = vld [vmem:[#allocation7 + $0x3c4] ss:$16 sps:$4 sm:$0xff]  }
 0x1ea   :  { %3249 = vmatpush2.bf16.msra.mxu0 %v6086_v1 }
 0x1eb   :  { %3286 = vmatpush2.bf16.msra.mxu1 %v6238_v60  ;;  %3314 = vmatprep.subr.bf16.mxu0 %v6295_v52  ;;  %v6648_v52 = vld [vmem:[#allocation7 + $0x2e0] ss:$16 sps:$4 sm:$0xff]  }
 0x1ec   :  { %3287 = vmatprep.subr.bf16.mxu1 %v6231_v53 }
 0x1ed   :  { %v2994_v8 = vpop.f32.mrf.mxu0  ;;  %3251 = vmatmul.mubr.bf16.vlgmr.msra.gmra.mxu0 %v7140_v2  ;;  %v6668_v2 = vld [vmem:[#allocation7 + $0x284] ss:$16 sps:$4 sm:$0xff]  }
 0x1ee   :  { %v2951_v16 = vpop.f32.mrf.mxu1  ;;  %3315 = vmatpush1.bf16.msra.mxu0 %v6294_v63  ;;  %3336 = vmatprep.mubr.bf16.mxu0 %v7304_v30 }
 0x1ef   :  { %v2952_v18 = vadd.f32 %v2951_v16, %v2909_v31  ;;  %3288 = vmatpush2.bf16.msra.mxu1 %v6230_v15  ;;  %v2996_v7 = vpop.f32.mrf.mxu0  ;;  %3316 = vmatprep.subr.bf16.mxu0 %v6287_v17  ;;  %v6214_v31 = vcombine.low %v453_v57, %v457_v11  ;;  %v6651_v15 = vld [vmem:[#allocation7 + $0xc0] ss:$16 sps:$4 sm:$0xff]   ;;  %v6674_v16 = vld [vmem:[#allocation7 + $0x264] ss:$16 sps:$4 sm:$0xff]  }
 0x1f0   :  { %v2953_v23 = vpop.f32.mrf.mxu1  ;;  %3289 = vmatprep.subr.bf16.mxu1 %v6223_v5  ;;  %v6654_v17 = vld [vmem:[#allocation7 + $0x2c0] ss:$16 sps:$4 sm:$0xff]   ;;  %v6659_v5 = vld [vmem:[#allocation7 + $0xa4] ss:$16 sps:$4 sm:$0xff]  }
 0x1f1   :  { %v2995_v26 = vadd.f32 %v2994_v8, %v2952_v18  ;;  %v2954_v27 = vadd.f32 %v2953_v23, %v2911_v10  ;;  %v2998_v20 = vpop.f32.mrf.mxu0  ;;  %v6665_v8 = vld [vmem:[#allocation7 + $0x84] ss:$16 sps:$4 sm:$0xff]   ;;  %v6663_v57 = vld [vmem:[#allocation7 + $0x80] ss:$16 sps:$4 sm:$0xff]  }
 0x1f2   :  { %v2955_v33 = vpop.f32.mrf.mxu1  ;;  %3317 = vmatpush1.bf16.msra.mxu0 %v6286_v25  ;;  %v6666_v11 = vld [vmem:[#allocation7 + $0x280] ss:$16 sps:$4 sm:$0xff]   ;;  %v6677_v10 = vld [vmem:[#allocation7 + $0x44] ss:$16 sps:$4 sm:$0xff]  }
 0x1f3   :  { %v2956_v30 = vadd.f32 %v2955_v33, %v2913_v50  ;;  %3290 = vmatpush2.bf16.msra.mxu1 %v6222_v39  ;;  %3318 = vmatprep.subr.bf16.mxu0 %v6279_v19  ;;  %v2997_v37 = vadd.f32 %v2996_v7, %v2954_v27  ;;  %v3365_v46 = vmul.f32 0.2, %v2995_v26  ;;  %vm3349_vm5 = vcmp.gt.f32.partialorder %v2995_v26, 0.0  ;;  %v3000_v60 = vpop.f32.mrf.mxu0  ;;  %v6669_v39 = vld [vmem:[#allocation7 + $0x60] ss:$16 sps:$4 sm:$0xff]  }
 0x1f4   :  { %v2957_v43 = vpop.f32.mrf.mxu1  ;;  %3291 = vmatprep.subr.bf16.mxu1 %v6215_v24  ;;  %v3388_v50 = vsel %vm3356_vm3, %v2829_v14, %v3372_v51  ;;  %v6671_v14 = vld [vmem:[#allocation7 + $0x64] ss:$16 sps:$4 sm:$0xff]   ;;  %v6672_v25 = vld [vmem:[#allocation7 + $0x260] ss:$16 sps:$4 sm:$0xff]  }
 0x1f5   :  { %v2999_v47 = vadd.f32 %v2998_v20, %v2956_v30  ;;  %v2958_v48 = vadd.f32 %v2957_v43, %v2915_v42  ;;  %v3366_v21 = vmul.f32 0.2, %v2997_v37  ;;  %v3381_v58 = vsel %vm3349_vm5, %v2995_v26, %v3365_v46  ;;  %v6680_v18 = vld [vmem:[#allocation7 + $0x244] ss:$16 sps:$4 sm:$0xff]   ;;  %v6675_v7 = vld [vmem:[#allocation7 + $0x40] ss:$16 sps:$4 sm:$0xff]  }
 0x1f6   :  { %3319 = vmatpush1.bf16.msra.mxu0 %v6278_v34  ;;  %vm3350_vm7 = vcmp.gt.f32.partialorder %v2997_v37, 0.0  ;;  %v7539_v61 = vpack.c.bf16 %v3388_v50, %v3380_v55  ;;  %v6678_v19 = vld [vmem:[#allocation7 + $0x240] ss:$16 sps:$4 sm:$0xff]   ;;  %v6686_v23 = vld [vmem:[#allocation7 + $0x224] ss:$16 sps:$4 sm:$0xff]  }
 0x1f7   :  { %vm3357_vm6 = vcmp.gt.f32.partialorder %v2999_v47, 0.0  ;;  %v3373_v1 = vmul.f32 0.2, %v2999_v47  ;;  %3292 = vmatpush2.bf16.msra.mxu1 %v6214_v31  ;;  %4961 = vmatprep.subr.bf16.mxu0 %v6647_v35  ;;  %v3001_v53 = vadd.f32 %v3000_v60, %v2958_v48  ;;  %v3382_v44 = vsel %vm3350_vm7, %v2997_v37, %v3366_v21  ;;  %v6681_v24 = vld [vmem:[#allocation7 + $0x20] ss:$16 sps:$4 sm:$0xff]  }
 0x1f8   :  { %5004 = vmatprep.subr.bf16.mxu1 %v6650_v41  ;;  %v6684_v26 = vld [vmem:[#allocation7 + $0x220] ss:$16 sps:$4 sm:$0xff]   ;;  %v6689_v27 = vld [vmem:[#allocation7 + $0x4] ss:$16 sps:$4 sm:$0xff]  }
 0x1f9   :  { %v3389_v59 = vsel %vm3357_vm6, %v2999_v47, %v3373_v1  ;;  %6299 = vmatmul.mubr.msk.bf16.vlgmr.msra.gmra.mxu0 %vm2655_vm0, %v7141_v62  ;;  %vm3358_vm8 = vcmp.gt.f32.partialorder %v3001_v53, 0.0  ;;  %v3374_v0 = vmul.f32 0.2, %v3001_v53  ;;  %v6692_v51 = vld [vmem:[#allocation7 + $0x204] ss:$16 sps:$4 sm:$0xff]  }
 0x1fa   :  { %v7541_v63 = vpack.c.bf16 %v3389_v59, %v3381_v58  ;;  %3294 = vmatmul.mubr.bf16.vlgmr.msra.gmra.mxu1 %v7495_v3  ;;  %4962 = vmatpush1.bf16.msra.mxu0 %v6645_v49  ;;  %v6660_v3 = vld [vmem:[#allocation7 + $0x2a0] ss:$16 sps:$4 sm:$0xff]   ;;  %v6695_v34 = vld [vmem:[#allocation7 + $0x1e4] ss:$16 sps:$4 sm:$0xff]  }
 0x1fb   :  { %4993 = vmatprep.mubr.bf16.mxu0 %v7539_v61  ;;  %5005 = vmatpush1.bf16.msra.mxu1 %v6648_v52  ;;  %v3390_v4 = vsel %vm3358_vm8, %v3001_v53, %v3374_v0  ;;  %v6690_v33 = vld [vmem:[#allocation7 + $0x200] ss:$16 sps:$4 sm:$0xff]   ;;  %v6698_v30 = vld [vmem:[#allocation7 + $0x3e4] ss:$16 sps:$4 sm:$0xff]  }
 0x1fc   :  { %4963 = vmatprep.subr.bf16.mxu0 %v6653_v29  ;;  %5006 = vmatprep.subr.bf16.mxu1 %v6656_v56  ;;  %v7546_v13 = vpack.c.bf16 %v3390_v4, %v3382_v44  ;;  %v6693_v20 = vld [vmem:[#allocation7 + $0x1e0] ss:$16 sps:$4 sm:$0xff]   ;;  %v6701_v35 = vld [vmem:[#allocation7 + $0x1c4] ss:$16 sps:$4 sm:$0xff]  }
 0x1fd   :  { %v6696_v31 = vld [vmem:[#allocation7 + $0x3e0] ss:$16 sps:$4 sm:$0xff]   ;;  %v6707_v43 = vld [vmem:[#allocation7 + $0x1a4] ss:$16 sps:$4 sm:$0xff]  }
 0x1fe   :  { %4964 = vmatpush1.bf16.msra.mxu0 %v6651_v15  ;;  %5036 = vmatprep.mubr.bf16.mxu1 %v7546_v13  ;;  %v6699_v42 = vld [vmem:[#allocation7 + $0x1c0] ss:$16 sps:$4 sm:$0xff]   ;;  %v6710_v41 = vld [vmem:[#allocation7 + $0x3a4] ss:$16 sps:$4 sm:$0xff]  }
 0x1ff   :  { %5007 = vmatpush1.bf16.msra.mxu1 %v6654_v17  ;;  %4965 = vmatprep.subr.bf16.mxu0 %v6659_v5  ;;  %v6702_v37 = vld [vmem:[#allocation7 + $0x3c0] ss:$16 sps:$4 sm:$0xff]   ;;  %v6713_v48 = vld [vmem:[#allocation7 + $0x184] ss:$16 sps:$4 sm:$0xff]  }
 0x200   :  { %5008 = vmatprep.subr.bf16.mxu1 %v6662_v6  ;;  %v6705_v46 = vld [vmem:[#allocation7 + $0x1a0] ss:$16 sps:$4 sm:$0xff]   ;;  %v6716_v49 = vld [vmem:[#allocation7 + $0x384] ss:$16 sps:$4 sm:$0xff]  }
 0x201   :  { %v6708_v47 = vld [vmem:[#allocation7 + $0x3a0] ss:$16 sps:$4 sm:$0xff]   ;;  %v6719_v60 = vld [vmem:[#allocation7 + $0x164] ss:$16 sps:$4 sm:$0xff]  }
 0x202   :  { %4966 = vmatpush1.bf16.msra.mxu0 %v6657_v40  ;;  %v6711_v50 = vld [vmem:[#allocation7 + $0x180] ss:$16 sps:$4 sm:$0xff]   ;;  %v6722_v52 = vld [vmem:[#allocation7 + $0x364] ss:$16 sps:$4 sm:$0xff]  }
 0x203   :  { %5009 = vmatpush1.bf16.msra.mxu1 %v6660_v3  ;;  %4967 = vmatprep.subr.bf16.mxu0 %v6665_v8  ;;  %v6714_v1 = vld [vmem:[#allocation7 + $0x380] ss:$16 sps:$4 sm:$0xff]   ;;  %v6725_v55 = vld [vmem:[#allocation7 + $0x144] ss:$16 sps:$4 sm:$0xff]  }
 0x204   :  { %5010 = vmatprep.subr.bf16.mxu1 %v6668_v2  ;;  %v6717_v21 = vld [vmem:[#allocation7 + $0x160] ss:$16 sps:$4 sm:$0xff]   ;;  %v6728_v29 = vld [vmem:[#allocation7 + $0x344] ss:$16 sps:$4 sm:$0xff]  }
 0x205   :  { %v6720_v53 = vld [vmem:[#allocation7 + $0x360] ss:$16 sps:$4 sm:$0xff]   ;;  %v6731_v59 = vld [vmem:[#allocation7 + $0x124] ss:$16 sps:$4 sm:$0xff]  }
 0x206   :  { %4968 = vmatpush1.bf16.msra.mxu0 %v6663_v57  ;;  %v6723_v56 = vld [vmem:[#allocation7 + $0x140] ss:$16 sps:$4 sm:$0xff]   ;;  %v6734_v62 = vld [vmem:[#allocation7 + $0x324] ss:$16 sps:$4 sm:$0xff]  }
 0x207   :  { %5011 = vmatpush1.bf16.msra.mxu1 %v6666_v11  ;;  %4969 = vmatprep.subr.bf16.mxu0 %v6671_v14  ;;  %v6726_v58 = vld [vmem:[#allocation7 + $0x340] ss:$16 sps:$4 sm:$0xff]   ;;  %v6737_v17 = vld [vmem:[#allocation7 + $0x104] ss:$16 sps:$4 sm:$0xff]  }
 0x208   :  { %5012 = vmatprep.subr.bf16.mxu1 %v6674_v16  ;;  %v6729_v0 = vld [vmem:[#allocation7 + $0x120] ss:$16 sps:$4 sm:$0xff]   ;;  %v6740_v44 = vld [vmem:[#allocation7 + $0x304] ss:$16 sps:$4 sm:$0xff]  }
 0x209   :  { %v6732_v15 = vld [vmem:[#allocation7 + $0x320] ss:$16 sps:$4 sm:$0xff]   ;;  %v6743_v6 = vld [vmem:[#allocation7 + $0x4e4] ss:$16 sps:$4 sm:$0xff]  }
 0x20a   :  { %4970 = vmatpush1.bf16.msra.mxu0 %v6669_v39  ;;  %v6735_v4 = vld [vmem:[#allocation7 + $0x100] ss:$16 sps:$4 sm:$0xff]   ;;  %v6800_v40 = vld [vmem:[#allocation7 + $0x6e4] ss:$16 sps:$4 sm:$0xff]  }
 0x20b   :  { %5013 = vmatpush1.bf16.msra.mxu1 %v6672_v25  ;;  %4971 = vmatprep.subr.bf16.mxu0 %v6677_v10  ;;  %v6738_v5 = vld [vmem:[#allocation7 + $0x300] ss:$16 sps:$4 sm:$0xff]   ;;  %v6746_v8 = vld [vmem:[#allocation7 + $0x4c4] ss:$16 sps:$4 sm:$0xff]  }
 0x20c   :  { %5014 = vmatprep.subr.bf16.mxu1 %v6680_v18  ;;  %v6741_v3 = vld [vmem:[#allocation7 + $0x4e0] ss:$16 sps:$4 sm:$0xff]   ;;  %v6806_v57 = vld [vmem:[#allocation7 + $0x6c4] ss:$16 sps:$4 sm:$0xff]  }
 0x20d   :  { %v6798_v2 = vld [vmem:[#allocation7 + $0x6e0] ss:$16 sps:$4 sm:$0xff]   ;;  %v6749_v14 = vld [vmem:[#allocation7 + $0x4a4] ss:$16 sps:$4 sm:$0xff]  }
 0x20e   :  { %4972 = vmatpush1.bf16.msra.mxu0 %v6675_v7  ;;  %v6744_v11 = vld [vmem:[#allocation7 + $0x4c0] ss:$16 sps:$4 sm:$0xff]   ;;  %v6812_v39 = vld [vmem:[#allocation7 + $0x6a4] ss:$16 sps:$4 sm:$0xff]  }
 0x20f   :  { %5015 = vmatpush1.bf16.msra.mxu1 %v6678_v19  ;;  %4973 = vmatprep.subr.bf16.mxu0 %v6683_v22  ;;  %v6804_v16 = vld [vmem:[#allocation7 + $0x6c0] ss:$16 sps:$4 sm:$0xff]   ;;  %v6752_v10 = vld [vmem:[#allocation7 + $0x484] ss:$16 sps:$4 sm:$0xff]  }
 0x210   :  { %5016 = vmatprep.subr.bf16.mxu1 %v6686_v23  ;;  %v6747_v25 = vld [vmem:[#allocation7 + $0x4a0] ss:$16 sps:$4 sm:$0xff]   ;;  %v6818_v7 = vld [vmem:[#allocation7 + $0x684] ss:$16 sps:$4 sm:$0xff]  }
 0x211   :  { %v6810_v18 = vld [vmem:[#allocation7 + $0x6a0] ss:$16 sps:$4 sm:$0xff]   ;;  %v6755_v22 = vld [vmem:[#allocation7 + $0x464] ss:$16 sps:$4 sm:$0xff]  }
 0x212   :  { %4974 = vmatpush1.bf16.msra.mxu0 %v6681_v24  ;;  %v6750_v19 = vld [vmem:[#allocation7 + $0x480] ss:$16 sps:$4 sm:$0xff]   ;;  %v6824_v24 = vld [vmem:[#allocation7 + $0x664] ss:$16 sps:$4 sm:$0xff]  }
 0x213   :  { %5017 = vmatpush1.bf16.msra.mxu1 %v6684_v26  ;;  %4975 = vmatprep.subr.bf16.mxu0 %v6689_v27  ;;  %v6816_v23 = vld [vmem:[#allocation7 + $0x680] ss:$16 sps:$4 sm:$0xff]   ;;  %v6758_v27 = vld [vmem:[#allocation7 + $0x444] ss:$16 sps:$4 sm:$0xff]  }
 0x214   :  { %5018 = vmatprep.subr.bf16.mxu1 %v6692_v51  ;;  %v6753_v26 = vld [vmem:[#allocation7 + $0x460] ss:$16 sps:$4 sm:$0xff]  }
 0x215   :  { %v6822_v51 = vld [vmem:[#allocation7 + $0x660] ss:$16 sps:$4 sm:$0xff]  }
 0x216   :  { %4976 = vmatpush1.bf16.msra.mxu0 %v6687_v32  ;;  %v6830_v32 = vld [vmem:[#allocation7 + $0x644] ss:$16 sps:$4 sm:$0xff]  }
 0x217   :  { %5019 = vmatpush1.bf16.msra.mxu1 %v6690_v33  ;;  %4977 = vmatprep.subr.bf16.mxu0 %v6695_v34  ;;  %v6756_v33 = vld [vmem:[#allocation7 + $0x440] ss:$16 sps:$4 sm:$0xff]   ;;  %v6761_v34 = vld [vmem:[#allocation7 + $0x424] ss:$16 sps:$4 sm:$0xff]  }
 0x218   :  { %5020 = vmatprep.subr.bf16.mxu1 %v6698_v30  ;;  %v6828_v30 = vld [vmem:[#allocation7 + $0x640] ss:$16 sps:$4 sm:$0xff]  }
 0x21a   :  { %4978 = vmatpush2.bf16.msra.mxu0 %v6693_v20  ;;  %v6836_v20 = vld [vmem:[#allocation7 + $0x624] ss:$16 sps:$4 sm:$0xff]  }
 0x21b   :  { %5021 = vmatpush2.bf16.msra.mxu1 %v6696_v31  ;;  %4979 = vmatprep.subr.bf16.mxu0 %v6701_v35  ;;  %v6759_v31 = vld [vmem:[#allocation7 + $0x420] ss:$16 sps:$4 sm:$0xff]   ;;  %v6764_v35 = vld [vmem:[#allocation7 + $0x404] ss:$16 sps:$4 sm:$0xff]  }
 0x21c   :  { %5022 = vmatprep.subr.bf16.mxu1 %v6704_v36  ;;  %v6834_v36 = vld [vmem:[#allocation7 + $0x620] ss:$16 sps:$4 sm:$0xff]  }
 0x21e   :  { %4980 = vmatpush2.bf16.msra.mxu0 %v6699_v42  ;;  %v6842_v42 = vld [vmem:[#allocation7 + $0x604] ss:$16 sps:$4 sm:$0xff]  }
 0x21f   :  { %5023 = vmatpush2.bf16.msra.mxu1 %v6702_v37  ;;  %4981 = vmatprep.subr.bf16.mxu0 %v6707_v43  ;;  %v6762_v37 = vld [vmem:[#allocation7 + $0x400] ss:$16 sps:$4 sm:$0xff]   ;;  %v6767_v43 = vld [vmem:[#allocation7 + $0x5e4] ss:$16 sps:$4 sm:$0xff]  }
 0x220   :  { %5024 = vmatprep.subr.bf16.mxu1 %v6710_v41  ;;  %v6840_v41 = vld [vmem:[#allocation7 + $0x600] ss:$16 sps:$4 sm:$0xff]  }
 0x222   :  { %4982 = vmatpush2.bf16.msra.mxu0 %v6705_v46  ;;  %v6848_v46 = vld [vmem:[#allocation7 + $0x7e4] ss:$16 sps:$4 sm:$0xff]  }
 0x223   :  { %5025 = vmatpush2.bf16.msra.mxu1 %v6708_v47  ;;  %4983 = vmatprep.subr.bf16.mxu0 %v6713_v48  ;;  %v6765_v47 = vld [vmem:[#allocation7 + $0x5e0] ss:$16 sps:$4 sm:$0xff]   ;;  %v6770_v48 = vld [vmem:[#allocation7 + $0x5c4] ss:$16 sps:$4 sm:$0xff]  }
 0x224   :  { %5026 = vmatprep.subr.bf16.mxu1 %v6716_v49  ;;  %v6846_v49 = vld [vmem:[#allocation7 + $0x7e0] ss:$16 sps:$4 sm:$0xff]  }
 0x226   :  { %4984 = vmatpush2.bf16.msra.mxu0 %v6711_v50  ;;  %v6854_v50 = vld [vmem:[#allocation7 + $0x7c4] ss:$16 sps:$4 sm:$0xff]  }
 0x227   :  { %5027 = vmatpush2.bf16.msra.mxu1 %v6714_v1  ;;  %4985 = vmatprep.subr.bf16.mxu0 %v6719_v60  ;;  %v6768_v1 = vld [vmem:[#allocation7 + $0x5c0] ss:$16 sps:$4 sm:$0xff]   ;;  %v6773_v60 = vld [vmem:[#allocation7 + $0x5a4] ss:$16 sps:$4 sm:$0xff]  }
 0x228   :  { %5028 = vmatprep.subr.bf16.mxu1 %v6722_v52  ;;  %v6852_v52 = vld [vmem:[#allocation7 + $0x7c0] ss:$16 sps:$4 sm:$0xff]  }
 0x22a   :  { %4986 = vmatpush2.bf16.msra.mxu0 %v6717_v21 }
 0x22b   :  { %5029 = vmatpush2.bf16.msra.mxu1 %v6720_v53  ;;  %4987 = vmatprep.subr.bf16.mxu0 %v6725_v55  ;;  %v6860_v53 = vld [vmem:[#allocation7 + $0x7a4] ss:$16 sps:$4 sm:$0xff]   ;;  %v6771_v55 = vld [vmem:[#allocation7 + $0x5a0] ss:$16 sps:$4 sm:$0xff]  }
 0x22c   :  { %5030 = vmatprep.subr.bf16.mxu1 %v6728_v29 }
 0x22d   :  { %v3037_v29 = vpop.f32.mrf.mxu0 }
 0x22e   :  { %4988 = vmatpush2.bf16.msra.mxu0 %v6723_v56  ;;  %v3080_v21 = vpop.f32.mrf.mxu1  ;;  %v6776_v56 = vld [vmem:[#allocation7 + $0x584] ss:$16 sps:$4 sm:$0xff]  }
 0x22f   :  { %5031 = vmatpush2.bf16.msra.mxu1 %v6726_v58  ;;  %4989 = vmatprep.subr.bf16.mxu0 %v6731_v59  ;;  %v6858_v58 = vld [vmem:[#allocation7 + $0x7a0] ss:$16 sps:$4 sm:$0xff]  }
 0x230   :  { %5032 = vmatprep.subr.bf16.mxu1 %v6734_v62  ;;  %v3082_v59 = vpop.f32.mrf.mxu1  ;;  %v6866_v62 = vld [vmem:[#allocation7 + $0x784] ss:$16 sps:$4 sm:$0xff]  }
 0x232   :  { %4990 = vmatpush2.bf16.msra.mxu0 %v6729_v0  ;;  %v558_v0 = vsub.s32 4, %v7448_v28 }
 0x233   :  { %5033 = vmatpush2.bf16.msra.mxu1 %v6732_v15  ;;  %4991 = vmatprep.subr.bf16.mxu0 %v6737_v17  ;;  %v562_v15 = vsub.s32 5, %v7448_v28  ;;  %v6774_v17 = vld [vmem:[#allocation7 + $0x580] ss:$16 sps:$4 sm:$0xff]  }
 0x234   :  { %5034 = vmatprep.subr.bf16.mxu1 %v6740_v44  ;;  %v3039_v44 = vpop.f32.mrf.mxu0 }
 0x236   :  { %4992 = vmatpush2.bf16.msra.mxu0 %v6735_v4  ;;  %v6779_v4 = vld [vmem:[#allocation7 + $0x564] ss:$16 sps:$4 sm:$0xff]  }
 0x237   :  { %5035 = vmatpush2.bf16.msra.mxu1 %v6738_v5  ;;  %5047 = vmatprep.subr.bf16.mxu0 %v6743_v6  ;;  %v6864_v5 = vld [vmem:[#allocation7 + $0x780] ss:$16 sps:$4 sm:$0xff]   ;;  %v3084_v6 = vpop.f32.mrf.mxu1 }
 0x238   :  { %5090 = vmatprep.subr.bf16.mxu1 %v6800_v40  ;;  %v6872_v40 = vld [vmem:[#allocation7 + $0x764] ss:$16 sps:$4 sm:$0xff]  }
 0x239   :  { %4994 = vmatmul.mubr.bf16.vlgmr.msra.gmra.mxu0 %v7498_v12 }
 0x23a   :  { %5037 = vmatmul.mubr.bf16.vlgmr.msra.gmra.mxu1 %v7541_v63  ;;  %5048 = vmatpush1.bf16.msra.mxu0 %v6741_v3  ;;  %v7553_v3 = vld [vmem:[#allocation5] sm:$0xff] }
 0x23b   :  { %5049 = vmatprep.subr.bf16.mxu0 %v6746_v8  ;;  %5091 = vmatpush1.bf16.msra.mxu1 %v6798_v2  ;;  %v559_v8 = vrot.slane %v7553_v3, %v558_v0  ;;  %v563_v2 = vrot.slane %v7553_v3, %v562_v15 }
 0x23c   :  { %5092 = vmatprep.subr.bf16.mxu1 %v6806_v57  ;;  %v6777_v57 = vld [vmem:[#allocation7 + $0x560] ss:$16 sps:$4 sm:$0xff]  }
 0x23e   :  { %5050 = vmatpush1.bf16.msra.mxu0 %v6744_v11  ;;  %v3041_v11 = vpop.f32.mrf.mxu0 }
 0x23f   :  { %5051 = vmatprep.subr.bf16.mxu0 %v6749_v14  ;;  %5093 = vmatpush1.bf16.msra.mxu1 %v6804_v16  ;;  %v6782_v14 = vld [vmem:[#allocation7 + $0x544] ss:$16 sps:$4 sm:$0xff]   ;;  %v6870_v16 = vld [vmem:[#allocation7 + $0x760] ss:$16 sps:$4 sm:$0xff]  }
 0x240   :  { %5094 = vmatprep.subr.bf16.mxu1 %v6812_v39  ;;  %v3086_v39 = vpop.f32.mrf.mxu1 }
 0x242   :  { %5052 = vmatpush1.bf16.msra.mxu0 %v6747_v25  ;;  %v6878_v25 = vld [vmem:[#allocation7 + $0x744] ss:$16 sps:$4 sm:$0xff]  }
 0x243   :  { %5053 = vmatprep.subr.bf16.mxu0 %v6752_v10  ;;  %5095 = vmatpush1.bf16.msra.mxu1 %v6810_v18  ;;  %v3038_v10 = vadd.f32 %v3037_v29, %v559_v8  ;;  %v3040_v18 = vadd.f32 %v3039_v44, %v563_v2  ;;  %v6896_v29 = vld [vmem:[#allocation7 + $0x2ec] ss:$16 sps:$4 sm:$0xff]  }
 0x244   :  { %5096 = vmatprep.subr.bf16.mxu1 %v6818_v7  ;;  %v3166_v7 = vpop.f32.mrf.mxu1 }
 0x246   :  { %5054 = vmatpush1.bf16.msra.mxu0 %v6750_v19  ;;  %v6780_v19 = vld [vmem:[#allocation7 + $0x540] ss:$16 sps:$4 sm:$0xff]  }
 0x247   :  { %5055 = vmatprep.subr.bf16.mxu0 %v6755_v22  ;;  %5097 = vmatpush1.bf16.msra.mxu1 %v6816_v23  ;;  %v3043_v22 = vpop.f32.mrf.mxu0  ;;  %v6785_v23 = vld [vmem:[#allocation7 + $0x524] ss:$16 sps:$4 sm:$0xff]  }
 0x248   :  { %5098 = vmatprep.subr.bf16.mxu1 %v6824_v24  ;;  %v6876_v24 = vld [vmem:[#allocation7 + $0x740] ss:$16 sps:$4 sm:$0xff]  }
 0x24a   :  { %5056 = vmatpush1.bf16.msra.mxu0 %v6753_v26  ;;  %v3042_v26 = vadd.f32 %v3041_v11, %v559_v8  ;;  %v6789_v8 = vld [vmem:[#allocation7 + $0xe8] ss:$16 sps:$4 sm:$0xff]  }
 0x24b   :  { %5057 = vmatprep.subr.bf16.mxu0 %v6758_v27  ;;  %5099 = vmatpush1.bf16.msra.mxu1 %v6822_v51  ;;  %v6884_v27 = vld [vmem:[#allocation7 + $0x724] ss:$16 sps:$4 sm:$0xff]   ;;  %v6792_v11 = vld [vmem:[#allocation7 + $0xc8] ss:$16 sps:$4 sm:$0xff]  }
 0x24c   :  { %5100 = vmatprep.subr.bf16.mxu1 %v6830_v32  ;;  %v3081_v32 = vadd.f32 %v3080_v21, %v3038_v10  ;;  %v6888_v21 = vld [vmem:[#allocation7 + $0x700] ss:$16 sps:$4 sm:$0xff]   ;;  %v6809_v10 = vld [vmem:[#allocation7 + $0x6c] ss:$16 sps:$4 sm:$0xff]  }
 0x24e   :  { %5058 = vmatpush1.bf16.msra.mxu0 %v6756_v33  ;;  %v3083_v33 = vadd.f32 %v3082_v59, %v3040_v18  ;;  %v6807_v18 = vld [vmem:[#allocation7 + $0x68] ss:$16 sps:$4 sm:$0xff]  }
 0x24f   :  { %5059 = vmatprep.subr.bf16.mxu0 %v6761_v34  ;;  %5101 = vmatpush1.bf16.msra.mxu1 %v6828_v30  ;;  %v3168_v34 = vpop.f32.mrf.mxu1  ;;  %v6783_v30 = vld [vmem:[#allocation7 + $0x520] ss:$16 sps:$4 sm:$0xff]  }
 0x250   :  { %5102 = vmatprep.subr.bf16.mxu1 %v6836_v20  ;;  %v3044_v20 = vadd.f32 %v3043_v22, %v563_v2  ;;  %v6821_v22 = vld [vmem:[#allocation7 + $0x2c] ss:$16 sps:$4 sm:$0xff]  }
 0x252   :  { %5060 = vmatpush1.bf16.msra.mxu0 %v6759_v31 }
 0x253   :  { %5061 = vmatprep.subr.bf16.mxu0 %v6764_v35  ;;  %5103 = vmatpush1.bf16.msra.mxu1 %v6834_v36  ;;  %v6788_v35 = vld [vmem:[#allocation7 + $0x504] ss:$16 sps:$4 sm:$0xff]   ;;  %v6882_v36 = vld [vmem:[#allocation7 + $0x720] ss:$16 sps:$4 sm:$0xff]  }
 0x254   :  { %5104 = vmatprep.subr.bf16.mxu1 %v6842_v42  ;;  %v3085_v42 = vadd.f32 %v3084_v6, %v3042_v26  ;;  %v6833_v26 = vld [vmem:[#allocation7 + $0x1ec] ss:$16 sps:$4 sm:$0xff]  }
 0x256   :  { %5062 = vmatpush1.bf16.msra.mxu0 %v6762_v37 }
 0x257   :  { %5063 = vmatprep.subr.bf16.mxu0 %v6767_v43  ;;  %5105 = vmatpush1.bf16.msra.mxu1 %v6840_v41  ;;  %v6890_v41 = vld [vmem:[#allocation7 + $0x704] ss:$16 sps:$4 sm:$0xff]  }
 0x258   :  { %5106 = vmatprep.subr.bf16.mxu1 %v6848_v46 }
 0x25a   :  { %5064 = vmatpush2.bf16.msra.mxu0 %v6765_v47  ;;  %v3170_v47 = vpop.f32.mrf.mxu1 }
 0x25b   :  { %5065 = vmatprep.subr.bf16.mxu0 %v6770_v48  ;;  %5107 = vmatpush2.bf16.msra.mxu1 %v6846_v49  ;;  %v6786_v49 = vld [vmem:[#allocation7 + $0x500] ss:$16 sps:$4 sm:$0xff]  }
 0x25c   :  { %5108 = vmatprep.subr.bf16.mxu1 %v6854_v50  ;;  %v3087_v50 = vadd.f32 %v3086_v39, %v3044_v20  ;;  %v6803_v39 = vld [vmem:[#allocation7 + $0x8c] ss:$16 sps:$4 sm:$0xff]   ;;  %v6849_v20 = vld [vmem:[#allocation7 + $0x188] ss:$16 sps:$4 sm:$0xff]  }
 0x25e   :  { %5066 = vmatpush2.bf16.msra.mxu0 %v6768_v1 }
 0x25f   :  { %5067 = vmatprep.subr.bf16.mxu0 %v6773_v60  ;;  %5109 = vmatpush2.bf16.msra.mxu1 %v6852_v52  ;;  %v6791_v52 = vld [vmem:[#allocation7 + $0xec] ss:$16 sps:$4 sm:$0xff]  }
 0x260   :  { %5110 = vmatprep.subr.bf16.mxu1 %v6860_v53 }
 0x262   :  { %5068 = vmatpush2.bf16.msra.mxu0 %v6771_v55 }
 0x263   :  { %5069 = vmatprep.subr.bf16.mxu0 %v6776_v56  ;;  %5111 = vmatpush2.bf16.msra.mxu1 %v6858_v58  ;;  %v3172_v58 = vpop.f32.mrf.mxu1 }
 0x264   :  { %5112 = vmatprep.subr.bf16.mxu1 %v6866_v62 }
 0x266   :  { %5070 = vmatpush2.bf16.msra.mxu0 %v6774_v17 }
 0x267   :  { %5071 = vmatprep.subr.bf16.mxu0 %v6779_v4  ;;  %5113 = vmatpush2.bf16.msra.mxu1 %v6864_v5 }
 0x268   :  { %5114 = vmatprep.subr.bf16.mxu1 %v6872_v40 }
 0x26a   :  { %5072 = vmatpush2.bf16.msra.mxu0 %v6777_v57  ;;  %v6794_v57 = vld [vmem:[#allocation7 + $0xcc] ss:$16 sps:$4 sm:$0xff]  }
 0x26b   :  { %5073 = vmatprep.subr.bf16.mxu0 %v6782_v14  ;;  %5115 = vmatpush2.bf16.msra.mxu1 %v6870_v16  ;;  %v6797_v14 = vld [vmem:[#allocation7 + $0xac] ss:$16 sps:$4 sm:$0xff]   ;;  %v6795_v16 = vld [vmem:[#allocation7 + $0xa8] ss:$16 sps:$4 sm:$0xff]  }
 0x26c   :  { %5116 = vmatprep.subr.bf16.mxu1 %v6878_v25  ;;  %v6801_v25 = vld [vmem:[#allocation7 + $0x88] ss:$16 sps:$4 sm:$0xff]  }
 0x26d   :  { %v3123_v51 = vpop.f32.mrf.mxu0 }
 0x26e   :  { %5074 = vmatpush2.bf16.msra.mxu0 %v6780_v19  ;;  %v3124_v37 = vadd.f32 %v3123_v51, %v3081_v32  ;;  %v6813_v19 = vld [vmem:[#allocation7 + $0x48] ss:$16 sps:$4 sm:$0xff]   ;;  %v6839_v51 = vld [vmem:[#allocation7 + $0x1cc] ss:$16 sps:$4 sm:$0xff]  }
 0x26f   :  { %v3125_v31 = vpop.f32.mrf.mxu0  ;;  %5075 = vmatprep.subr.bf16.mxu0 %v6785_v23  ;;  %5117 = vmatpush2.bf16.msra.mxu1 %v6876_v24  ;;  %v6827_v23 = vld [vmem:[#allocation7 + $0xc] ss:$16 sps:$4 sm:$0xff]   ;;  %v6825_v24 = vld [vmem:[#allocation7 + $0x8] ss:$16 sps:$4 sm:$0xff]  }
 0x270   :  { %v3126_v43 = vadd.f32 %v3125_v31, %v3083_v33  ;;  %5118 = vmatprep.subr.bf16.mxu1 %v6884_v27  ;;  %v3167_v53 = vadd.f32 %v3166_v7, %v3124_v37  ;;  %v6815_v7 = vld [vmem:[#allocation7 + $0x4c] ss:$16 sps:$4 sm:$0xff]   ;;  %v6831_v27 = vld [vmem:[#allocation7 + $0x1e8] ss:$16 sps:$4 sm:$0xff]  }
 0x271   :  { %v3127_v46 = vpop.f32.mrf.mxu0  ;;  %v6837_v32 = vld [vmem:[#allocation7 + $0x1c8] ss:$16 sps:$4 sm:$0xff]   ;;  %v6845_v33 = vld [vmem:[#allocation7 + $0x1ac] ss:$16 sps:$4 sm:$0xff]  }
 0x272   :  { %v3128_v48 = vadd.f32 %v3127_v46, %v3085_v42  ;;  %5076 = vmatpush2.bf16.msra.mxu0 %v6783_v30  ;;  %v3169_v1 = vadd.f32 %v3168_v34, %v3126_v43  ;;  %v3367_v15 = vmul.f32 0.2, %v3167_v53  ;;  %vm3351_vm11 = vcmp.gt.f32.partialorder %v3167_v53, 0.0  ;;  %v6843_v34 = vld [vmem:[#allocation7 + $0x1a8] ss:$16 sps:$4 sm:$0xff]  }
 0x273   :  { %v3129_v60 = vpop.f32.mrf.mxu0  ;;  %5077 = vmatprep.subr.bf16.mxu0 %v6788_v35  ;;  %5119 = vmatpush2.bf16.msra.mxu1 %v6882_v36  ;;  %v6851_v30 = vld [vmem:[#allocation7 + $0x18c] ss:$16 sps:$4 sm:$0xff]   ;;  %v6855_v36 = vld [vmem:[#allocation7 + $0x168] ss:$16 sps:$4 sm:$0xff]  }
 0x274   :  { %v3171_v55 = vadd.f32 %v3170_v47, %v3128_v48  ;;  %5120 = vmatprep.subr.bf16.mxu1 %v6890_v41  ;;  %v3130_v56 = vadd.f32 %v3129_v60, %v3087_v50  ;;  %v3368_v62 = vmul.f32 0.2, %v3169_v1  ;;  %vm3352_vm10 = vcmp.gt.f32.partialorder %v3169_v1, 0.0  ;;  %v6857_v31 = vld [vmem:[#allocation7 + $0x16c] ss:$16 sps:$4 sm:$0xff]  }
 0x275   :  { %v3383_v6 = vsel %vm3351_vm11, %v3167_v53, %v3367_v15  ;;  %v6863_v37 = vld [vmem:[#allocation7 + $0x14c] ss:$16 sps:$4 sm:$0xff]   ;;  %v6861_v46 = vld [vmem:[#allocation7 + $0x148] ss:$16 sps:$4 sm:$0xff]   ;;  %v566_v47 = vsub.s32 6, %v7448_v28  ;;  %v570_v48 = vsub.s32 7, %v7448_v28 }
 0x276   :  { %v3375_v59 = vmul.f32 0.2, %v3171_v55  ;;  %5078 = vmatpush2.bf16.msra.mxu0 %v6786_v49  ;;  %vm3359_vm9 = vcmp.gt.f32.partialorder %v3171_v55, 0.0  ;;  %v3173_v0 = vadd.f32 %v3172_v58, %v3130_v56  ;;  %v3384_v4 = vsel %vm3352_vm10, %v3169_v1, %v3368_v62  ;;  %v6869_v49 = vld [vmem:[#allocation7 + $0x12c] ss:$16 sps:$4 sm:$0xff]  }
 0x277   :  { %5133 = vmatprep.subr.bf16.mxu0 %v6791_v52  ;;  %5121 = vmatpush2.bf16.msra.mxu1 %v6888_v21  ;;  %v6867_v60 = vld [vmem:[#allocation7 + $0x128] ss:$16 sps:$4 sm:$0xff]   ;;  %v567_v52 = vrot.slane %v7553_v3, %v566_v47  ;;  %v571_v21 = vrot.slane %v7553_v3, %v570_v48  ;;  %v6875_v53 = vld [vmem:[#allocation7 + $0x10c] ss:$16 sps:$4 sm:$0xff]  }
 0x278   :  { %5176 = vmatprep.subr.bf16.mxu1 %v6896_v29  ;;  %vm3360_vm12 = vcmp.gt.f32.partialorder %v3173_v0, 0.0  ;;  %v3376_v17 = vmul.f32 0.2, %v3173_v0  ;;  %v3391_v44 = vsel %vm3359_vm9, %v3171_v55, %v3375_v59  ;;  %v6873_v56 = vld [vmem:[#allocation7 + $0x108] ss:$16 sps:$4 sm:$0xff]  }
 0x279   :  { %v7559_v2 = vpack.c.bf16 %v3391_v44, %v3383_v6  ;;  %v6905_v47 = vld [vmem:[#allocation7 + $0x46c] ss:$16 sps:$4 sm:$0xff]   ;;  %v6903_v48 = vld [vmem:[#allocation7 + $0x468] ss:$16 sps:$4 sm:$0xff]  }
 0x27a   :  { %v3392_v5 = vsel %vm3360_vm12, %v3173_v0, %v3376_v17  ;;  %v3209_v35 = vpop.f32.mrf.mxu1  ;;  %v6881_v0 = vld [vmem:[#allocation7 + $0x4ec] ss:$16 sps:$4 sm:$0xff]  }
 0x27b   :  { %v7557_v40 = vpack.c.bf16 %v3392_v5, %v3384_v4  ;;  %v3210_v58 = vadd.f32 %v3209_v35, %v567_v52 }
 0x27c   :  { %v3211_v41 = vpop.f32.mrf.mxu1 }
 0x27d   :  { %5079 = vmatprep.mubr.bf16.mxu0 %v7557_v40  ;;  %v3212_v59 = vadd.f32 %v3211_v41, %v571_v21 }
 0x27e   :  { %5080 = vmatmul.mubr.bf16.vlgmr.msra.gmra.mxu0 %v7559_v2  ;;  %v3213_v1 = vpop.f32.mrf.mxu1 }
 0x27f   :  { %5134 = vmatpush1.bf16.msra.mxu0 %v6789_v8  ;;  %5165 = vmatprep.mubr.bf16.mxu0 %v7539_v61  ;;  %v6819_v61 = vld [vmem:[#allocation7 + $0x28] ss:$16 sps:$4 sm:$0xff]   ;;  %v3214_v17 = vadd.f32 %v3213_v1, %v567_v52  ;;  %v6908_v1 = vld [vmem:[#allocation7 + $0x2ac] ss:$16 sps:$4 sm:$0xff]  }
 0x280   :  { %5135 = vmatprep.subr.bf16.mxu0 %v6794_v57  ;;  %v3215_v29 = vpop.f32.mrf.mxu1  ;;  %v6879_v8 = vld [vmem:[#allocation7 + $0x4e8] ss:$16 sps:$4 sm:$0xff]  }
 0x281   :  { %v6906_v52 = vld [vmem:[#allocation7 + $0x2a8] ss:$16 sps:$4 sm:$0xff]  }
 0x283   :  { %5136 = vmatpush1.bf16.msra.mxu0 %v6792_v11 }
 0x284   :  { %5137 = vmatprep.subr.bf16.mxu0 %v6797_v14  ;;  %v6887_v14 = vld [vmem:[#allocation7 + $0x4cc] ss:$16 sps:$4 sm:$0xff]  }
 0x287   :  { %5138 = vmatpush1.bf16.msra.mxu0 %v6795_v16  ;;  %v3216_v16 = vadd.f32 %v3215_v29, %v571_v21  ;;  %v6917_v21 = vld [vmem:[#allocation7 + $0x42c] ss:$16 sps:$4 sm:$0xff]   ;;  %v6912_v29 = vld [vmem:[#allocation7 + $0x288] ss:$16 sps:$4 sm:$0xff]  }
 0x288   :  { %5139 = vmatprep.subr.bf16.mxu0 %v6803_v39 }
 0x28b   :  { %5140 = vmatpush1.bf16.msra.mxu0 %v6801_v25 }
 0x28c   :  { %5141 = vmatprep.subr.bf16.mxu0 %v6809_v10 }
 0x28f   :  { %5142 = vmatpush1.bf16.msra.mxu0 %v6807_v18 }
 0x290   :  { %5143 = vmatprep.subr.bf16.mxu0 %v6815_v7 }
 0x293   :  { %5144 = vmatpush1.bf16.msra.mxu0 %v6813_v19 }
 0x294   :  { %5145 = vmatprep.subr.bf16.mxu0 %v6821_v22  ;;  %v6885_v22 = vld [vmem:[#allocation7 + $0x4c8] ss:$16 sps:$4 sm:$0xff]  }
 0x297   :  { %5146 = vmatpush1.bf16.msra.mxu0 %v6819_v61 }
 0x298   :  { %5147 = vmatprep.subr.bf16.mxu0 %v6827_v23 }
 0x29b   :  { %5148 = vmatpush1.bf16.msra.mxu0 %v6825_v24  ;;  %v6893_v24 = vld [vmem:[#allocation7 + $0x4ac] ss:$16 sps:$4 sm:$0xff]  }
 0x29c   :  { %5149 = vmatprep.subr.bf16.mxu0 %v6833_v26 }
 0x29f   :  { %5150 = vmatpush2.bf16.msra.mxu0 %v6831_v27 }
 0x2a0   :  { %5151 = vmatprep.subr.bf16.mxu0 %v6839_v51 }
 0x2a3   :  { %5152 = vmatpush2.bf16.msra.mxu0 %v6837_v32 }
 0x2a4   :  { %5153 = vmatprep.subr.bf16.mxu0 %v6845_v33 }
 0x2a7   :  { %5154 = vmatpush2.bf16.msra.mxu0 %v6843_v34  ;;  %v6891_v34 = vld [vmem:[#allocation7 + $0x4a8] ss:$16 sps:$4 sm:$0xff]  }
 0x2a8   :  { %5155 = vmatprep.subr.bf16.mxu0 %v6851_v30  ;;  %v6899_v30 = vld [vmem:[#allocation7 + $0x48c] ss:$16 sps:$4 sm:$0xff]  }
 0x2ab   :  { %5156 = vmatpush2.bf16.msra.mxu0 %v6849_v20 }
 0x2ac   :  { %5157 = vmatprep.subr.bf16.mxu0 %v6857_v31 }
 0x2ad   :  { %v3252_v42 = vpop.f32.mrf.mxu0 }
 0x2ae   :  { %v3253_v44 = vadd.f32 %v3252_v42, %v3210_v58  ;;  %v6921_v58 = vld [vmem:[#allocation7 + $0x408] ss:$16 sps:$4 sm:$0xff]  }
 0x2af   :  { %v3254_v43 = vpop.f32.mrf.mxu0  ;;  %5158 = vmatpush2.bf16.msra.mxu0 %v6855_v36  ;;  %v6897_v36 = vld [vmem:[#allocation7 + $0x488] ss:$16 sps:$4 sm:$0xff]  }
 0x2b0   :  { %5159 = vmatprep.subr.bf16.mxu0 %v6863_v37  ;;  %v3255_v4 = vadd.f32 %v3254_v43, %v3212_v59  ;;  %v6894_v43 = vld [vmem:[#allocation7 + $0x2e8] ss:$16 sps:$4 sm:$0xff]  }
 0x2b1   :  { %v3256_v50 = vpop.f32.mrf.mxu0  ;;  %v6918_v59 = vld [vmem:[#allocation7 + $0x268] ss:$16 sps:$4 sm:$0xff]  }
 0x2b2   :  { %v3257_v3 = vadd.f32 %v3256_v50, %v3214_v17  ;;  %v6911_v50 = vld [vmem:[#allocation7 + $0x44c] ss:$16 sps:$4 sm:$0xff]   ;;  %v6924_v17 = vld [vmem:[#allocation7 + $0x248] ss:$16 sps:$4 sm:$0xff]  }
 0x2b3   :  { %5160 = vmatpush2.bf16.msra.mxu0 %v6861_v46  ;;  %v3258_v55 = vpop.f32.mrf.mxu0  ;;  %v6902_v46 = vld [vmem:[#allocation7 + $0x2cc] ss:$16 sps:$4 sm:$0xff]  }
 0x2b4   :  { %5161 = vmatprep.subr.bf16.mxu0 %v6869_v49  ;;  %v3259_v18 = vadd.f32 %v3258_v55, %v3216_v16  ;;  %v6900_v49 = vld [vmem:[#allocation7 + $0x2c8] ss:$16 sps:$4 sm:$0xff]   ;;  %v6944_v16 = vld [vmem:[#allocation7 + $0x3ec] ss:$16 sps:$4 sm:$0xff]  }
 0x2b5   :  { %v6915_v55 = vld [vmem:[#allocation7 + $0x428] ss:$16 sps:$4 sm:$0xff]  }
 0x2b7   :  { %5162 = vmatpush2.bf16.msra.mxu0 %v6867_v60  ;;  %v6909_v60 = vld [vmem:[#allocation7 + $0x448] ss:$16 sps:$4 sm:$0xff]  }
 0x2b8   :  { %5163 = vmatprep.subr.bf16.mxu0 %v6875_v53  ;;  %v6914_v53 = vld [vmem:[#allocation7 + $0x28c] ss:$16 sps:$4 sm:$0xff]  }
 0x2b9   :  { %v3338_v62 = vpop.f32.mrf.mxu0 }
 0x2ba   :  { %v3295_v15 = vpop.f32.mrf.mxu1 }
 0x2bb   :  { %v3340_v5 = vpop.f32.mrf.mxu0  ;;  %5164 = vmatpush2.bf16.msra.mxu0 %v6873_v56  ;;  %v3296_v57 = vadd.f32 %v3295_v15, %v3253_v44  ;;  %v6923_v56 = vld [vmem:[#allocation7 + $0x40c] ss:$16 sps:$4 sm:$0xff]   ;;  %v6927_v15 = vld [vmem:[#allocation7 + $0x5e8] ss:$16 sps:$4 sm:$0xff]  }
 0x2bc   :  { %v3297_v6 = vpop.f32.mrf.mxu1  ;;  %5219 = vmatprep.subr.bf16.mxu0 %v6881_v0  ;;  %v6926_v0 = vld [vmem:[#allocation7 + $0x24c] ss:$16 sps:$4 sm:$0xff]  }
 0x2bd   :  { %v3298_v11 = vadd.f32 %v3297_v6, %v3255_v4  ;;  %v3342_v10 = vpop.f32.mrf.mxu0  ;;  %v3339_v61 = vadd.f32 %v3338_v62, %v3296_v57  ;;  %v6929_v62 = vld [vmem:[#allocation7 + $0x5ec] ss:$16 sps:$4 sm:$0xff]   ;;  %v6930_v6 = vld [vmem:[#allocation7 + $0x228] ss:$16 sps:$4 sm:$0xff]  }
 0x2be   :  { %v3299_v39 = vpop.f32.mrf.mxu1  ;;  %5166 = vmatmul.mubr.bf16.vlgmr.msra.gmra.mxu0 %v7498_v12  ;;  %v6935_v44 = vld [vmem:[#allocation7 + $0x5cc] ss:$16 sps:$4 sm:$0xff]   ;;  %v6939_v57 = vld [vmem:[#allocation7 + $0x5a8] ss:$16 sps:$4 sm:$0xff]  }
 0x2bf   :  { %v3300_v25 = vadd.f32 %v3299_v39, %v3257_v3  ;;  %v3341_v7 = vadd.f32 %v3340_v5, %v3298_v11  ;;  %5220 = vmatpush1.bf16.msra.mxu0 %v6879_v8  ;;  %5251 = vmatprep.mubr.bf16.mxu0 %v7557_v40  ;;  %v3344_v51 = vpop.f32.mrf.mxu0  ;;  %v3369_v12 = vmul.f32 0.2, %v3339_v61  ;;  %vm3353_vm15 = vcmp.gt.f32.partialorder %v3339_v61, 0.0  ;;  %v6932_v4 = vld [vmem:[#allocation7 + $0x22c] ss:$16 sps:$4 sm:$0xff]  }
 0x2c0   :  { %v3301_v19 = vpop.f32.mrf.mxu1  ;;  %5221 = vmatprep.subr.bf16.mxu0 %v6887_v14  ;;  %v6933_v5 = vld [vmem:[#allocation7 + $0x5c8] ss:$16 sps:$4 sm:$0xff]   ;;  %v6941_v8 = vld [vmem:[#allocation7 + $0x5ac] ss:$16 sps:$4 sm:$0xff]  }
 0x2c1   :  { %v3343_v23 = vadd.f32 %v3342_v10, %v3300_v25  ;;  %v3302_v26 = vadd.f32 %v3301_v19, %v3259_v18  ;;  %v3370_v32 = vmul.f32 0.2, %v3341_v7  ;;  %vm3354_vm14 = vcmp.gt.f32.partialorder %v3341_v7, 0.0  ;;  %v6938_v3 = vld [vmem:[#allocation7 + $0x20c] ss:$16 sps:$4 sm:$0xff]  }
 0x2c2   :  { %v3385_v42 = vsel %vm3353_vm15, %v3339_v61, %v3369_v12  ;;  %v6936_v11 = vld [vmem:[#allocation7 + $0x208] ss:$16 sps:$4 sm:$0xff]   ;;  %v6947_v14 = vld [vmem:[#allocation7 + $0x58c] ss:$16 sps:$4 sm:$0xff]  }
 0x2c3   :  { %v3377_v27 = vmul.f32 0.2, %v3343_v23  ;;  %vm3361_vm13 = vcmp.gt.f32.partialorder %v3343_v23, 0.0  ;;  %v3345_v33 = vadd.f32 %v3344_v51, %v3302_v26  ;;  %5222 = vmatpush1.bf16.msra.mxu0 %v6885_v22  ;;  %v3386_v31 = vsel %vm3354_vm14, %v3341_v7, %v3370_v32  ;;  %v6945_v39 = vld [vmem:[#allocation7 + $0x588] ss:$16 sps:$4 sm:$0xff]  }
 0x2c4   :  { %5223 = vmatprep.subr.bf16.mxu0 %v6893_v24  ;;  %v6942_v25 = vld [vmem:[#allocation7 + $0x3e8] ss:$16 sps:$4 sm:$0xff]   ;;  %v6953_v10 = vld [vmem:[#allocation7 + $0x56c] ss:$16 sps:$4 sm:$0xff]  }
 0x2c5   :  { %vm3362_vm0 = vcmp.gt.f32.partialorder %v3345_v33, 0.0  ;;  %v3378_v40 = vmul.f32 0.2, %v3345_v33  ;;  %v3393_v20 = vsel %vm3361_vm13, %v3343_v23, %v3377_v27  ;;  %v6950_v18 = vld [vmem:[#allocation7 + $0x3cc] ss:$16 sps:$4 sm:$0xff]   ;;  %vm5870_vm13 = vcmask 7168  }
 0x2c6   :  { %v7572_v41 = vpack.c.bf16 %v3393_v20, %v3385_v42  ;;  %v6951_v7 = vld [vmem:[#allocation7 + $0x568] ss:$16 sps:$4 sm:$0xff]   ;;  %v6959_v22 = vld [vmem:[#allocation7 + $0x54c] ss:$16 sps:$4 sm:$0xff]  }
 0x2c7   :  { %5224 = vmatpush1.bf16.msra.mxu0 %v6891_v34  ;;  %v3394_v35 = vsel %vm3362_vm0, %v3345_v33, %v3378_v40  ;;  %v6948_v19 = vld [vmem:[#allocation7 + $0x3c8] ss:$16 sps:$4 sm:$0xff]   ;;  %v6956_v61 = vld [vmem:[#allocation7 + $0x3ac] ss:$16 sps:$4 sm:$0xff]  }
 0x2c8   :  { %v7570_v37 = vpack.c.bf16 %v3394_v35, %v3386_v31  ;;  %5225 = vmatprep.subr.bf16.mxu0 %v6899_v30  ;;  %v6957_v23 = vld [vmem:[#allocation7 + $0x548] ss:$16 sps:$4 sm:$0xff]   ;;  %v6965_v26 = vld [vmem:[#allocation7 + $0x52c] ss:$16 sps:$4 sm:$0xff]  }
 0x2c9   :  { %v6954_v24 = vld [vmem:[#allocation7 + $0x3a8] ss:$16 sps:$4 sm:$0xff]   ;;  %v6962_v27 = vld [vmem:[#allocation7 + $0x38c] ss:$16 sps:$4 sm:$0xff]  }
 0x2ca   :  { %5122 = vmatprep.mubr.bf16.mxu1 %v7570_v37  ;;  %v6963_v51 = vld [vmem:[#allocation7 + $0x528] ss:$16 sps:$4 sm:$0xff]   ;;  %v6971_v33 = vld [vmem:[#allocation7 + $0x50c] ss:$16 sps:$4 sm:$0xff]  }
 0x2cb   :  { %5123 = vmatmul.mubr.bf16.vlgmr.msra.gmra.mxu1 %v7572_v41  ;;  %5226 = vmatpush1.bf16.msra.mxu0 %v6897_v36  ;;  %v6960_v32 = vld [vmem:[#allocation7 + $0x388] ss:$16 sps:$4 sm:$0xff]   ;;  %v6968_v34 = vld [vmem:[#allocation7 + $0x36c] ss:$16 sps:$4 sm:$0xff]  }
 0x2cc   :  { %5177 = vmatpush1.bf16.msra.mxu1 %v6894_v43  ;;  %5208 = vmatprep.mubr.bf16.mxu1 %v7546_v13  ;;  %v6920_v13 = vld [vmem:[#allocation7 + $0x26c] ss:$16 sps:$4 sm:$0xff]   ;;  %v6969_v12 = vld [vmem:[#allocation7 + $0x508] ss:$16 sps:$4 sm:$0xff]  }
 0x2cd   :  { %5178 = vmatprep.subr.bf16.mxu1 %v6902_v46  ;;  %5227 = vmatprep.subr.bf16.mxu0 %v6905_v47  ;;  %v6966_v30 = vld [vmem:[#allocation7 + $0x368] ss:$16 sps:$4 sm:$0xff]   ;;  %v6974_v20 = vld [vmem:[#allocation7 + $0x34c] ss:$16 sps:$4 sm:$0xff]  }
 0x2ce   :  { %v7031_v40 = vld [vmem:[#allocation10 + $0x74] ss:$8 sps:$4 sm:$0xff]   ;;  %v7029_v31 = vld [vmem:[#allocation10 + $0x70] ss:$8 sps:$4 sm:$0xff]   ;;  %v7034_v36 = vld [vmem:[#allocation10 + $0x64] ss:$8 sps:$4 sm:$0xff]  }
 0x2cf   :  { %5228 = vmatpush1.bf16.msra.mxu0 %v6903_v48  ;;  %v6972_v35 = vld [vmem:[#allocation7 + $0x348] ss:$16 sps:$4 sm:$0xff]   ;;  %v6977_v42 = vld [vmem:[#allocation7 + $0x32c] ss:$16 sps:$4 sm:$0xff]  }
 0x2d0   :  { %5179 = vmatpush1.bf16.msra.mxu1 %v6900_v49  ;;  %5229 = vmatprep.subr.bf16.mxu0 %v6911_v50  ;;  %v7032_v43 = vld [vmem:[#allocation10 + $0x60] ss:$8 sps:$4 sm:$0xff]   ;;  %v6975_v46 = vld [vmem:[#allocation7 + $0x328] ss:$16 sps:$4 sm:$0xff]   ;;  %v7035_v49 = vld [vmem:[#allocation10 + $0x50] ss:$8 sps:$4 sm:$0xff]  }
 0x2d1   :  { %5180 = vmatprep.subr.bf16.mxu1 %v6908_v1  ;;  %v7037_v47 = vld [vmem:[#allocation10 + $0x54] ss:$8 sps:$4 sm:$0xff]   ;;  %v6980_v48 = vld [vmem:[#allocation7 + $0x30c] ss:$16 sps:$4 sm:$0xff]   ;;  %v7040_v1 = vld [vmem:[#allocation10 + $0x44] ss:$8 sps:$4 sm:$0xff]  }
 0x2d2   :  { %v6978_v50 = vld [vmem:[#allocation7 + $0x308] ss:$16 sps:$4 sm:$0xff]  }
 0x2d3   :  { %5230 = vmatpush1.bf16.msra.mxu0 %v6909_v60  ;;  %v6983_v60 = vld [vmem:[#allocation7 + $0x6ec] ss:$16 sps:$4 sm:$0xff]  }
 0x2d4   :  { %5181 = vmatpush1.bf16.msra.mxu1 %v6906_v52  ;;  %5231 = vmatprep.subr.bf16.mxu0 %v6917_v21  ;;  %v7038_v52 = vld [vmem:[#allocation10 + $0x40] ss:$8 sps:$4 sm:$0xff]  }
 0x2d5   :  { %5182 = vmatprep.subr.bf16.mxu1 %v6914_v53  ;;  %v6986_v21 = vld [vmem:[#allocation7 + $0x6cc] ss:$16 sps:$4 sm:$0xff]   ;;  %v7043_v53 = vld [vmem:[#allocation10 + $0x34] ss:$8 sps:$4 sm:$0xff]  }
 0x2d7   :  { %5232 = vmatpush1.bf16.msra.mxu0 %v6915_v55  ;;  %v7041_v55 = vld [vmem:[#allocation10 + $0x30] ss:$8 sps:$4 sm:$0xff]  }
 0x2d8   :  { %5183 = vmatpush1.bf16.msra.mxu1 %v6912_v29  ;;  %5233 = vmatprep.subr.bf16.mxu0 %v6923_v56  ;;  %v6984_v29 = vld [vmem:[#allocation7 + $0x6c8] ss:$16 sps:$4 sm:$0xff]  }
 0x2d9   :  { %5184 = vmatprep.subr.bf16.mxu1 %v6920_v13  ;;  %v7046_v56 = vld [vmem:[#allocation10 + $0x24] ss:$8 sps:$4 sm:$0xff]   ;;  %v6989_v13 = vld [vmem:[#allocation7 + $0x6ac] ss:$16 sps:$4 sm:$0xff]  }
 0x2db   :  { %5234 = vmatpush1.bf16.msra.mxu0 %v6921_v58  ;;  %v7044_v58 = vld [vmem:[#allocation10 + $0x20] ss:$8 sps:$4 sm:$0xff]  }
 0x2dc   :  { %5185 = vmatpush1.bf16.msra.mxu1 %v6918_v59  ;;  %5235 = vmatprep.subr.bf16.mxu0 %v6929_v62  ;;  %v6987_v59 = vld [vmem:[#allocation7 + $0x6a8] ss:$16 sps:$4 sm:$0xff]  }
 0x2dd   :  { %5186 = vmatprep.subr.bf16.mxu1 %v6926_v0  ;;  %v7049_v62 = vld [vmem:[#allocation10 + $0x14] ss:$8 sps:$4 sm:$0xff]   ;;  %v6992_v0 = vld [vmem:[#allocation7 + $0x68c] ss:$16 sps:$4 sm:$0xff]  }
 0x2df   :  { %5236 = vmatpush2.bf16.msra.mxu0 %v6927_v15  ;;  %v6990_v15 = vld [vmem:[#allocation7 + $0x688] ss:$16 sps:$4 sm:$0xff]  }
 0x2e0   :  { %5187 = vmatpush1.bf16.msra.mxu1 %v6924_v17  ;;  %5237 = vmatprep.subr.bf16.mxu0 %v6935_v44  ;;  %v7052_v17 = vld [vmem:[#allocation10 + $0x4] ss:$8 sps:$4 sm:$0xff]   ;;  %v7050_v44 = vld [vmem:[#allocation10] ss:$8 sps:$4 sm:$0xff]  }
 0x2e1   :  { %5188 = vmatprep.subr.bf16.mxu1 %v6932_v4  ;;  %v6993_v4 = vld [vmem:[#allocation7 + $0x668] ss:$16 sps:$4 sm:$0xff]  }
 0x2e3   :  { %5238 = vmatpush2.bf16.msra.mxu0 %v6933_v5  ;;  %v7055_v5 = vld [vmem:[#allocation10 + $0xf4] ss:$8 sps:$4 sm:$0xff]  }
 0x2e4   :  { %5189 = vmatpush1.bf16.msra.mxu1 %v6930_v6  ;;  %5239 = vmatprep.subr.bf16.mxu0 %v6941_v8  ;;  %v6998_v6 = vld [vmem:[#allocation7 + $0x64c] ss:$16 sps:$4 sm:$0xff]  }
 0x2e5   :  { %5190 = vmatprep.subr.bf16.mxu1 %v6938_v3  ;;  %v7053_v8 = vld [vmem:[#allocation10 + $0xf0] ss:$8 sps:$4 sm:$0xff]   ;;  %v6996_v3 = vld [vmem:[#allocation7 + $0x648] ss:$16 sps:$4 sm:$0xff]  }
 0x2e7   :  { %5240 = vmatpush2.bf16.msra.mxu0 %v6939_v57  ;;  %v7058_v57 = vld [vmem:[#allocation10 + $0xe4] ss:$8 sps:$4 sm:$0xff]  }
 0x2e8   :  { %5191 = vmatpush1.bf16.msra.mxu1 %v6936_v11  ;;  %5241 = vmatprep.subr.bf16.mxu0 %v6947_v14  ;;  %v7001_v11 = vld [vmem:[#allocation7 + $0x62c] ss:$16 sps:$4 sm:$0xff]  }
 0x2e9   :  { %5192 = vmatprep.subr.bf16.mxu1 %v6944_v16  ;;  %v7056_v14 = vld [vmem:[#allocation10 + $0xe0] ss:$8 sps:$4 sm:$0xff]   ;;  %v6999_v16 = vld [vmem:[#allocation7 + $0x628] ss:$16 sps:$4 sm:$0xff]  }
 0x2eb   :  { %5242 = vmatpush2.bf16.msra.mxu0 %v6945_v39  ;;  %v7061_v39 = vld [vmem:[#allocation10 + $0xd4] ss:$8 sps:$4 sm:$0xff]  }
 0x2ec   :  { %5193 = vmatpush2.bf16.msra.mxu1 %v6942_v25  ;;  %5243 = vmatprep.subr.bf16.mxu0 %v6953_v10  ;;  %v7004_v25 = vld [vmem:[#allocation7 + $0x60c] ss:$16 sps:$4 sm:$0xff]  }
 0x2ed   :  { %5194 = vmatprep.subr.bf16.mxu1 %v6950_v18  ;;  %v7059_v10 = vld [vmem:[#allocation10 + $0xd0] ss:$8 sps:$4 sm:$0xff]   ;;  %v7002_v18 = vld [vmem:[#allocation7 + $0x608] ss:$16 sps:$4 sm:$0xff]  }
 0x2ef   :  { %5244 = vmatpush2.bf16.msra.mxu0 %v6951_v7  ;;  %v7064_v7 = vld [vmem:[#allocation10 + $0xc4] ss:$8 sps:$4 sm:$0xff]  }
 0x2f0   :  { %5195 = vmatpush2.bf16.msra.mxu1 %v6948_v19  ;;  %5245 = vmatprep.subr.bf16.mxu0 %v6959_v22  ;;  %v7007_v19 = vld [vmem:[#allocation7 + $0x7ec] ss:$16 sps:$4 sm:$0xff]  }
 0x2f1   :  { %5196 = vmatprep.subr.bf16.mxu1 %v6956_v61  ;;  %v7062_v22 = vld [vmem:[#allocation10 + $0xc0] ss:$8 sps:$4 sm:$0xff]   ;;  %v7005_v61 = vld [vmem:[#allocation7 + $0x7e8] ss:$16 sps:$4 sm:$0xff]  }
 0x2f3   :  { %5246 = vmatpush2.bf16.msra.mxu0 %v6957_v23  ;;  %v7067_v23 = vld [vmem:[#allocation10 + $0xb4] ss:$8 sps:$4 sm:$0xff]  }
 0x2f4   :  { %5197 = vmatpush2.bf16.msra.mxu1 %v6954_v24  ;;  %5247 = vmatprep.subr.bf16.mxu0 %v6965_v26  ;;  %v7010_v24 = vld [vmem:[#allocation7 + $0x7cc] ss:$16 sps:$4 sm:$0xff]  }
 0x2f5   :  { %5198 = vmatprep.subr.bf16.mxu1 %v6962_v27  ;;  %v7065_v26 = vld [vmem:[#allocation10 + $0xb0] ss:$8 sps:$4 sm:$0xff]   ;;  %v7008_v27 = vld [vmem:[#allocation7 + $0x7c8] ss:$16 sps:$4 sm:$0xff]  }
 0x2f7   :  { %5248 = vmatpush2.bf16.msra.mxu0 %v6963_v51  ;;  %v7070_v51 = vld [vmem:[#allocation10 + $0xa4] ss:$8 sps:$4 sm:$0xff]  }
 0x2f8   :  { %5199 = vmatpush2.bf16.msra.mxu1 %v6960_v32  ;;  %5249 = vmatprep.subr.bf16.mxu0 %v6971_v33  ;;  %v7013_v32 = vld [vmem:[#allocation7 + $0x7ac] ss:$16 sps:$4 sm:$0xff]  }
 0x2f9   :  { %5200 = vmatprep.subr.bf16.mxu1 %v6968_v34  ;;  %v7068_v33 = vld [vmem:[#allocation10 + $0xa0] ss:$8 sps:$4 sm:$0xff]   ;;  %v7011_v34 = vld [vmem:[#allocation7 + $0x7a8] ss:$16 sps:$4 sm:$0xff]  }
 0x2fb   :  { %5250 = vmatpush2.bf16.msra.mxu0 %v6969_v12  ;;  %v7073_v12 = vld [vmem:[#allocation10 + $0x94] ss:$8 sps:$4 sm:$0xff]  }
 0x2fc   :  { %5201 = vmatpush2.bf16.msra.mxu1 %v6966_v30  ;;  %5729 = vmatprep.subr.bf16.mxu0 %v7031_v40  ;;  %v7016_v30 = vld [vmem:[#allocation7 + $0x78c] ss:$16 sps:$4 sm:$0xff]  }
 0x2fd   :  { %5202 = vmatprep.subr.bf16.mxu1 %v6974_v20  ;;  %v7071_v40 = vld [vmem:[#allocation10 + $0x90] ss:$8 sps:$4 sm:$0xff]   ;;  %v7014_v20 = vld [vmem:[#allocation7 + $0x788] ss:$16 sps:$4 sm:$0xff]  }
 0x2fe   :  { %5252 = vmatmul.mubr.bf16.vlgmr.msra.gmra.mxu0 %v7559_v2  ;;  %v6981_v2 = vld [vmem:[#allocation7 + $0x6e8] ss:$16 sps:$4 sm:$0xff]  }
 0x2ff   :  { %5730 = vmatpush1.bf16.msra.mxu0 %v7029_v31  ;;  %v7076_v31 = vld [vmem:[#allocation10 + $0x84] ss:$8 sps:$4 sm:$0xff]  }
 0x300   :  { %5203 = vmatpush2.bf16.msra.mxu1 %v6972_v35  ;;  %5731 = vmatprep.subr.bf16.mxu0 %v7034_v36  ;;  %v7019_v35 = vld [vmem:[#allocation7 + $0x76c] ss:$16 sps:$4 sm:$0xff]  }
 0x301   :  { %5204 = vmatprep.subr.bf16.mxu1 %v6977_v42  ;;  %v7074_v36 = vld [vmem:[#allocation10 + $0x80] ss:$8 sps:$4 sm:$0xff]   ;;  %v7017_v42 = vld [vmem:[#allocation7 + $0x768] ss:$16 sps:$4 sm:$0xff]  }
 0x303   :  { %5732 = vmatpush1.bf16.msra.mxu0 %v7032_v43  ;;  %v7022_v43 = vld [vmem:[#allocation7 + $0x74c] ss:$16 sps:$4 sm:$0xff]  }
 0x304   :  { %5205 = vmatpush2.bf16.msra.mxu1 %v6975_v46  ;;  %5733 = vmatprep.subr.bf16.mxu0 %v7037_v47  ;;  %v7020_v46 = vld [vmem:[#allocation7 + $0x748] ss:$16 sps:$4 sm:$0xff]   ;;  %v7025_v47 = vld [vmem:[#allocation7 + $0x72c] ss:$16 sps:$4 sm:$0xff]  }
 0x305   :  { %5206 = vmatprep.subr.bf16.mxu1 %v6980_v48  ;;  %v7023_v48 = vld [vmem:[#allocation7 + $0x728] ss:$16 sps:$4 sm:$0xff]  }
 0x307   :  { %5734 = vmatpush1.bf16.msra.mxu0 %v7035_v49  ;;  %v7028_v49 = vld [vmem:[#allocation7 + $0x70c] ss:$16 sps:$4 sm:$0xff]  }
 0x308   :  { %5207 = vmatpush2.bf16.msra.mxu1 %v6978_v50  ;;  %5735 = vmatprep.subr.bf16.mxu0 %v7040_v1  ;;  %v7026_v50 = vld [vmem:[#allocation7 + $0x708] ss:$16 sps:$4 sm:$0xff]   ;;  %v7077_v1 = vld [vmem:[#allocation10 + $0x170] ss:$8 sps:$4 sm:$0xff]  }
 0x309   :  { %5262 = vmatprep.subr.bf16.mxu1 %v6983_v60  ;;  %v7079_v60 = vld [vmem:[#allocation10 + $0x174] ss:$8 sps:$4 sm:$0xff]  }
 0x30b   :  { %5209 = vmatmul.mubr.bf16.vlgmr.msra.gmra.mxu1 %v7541_v63  ;;  %5736 = vmatpush1.bf16.msra.mxu0 %v7038_v52  ;;  %v7047_v63 = vld [vmem:[#allocation10 + $0x10] ss:$8 sps:$4 sm:$0xff]   ;;  %v7082_v52 = vld [vmem:[#allocation10 + $0x164] ss:$8 sps:$4 sm:$0xff]  }
 0x30c   :  { %5263 = vmatpush1.bf16.msra.mxu1 %v6981_v2  ;;  %5294 = vmatprep.mubr.bf16.mxu1 %v7570_v37  ;;  %v6995_v37 = vld [vmem:[#allocation7 + $0x66c] ss:$16 sps:$4 sm:$0xff]  }
 0x30d   :  { %5264 = vmatprep.subr.bf16.mxu1 %v6986_v21  ;;  %5737 = vmatprep.subr.bf16.mxu0 %v7043_v53  ;;  %v7080_v2 = vld [vmem:[#allocation10 + $0x160] ss:$8 sps:$4 sm:$0xff]   ;;  %v7085_v21 = vld [vmem:[#allocation10 + $0x154] ss:$8 sps:$4 sm:$0xff]   ;;  %v7083_v53 = vld [vmem:[#allocation10 + $0x150] ss:$8 sps:$4 sm:$0xff]  }
 0x30f   :  { %5738 = vmatpush1.bf16.msra.mxu0 %v7041_v55  ;;  %v7088_v55 = vld [vmem:[#allocation10 + $0x144] ss:$8 sps:$4 sm:$0xff]  }
 0x310   :  { %5265 = vmatpush1.bf16.msra.mxu1 %v6984_v29  ;;  %5739 = vmatprep.subr.bf16.mxu0 %v7046_v56  ;;  %v7086_v29 = vld [vmem:[#allocation10 + $0x140] ss:$8 sps:$4 sm:$0xff]   ;;  %v7091_v56 = vld [vmem:[#allocation10 + $0x134] ss:$8 sps:$4 sm:$0xff]  }
 0x311   :  { %5266 = vmatprep.subr.bf16.mxu1 %v6989_v13  ;;  %v7089_v13 = vld [vmem:[#allocation10 + $0x130] ss:$8 sps:$4 sm:$0xff]  }
 0x313   :  { %5740 = vmatpush1.bf16.msra.mxu0 %v7044_v58  ;;  %v7092_v58 = vld [vmem:[#allocation10 + $0x120] ss:$8 sps:$4 sm:$0xff]  }
 0x314   :  { %5267 = vmatpush1.bf16.msra.mxu1 %v6987_v59  ;;  %5741 = vmatprep.subr.bf16.mxu0 %v7049_v62  ;;  %v7097_v59 = vld [vmem:[#allocation10 + $0x114] ss:$8 sps:$4 sm:$0xff]   ;;  %v7095_v62 = vld [vmem:[#allocation10 + $0x110] ss:$8 sps:$4 sm:$0xff]  }
 0x315   :  { %5268 = vmatprep.subr.bf16.mxu1 %v6992_v0  ;;  %v7100_v0 = vld [vmem:[#allocation10 + $0x104] ss:$8 sps:$4 sm:$0xff]  }
 0x317   :  { %5742 = vmatpush1.bf16.msra.mxu0 %v7047_v63  ;;  %v7098_v63 = vld [vmem:[#allocation10 + $0x100] ss:$8 sps:$4 sm:$0xff]  }
 0x318   :  { %5269 = vmatpush1.bf16.msra.mxu1 %v6990_v15  ;;  %5743 = vmatprep.subr.bf16.mxu0 %v7052_v17  ;;  %v7103_v15 = vld [vmem:[#allocation10 + $0x1f4] ss:$8 sps:$4 sm:$0xff]   ;;  %v7101_v17 = vld [vmem:[#allocation10 + $0x1f0] ss:$8 sps:$4 sm:$0xff]  }
 0x319   :  { %5270 = vmatprep.subr.bf16.mxu1 %v6995_v37  ;;  %v7106_v37 = vld [vmem:[#allocation10 + $0x1e4] ss:$8 sps:$4 sm:$0xff]  }
 0x31b   :  { %5744 = vmatpush1.bf16.msra.mxu0 %v7050_v44  ;;  %v4995_v44 = vpop.f32.mrf.mxu0 }
 0x31c   :  { %5271 = vmatpush1.bf16.msra.mxu1 %v6993_v4  ;;  %5745 = vmatprep.subr.bf16.mxu0 %v7055_v5  ;;  %v7104_v4 = vld [vmem:[#allocation10 + $0x1e0] ss:$8 sps:$4 sm:$0xff]   ;;  %v7109_v5 = vld [vmem:[#allocation10 + $0x1d4] ss:$8 sps:$4 sm:$0xff]  }
 0x31d   :  { %5272 = vmatprep.subr.bf16.mxu1 %v6998_v6  ;;  %v4997_v6 = vpop.f32.mrf.mxu0 }
 0x31f   :  { %5746 = vmatpush2.bf16.msra.mxu0 %v7053_v8  ;;  %v7107_v8 = vld [vmem:[#allocation10 + $0x1d0] ss:$8 sps:$4 sm:$0xff]  }
 0x320   :  { %5273 = vmatpush1.bf16.msra.mxu1 %v6996_v3  ;;  %5747 = vmatprep.subr.bf16.mxu0 %v7058_v57  ;;  %v7112_v3 = vld [vmem:[#allocation10 + $0x1c4] ss:$8 sps:$4 sm:$0xff]   ;;  %v4999_v57 = vpop.f32.mrf.mxu0 }
 0x321   :  { %5274 = vmatprep.subr.bf16.mxu1 %v7001_v11  ;;  %v5038_v11 = vpop.f32.mrf.mxu1 }
 0x323   :  { %5748 = vmatpush2.bf16.msra.mxu0 %v7056_v14  ;;  %v7110_v14 = vld [vmem:[#allocation10 + $0x1c0] ss:$8 sps:$4 sm:$0xff]  }
 0x324   :  { %5275 = vmatpush1.bf16.msra.mxu1 %v6999_v16  ;;  %5749 = vmatprep.subr.bf16.mxu0 %v7061_v39  ;;  %v7115_v16 = vld [vmem:[#allocation10 + $0x1b4] ss:$8 sps:$4 sm:$0xff]   ;;  %v5001_v39 = vpop.f32.mrf.mxu0 }
 0x325   :  { %5276 = vmatprep.subr.bf16.mxu1 %v7004_v25  ;;  %v7581_v25 = vld [vmem:[#allocation8] sm:$0xf] }
 0x327   :  { %5750 = vmatpush2.bf16.msra.mxu0 %v7059_v10  ;;  %v5040_v10 = vpop.f32.mrf.mxu1 }
 0x328   :  { %5277 = vmatpush1.bf16.msra.mxu1 %v7002_v18  ;;  %5751 = vmatprep.subr.bf16.mxu0 %v7064_v7  ;;  %v7113_v7 = vld [vmem:[#allocation10 + $0x1b0] ss:$8 sps:$4 sm:$0xff]  }
 0x329   :  { %5278 = vmatprep.subr.bf16.mxu1 %v7007_v19  ;;  %v3668_v19 = vrot.slane %v7581_v25, %v7512_v9 }
 0x32b   :  { %5752 = vmatpush2.bf16.msra.mxu0 %v7062_v22  ;;  %v3664_v22 = vrot.slane %v7581_v25, %v7451_v38 }
 0x32c   :  { %5279 = vmatpush2.bf16.msra.mxu1 %v7005_v61  ;;  %5753 = vmatprep.subr.bf16.mxu0 %v7067_v23  ;;  %v5042_v61 = vpop.f32.mrf.mxu1 }
 0x32d   :  { %5280 = vmatprep.subr.bf16.mxu1 %v7010_v24  ;;  %v4998_v24 = vadd.f32 %v4997_v6, %v3668_v19 }
 0x32f   :  { %5754 = vmatpush2.bf16.msra.mxu0 %v7065_v26  ;;  %v4996_v26 = vadd.f32 %v4995_v44, %v3664_v22 }
 0x330   :  { %5281 = vmatpush2.bf16.msra.mxu1 %v7008_v27  ;;  %5755 = vmatprep.subr.bf16.mxu0 %v7070_v51  ;;  %v5000_v27 = vadd.f32 %v4999_v57, %v3664_v22  ;;  %v5044_v51 = vpop.f32.mrf.mxu1  ;;  %v3672_v57 = vrot.slane %v7581_v25, %v550_v54 }
 0x331   :  { %5282 = vmatprep.subr.bf16.mxu1 %v7013_v32 }
 0x333   :  { %5756 = vmatpush2.bf16.msra.mxu0 %v7068_v33  ;;  %v5041_v33 = vadd.f32 %v5040_v10, %v4998_v24 }
 0x334   :  { %5283 = vmatpush2.bf16.msra.mxu1 %v7011_v34  ;;  %5757 = vmatprep.subr.bf16.mxu0 %v7073_v12  ;;  %v5002_v34 = vadd.f32 %v5001_v39, %v3668_v19  ;;  %v5039_v12 = vadd.f32 %v5038_v11, %v4996_v26 }
 0x335   :  { %5284 = vmatprep.subr.bf16.mxu1 %v7016_v30 }
 0x337   :  { %5758 = vmatpush2.bf16.msra.mxu0 %v7071_v40  ;;  %v5043_v40 = vadd.f32 %v5042_v61, %v5000_v27 }
 0x338   :  { %5285 = vmatpush2.bf16.msra.mxu1 %v7014_v20  ;;  %5759 = vmatprep.subr.bf16.mxu0 %v7076_v31  ;;  %v7118_v31 = vld [vmem:[#allocation10 + $0x1a4] ss:$8 sps:$4 sm:$0xff]  }
 0x339   :  { %5286 = vmatprep.subr.bf16.mxu1 %v7019_v35 }
 0x33b   :  { %5760 = vmatpush2.bf16.msra.mxu0 %v7074_v36 }
 0x33c   :  { %5287 = vmatpush2.bf16.msra.mxu1 %v7017_v42 }
 0x33d   :  { %5288 = vmatprep.subr.bf16.mxu1 %v7022_v43  ;;  %v7116_v43 = vld [vmem:[#allocation10 + $0x1a0] ss:$8 sps:$4 sm:$0xff]  }
 0x33e   :  { %v5081_v18 = vpop.f32.mrf.mxu0 }
 0x33f   :  { %v5082_v35 = vadd.f32 %v5081_v18, %v5039_v12 }
 0x340   :  { %5289 = vmatpush2.bf16.msra.mxu1 %v7020_v46  ;;  %v5083_v23 = vpop.f32.mrf.mxu0  ;;  %v5045_v46 = vadd.f32 %v5044_v51, %v5002_v34 }
 0x341   :  { %5290 = vmatprep.subr.bf16.mxu1 %v7025_v47  ;;  %v5084_v20 = vadd.f32 %v5083_v23, %v5041_v33 }
 0x342   :  { %v5085_v32 = vpop.f32.mrf.mxu0 }
 0x343   :  { %v5086_v47 = vadd.f32 %v5085_v32, %v5043_v40 }
 0x344   :  { %5291 = vmatpush2.bf16.msra.mxu1 %v7023_v48  ;;  %v5087_v36 = vpop.f32.mrf.mxu0 }
 0x345   :  { %5292 = vmatprep.subr.bf16.mxu1 %v7028_v49 }
 0x348   :  { %5293 = vmatpush2.bf16.msra.mxu1 %v7026_v50 }
 0x349   :  { %5772 = vmatprep.subr.bf16.mxu1 %v7079_v60 }
 0x34b   :  { %5295 = vmatmul.mubr.bf16.vlgmr.msra.gmra.mxu1 %v7572_v41  ;;  %v7094_v41 = vld [vmem:[#allocation10 + $0x124] ss:$8 sps:$4 sm:$0xff]  }
 0x34c   :  { %5773 = vmatpush1.bf16.msra.mxu1 %v7077_v1  ;;  %v5088_v1 = vadd.f32 %v5087_v36, %v5045_v46 }
 0x34d   :  { %5774 = vmatprep.subr.bf16.mxu1 %v7082_v52  ;;  %v7121_v52 = vld [vmem:[#allocation10 + $0x194] ss:$8 sps:$4 sm:$0xff]  }
 0x350   :  { %5775 = vmatpush1.bf16.msra.mxu1 %v7080_v2 }
 0x351   :  { %5776 = vmatprep.subr.bf16.mxu1 %v7085_v21  ;;  %v7119_v21 = vld [vmem:[#allocation10 + $0x190] ss:$8 sps:$4 sm:$0xff]  }
 0x354   :  { %5777 = vmatpush1.bf16.msra.mxu1 %v7083_v53 }
 0x355   :  { %5778 = vmatprep.subr.bf16.mxu1 %v7088_v55 }
 0x358   :  { %5779 = vmatpush1.bf16.msra.mxu1 %v7086_v29 }
 0x359   :  { %5780 = vmatprep.subr.bf16.mxu1 %v7091_v56 }
 0x35c   :  { %5781 = vmatpush1.bf16.msra.mxu1 %v7089_v13 }
 0x35d   :  { %5782 = vmatprep.subr.bf16.mxu1 %v7094_v41  ;;  %v7124_v41 = vld [vmem:[#allocation10 + $0x184] ss:$8 sps:$4 sm:$0xff]  }
 0x360   :  { %5783 = vmatpush1.bf16.msra.mxu1 %v7092_v58 }
 0x361   :  { %5784 = vmatprep.subr.bf16.mxu1 %v7097_v59  ;;  %v7122_v59 = vld [vmem:[#allocation10 + $0x180] ss:$8 sps:$4 sm:$0xff]  }
 0x364   :  { %5785 = vmatpush1.bf16.msra.mxu1 %v7095_v62 }
 0x365   :  { %5786 = vmatprep.subr.bf16.mxu1 %v7100_v0 }
 0x368   :  { %5787 = vmatpush1.bf16.msra.mxu1 %v7098_v63 }
 0x369   :  { %5788 = vmatprep.subr.bf16.mxu1 %v7103_v15 }
 0x36c   :  { %5789 = vmatpush2.bf16.msra.mxu1 %v7101_v17 }
 0x36d   :  { %5790 = vmatprep.subr.bf16.mxu1 %v7106_v37 }
 0x370   :  { %5791 = vmatpush2.bf16.msra.mxu1 %v7104_v4 }
 0x371   :  { %5792 = vmatprep.subr.bf16.mxu1 %v7109_v5 }
 0x374   :  { %5793 = vmatpush2.bf16.msra.mxu1 %v7107_v8 }
 0x375   :  { %5794 = vmatprep.subr.bf16.mxu1 %v7112_v3  ;;  %v3676_v3 = vrot.slane %v7581_v25, %v554_v45 }
 0x378   :  { %5795 = vmatpush2.bf16.msra.mxu1 %v7110_v14 }
 0x379   :  { %5796 = vmatprep.subr.bf16.mxu1 %v7115_v16 }
 0x37c   :  { %5797 = vmatpush2.bf16.msra.mxu1 %v7113_v7 }
 0x37d   :  { %5798 = vmatprep.subr.bf16.mxu1 %v7118_v31 }
 0x37e   :  { %v5167_v37 = vpop.f32.mrf.mxu0 }
 0x37f   :  { %v5168_v39 = vadd.f32 %v5167_v37, %v3672_v57 }
 0x380   :  { %5799 = vmatpush2.bf16.msra.mxu1 %v7116_v43  ;;  %v5169_v44 = vpop.f32.mrf.mxu0 }
 0x381   :  { %5800 = vmatprep.subr.bf16.mxu1 %v7121_v52  ;;  %v5170_v16 = vadd.f32 %v5169_v44, %v3676_v3 }
 0x382   :  { %v5171_v4 = vpop.f32.mrf.mxu0 }
 0x383   :  { %v5172_v18 = vadd.f32 %v5171_v4, %v3672_v57 }
 0x384   :  { %5801 = vmatpush2.bf16.msra.mxu1 %v7119_v21  ;;  %v5173_v6 = vpop.f32.mrf.mxu0 }
 0x385   :  { %5802 = vmatprep.subr.bf16.mxu1 %v7124_v41  ;;  %v5174_v61 = vadd.f32 %v5173_v6, %v3676_v3 }
 0x388   :  { %5803 = vmatpush2.bf16.msra.mxu1 %v7122_v59 }
 0x38b   :  { %v5124_v30 = vpop.f32.mrf.mxu1 }
 0x38c   :  { %v5125_v49 = vadd.f32 %v5124_v30, %v5082_v35 }
 0x38d   :  { %v5126_v42 = vpop.f32.mrf.mxu1 }
 0x38e   :  { %v5127_v48 = vadd.f32 %v5126_v42, %v5084_v20  ;;  %v5313_v56 = vmul.f32 0.2, %v5125_v49  ;;  %vm5305_vm3 = vcmp.gt.f32.partialorder %v5125_v49, 0.0 }
 0x38f   :  { %v5128_v50 = vpop.f32.mrf.mxu1 }
 0x390   :  { %v5129_v60 = vadd.f32 %v5128_v50, %v5086_v47  ;;  %v5314_v53 = vmul.f32 0.2, %v5127_v48  ;;  %vm5306_vm2 = vcmp.gt.f32.partialorder %v5127_v48, 0.0  ;;  %v5321_v63 = vsel %vm5305_vm3, %v5125_v49, %v5313_v56 }
 0x391   :  { %v5130_v2 = vpop.f32.mrf.mxu1 }
 0x392   :  { %vm5309_vm1 = vcmp.gt.f32.partialorder %v5129_v60, 0.0  ;;  %v5317_v55 = vmul.f32 0.2, %v5129_v60  ;;  %v5131_v29 = vadd.f32 %v5130_v2, %v5088_v1  ;;  %v5322_v62 = vsel %vm5306_vm2, %v5127_v48, %v5314_v53 }
 0x394   :  { %vm5310_vm4 = vcmp.gt.f32.partialorder %v5131_v29, 0.0  ;;  %v5318_v13 = vmul.f32 0.2, %v5131_v29  ;;  %v5325_v58 = vsel %vm5309_vm1, %v5129_v60, %v5317_v55  ;;  %v5397_v60 = vld [vmem:[#allocation11] sm:$0x3] }
 0x395   :  { %v5329_v17 = vpack.c.bf16 %v5325_v58, %v5321_v63  ;;  %v5402_v2 = vrot.slane %v5397_v60, %v7451_v38  ;;  %v5406_v21 = vrot.slane %v5397_v60, %v7512_v9  ;;  %v5827_v58 = vld [vmem:[#allocation13] sm:$0x3] }
 0x396   :  { %v5326_v0 = vsel %vm5310_vm4, %v5131_v29, %v5318_v13  ;;  %v5832_v37 = vrot.slane %v5827_v58, %v7451_v38  ;;  %v5836_v44 = vrot.slane %v5827_v58, %v7512_v9 }
 0x397   :  { %v5330_v15 = vpack.c.bf16 %v5326_v0, %v5322_v62 }
 0x399   :  { %5761 = vmatprep.mubr.bf16.mxu0 %v5330_v15 }
 0x39a   :  { %5762 = vmatmul.mubr.bf16.vlgmr.msra.gmra.mxu0 %v5329_v17 }
 0x3be   :  { %v5253_v11 = vpop.f32.mrf.mxu0 }
 0x3c0   :  { %v5255_v10 = vpop.f32.mrf.mxu0 }
 0x3c2   :  { %v5257_v24 = vpop.f32.mrf.mxu0 }
 0x3c4   :  { %v5259_v54 = vpop.f32.mrf.mxu0 }
 0x3cb   :  { %v5210_v5 = vpop.f32.mrf.mxu1 }
 0x3cc   :  { %v5211_v19 = vadd.f32 %v5210_v5, %v5168_v39 }
 0x3cd   :  { %v5212_v8 = vpop.f32.mrf.mxu1 }
 0x3ce   :  { %v5213_v7 = vadd.f32 %v5212_v8, %v5170_v16  ;;  %v5254_v45 = vadd.f32 %v5253_v11, %v5211_v19 }
 0x3cf   :  { %v5214_v14 = vpop.f32.mrf.mxu1 }
 0x3d0   :  { %v5215_v23 = vadd.f32 %v5214_v14, %v5172_v18  ;;  %v5256_v51 = vadd.f32 %v5255_v10, %v5213_v7 }
 0x3d1   :  { %v5216_v22 = vpop.f32.mrf.mxu1 }
 0x3d2   :  { %v5217_v27 = vadd.f32 %v5216_v22, %v5174_v61  ;;  %v5258_v33 = vadd.f32 %v5257_v24, %v5215_v23  ;;  %v6620_v22 = vld [vmem:[#allocation2] ss:$0 sm:$0xff] }
 0x3d4   :  { %v5260_v30 = vadd.f32 %v5259_v54, %v5217_v27 }
 0x40b   :  { %v5296_v26 = vpop.f32.mrf.mxu1 }
 0x40c   :  { %v5297_v25 = vadd.f32 %v5296_v26, %v5254_v45 }
 0x40d   :  { %v5298_v32 = vpop.f32.mrf.mxu1 }
 0x40e   :  { %v5299_v28 = vadd.f32 %v5298_v32, %v5256_v51  ;;  %v5315_v36 = vmul.f32 0.2, %v5297_v25  ;;  %vm5307_vm7 = vcmp.gt.f32.partialorder %v5297_v25, 0.0 }
 0x40f   :  { %v5300_v34 = vpop.f32.mrf.mxu1 }
 0x410   :  { %v5301_v12 = vadd.f32 %v5300_v34, %v5258_v33  ;;  %v5316_v20 = vmul.f32 0.2, %v5299_v28  ;;  %vm5308_vm6 = vcmp.gt.f32.partialorder %v5299_v28, 0.0  ;;  %v5323_v48 = vsel %vm5307_vm7, %v5297_v25, %v5315_v36 }
 0x411   :  { %v5302_v40 = vpop.f32.mrf.mxu1 }
 0x412   :  { %vm5311_vm5 = vcmp.gt.f32.partialorder %v5301_v12, 0.0  ;;  %v5319_v31 = vmul.f32 0.2, %v5301_v12  ;;  %v5303_v35 = vadd.f32 %v5302_v40, %v5260_v30  ;;  %v5324_v46 = vsel %vm5308_vm6, %v5299_v28, %v5316_v20 }
 0x414   :  { %vm5312_vm8 = vcmp.gt.f32.partialorder %v5303_v35, 0.0  ;;  %v5320_v42 = vmul.f32 0.2, %v5303_v35  ;;  %v5327_v43 = vsel %vm5311_vm5, %v5301_v12, %v5319_v31 }
 0x415   :  { %v5331_v50 = vpack.c.bf16 %v5327_v43, %v5323_v48 }
 0x416   :  { %v5328_v47 = vsel %vm5312_vm8, %v5303_v35, %v5320_v42 }
 0x417   :  { %v5332_v49 = vpack.c.bf16 %v5328_v47, %v5324_v46 }
 0x419   :  { %5804 = vmatprep.mubr.bf16.mxu1 %v5332_v49 }
 0x41a   :  { %5805 = vmatmul.mubr.bf16.vlgmr.msra.gmra.mxu1 %v5331_v50 }
 0x45a   :  { %v5763_v1 = vpop.f32.mrf.mxu0 }
 0x45b   :  { %v5764_v55 = vadd.f32 %v5763_v1, %v5402_v2 }
 0x45c   :  { %v5765_v52 = vpop.f32.mrf.mxu0 }
 0x45d   :  { %v5766_v56 = vadd.f32 %v5765_v52, %v5406_v21 }
 0x45e   :  { %v5767_v53 = vpop.f32.mrf.mxu0 }
 0x45f   :  { %v5768_v62 = vadd.f32 %v5767_v53, %v5402_v2 }
 0x460   :  { %v5769_v13 = vpop.f32.mrf.mxu0 }
 0x461   :  { %v5770_v15 = vadd.f32 %v5769_v13, %v5406_v21 }
 0x4da   :  { %v5806_v29 = vpop.f32.mrf.mxu1 }
 0x4db   :  { %v5807_v41 = vadd.f32 %v5806_v29, %v5764_v55 }
 0x4dc   :  { %v5808_v59 = vpop.f32.mrf.mxu1 }
 0x4dd   :  { %vm5815_vm9 = vcmp.gt.f32.partialorder %v5807_v41, 0.0  ;;  %v5819_v0 = vmul.f32 0.2, %v5807_v41  ;;  %v5809_v63 = vadd.f32 %v5808_v59, %v5766_v56 }
 0x4de   :  { %v5810_v17 = vpop.f32.mrf.mxu1 }
 0x4df   :  { %vm5816_vm10 = vcmp.gt.f32.partialorder %v5809_v63, 0.0  ;;  %v5820_v4 = vmul.f32 0.2, %v5809_v63  ;;  %v5811_v5 = vadd.f32 %v5810_v17, %v5768_v62  ;;  %v5823_v6 = vsel %vm5815_vm9, %v5807_v41, %v5819_v0 }
 0x4e0   :  { %v5812_v8 = vpop.f32.mrf.mxu1  ;;  %v5839_v14 = vmul.f32 %v5832_v37, %v5823_v6 }
 0x4e1   :  { %vm5817_vm11 = vcmp.gt.f32.partialorder %v5811_v5, 0.0  ;;  %v5821_v3 = vmul.f32 0.2, %v5811_v5  ;;  %v5813_v57 = vadd.f32 %v5812_v8, %v5770_v15  ;;  %v5824_v11 = vsel %vm5816_vm10, %v5809_v63, %v5820_v4 }
 0x4e2   :  { %v5840_v16 = vmul.f32 %v5836_v44, %v5824_v11 }
 0x4e3   :  { %vm5818_vm12 = vcmp.gt.f32.partialorder %v5813_v57, 0.0  ;;  %v5822_v39 = vmul.f32 0.2, %v5813_v57  ;;  %v5825_v10 = vsel %vm5817_vm11, %v5811_v5, %v5821_v3 }
 0x4e4   :  { %v5843_v18 = vadd.f32 %v5840_v16, %v5839_v14  ;;  %v5841_v38 = vmul.f32 %v5832_v37, %v5825_v10 }
 0x4e5   :  { %v5826_v7 = vsel %vm5818_vm12, %v5813_v57, %v5822_v39 }
 0x4e6   :  { %5844 = vadd.xlane.f32.xlu0 %v5843_v18  ;;  %v5842_v19 = vmul.f32 %v5836_v44, %v5826_v7 }
 0x4e8   :  { %v5846_v9 = vadd.f32 %v5842_v19, %v5841_v38 }
 0x4ea   :  { %5847 = vadd.xlane.f32.xlu0 %v5846_v9 }
 0x56f   :  { %v5845_v61 = vpop.xlane.xlu0 %5844 }
 0x570   :  { %v5856_v23 = vadd.f32 %v6620_v22, %v5845_v61 }
 0x572   :  { %v5858_v24 = vsub.f32 0.0, %v5856_v23 }
 0x573   :  { %v5848_v26 = vpop.xlane.xlu0 %5847 }
 0x574   :  { %v5860_v27 = vmul.f32 1.442695, %v5858_v24  ;;  %v5857_v51 = vadd.f32 %v6620_v22, %v5848_v26 }
 0x576   :  { %7125 = vpow2.f32 %v5860_v27  ;;  %v5859_v45 = vsub.f32 0.0, %v5857_v51 }
 0x578   :  { %v5862_v32 = vmul.f32 1.442695, %v5859_v45 }
 0x57a   :  { %7127 = vpow2.f32 %v5862_v32 }
 0x583   :  { %v7126_v28 = vpop.eup %7125 }
 0x584   :  { %v5864_v33 = vadd.f32 1.0, %v7126_v28 }
 0x586   :  { %7129 = vrcp.f32 %v5864_v33 }
 0x587   :  { %v7128_v54 = vpop.eup %7127 }
 0x588   :  { %v5865_v25 = vadd.f32 1.0, %v7128_v54 }
 0x58a   :  { %7131 = vrcp.f32 %v5865_v25 }
 0x593   :  { %v7130_v34 = vpop.eup %7129 }
 0x594   :  { %5871 = vst.msk [vmem:[%s7612_s9] sm:$0xff] %vm5870_vm13, %v7130_v34 }
 0x597   :  { %v7132_v12 = vpop.eup %7131 }
 0x598   :  { %5872 = vst.msk [vmem:[%s7612_s9 + $0x8] sm:$0xff] %vm5870_vm13, %v7132_v12 }
 0x599   :  { %5877 = vsyncpa [#allocation4], 1 }
 0x59a   :  { %5878 = vsyncpa [#allocation6], 1 }
 0x59b   :  { %5879 = vsyncpa [#allocation9], 1 }
 0x59c   :  { %5880 = vsyncpa [#allocation12], 1 }

// kernel: discriminator_forward.1
= control target key start
LH: loop header
LB: loop body
LE: loop exit
PB: predicated region body
PF: predicated region fallthrough
CT: control target
= control target key end

     0   :  { %s7603_s0 = inlined_call_operand.vmem [shape: bf16[16,816], index: 0, kind: input, shape index: {}]   ;;  %s7604_s1 = inlined_call_operand.hbm [shape: bf16[816,1024], index: 1, kind: input, shape index: {}]   ;;  %s7605_s2 = inlined_call_operand.hbm [shape: f32[1,1024], index: 2, kind: input, shape index: {}]   ;;  %s7606_s3 = inlined_call_operand.hbm [shape: bf16[1024,512], index: 3, kind: input, shape index: {}]   ;;  %s7607_s4 = inlined_call_operand.hbm [shape: f32[1,512], index: 4, kind: input, shape index: {}]   ;;  %s7608_s5 = inlined_call_operand.hbm [shape: bf16[512,256], index: 5, kind: input, shape index: {}]   ;;  %s7609_s6 = inlined_call_operand.hbm [shape: f32[1,256], index: 6, kind: input, shape index: {}]   ;;  %s7610_s7 = inlined_call_operand.hbm [shape: f32[1,256], index: 7, kind: input, shape index: {}]   ;;  %s7611_s8 = inlined_call_operand.<no memory space> [shape: f32[1,1], index: 8, kind: input, shape index: {}]   ;;  %s7612_s9 = inlined_call_operand.vmem [shape: f32[16,1], index: 9, kind: output, shape index: {}]  }
   0x1   :  { %v14_v0 = vstv %s7611_s8 }
   0x2   :  { %15 = vst [vmem:[#allocation2] sm:$0x1] %v14_v0 }
   0x3   :  { %16 = vsyncpa [#allocation4], 0 }
   0x4   :  { %17 = vsyncpa [#allocation6], 0 }
   0x5   :  { %18 = vsyncpa [#allocation9], 0 }
   0x6   :  { %19 = vsyncpa [#allocation12], 0  ;;  %s7291_s11 = smov [#allocation5]   ;;  %s7292_s13 = smov [#allocation8]  }
   0x7   :  { %s40_s12 = sshll.u32 %s7291_s11, 4  ;;  %s62_s14 = sshll.u32 %s7292_s13, 4  ;;  %s41_s12 = int_to_ptr.vmem [resolvable:$true] %s40_s12  ;;  %s63_s14 = int_to_ptr.vmem [resolvable:$true] %s62_s14 }
   0x8   :  { %s7151_s15 = scalar_lea.vmem %s41_s12, 128  ;;  %p7156_p1 = scmp.lt.s32.totalorder %s41_s12, %s41_s12 }
   0x9   :  { %p7152_p0 = scmp.ne.s32.totalorder %s41_s12, %s7151_s15  ;;  %p7157_p2 = scmp.lt.s32.totalorder %s7151_s15, %s7151_s15 }
   0xb   :  { %p7158_p3 = por %p7157_p2, %p7156_p1 }
   0xd   :  { %p7159_p4 = pnand %p7158_p3, %p7152_p0 }
   0xf   :  { %7162 = shalt.err (!%p7159_p4)
}
  0x10   :  { %43 = dma.hbm_to_vmem [thread:$0]  %s7605_s2, 128, %s41_s12, [#allocation6]  }
  0x11   :  { %s7171_s17 = scalar_lea.vmem %s63_s14, 64  ;;  %p7176_p6 = scmp.lt.s32.totalorder %s63_s14, %s63_s14 }
  0x12   :  { %p7172_p5 = scmp.ne.s32.totalorder %s63_s14, %s7171_s17  ;;  %p7177_p7 = scmp.lt.s32.totalorder %s7171_s17, %s7171_s17 }
  0x14   :  { %p7178_p8 = por %p7177_p7, %p7176_p6 }
  0x16   :  { %p7179_p9 = pnand %p7178_p8, %p7172_p5 }
  0x18   :  { %7182 = shalt.err (!%p7179_p9)
}
  0x19   :  { %65 = dma.hbm_to_vmem [thread:$0]  %s7607_s4, 64, %s63_s14, [#allocation9]  }
  0x1a   :  { %s7293_s20 = smov [#allocation11]   ;;  %s7294_s22 = smov [#allocation3]  }
  0x1b   :  { %s84_s21 = sshll.u32 %s7293_s20, 4  ;;  %s27_s23 = sshll.u32 %s7294_s22, 4  ;;  %s85_s21 = int_to_ptr.vmem [resolvable:$true] %s84_s21  ;;  %s28_s23 = int_to_ptr.vmem [resolvable:$true] %s27_s23 }
  0x1c   :  { %s7191_s24 = scalar_lea.vmem %s85_s21, 32  ;;  %p7196_p11 = scmp.lt.s32.totalorder %s85_s21, %s85_s21 }
  0x1d   :  { %p7192_p10 = scmp.ne.s32.totalorder %s85_s21, %s7191_s24  ;;  %p7197_p12 = scmp.lt.s32.totalorder %s7191_s24, %s7191_s24 }
  0x1f   :  { %p7198_p13 = por %p7197_p12, %p7196_p11 }
  0x21   :  { %p7199_p0 = pnand %p7198_p13, %p7192_p10 }
  0x23   :  { %7202 = shalt.err (!%p7199_p0)
}
  0x24   :  { %87 = dma.hbm_to_vmem [thread:$0]  %s7609_s6, 32, %s85_s21, [#allocation12]  }
  0x25   :  { %s7211_s26 = scalar_lea.vmem %s28_s23, 52224  ;;  %p7216_p2 = scmp.lt.s32.totalorder %s28_s23, %s28_s23 }
  0x26   :  { %p7212_p1 = scmp.ne.s32.totalorder %s28_s23, %s7211_s26  ;;  %p7217_p3 = scmp.lt.s32.totalorder %s7211_s26, %s7211_s26 }
  0x28   :  { %p7218_p4 = por %p7217_p3, %p7216_p2 }
  0x2a   :  { %p7219_p5 = pnand %p7218_p4, %p7212_p1 }
  0x2c   :  { %7222 = shalt.err (!%p7219_p5)
}
  0x2d   :  { %s7295_s4 = smov 512   ;;  %s7296_s27 = smov 32  }
  0x2e   :  { %33 = dma.hbm_to_vmem [thread:$0]  %s7604_s1, 52224, %s28_s23, [#allocation4], %s7295_s4, %s7295_s4, %s7296_s27  }
  0x2f   :  { %s7297_s30 = smov [#allocation7]  }
  0x30   :  { %s49_s10 = sshll.u32 %s7297_s30, 4  ;;  %s50_s10 = int_to_ptr.vmem [resolvable:$true] %s49_s10 }
  0x31   :  { %s7231_s11 = scalar_lea.vmem %s50_s10, 32768  ;;  %p7236_p7 = scmp.lt.s32.totalorder %s50_s10, %s50_s10 }
  0x32   :  { %p7232_p6 = scmp.ne.s32.totalorder %s50_s10, %s7231_s11  ;;  %p7237_p8 = scmp.lt.s32.totalorder %s7231_s11, %s7231_s11 }
  0x34   :  { %p7238_p9 = por %p7237_p8, %p7236_p7 }
  0x36   :  { %p7239_p10 = pnand %p7238_p9, %p7232_p6 }
  0x38   :  { %7242 = shalt.err (!%p7239_p10)
}
  0x39   :  { %s7298_s6 = smov 256   ;;  %s7299_s12 = smov 16  }
  0x3a   :  { %55 = dma.hbm_to_vmem [thread:$0]  %s7606_s3, 32768, %s50_s10, [#allocation6], %s7298_s6, %s7298_s6, %s7299_s12  }
  0x3b   :  { %s7300_s15 = smov [#allocation10]  }
  0x3c   :  { %s71_s16 = sshll.u32 %s7300_s15, 4  ;;  %s72_s16 = int_to_ptr.vmem [resolvable:$true] %s71_s16 }
  0x3d   :  { %s7251_s1 = scalar_lea.vmem %s72_s16, 8192  ;;  %p7256_p12 = scmp.lt.s32.totalorder %s72_s16, %s72_s16 }
  0x3e   :  { %p7252_p11 = scmp.ne.s32.totalorder %s72_s16, %s7251_s1  ;;  %p7257_p13 = scmp.lt.s32.totalorder %s7251_s1, %s7251_s1 }
  0x40   :  { %p7258_p0 = por %p7257_p13, %p7256_p12 }
  0x42   :  { %p7259_p1 = pnand %p7258_p0, %p7252_p11 }
  0x44   :  { %7262 = shalt.err (!%p7259_p1)
}
  0x45   :  { %s7301_s8 = smov 128   ;;  %s7302_s17 = smov 8  }
  0x46   :  { %77 = dma.hbm_to_vmem [thread:$0]  %s7608_s5, 8192, %s72_s16, [#allocation9], %s7301_s8, %s7301_s8, %s7302_s17  }
  0x47   :  { %s7303_s20 = smov [#allocation13]  }
  0x48   :  { %s94_s21 = sshll.u32 %s7303_s20, 4  ;;  %s95_s21 = int_to_ptr.vmem [resolvable:$true] %s94_s21 }
  0x49   :  { %s7271_s3 = scalar_lea.vmem %s95_s21, 32  ;;  %p7276_p3 = scmp.lt.s32.totalorder %s95_s21, %s95_s21 }
  0x4a   :  { %p7272_p2 = scmp.ne.s32.totalorder %s95_s21, %s7271_s3  ;;  %p7277_p4 = scmp.lt.s32.totalorder %s7271_s3, %s7271_s3 }
  0x4c   :  { %p7278_p5 = por %p7277_p4, %p7276_p3 }
  0x4e   :  { %p7279_p6 = pnand %p7278_p5, %p7272_p2 }
  0x50   :  { %7282 = shalt.err (!%p7279_p6)
}
  0x51   :  { %97 = dma.hbm_to_vmem [thread:$0]  %s7610_s7, 32, %s95_s21, [#allocation12]  }
  0x52   :  { %7283 = dma.done.wait [#allocation4], 52224  }
  0x53   :  { %7284 = vsyncadd [#allocation4], 4294915072 }
  0x54   :  { %7285 = dma.done.wait [#allocation6], 32896  }
  0x55   :  { %7286 = vsyncadd [#allocation6], 4294934400 }
  0x56   :  { %7287 = dma.done.wait [#allocation9], 8256  }
  0x57   :  { %7288 = vsyncadd [#allocation9], 4294959040 }
  0x58   :  { %7289 = dma.done.wait [#allocation12], 64  }
  0x59   :  { %7290 = vsyncadd [#allocation12], 4294967232  ;;  %v186_v1 = vld [vmem:[#allocation3 + $0x1c0] sm:$0xff]  ;;  %vm2655_vm0 = vcmask 392192  }
  0x5a   :  { %v190_v2 = vld [vmem:[#allocation3 + $0x1e0] sm:$0xff] }
  0x5b   :  { %v314_v3 = vld [vmem:[#allocation3 + $0x5c0] sm:$0xff]  ;;  %v5945_v4 = vcombine.high %v186_v1, %v190_v2  ;;  %v5944_v6 = vcombine.low %v186_v1, %v190_v2 }
  0x5c   :  { %v318_v5 = vld [vmem:[#allocation3 + $0x5e0] sm:$0xff] }
  0x5d   :  { %v178_v7 = vld [vmem:[#allocation3 + $0x180] sm:$0xff]  ;;  %v6073_v9 = vcombine.high %v314_v3, %v318_v5  ;;  %v6072_v10 = vcombine.low %v314_v3, %v318_v5  ;;  %2659 = vmatprep.subr.bf16.mxu0 %v5945_v4 }
  0x5e   :  { %v182_v8 = vld [vmem:[#allocation3 + $0x1a0] sm:$0xff]  ;;  %2660 = vmatpush1.bf16.msra.mxu0 %v5944_v6 }
  0x5f   :  { %v5937_v11 = vcombine.high %v178_v7, %v182_v8  ;;  %v306_v12 = vld [vmem:[#allocation3 + $0x580] sm:$0xff]  ;;  %2702 = vmatprep.subr.bf16.mxu1 %v6073_v9  ;;  %v5936_v19 = vcombine.low %v178_v7, %v182_v8 }
  0x60   :  { %v310_v13 = vld [vmem:[#allocation3 + $0x5a0] sm:$0xff]  ;;  %2703 = vmatpush1.bf16.msra.mxu1 %v6072_v10 }
  0x61   :  { %v170_v14 = vld [vmem:[#allocation3 + $0x140] sm:$0xff]  ;;  %v6065_v15 = vcombine.high %v306_v12, %v310_v13  ;;  %2661 = vmatprep.subr.bf16.mxu0 %v5937_v11  ;;  %v6064_v20 = vcombine.low %v306_v12, %v310_v13 }
  0x62   :  { %v174_v16 = vld [vmem:[#allocation3 + $0x160] sm:$0xff]  ;;  %2662 = vmatpush1.bf16.msra.mxu0 %v5936_v19 }
  0x63   :  { %v298_v17 = vld [vmem:[#allocation3 + $0x540] sm:$0xff]  ;;  %v5929_v21 = vcombine.high %v170_v14, %v174_v16  ;;  %2704 = vmatprep.subr.bf16.mxu1 %v6065_v15  ;;  %v5928_v27 = vcombine.low %v170_v14, %v174_v16 }
  0x64   :  { %v302_v18 = vld [vmem:[#allocation3 + $0x560] sm:$0xff]  ;;  %2705 = vmatpush1.bf16.msra.mxu1 %v6064_v20 }
  0x65   :  { %v6057_v22 = vcombine.high %v298_v17, %v302_v18  ;;  %v162_v23 = vld [vmem:[#allocation3 + $0x100] sm:$0xff]  ;;  %2663 = vmatprep.subr.bf16.mxu0 %v5929_v21  ;;  %v6056_v28 = vcombine.low %v298_v17, %v302_v18 }
  0x66   :  { %v166_v24 = vld [vmem:[#allocation3 + $0x120] sm:$0xff]  ;;  %2664 = vmatpush1.bf16.msra.mxu0 %v5928_v27 }
  0x67   :  { %v290_v25 = vld [vmem:[#allocation3 + $0x500] sm:$0xff]  ;;  %v5921_v29 = vcombine.high %v162_v23, %v166_v24  ;;  %2706 = vmatprep.subr.bf16.mxu1 %v6057_v22  ;;  %v5920_v35 = vcombine.low %v162_v23, %v166_v24 }
  0x68   :  { %v294_v26 = vld [vmem:[#allocation3 + $0x520] sm:$0xff]  ;;  %2707 = vmatpush1.bf16.msra.mxu1 %v6056_v28 }
  0x69   :  { %v6049_v30 = vcombine.high %v290_v25, %v294_v26  ;;  %v154_v31 = vld [vmem:[#allocation3 + $0xc0] sm:$0xff]  ;;  %2665 = vmatprep.subr.bf16.mxu0 %v5921_v29  ;;  %v6048_v36 = vcombine.low %v290_v25, %v294_v26 }
  0x6a   :  { %v158_v32 = vld [vmem:[#allocation3 + $0xe0] sm:$0xff]  ;;  %2666 = vmatpush1.bf16.msra.mxu0 %v5920_v35 }
  0x6b   :  { %v282_v33 = vld [vmem:[#allocation3 + $0x4c0] sm:$0xff]  ;;  %v5913_v37 = vcombine.high %v154_v31, %v158_v32  ;;  %2708 = vmatprep.subr.bf16.mxu1 %v6049_v30  ;;  %v5912_v43 = vcombine.low %v154_v31, %v158_v32 }
  0x6c   :  { %v286_v34 = vld [vmem:[#allocation3 + $0x4e0] sm:$0xff]  ;;  %2709 = vmatpush1.bf16.msra.mxu1 %v6048_v36 }
  0x6d   :  { %v6041_v38 = vcombine.high %v282_v33, %v286_v34  ;;  %v146_v39 = vld [vmem:[#allocation3 + $0x80] sm:$0xff]  ;;  %2667 = vmatprep.subr.bf16.mxu0 %v5913_v37  ;;  %v6040_v44 = vcombine.low %v282_v33, %v286_v34 }
  0x6e   :  { %v150_v40 = vld [vmem:[#allocation3 + $0xa0] sm:$0xff]  ;;  %2668 = vmatpush1.bf16.msra.mxu0 %v5912_v43 }
  0x6f   :  { %v274_v41 = vld [vmem:[#allocation3 + $0x480] sm:$0xff]  ;;  %v5905_v45 = vcombine.high %v146_v39, %v150_v40  ;;  %2710 = vmatprep.subr.bf16.mxu1 %v6041_v38  ;;  %v5904_v51 = vcombine.low %v146_v39, %v150_v40 }
  0x70   :  { %v278_v42 = vld [vmem:[#allocation3 + $0x4a0] sm:$0xff]  ;;  %2711 = vmatpush1.bf16.msra.mxu1 %v6040_v44 }
  0x71   :  { %v6033_v46 = vcombine.high %v274_v41, %v278_v42  ;;  %v138_v47 = vld [vmem:[#allocation3 + $0x40] sm:$0xff]  ;;  %2669 = vmatprep.subr.bf16.mxu0 %v5905_v45  ;;  %v6032_v53 = vcombine.low %v274_v41, %v278_v42 }
  0x72   :  { %v142_v48 = vld [vmem:[#allocation3 + $0x60] sm:$0xff]  ;;  %2670 = vmatpush1.bf16.msra.mxu0 %v5904_v51 }
  0x73   :  { %v266_v49 = vld [vmem:[#allocation3 + $0x440] sm:$0xff]  ;;  %v5897_v54 = vcombine.high %v138_v47, %v142_v48  ;;  %2712 = vmatprep.subr.bf16.mxu1 %v6033_v46  ;;  %v5896_v61 = vcombine.low %v138_v47, %v142_v48 }
  0x74   :  { %v270_v50 = vld [vmem:[#allocation3 + $0x460] sm:$0xff]  ;;  %2713 = vmatpush1.bf16.msra.mxu1 %v6032_v53 }
  0x75   :  { %v130_v52 = vld [vmem:[#allocation3] sm:$0xff]  ;;  %v6025_v56 = vcombine.high %v266_v49, %v270_v50  ;;  %2671 = vmatprep.subr.bf16.mxu0 %v5897_v54  ;;  %v6024_v62 = vcombine.low %v266_v49, %v270_v50 }
  0x76   :  { %v134_v55 = vld [vmem:[#allocation3 + $0x20] sm:$0xff]  ;;  %2672 = vmatpush1.bf16.msra.mxu0 %v5896_v61 }
  0x77   :  { %v7382_v57 = vld [vmem:[%s7603_s0 + $0x4] ss:$28 sps:$4 sm:$0xff]   ;;  %v7387_v60 = vld [vmem:[%s7603_s0 + $0xc] ss:$28 sps:$4 sm:$0xff]   ;;  %v5889_v63 = vcombine.high %v130_v52, %v134_v55  ;;  %2714 = vmatprep.subr.bf16.mxu1 %v6025_v56  ;;  %v5888_v5 = vcombine.low %v130_v52, %v134_v55 }
  0x78   :  { %v258_v58 = vld [vmem:[#allocation3 + $0x400] sm:$0xff]  ;;  %2691 = vmatprep.mubr.bf16.mxu0 %v7382_v57  ;;  %2734 = vmatprep.mubr.bf16.mxu1 %v7387_v60 }
  0x79   :  { %v262_v59 = vld [vmem:[#allocation3 + $0x420] sm:$0xff]  ;;  %2715 = vmatpush1.bf16.msra.mxu1 %v6024_v62  ;;  %2673 = vmatprep.subr.bf16.mxu0 %v5889_v63 }
  0x7a   :  { %v6017_v0 = vcombine.high %v258_v58, %v262_v59  ;;  %v250_v1 = vld [vmem:[#allocation3 + $0x3c0] sm:$0xff]  ;;  %v6016_v6 = vcombine.low %v258_v58, %v262_v59  ;;  %2674 = vmatpush1.bf16.msra.mxu0 %v5888_v5 }
  0x7b   :  { %v254_v2 = vld [vmem:[#allocation3 + $0x3e0] sm:$0xff] }
  0x7c   :  { %v378_v3 = vld [vmem:[#allocation3 + $0x7c0] sm:$0xff]  ;;  %v6009_v7 = vcombine.high %v250_v1, %v254_v2  ;;  %2716 = vmatprep.subr.bf16.mxu1 %v6017_v0  ;;  %v6008_v13 = vcombine.low %v250_v1, %v254_v2 }
  0x7d   :  { %v382_v4 = vld [vmem:[#allocation3 + $0x7e0] sm:$0xff]  ;;  %2717 = vmatpush1.bf16.msra.mxu1 %v6016_v6 }
  0x7e   :  { %v6137_v8 = vcombine.high %v378_v3, %v382_v4  ;;  %v242_v9 = vld [vmem:[#allocation3 + $0x380] sm:$0xff]  ;;  %2675 = vmatprep.subr.bf16.mxu0 %v6009_v7  ;;  %v6136_v14 = vcombine.low %v378_v3, %v382_v4 }
  0x7f   :  { %v246_v10 = vld [vmem:[#allocation3 + $0x3a0] sm:$0xff]  ;;  %2676 = vmatpush2.bf16.msra.mxu0 %v6008_v13 }
  0x80   :  { %v370_v11 = vld [vmem:[#allocation3 + $0x780] sm:$0xff]  ;;  %v6001_v15 = vcombine.high %v242_v9, %v246_v10  ;;  %2718 = vmatprep.subr.bf16.mxu1 %v6137_v8  ;;  %v6000_v21 = vcombine.low %v242_v9, %v246_v10 }
  0x81   :  { %v374_v12 = vld [vmem:[#allocation3 + $0x7a0] sm:$0xff]  ;;  %2719 = vmatpush2.bf16.msra.mxu1 %v6136_v14 }
  0x82   :  { %v6129_v16 = vcombine.high %v370_v11, %v374_v12  ;;  %v234_v17 = vld [vmem:[#allocation3 + $0x340] sm:$0xff]  ;;  %2677 = vmatprep.subr.bf16.mxu0 %v6001_v15  ;;  %v6128_v22 = vcombine.low %v370_v11, %v374_v12 }
  0x83   :  { %v238_v18 = vld [vmem:[#allocation3 + $0x360] sm:$0xff]  ;;  %2678 = vmatpush2.bf16.msra.mxu0 %v6000_v21 }
  0x84   :  { %v362_v19 = vld [vmem:[#allocation3 + $0x740] sm:$0xff]  ;;  %v5993_v23 = vcombine.high %v234_v17, %v238_v18  ;;  %2720 = vmatprep.subr.bf16.mxu1 %v6129_v16  ;;  %v5992_v29 = vcombine.low %v234_v17, %v238_v18 }
  0x85   :  { %v366_v20 = vld [vmem:[#allocation3 + $0x760] sm:$0xff]  ;;  %2721 = vmatpush2.bf16.msra.mxu1 %v6128_v22 }
  0x86   :  { %v6121_v24 = vcombine.high %v362_v19, %v366_v20  ;;  %v226_v25 = vld [vmem:[#allocation3 + $0x300] sm:$0xff]  ;;  %2679 = vmatprep.subr.bf16.mxu0 %v5993_v23  ;;  %v6120_v30 = vcombine.low %v362_v19, %v366_v20 }
  0x87   :  { %v230_v26 = vld [vmem:[#allocation3 + $0x320] sm:$0xff]  ;;  %2680 = vmatpush2.bf16.msra.mxu0 %v5992_v29 }
  0x88   :  { %v354_v27 = vld [vmem:[#allocation3 + $0x700] sm:$0xff]  ;;  %v5985_v31 = vcombine.high %v226_v25, %v230_v26  ;;  %2722 = vmatprep.subr.bf16.mxu1 %v6121_v24  ;;  %v5984_v37 = vcombine.low %v226_v25, %v230_v26  ;;  %v7403_v25 = vld [vmem:[%s7603_s0 + $0x14] ss:$28 sps:$4 sm:$0xff]  }
  0x89   :  { %v358_v28 = vld [vmem:[#allocation3 + $0x720] sm:$0xff]  ;;  %2723 = vmatpush2.bf16.msra.mxu1 %v6120_v30  ;;  %v7304_v30 = vmov 0  }
  0x8a   :  { %v6113_v32 = vcombine.high %v354_v27, %v358_v28  ;;  %v218_v33 = vld [vmem:[#allocation3 + $0x2c0] sm:$0xff]  ;;  %2681 = vmatprep.subr.bf16.mxu0 %v5985_v31  ;;  %v6112_v38 = vcombine.low %v354_v27, %v358_v28 }
  0x8b   :  { %v222_v34 = vld [vmem:[#allocation3 + $0x2e0] sm:$0xff]  ;;  %2682 = vmatpush2.bf16.msra.mxu0 %v5984_v37 }
  0x8c   :  { %v346_v35 = vld [vmem:[#allocation3 + $0x6c0] sm:$0xff]  ;;  %v5977_v39 = vcombine.high %v218_v33, %v222_v34  ;;  %2724 = vmatprep.subr.bf16.mxu1 %v6113_v32  ;;  %v5976_v45 = vcombine.low %v218_v33, %v222_v34  ;;  %v187_v33 = vld [vmem:[#allocation3 + $0x1c8] sm:$0xff] }
  0x8d   :  { %v350_v36 = vld [vmem:[#allocation3 + $0x6e0] sm:$0xff]  ;;  %2725 = vmatpush2.bf16.msra.mxu1 %v6112_v38  ;;  %v191_v34 = vld [vmem:[#allocation3 + $0x1e8] sm:$0xff] }
  0x8e   :  { %v210_v40 = vld [vmem:[#allocation3 + $0x280] sm:$0xff]  ;;  %v6105_v41 = vcombine.high %v346_v35, %v350_v36  ;;  %2683 = vmatprep.subr.bf16.mxu0 %v5977_v39  ;;  %v6104_v46 = vcombine.low %v346_v35, %v350_v36 }
  0x8f   :  { %v214_v42 = vld [vmem:[#allocation3 + $0x2a0] sm:$0xff]  ;;  %2684 = vmatpush2.bf16.msra.mxu0 %v5976_v45  ;;  %v5946_v45 = vcombine.low %v187_v33, %v191_v34 }
  0x90   :  { %v338_v43 = vld [vmem:[#allocation3 + $0x680] sm:$0xff]  ;;  %v5969_v47 = vcombine.high %v210_v40, %v214_v42  ;;  %2726 = vmatprep.subr.bf16.mxu1 %v6105_v41  ;;  %v5968_v53 = vcombine.low %v210_v40, %v214_v42  ;;  %v179_v40 = vld [vmem:[#allocation3 + $0x188] sm:$0xff]  ;;  %v6641_v41 = vld [vmem:[%s7603_s0 + $0x18] ss:$28 sps:$4 sm:$0xff]   ;;  %v5947_v42 = vcombine.high %v187_v33, %v191_v34 }
  0x91   :  { %v342_v44 = vld [vmem:[#allocation3 + $0x6a0] sm:$0xff]  ;;  %2727 = vmatpush2.bf16.msra.mxu1 %v6104_v46 }
  0x92   :  { %v6097_v48 = vcombine.high %v338_v43, %v342_v44  ;;  %v202_v49 = vld [vmem:[#allocation3 + $0x240] sm:$0xff]  ;;  %2685 = vmatprep.subr.bf16.mxu0 %v5969_v47  ;;  %v6096_v54 = vcombine.low %v338_v43, %v342_v44  ;;  %v183_v43 = vld [vmem:[#allocation3 + $0x1a8] sm:$0xff] }
  0x93   :  { %v206_v50 = vld [vmem:[#allocation3 + $0x260] sm:$0xff]  ;;  %2686 = vmatpush2.bf16.msra.mxu0 %v5968_v53  ;;  %v5938_v53 = vcombine.low %v179_v40, %v183_v43 }
  0x94   :  { %v330_v51 = vld [vmem:[#allocation3 + $0x640] sm:$0xff]  ;;  %v5961_v55 = vcombine.high %v202_v49, %v206_v50  ;;  %2728 = vmatprep.subr.bf16.mxu1 %v6097_v48  ;;  %v5960_v63 = vcombine.low %v202_v49, %v206_v50  ;;  %v171_v49 = vld [vmem:[#allocation3 + $0x148] sm:$0xff]  ;;  %v5939_v50 = vcombine.high %v179_v40, %v183_v43 }
  0x95   :  { %v334_v52 = vld [vmem:[#allocation3 + $0x660] sm:$0xff]  ;;  %2729 = vmatpush2.bf16.msra.mxu1 %v6096_v54 }
  0x96   :  { %v6089_v56 = vcombine.high %v330_v51, %v334_v52  ;;  %v194_v58 = vld [vmem:[#allocation3 + $0x200] sm:$0xff]  ;;  %2687 = vmatprep.subr.bf16.mxu0 %v5961_v55  ;;  %v6088_v0 = vcombine.low %v330_v51, %v334_v52  ;;  %v175_v51 = vld [vmem:[#allocation3 + $0x168] sm:$0xff] }
  0x97   :  { %v198_v59 = vld [vmem:[#allocation3 + $0x220] sm:$0xff]  ;;  %2688 = vmatpush2.bf16.msra.mxu0 %v5960_v63  ;;  %v5930_v63 = vcombine.low %v171_v49, %v175_v51 }
  0x98   :  { %v322_v61 = vld [vmem:[#allocation3 + $0x600] sm:$0xff]  ;;  %v5953_v1 = vcombine.high %v194_v58, %v198_v59  ;;  %2730 = vmatprep.subr.bf16.mxu1 %v6089_v56  ;;  %v5952_v7 = vcombine.low %v194_v58, %v198_v59  ;;  %v163_v58 = vld [vmem:[#allocation3 + $0x108] sm:$0xff]  ;;  %v5931_v59 = vcombine.high %v171_v49, %v175_v51 }
  0x99   :  { %v326_v62 = vld [vmem:[#allocation3 + $0x620] sm:$0xff]  ;;  %2731 = vmatpush2.bf16.msra.mxu1 %v6088_v0 }
  0x9a   :  { %v6081_v2 = vcombine.high %v322_v61, %v326_v62  ;;  %v442_v3 = vld [vmem:[#allocation3 + $0x9c0] sm:$0xff]  ;;  %2689 = vmatprep.subr.bf16.mxu0 %v5953_v1  ;;  %v6080_v8 = vcombine.low %v322_v61, %v326_v62  ;;  %v167_v61 = vld [vmem:[#allocation3 + $0x128] sm:$0xff] }
  0x9b   :  { %v446_v4 = vld [vmem:[#allocation3 + $0x9e0] sm:$0xff]  ;;  %2690 = vmatpush2.bf16.msra.mxu0 %v5952_v7  ;;  %v5922_v7 = vcombine.low %v163_v58, %v167_v61 }
  0x9c   :  { %v530_v5 = vld [vmem:[#allocation3 + $0xc80] sm:$0xff]  ;;  %v6201_v9 = vcombine.high %v442_v3, %v446_v4  ;;  %2732 = vmatprep.subr.bf16.mxu1 %v6081_v2  ;;  %v6200_v17 = vcombine.low %v442_v3, %v446_v4  ;;  %v155_v3 = vld [vmem:[#allocation3 + $0xc8] sm:$0xff]  ;;  %v5923_v4 = vcombine.high %v163_v58, %v167_v61 }
  0x9d   :  { %v534_v6 = vld [vmem:[#allocation3 + $0xca0] sm:$0xff]  ;;  %2733 = vmatpush2.bf16.msra.mxu1 %v6080_v8 }
  0x9e   :  { %v6289_v10 = vcombine.high %v530_v5, %v534_v6  ;;  %v434_v11 = vld [vmem:[#allocation3 + $0x980] sm:$0xff]  ;;  %2745 = vmatprep.subr.bf16.mxu0 %v6201_v9  ;;  %v6288_v18 = vcombine.low %v530_v5, %v534_v6  ;;  %v159_v5 = vld [vmem:[#allocation3 + $0xe8] sm:$0xff] }
  0x9f   :  { %v438_v12 = vld [vmem:[#allocation3 + $0x9a0] sm:$0xff] }
  0xa0   :  { %v7394_v13 = vld [vmem:[%s7603_s0] ss:$28 sps:$4 sm:$0xff]   ;;  %v6640_v16 = vld [vmem:[%s7603_s0 + $0x8] ss:$28 sps:$4 sm:$0xff]   ;;  %v6193_v19 = vcombine.high %v434_v11, %v438_v12  ;;  %2798 = vmatprep.subr.bf16.mxu1 %v6289_v10  ;;  %v6192_v26 = vcombine.low %v434_v11, %v438_v12  ;;  %v5915_v11 = vcombine.high %v155_v3, %v159_v5 }
  0xa1   :  { %v522_v14 = vld [vmem:[#allocation3 + $0xc40] sm:$0xff]  ;;  %2692 = vmatmul.mubr.bf16.vlgmr.msra.gmra.mxu0 %v7394_v13  ;;  %2735 = vmatmul.mubr.bf16.vlgmr.msra.gmra.mxu1 %v6640_v16  ;;  %v147_v10 = vld [vmem:[#allocation3 + $0x88] sm:$0xff] }
  0xa2   :  { %v526_v15 = vld [vmem:[#allocation3 + $0xc60] sm:$0xff]  ;;  %2746 = vmatpush1.bf16.msra.mxu0 %v6200_v17  ;;  %2799 = vmatpush1.bf16.msra.mxu1 %v6288_v18  ;;  %v151_v12 = vld [vmem:[#allocation3 + $0xa8] sm:$0xff] }
  0xa3   :  { %v6281_v20 = vcombine.high %v522_v14, %v526_v15  ;;  %v426_v21 = vld [vmem:[#allocation3 + $0x940] sm:$0xff]  ;;  %2747 = vmatprep.subr.bf16.mxu0 %v6193_v19  ;;  %v6280_v27 = vcombine.low %v522_v14, %v526_v15  ;;  %2820 = vmatprep.mubr.bf16.mxu1 %v7304_v30  ;;  %v5914_v15 = vcombine.low %v155_v3, %v159_v5  ;;  %v139_v19 = vld [vmem:[#allocation3 + $0x48] sm:$0xff] }
  0xa4   :  { %v430_v22 = vld [vmem:[#allocation3 + $0x960] sm:$0xff]  ;;  %2777 = vmatprep.mubr.bf16.mxu0 %v7403_v25 }
  0xa5   :  { %v514_v23 = vld [vmem:[#allocation3 + $0xc00] sm:$0xff]  ;;  %v6185_v28 = vcombine.high %v426_v21, %v430_v22  ;;  %2800 = vmatprep.subr.bf16.mxu1 %v6281_v20  ;;  %v6184_v35 = vcombine.low %v426_v21, %v430_v22  ;;  %v5907_v20 = vcombine.high %v147_v10, %v151_v12  ;;  %v143_v21 = vld [vmem:[#allocation3 + $0x68] sm:$0xff] }
  0xa6   :  { %v518_v24 = vld [vmem:[#allocation3 + $0xc20] sm:$0xff]  ;;  %2748 = vmatpush1.bf16.msra.mxu0 %v6192_v26  ;;  %2801 = vmatpush1.bf16.msra.mxu1 %v6280_v27  ;;  %v5898_v33 = vcombine.low %v139_v19, %v143_v21 }
  0xa7   :  { %v6273_v29 = vcombine.high %v514_v23, %v518_v24  ;;  %v418_v31 = vld [vmem:[#allocation3 + $0x900] sm:$0xff]  ;;  %2749 = vmatprep.subr.bf16.mxu0 %v6185_v28  ;;  %v6272_v36 = vcombine.low %v514_v23, %v518_v24  ;;  %v5906_v23 = vcombine.low %v147_v10, %v151_v12  ;;  %v131_v28 = vld [vmem:[#allocation3 + $0x8] sm:$0xff] }
  0xa8   :  { %v422_v32 = vld [vmem:[#allocation3 + $0x920] sm:$0xff]  ;;  %v211_v12 = vld [vmem:[#allocation3 + $0x288] sm:$0xff] }
  0xa9   :  { %v6177_v37 = vcombine.high %v418_v31, %v422_v32  ;;  %v410_v38 = vld [vmem:[#allocation3 + $0x8c0] sm:$0xff]  ;;  %2802 = vmatprep.subr.bf16.mxu1 %v6273_v29  ;;  %v6176_v44 = vcombine.low %v418_v31, %v422_v32  ;;  %v5899_v29 = vcombine.high %v139_v19, %v143_v21  ;;  %v135_v31 = vld [vmem:[#allocation3 + $0x28] sm:$0xff] }
  0xaa   :  { %v414_v39 = vld [vmem:[#allocation3 + $0x8e0] sm:$0xff]  ;;  %2750 = vmatpush1.bf16.msra.mxu0 %v6184_v35  ;;  %2803 = vmatpush1.bf16.msra.mxu1 %v6272_v36 }
  0xab   :  { %2751 = vmatprep.subr.bf16.mxu0 %v6177_v37  ;;  %v6169_v46 = vcombine.high %v410_v38, %v414_v39  ;;  %v402_v47 = vld [vmem:[#allocation3 + $0x880] sm:$0xff]  ;;  %2831 = vmatprep.subr.bf16.mxu1 %v5947_v42  ;;  %v6168_v52 = vcombine.low %v410_v38, %v414_v39  ;;  %v251_v37 = vld [vmem:[#allocation3 + $0x3c8] sm:$0xff]  ;;  %v5891_v38 = vcombine.high %v131_v28, %v135_v31 }
  0xac   :  { %v406_v48 = vld [vmem:[#allocation3 + $0x8a0] sm:$0xff]  ;;  %v255_v39 = vld [vmem:[#allocation3 + $0x3e8] sm:$0xff] }
  0xad   :  { %6296 = vmatmul.mubr.msk.bf16.vlgmr.msra.gmra.mxu1 %vm2655_vm0, %v6641_v41  ;;  %v6161_v54 = vcombine.high %v402_v47, %v406_v48  ;;  %v394_v55 = vld [vmem:[#allocation3 + $0x840] sm:$0xff]  ;;  %v6160_v62 = vcombine.low %v402_v47, %v406_v48  ;;  %v5890_v41 = vcombine.low %v131_v28, %v135_v31  ;;  %v247_v47 = vld [vmem:[#allocation3 + $0x3a8] sm:$0xff]  ;;  %v6010_v49 = vcombine.low %v251_v37, %v255_v39 }
  0xae   :  { %2752 = vmatpush1.bf16.msra.mxu0 %v6176_v44  ;;  %2832 = vmatpush1.bf16.msra.mxu1 %v5946_v45  ;;  %v398_v56 = vld [vmem:[#allocation3 + $0x860] sm:$0xff]  ;;  %v243_v45 = vld [vmem:[#allocation3 + $0x388] sm:$0xff] }
  0xaf   :  { %2753 = vmatprep.subr.bf16.mxu0 %v6169_v46  ;;  %2833 = vmatprep.subr.bf16.mxu1 %v5939_v50  ;;  %v6153_v0 = vcombine.high %v394_v55, %v398_v56  ;;  %v386_v1 = vld [vmem:[#allocation3 + $0x800] sm:$0xff]  ;;  %v6152_v6 = vcombine.low %v394_v55, %v398_v56  ;;  %v6011_v46 = vcombine.high %v251_v37, %v255_v39  ;;  %v239_v55 = vld [vmem:[#allocation3 + $0x368] sm:$0xff] }
  0xb0   :  { %2863 = vmatprep.mubr.bf16.mxu1 %v7382_v57  ;;  %v390_v2 = vld [vmem:[#allocation3 + $0x820] sm:$0xff]  ;;  %v6002_v58 = vcombine.low %v243_v45, %v247_v47 }
  0xb1   :  { %v6145_v8 = vcombine.high %v386_v1, %v390_v2  ;;  %v506_v9 = vld [vmem:[#allocation3 + $0xbc0] sm:$0xff]  ;;  %v6144_v14 = vcombine.low %v386_v1, %v390_v2  ;;  %v231_v1 = vld [vmem:[#allocation3 + $0x328] sm:$0xff] }
  0xb2   :  { %2754 = vmatpush1.bf16.msra.mxu0 %v6168_v52  ;;  %2834 = vmatpush1.bf16.msra.mxu1 %v5938_v53  ;;  %v510_v57 = vld [vmem:[#allocation3 + $0xbe0] sm:$0xff]  ;;  %v235_v53 = vld [vmem:[#allocation3 + $0x348] sm:$0xff] }
  0xb3   :  { %2755 = vmatprep.subr.bf16.mxu0 %v6161_v54  ;;  %2835 = vmatprep.subr.bf16.mxu1 %v5931_v59  ;;  %v6265_v16 = vcombine.high %v506_v9, %v510_v57  ;;  %v498_v17 = vld [vmem:[#allocation3 + $0xb80] sm:$0xff]  ;;  %v6264_v22 = vcombine.low %v506_v9, %v510_v57  ;;  %v6003_v54 = vcombine.high %v243_v45, %v247_v47  ;;  %v223_v9 = vld [vmem:[#allocation3 + $0x2e8] sm:$0xff] }
  0xb4   :  { %v502_v18 = vld [vmem:[#allocation3 + $0xba0] sm:$0xff]  ;;  %v5994_v3 = vcombine.low %v235_v53, %v239_v55 }
  0xb5   :  { %v6257_v24 = vcombine.high %v498_v17, %v502_v18  ;;  %v490_v26 = vld [vmem:[#allocation3 + $0xb40] sm:$0xff]  ;;  %v6256_v32 = vcombine.low %v498_v17, %v502_v18  ;;  %v319_v17 = vld [vmem:[#allocation3 + $0x5e8] sm:$0xff] }
  0xb6   :  { %2756 = vmatpush1.bf16.msra.mxu0 %v6160_v62  ;;  %2836 = vmatpush1.bf16.msra.mxu1 %v5930_v63  ;;  %v494_v27 = vld [vmem:[#allocation3 + $0xb60] sm:$0xff]  ;;  %v227_v63 = vld [vmem:[#allocation3 + $0x308] sm:$0xff] }
  0xb7   :  { %2757 = vmatprep.subr.bf16.mxu0 %v6153_v0  ;;  %2837 = vmatprep.subr.bf16.mxu1 %v5923_v4  ;;  %v6249_v34 = vcombine.high %v490_v26, %v494_v27  ;;  %v482_v35 = vld [vmem:[#allocation3 + $0xb00] sm:$0xff]  ;;  %v6248_v40 = vcombine.low %v490_v26, %v494_v27  ;;  %v5995_v0 = vcombine.high %v235_v53, %v239_v55  ;;  %v311_v27 = vld [vmem:[#allocation3 + $0x5a8] sm:$0xff] }
  0xb8   :  { %v486_v36 = vld [vmem:[#allocation3 + $0xb20] sm:$0xff]  ;;  %v5986_v10 = vcombine.low %v227_v63, %v231_v1  ;;  %v275_v55 = vld [vmem:[#allocation3 + $0x488] sm:$0xff] }
  0xb9   :  { %v6241_v42 = vcombine.high %v482_v35, %v486_v36  ;;  %v474_v43 = vld [vmem:[#allocation3 + $0xac0] sm:$0xff]  ;;  %v6240_v48 = vcombine.low %v482_v35, %v486_v36  ;;  %v299_v35 = vld [vmem:[#allocation3 + $0x548] sm:$0xff] }
  0xba   :  { %2758 = vmatpush1.bf16.msra.mxu0 %v6152_v6  ;;  %2838 = vmatpush1.bf16.msra.mxu1 %v5922_v7  ;;  %v478_v44 = vld [vmem:[#allocation3 + $0xae0] sm:$0xff]  ;;  %v219_v7 = vld [vmem:[#allocation3 + $0x2c8] sm:$0xff] }
  0xbb   :  { %2759 = vmatprep.subr.bf16.mxu0 %v6145_v8  ;;  %2839 = vmatprep.subr.bf16.mxu1 %v5915_v11  ;;  %v6233_v50 = vcombine.high %v474_v43, %v478_v44  ;;  %v466_v51 = vld [vmem:[#allocation3 + $0xa80] sm:$0xff]  ;;  %v6232_v56 = vcombine.low %v474_v43, %v478_v44  ;;  %v5987_v8 = vcombine.high %v227_v63, %v231_v1  ;;  %v303_v36 = vld [vmem:[#allocation3 + $0x568] sm:$0xff] }
  0xbc   :  { %v470_v52 = vld [vmem:[#allocation3 + $0xaa0] sm:$0xff]  ;;  %v5978_v19 = vcombine.low %v219_v7, %v223_v9  ;;  %v6059_v39 = vcombine.high %v299_v35, %v303_v36  ;;  %v447_v44 = vld [vmem:[#allocation3 + $0x9e8] sm:$0xff]  ;;  %v6058_v45 = vcombine.low %v299_v35, %v303_v36 }
  0xbd   :  { %v6225_v59 = vcombine.high %v466_v51, %v470_v52  ;;  %v458_v61 = vld [vmem:[#allocation3 + $0xa40] sm:$0xff]  ;;  %v6224_v2 = vcombine.low %v466_v51, %v470_v52  ;;  %v439_v51 = vld [vmem:[#allocation3 + $0x9a8] sm:$0xff] }
  0xbe   :  { %2760 = vmatpush1.bf16.msra.mxu0 %v6144_v14  ;;  %2840 = vmatpush1.bf16.msra.mxu1 %v5914_v15  ;;  %v462_v62 = vld [vmem:[#allocation3 + $0xa60] sm:$0xff]  ;;  %v215_v14 = vld [vmem:[#allocation3 + $0x2a8] sm:$0xff] }
  0xbf   :  { %2761 = vmatprep.subr.bf16.mxu0 %v6265_v16  ;;  %2841 = vmatprep.subr.bf16.mxu1 %v5907_v20  ;;  %v6217_v4 = vcombine.high %v458_v61, %v462_v62  ;;  %v450_v5 = vld [vmem:[#allocation3 + $0xa00] sm:$0xff]  ;;  %v6216_v57 = vcombine.low %v458_v61, %v462_v62  ;;  %v315_v15 = vld [vmem:[#allocation3 + $0x5c8] sm:$0xff]  ;;  %v5979_v16 = vcombine.high %v219_v7, %v223_v9 }
  0xc0   :  { %v454_v6 = vld [vmem:[#allocation3 + $0xa20] sm:$0xff]  ;;  %v7415_v20 = vld [vmem:[%s7603_s0 + $0x10] ss:$28 sps:$4 sm:$0xff]   ;;  %v6075_v21 = vcombine.high %v315_v15, %v319_v17  ;;  %v5971_v26 = vcombine.high %v211_v12, %v215_v14  ;;  %v6074_v28 = vcombine.low %v315_v15, %v319_v17 }
  0xc1   :  { %v6209_v11 = vcombine.high %v450_v5, %v454_v6  ;;  %v6208_v18 = vcombine.low %v450_v5, %v454_v6  ;;  %v431_v61 = vld [vmem:[#allocation3 + $0x968] sm:$0xff] }
  0xc2   :  { %2762 = vmatpush2.bf16.msra.mxu0 %v6264_v22  ;;  %2842 = vmatpush1.bf16.msra.mxu1 %v5906_v23  ;;  %v203_v22 = vld [vmem:[#allocation3 + $0x248] sm:$0xff] }
  0xc3   :  { %2763 = vmatprep.subr.bf16.mxu0 %v6257_v24  ;;  %2843 = vmatprep.subr.bf16.mxu1 %v5899_v29  ;;  %v207_v23 = vld [vmem:[#allocation3 + $0x268] sm:$0xff]  ;;  %v5970_v29 = vcombine.low %v211_v12, %v215_v14 }
  0xc4   :  { %v307_v24 = vld [vmem:[#allocation3 + $0x588] sm:$0xff] }
  0xc5   :  { %v6067_v31 = vcombine.high %v307_v24, %v311_v27  ;;  %v6066_v37 = vcombine.low %v307_v24, %v311_v27  ;;  %v267_v1 = vld [vmem:[#allocation3 + $0x448] sm:$0xff] }
  0xc6   :  { %2764 = vmatpush2.bf16.msra.mxu0 %v6256_v32  ;;  %2844 = vmatpush1.bf16.msra.mxu1 %v5898_v33  ;;  %v195_v32 = vld [vmem:[#allocation3 + $0x208] sm:$0xff] }
  0xc7   :  { %2765 = vmatprep.subr.bf16.mxu0 %v6249_v34  ;;  %2845 = vmatprep.subr.bf16.mxu1 %v5891_v38  ;;  %v199_v33 = vld [vmem:[#allocation3 + $0x228] sm:$0xff]  ;;  %v5963_v34 = vcombine.high %v203_v22, %v207_v23  ;;  %v5962_v38 = vcombine.low %v203_v22, %v207_v23 }
  0xc8   :  { %v5955_v43 = vcombine.high %v195_v32, %v199_v33  ;;  %v423_v5 = vld [vmem:[#allocation3 + $0x928] sm:$0xff] }
  0xc9   :  { %v263_v9 = vld [vmem:[#allocation3 + $0x428] sm:$0xff] }
  0xca   :  { %2766 = vmatpush2.bf16.msra.mxu0 %v6248_v40  ;;  %2846 = vmatpush1.bf16.msra.mxu1 %v5890_v41  ;;  %v291_v40 = vld [vmem:[#allocation3 + $0x508] sm:$0xff] }
  0xcb   :  { %2767 = vmatprep.subr.bf16.mxu0 %v6241_v42  ;;  %2847 = vmatprep.subr.bf16.mxu1 %v6011_v46  ;;  %v295_v41 = vld [vmem:[#allocation3 + $0x528] sm:$0xff]  ;;  %v5954_v46 = vcombine.low %v195_v32, %v199_v33 }
  0xcc   :  { %v443_v42 = vld [vmem:[#allocation3 + $0x9c8] sm:$0xff]  ;;  %v6051_v47 = vcombine.high %v291_v40, %v295_v41  ;;  %v6050_v52 = vcombine.low %v291_v40, %v295_v41 }
  0xcd   :  { %v6202_v53 = vcombine.low %v443_v42, %v447_v44  ;;  %v403_v17 = vld [vmem:[#allocation3 + $0x888] sm:$0xff] }
  0xce   :  { %2768 = vmatpush2.bf16.msra.mxu0 %v6240_v48  ;;  %2848 = vmatpush2.bf16.msra.mxu1 %v6010_v49  ;;  %v283_v48 = vld [vmem:[#allocation3 + $0x4c8] sm:$0xff] }
  0xcf   :  { %2769 = vmatprep.subr.bf16.mxu0 %v6233_v50  ;;  %2849 = vmatprep.subr.bf16.mxu1 %v6003_v54  ;;  %v287_v49 = vld [vmem:[#allocation3 + $0x4e8] sm:$0xff] }
  0xd0   :  { %v435_v50 = vld [vmem:[#allocation3 + $0x988] sm:$0xff]  ;;  %v6043_v54 = vcombine.high %v283_v48, %v287_v49  ;;  %v6042_v62 = vcombine.low %v283_v48, %v287_v49 }
  0xd1   :  { %v6194_v63 = vcombine.low %v435_v50, %v439_v51  ;;  %v371_v24 = vld [vmem:[#allocation3 + $0x788] sm:$0xff] }
  0xd2   :  { %2770 = vmatpush2.bf16.msra.mxu0 %v6232_v56  ;;  %2850 = vmatpush2.bf16.msra.mxu1 %v6002_v58  ;;  %v279_v56 = vld [vmem:[#allocation3 + $0x4a8] sm:$0xff] }
  0xd3   :  { %2771 = vmatprep.subr.bf16.mxu0 %v6225_v59  ;;  %2851 = vmatprep.subr.bf16.mxu1 %v5995_v0  ;;  %v427_v58 = vld [vmem:[#allocation3 + $0x948] sm:$0xff]  ;;  %v6195_v59 = vcombine.high %v435_v50, %v439_v51  ;;  %v6035_v0 = vcombine.high %v275_v55, %v279_v56  ;;  %v6034_v6 = vcombine.low %v275_v55, %v279_v56 }
  0xd4   :  { %v6186_v7 = vcombine.low %v427_v58, %v431_v61  ;;  %v395_v27 = vld [vmem:[#allocation3 + $0x848] sm:$0xff] }
  0xd5   :  { %v367_v35 = vld [vmem:[#allocation3 + $0x768] sm:$0xff] }
  0xd6   :  { %2772 = vmatpush2.bf16.msra.mxu0 %v6224_v2  ;;  %2852 = vmatpush2.bf16.msra.mxu1 %v5994_v3  ;;  %v271_v2 = vld [vmem:[#allocation3 + $0x468] sm:$0xff] }
  0xd7   :  { %2773 = vmatprep.subr.bf16.mxu0 %v6217_v4  ;;  %2853 = vmatprep.subr.bf16.mxu1 %v5987_v8  ;;  %v419_v3 = vld [vmem:[#allocation3 + $0x908] sm:$0xff]  ;;  %v6187_v4 = vcombine.high %v427_v58, %v431_v61  ;;  %v6026_v12 = vcombine.low %v267_v1, %v271_v2 }
  0xd8   :  { %v259_v8 = vld [vmem:[#allocation3 + $0x408] sm:$0xff]  ;;  %v6178_v14 = vcombine.low %v419_v3, %v423_v5 }
  0xd9   :  { %v6019_v15 = vcombine.high %v259_v8, %v263_v9  ;;  %v387_v36 = vld [vmem:[#allocation3 + $0x808] sm:$0xff] }
  0xda   :  { %2774 = vmatpush2.bf16.msra.mxu0 %v6216_v57  ;;  %2854 = vmatpush2.bf16.msra.mxu1 %v5986_v10  ;;  %v411_v57 = vld [vmem:[#allocation3 + $0x8c8] sm:$0xff]  ;;  %v6179_v10 = vcombine.high %v419_v3, %v423_v5 }
  0xdb   :  { %2775 = vmatprep.subr.bf16.mxu0 %v6209_v11  ;;  %2855 = vmatprep.subr.bf16.mxu1 %v5979_v16  ;;  %v415_v11 = vld [vmem:[#allocation3 + $0x8e8] sm:$0xff] }
  0xdc   :  { %v379_v16 = vld [vmem:[#allocation3 + $0x7c8] sm:$0xff]  ;;  %v6170_v22 = vcombine.low %v411_v57, %v415_v11 }
  0xdd   :  { %v347_v50 = vld [vmem:[#allocation3 + $0x6c8] sm:$0xff] }
  0xde   :  { %2776 = vmatpush2.bf16.msra.mxu0 %v6208_v18  ;;  %2856 = vmatpush2.bf16.msra.mxu1 %v5978_v19  ;;  %v6171_v18 = vcombine.high %v411_v57, %v415_v11  ;;  %v407_v19 = vld [vmem:[#allocation3 + $0x8a8] sm:$0xff] }
  0xdf   :  { %2874 = vmatprep.subr.bf16.mxu0 %v6075_v21  ;;  %2857 = vmatprep.subr.bf16.mxu1 %v5971_v26  ;;  %v6018_v21 = vcombine.low %v259_v8, %v263_v9  ;;  %v375_v26 = vld [vmem:[#allocation3 + $0x7a8] sm:$0xff]  ;;  %v6162_v32 = vcombine.low %v403_v17, %v407_v19 }
  0xe0   :  { %v6131_v33 = vcombine.high %v371_v24, %v375_v26  ;;  %v499_v51 = vld [vmem:[#allocation3 + $0xb88] sm:$0xff] }
  0xe1   :  { %2778 = vmatmul.mubr.bf16.vlgmr.msra.gmra.mxu0 %v7415_v20  ;;  %v339_v58 = vld [vmem:[#allocation3 + $0x688] sm:$0xff] }
  0xe2   :  { %2875 = vmatpush1.bf16.msra.mxu0 %v6074_v28  ;;  %2906 = vmatprep.mubr.bf16.mxu0 %v7387_v60  ;;  %v6203_v60 = vcombine.high %v443_v42, %v447_v44  ;;  %v6163_v28 = vcombine.high %v403_v17, %v407_v19  ;;  %v355_v42 = vld [vmem:[#allocation3 + $0x708] sm:$0xff] }
  0xe3   :  { %2858 = vmatpush2.bf16.msra.mxu1 %v5970_v29  ;;  %2876 = vmatprep.subr.bf16.mxu0 %v6067_v31  ;;  %v399_v29 = vld [vmem:[#allocation3 + $0x868] sm:$0xff] }
  0xe4   :  { %2859 = vmatprep.subr.bf16.mxu1 %v5963_v34  ;;  %v363_v34 = vld [vmem:[#allocation3 + $0x748] sm:$0xff]  ;;  %v6154_v40 = vcombine.low %v395_v27, %v399_v29 }
  0xe5   :  { %v6123_v41 = vcombine.high %v363_v34, %v367_v35  ;;  %v507_v44 = vld [vmem:[#allocation3 + $0xbc8] sm:$0xff] }
  0xe6   :  { %2877 = vmatpush1.bf16.msra.mxu0 %v6066_v37  ;;  %v6155_v37 = vcombine.high %v395_v27, %v399_v29  ;;  %v491_v61 = vld [vmem:[#allocation3 + $0xb48] sm:$0xff] }
  0xe7   :  { %2860 = vmatpush2.bf16.msra.mxu1 %v5962_v38  ;;  %2878 = vmatprep.subr.bf16.mxu0 %v6059_v39  ;;  %v391_v38 = vld [vmem:[#allocation3 + $0x828] sm:$0xff]  ;;  %v6130_v39 = vcombine.low %v371_v24, %v375_v26 }
  0xe8   :  { %2861 = vmatprep.subr.bf16.mxu1 %v5955_v43  ;;  %v359_v43 = vld [vmem:[#allocation3 + $0x728] sm:$0xff]  ;;  %v6146_v48 = vcombine.low %v387_v36, %v391_v38 }
  0xe9   :  { %v6115_v49 = vcombine.high %v355_v42, %v359_v43  ;;  %v331_v3 = vld [vmem:[#allocation3 + $0x648] sm:$0xff] }
  0xea   :  { %2879 = vmatpush1.bf16.msra.mxu0 %v6058_v45  ;;  %v6147_v45 = vcombine.high %v387_v36, %v391_v38  ;;  %v483_v5 = vld [vmem:[#allocation3 + $0xb08] sm:$0xff] }
  0xeb   :  { %2862 = vmatpush2.bf16.msra.mxu1 %v5954_v46  ;;  %2880 = vmatprep.subr.bf16.mxu0 %v6051_v47  ;;  %v511_v46 = vld [vmem:[#allocation3 + $0xbe8] sm:$0xff]  ;;  %v6122_v47 = vcombine.low %v363_v34, %v367_v35 }
  0xec   :  { %2917 = vmatprep.subr.bf16.mxu1 %v6203_v60  ;;  %v351_v60 = vld [vmem:[#allocation3 + $0x6e8] sm:$0xff]  ;;  %v6266_v55 = vcombine.low %v507_v44, %v511_v46 }
  0xed   :  { %v6107_v56 = vcombine.high %v347_v50, %v351_v60  ;;  %v323_v57 = vld [vmem:[#allocation3 + $0x608] sm:$0xff] }
  0xee   :  { %2864 = vmatmul.mubr.bf16.vlgmr.msra.gmra.mxu1 %v7394_v13  ;;  %2881 = vmatpush1.bf16.msra.mxu0 %v6050_v52  ;;  %v6027_v13 = vcombine.high %v267_v1, %v271_v2  ;;  %v6267_v52 = vcombine.high %v507_v44, %v511_v46  ;;  %v475_v11 = vld [vmem:[#allocation3 + $0xac8] sm:$0xff]  ;;  %v192_v46 = vld [vmem:[#allocation3 + $0x1f0] sm:$0xff] }
  0xef   :  { %2918 = vmatpush1.bf16.msra.mxu1 %v6202_v53  ;;  %2882 = vmatprep.subr.bf16.mxu0 %v6043_v54  ;;  %v503_v53 = vld [vmem:[#allocation3 + $0xba8] sm:$0xff]  ;;  %v6114_v54 = vcombine.low %v355_v42, %v359_v43 }
  0xf0   :  { %2919 = vmatprep.subr.bf16.mxu1 %v6195_v59  ;;  %2949 = vmatprep.mubr.bf16.mxu1 %v7403_v25  ;;  %v383_v25 = vld [vmem:[#allocation3 + $0x7e8] sm:$0xff]  ;;  %v6258_v1 = vcombine.low %v499_v51, %v503_v53 }
  0xf1   :  { %v6139_v23 = vcombine.high %v379_v16, %v383_v25  ;;  %v6138_v31 = vcombine.low %v379_v16, %v383_v25  ;;  %v343_v59 = vld [vmem:[#allocation3 + $0x6a8] sm:$0xff] }
  0xf2   :  { %2883 = vmatpush1.bf16.msra.mxu0 %v6042_v62  ;;  %v6259_v62 = vcombine.high %v499_v51, %v503_v53  ;;  %v6099_v2 = vcombine.high %v339_v58, %v343_v59  ;;  %v467_v17 = vld [vmem:[#allocation3 + $0xa88] sm:$0xff]  ;;  %v184_v53 = vld [vmem:[#allocation3 + $0x1b0] sm:$0xff] }
  0xf3   :  { %2920 = vmatpush1.bf16.msra.mxu1 %v6194_v63  ;;  %2884 = vmatprep.subr.bf16.mxu0 %v6035_v0  ;;  %v495_v63 = vld [vmem:[#allocation3 + $0xb68] sm:$0xff]  ;;  %v6106_v0 = vcombine.low %v347_v50, %v351_v60 }
  0xf4   :  { %2921 = vmatprep.subr.bf16.mxu1 %v6187_v4  ;;  %v335_v4 = vld [vmem:[#allocation3 + $0x668] sm:$0xff]  ;;  %v6250_v8 = vcombine.low %v491_v61, %v495_v63 }
  0xf5   :  { %v6091_v9 = vcombine.high %v331_v3, %v335_v4  ;;  %v531_v19 = vld [vmem:[#allocation3 + $0xc88] sm:$0xff] }
  0xf6   :  { %2885 = vmatpush1.bf16.msra.mxu0 %v6034_v6  ;;  %v6251_v6 = vcombine.high %v491_v61, %v495_v63  ;;  %v459_v27 = vld [vmem:[#allocation3 + $0xa48] sm:$0xff]  ;;  %v176_v63 = vld [vmem:[#allocation3 + $0x170] sm:$0xff] }
  0xf7   :  { %2922 = vmatpush1.bf16.msra.mxu1 %v6186_v7  ;;  %2886 = vmatprep.subr.bf16.mxu0 %v6027_v13  ;;  %v487_v7 = vld [vmem:[#allocation3 + $0xb28] sm:$0xff]  ;;  %v6098_v13 = vcombine.low %v339_v58, %v343_v59 }
  0xf8   :  { %2923 = vmatprep.subr.bf16.mxu1 %v6179_v10  ;;  %v327_v10 = vld [vmem:[#allocation3 + $0x628] sm:$0xff]  ;;  %v6242_v16 = vcombine.low %v483_v5, %v487_v7 }
  0xf9   :  { %v6083_v25 = vcombine.high %v323_v57, %v327_v10  ;;  %v523_v29 = vld [vmem:[#allocation3 + $0xc48] sm:$0xff] }
  0xfa   :  { %2887 = vmatpush1.bf16.msra.mxu0 %v6026_v12  ;;  %v6243_v12 = vcombine.high %v483_v5, %v487_v7  ;;  %v451_v36 = vld [vmem:[#allocation3 + $0xa08] sm:$0xff]  ;;  %v164_v7 = vld [vmem:[#allocation3 + $0x110] sm:$0xff] }
  0xfb   :  { %2924 = vmatpush1.bf16.msra.mxu1 %v6178_v14  ;;  %2888 = vmatprep.subr.bf16.mxu0 %v6019_v15  ;;  %v479_v14 = vld [vmem:[#allocation3 + $0xae8] sm:$0xff]  ;;  %v6090_v15 = vcombine.low %v331_v3, %v335_v4  ;;  %v7431_v3 = vld [vmem:[%s7603_s0 + $0x18] ss:$28 sps:$4 sm:$0xff]  }
  0xfc   :  { %2925 = vmatprep.subr.bf16.mxu1 %v6171_v18  ;;  %v471_v18 = vld [vmem:[#allocation3 + $0xaa8] sm:$0xff]  ;;  %v6234_v24 = vcombine.low %v475_v11, %v479_v14 }
  0xfd   :  { %v6226_v34 = vcombine.low %v467_v17, %v471_v18  ;;  %v515_v38 = vld [vmem:[#allocation3 + $0xc08] sm:$0xff] }
  0xfe   :  { %2889 = vmatpush1.bf16.msra.mxu0 %v6018_v21  ;;  %v6235_v21 = vcombine.high %v475_v11, %v479_v14 }
  0xff   :  { %2926 = vmatpush1.bf16.msra.mxu1 %v6170_v22  ;;  %2890 = vmatprep.subr.bf16.mxu0 %v6139_v23  ;;  %v535_v22 = vld [vmem:[#allocation3 + $0xca8] sm:$0xff]  ;;  %v6082_v23 = vcombine.low %v323_v57, %v327_v10  ;;  %v296_v57 = vld [vmem:[#allocation3 + $0x530] sm:$0xff]  ;;  %v7439_v10 = vld [vmem:[%s7603_s0 + $0x4] ss:$28 sps:$4 sm:$0xff]  }
 0x100   :  { %2927 = vmatprep.subr.bf16.mxu1 %v6163_v28  ;;  %v6291_v26 = vcombine.high %v531_v19, %v535_v22  ;;  %v463_v28 = vld [vmem:[#allocation3 + $0xa68] sm:$0xff] }
 0x101   :  { %v6218_v43 = vcombine.low %v459_v27, %v463_v28 }
 0x102   :  { %2891 = vmatpush2.bf16.msra.mxu0 %v6138_v31  ;;  %v6227_v31 = vcombine.high %v467_v17, %v471_v18  ;;  %v288_v18 = vld [vmem:[#allocation3 + $0x4f0] sm:$0xff] }
 0x103   :  { %2928 = vmatpush1.bf16.msra.mxu1 %v6162_v32  ;;  %2892 = vmatprep.subr.bf16.mxu0 %v6131_v33  ;;  %v527_v32 = vld [vmem:[#allocation3 + $0xc68] sm:$0xff]  ;;  %v6290_v33 = vcombine.low %v531_v19, %v535_v22 }
 0x104   :  { %2929 = vmatprep.subr.bf16.mxu1 %v6155_v37  ;;  %v6283_v35 = vcombine.high %v523_v29, %v527_v32  ;;  %v455_v37 = vld [vmem:[#allocation3 + $0xa28] sm:$0xff]  ;;  %v6282_v42 = vcombine.low %v523_v29, %v527_v32 }
 0x105   :  { %v6210_v60 = vcombine.low %v451_v36, %v455_v37 }
 0x106   :  { %2893 = vmatpush2.bf16.msra.mxu0 %v6130_v39  ;;  %v6219_v39 = vcombine.high %v459_v27, %v463_v28  ;;  %v280_v28 = vld [vmem:[#allocation3 + $0x4b0] sm:$0xff] }
 0x107   :  { %2930 = vmatpush1.bf16.msra.mxu1 %v6154_v40  ;;  %2894 = vmatprep.subr.bf16.mxu0 %v6123_v41  ;;  %v519_v40 = vld [vmem:[#allocation3 + $0xc28] sm:$0xff] }
 0x108   :  { %2931 = vmatprep.subr.bf16.mxu1 %v6147_v45  ;;  %v7424_v41 = vld [vmem:[%s7603_s0 + $0x8] ss:$28 sps:$4 sm:$0xff]   ;;  %v6275_v44 = vcombine.high %v515_v38, %v519_v40  ;;  %v188_v45 = vld [vmem:[#allocation3 + $0x1d0] sm:$0xff]  ;;  %v6274_v50 = vcombine.low %v515_v38, %v519_v40 }
 0x109   :  { %v5949_v51 = vcombine.high %v188_v45, %v192_v46  ;;  %v5948_v58 = vcombine.low %v188_v45, %v192_v46  ;;  %v264_v46 = vld [vmem:[#allocation3 + $0x430] sm:$0xff] }
 0x10a   :  { %2895 = vmatpush2.bf16.msra.mxu0 %v6122_v47  ;;  %v316_v47 = vld [vmem:[#allocation3 + $0x5d0] sm:$0xff] }
 0x10b   :  { %2932 = vmatpush1.bf16.msra.mxu1 %v6146_v48  ;;  %2896 = vmatprep.subr.bf16.mxu0 %v6115_v49  ;;  %v6211_v48 = vcombine.high %v451_v36, %v455_v37  ;;  %v320_v49 = vld [vmem:[#allocation3 + $0x5f0] sm:$0xff] }
 0x10c   :  { %2933 = vmatprep.subr.bf16.mxu1 %v6267_v52  ;;  %v180_v52 = vld [vmem:[#allocation3 + $0x190] sm:$0xff]  ;;  %v6076_v59 = vcombine.low %v316_v47, %v320_v49 }
 0x10d   :  { %v5941_v61 = vcombine.high %v180_v52, %v184_v53  ;;  %v5940_v4 = vcombine.low %v180_v52, %v184_v53  ;;  %v272_v37 = vld [vmem:[#allocation3 + $0x470] sm:$0xff] }
 0x10e   :  { %2897 = vmatpush2.bf16.msra.mxu0 %v6114_v54  ;;  %v308_v54 = vld [vmem:[#allocation3 + $0x590] sm:$0xff] }
 0x10f   :  { %2934 = vmatpush2.bf16.msra.mxu1 %v6266_v55  ;;  %2898 = vmatprep.subr.bf16.mxu0 %v6107_v56  ;;  %v6077_v55 = vcombine.high %v316_v47, %v320_v49  ;;  %v312_v56 = vld [vmem:[#allocation3 + $0x5b0] sm:$0xff] }
 0x110   :  { %2935 = vmatprep.subr.bf16.mxu1 %v6259_v62  ;;  %v172_v62 = vld [vmem:[#allocation3 + $0x150] sm:$0xff]  ;;  %v6068_v5 = vcombine.low %v308_v54, %v312_v56 }
 0x111   :  { %v5932_v11 = vcombine.low %v172_v62, %v176_v63  ;;  %v384_v53 = vld [vmem:[#allocation3 + $0x7f0] sm:$0xff] }
 0x112   :  { %2899 = vmatpush2.bf16.msra.mxu0 %v6106_v0  ;;  %v300_v0 = vld [vmem:[#allocation3 + $0x550] sm:$0xff] }
 0x113   :  { %2936 = vmatpush2.bf16.msra.mxu1 %v6258_v1  ;;  %2900 = vmatprep.subr.bf16.mxu0 %v6099_v2  ;;  %v6069_v1 = vcombine.high %v308_v54, %v312_v56  ;;  %v304_v2 = vld [vmem:[#allocation3 + $0x570] sm:$0xff] }
 0x114   :  { %2937 = vmatprep.subr.bf16.mxu1 %v6251_v6  ;;  %v5933_v6 = vcombine.high %v172_v62, %v176_v63  ;;  %v372_v62 = vld [vmem:[#allocation3 + $0x790] sm:$0xff] }
 0x115   :  { %v376_v63 = vld [vmem:[#allocation3 + $0x7b0] sm:$0xff] }
 0x116   :  { %2901 = vmatpush2.bf16.msra.mxu0 %v6098_v13  ;;  %v168_v13 = vld [vmem:[#allocation3 + $0x130] sm:$0xff] }
 0x117   :  { %2938 = vmatpush2.bf16.msra.mxu1 %v6250_v8  ;;  %2902 = vmatprep.subr.bf16.mxu0 %v6091_v9  ;;  %v292_v8 = vld [vmem:[#allocation3 + $0x510] sm:$0xff]  ;;  %v6061_v9 = vcombine.high %v300_v0, %v304_v2  ;;  %v5925_v14 = vcombine.high %v164_v7, %v168_v13  ;;  %v5924_v19 = vcombine.low %v164_v7, %v168_v13 }
 0x118   :  { %2939 = vmatprep.subr.bf16.mxu1 %v6243_v12  ;;  %v6060_v12 = vcombine.low %v300_v0, %v304_v2  ;;  %v6053_v17 = vcombine.high %v292_v8, %v296_v57  ;;  %v364_v7 = vld [vmem:[#allocation3 + $0x750] sm:$0xff] }
 0x119   :  { %v368_v13 = vld [vmem:[#allocation3 + $0x770] sm:$0xff] }
 0x11a   :  { %2903 = vmatpush2.bf16.msra.mxu0 %v6090_v15  ;;  %v156_v15 = vld [vmem:[#allocation3 + $0xd0] sm:$0xff] }
 0x11b   :  { %2940 = vmatpush2.bf16.msra.mxu1 %v6242_v16  ;;  %2904 = vmatprep.subr.bf16.mxu0 %v6083_v25  ;;  %v160_v16 = vld [vmem:[#allocation3 + $0xf0] sm:$0xff] }
 0x11c   :  { %2941 = vmatprep.subr.bf16.mxu1 %v6235_v21  ;;  %v284_v25 = vld [vmem:[#allocation3 + $0x4d0] sm:$0xff]  ;;  %v6052_v21 = vcombine.low %v292_v8, %v296_v57  ;;  %v5917_v22 = vcombine.high %v156_v15, %v160_v16  ;;  %v5916_v29 = vcombine.low %v156_v15, %v160_v16 }
 0x11d   :  { %v6045_v27 = vcombine.high %v284_v25, %v288_v18  ;;  %v356_v15 = vld [vmem:[#allocation3 + $0x710] sm:$0xff] }
 0x11e   :  { %2905 = vmatpush2.bf16.msra.mxu0 %v6082_v23  ;;  %v148_v23 = vld [vmem:[#allocation3 + $0x90] sm:$0xff] }
 0x11f   :  { %2942 = vmatpush2.bf16.msra.mxu1 %v6234_v24  ;;  %2970 = vmatprep.subr.bf16.mxu0 %v6291_v26  ;;  %v152_v24 = vld [vmem:[#allocation3 + $0xb0] sm:$0xff] }
 0x120   :  { %2943 = vmatprep.subr.bf16.mxu1 %v6227_v31  ;;  %v276_v26 = vld [vmem:[#allocation3 + $0x490] sm:$0xff]  ;;  %v6044_v31 = vcombine.low %v284_v25, %v288_v18  ;;  %v5909_v32 = vcombine.high %v148_v23, %v152_v24  ;;  %v5908_v38 = vcombine.low %v148_v23, %v152_v24  ;;  %v6124_v18 = vcombine.low %v364_v7, %v368_v13 }
 0x121   :  { %2907 = vmatmul.mubr.bf16.vlgmr.msra.gmra.mxu0 %v7424_v41  ;;  %v6037_v36 = vcombine.high %v276_v26, %v280_v28  ;;  %v360_v16 = vld [vmem:[#allocation3 + $0x730] sm:$0xff] }
 0x122   :  { %2971 = vmatpush1.bf16.msra.mxu0 %v6290_v33  ;;  %2992 = vmatprep.mubr.bf16.mxu0 %v7304_v30  ;;  %v140_v33 = vld [vmem:[#allocation3 + $0x50] sm:$0xff] }
 0x123   :  { %2944 = vmatpush2.bf16.msra.mxu1 %v6226_v34  ;;  %2972 = vmatprep.subr.bf16.mxu0 %v6283_v35  ;;  %v144_v34 = vld [vmem:[#allocation3 + $0x70] sm:$0xff] }
 0x124   :  { %2945 = vmatprep.subr.bf16.mxu1 %v6219_v39  ;;  %v268_v35 = vld [vmem:[#allocation3 + $0x450] sm:$0xff]  ;;  %v6036_v39 = vcombine.low %v276_v26, %v280_v28  ;;  %v5901_v40 = vcombine.high %v140_v33, %v144_v34  ;;  %v5900_v47 = vcombine.low %v140_v33, %v144_v34 }
 0x125   :  { %v6029_v45 = vcombine.high %v268_v35, %v272_v37  ;;  %v224_v23 = vld [vmem:[#allocation3 + $0x2f0] sm:$0xff] }
 0x126   :  { %2973 = vmatpush1.bf16.msra.mxu0 %v6282_v42  ;;  %v132_v42 = vld [vmem:[#allocation3 + $0x10] sm:$0xff] }
 0x127   :  { %2946 = vmatpush2.bf16.msra.mxu1 %v6218_v43  ;;  %2974 = vmatprep.subr.bf16.mxu0 %v6275_v44  ;;  %v136_v43 = vld [vmem:[#allocation3 + $0x30] sm:$0xff] }
 0x128   :  { %2947 = vmatprep.subr.bf16.mxu1 %v6211_v48  ;;  %v260_v44 = vld [vmem:[#allocation3 + $0x410] sm:$0xff]  ;;  %v6028_v48 = vcombine.low %v268_v35, %v272_v37  ;;  %v5893_v49 = vcombine.high %v132_v42, %v136_v43  ;;  %v5892_v54 = vcombine.low %v132_v42, %v136_v43 }
 0x129   :  { %v6021_v52 = vcombine.high %v260_v44, %v264_v46  ;;  %v348_v24 = vld [vmem:[#allocation3 + $0x6d0] sm:$0xff] }
 0x12a   :  { %2975 = vmatpush1.bf16.msra.mxu0 %v6274_v50  ;;  %v252_v50 = vld [vmem:[#allocation3 + $0x3d0] sm:$0xff] }
 0x12b   :  { %2948 = vmatpush2.bf16.msra.mxu1 %v6210_v60  ;;  %3003 = vmatprep.subr.bf16.mxu0 %v5949_v51  ;;  %v256_v60 = vld [vmem:[#allocation3 + $0x3f0] sm:$0xff] }
 0x12c   :  { %3046 = vmatprep.subr.bf16.mxu1 %v6077_v55  ;;  %v380_v51 = vld [vmem:[#allocation3 + $0x7d0] sm:$0xff]  ;;  %v6020_v55 = vcombine.low %v260_v44, %v264_v46  ;;  %v6013_v56 = vcombine.high %v252_v50, %v256_v60  ;;  %v6012_v0 = vcombine.low %v252_v50, %v256_v60 }
 0x12d   :  { %6297 = vmatmul.mubr.msk.bf16.vlgmr.msra.gmra.mxu0 %vm2655_vm0, %v7431_v3  ;;  %v352_v26 = vld [vmem:[#allocation3 + $0x6f0] sm:$0xff] }
 0x12e   :  { %2950 = vmatmul.mubr.bf16.vlgmr.msra.gmra.mxu1 %v7415_v20  ;;  %3004 = vmatpush1.bf16.msra.mxu0 %v5948_v58  ;;  %v7445_v20 = vld [vmem:[%s7603_s0 + $0xc] ss:$28 sps:$4 sm:$0xff]   ;;  %v6141_v58 = vcombine.high %v380_v51, %v384_v53  ;;  %v212_v33 = vld [vmem:[#allocation3 + $0x290] sm:$0xff] }
 0x12f   :  { %3047 = vmatpush1.bf16.msra.mxu1 %v6076_v59  ;;  %3005 = vmatprep.subr.bf16.mxu0 %v5941_v61  ;;  %v244_v59 = vld [vmem:[#allocation3 + $0x390] sm:$0xff] }
 0x130   :  { %3048 = vmatprep.subr.bf16.mxu1 %v6069_v1  ;;  %3035 = vmatprep.mubr.bf16.mxu0 %v7439_v10  ;;  %v248_v61 = vld [vmem:[#allocation3 + $0x3b0] sm:$0xff]  ;;  %v6140_v1 = vcombine.low %v380_v51, %v384_v53 }
 0x131   :  { %3078 = vmatprep.mubr.bf16.mxu1 %v7445_v20  ;;  %v6005_v2 = vcombine.high %v244_v59, %v248_v61  ;;  %v6004_v8 = vcombine.low %v244_v59, %v248_v61  ;;  %v216_v34 = vld [vmem:[#allocation3 + $0x2b0] sm:$0xff] }
 0x132   :  { %3006 = vmatpush1.bf16.msra.mxu0 %v5940_v4  ;;  %v6133_v4 = vcombine.high %v372_v62, %v376_v63  ;;  %v340_v35 = vld [vmem:[#allocation3 + $0x690] sm:$0xff]  ;;  %v5973_v42 = vcombine.high %v212_v33, %v216_v34 }
 0x133   :  { %3049 = vmatpush1.bf16.msra.mxu1 %v6068_v5  ;;  %3007 = vmatprep.subr.bf16.mxu0 %v5933_v6  ;;  %v236_v5 = vld [vmem:[#allocation3 + $0x350] sm:$0xff] }
 0x134   :  { %3050 = vmatprep.subr.bf16.mxu1 %v6061_v9  ;;  %v240_v6 = vld [vmem:[#allocation3 + $0x370] sm:$0xff]  ;;  %v6132_v9 = vcombine.low %v372_v62, %v376_v63 }
 0x135   :  { %v5997_v57 = vcombine.high %v236_v5, %v240_v6  ;;  %v5996_v25 = vcombine.low %v236_v5, %v240_v6  ;;  %v204_v44 = vld [vmem:[#allocation3 + $0x250] sm:$0xff] }
 0x136   :  { %3008 = vmatpush1.bf16.msra.mxu0 %v5932_v11  ;;  %v6125_v11 = vcombine.high %v364_v7, %v368_v13  ;;  %v332_v46 = vld [vmem:[#allocation3 + $0x650] sm:$0xff] }
 0x137   :  { %3051 = vmatpush1.bf16.msra.mxu1 %v6060_v12  ;;  %3009 = vmatprep.subr.bf16.mxu0 %v5925_v14  ;;  %v228_v12 = vld [vmem:[#allocation3 + $0x310] sm:$0xff] }
 0x138   :  { %3052 = vmatprep.subr.bf16.mxu1 %v6053_v17  ;;  %v232_v14 = vld [vmem:[#allocation3 + $0x330] sm:$0xff]  ;;  %v540_v17 = vlaneseq }
 0x139   :  { %v200_v53 = vld [vmem:[#allocation3 + $0x230] sm:$0xff] }
 0x13a   :  { %3010 = vmatpush1.bf16.msra.mxu0 %v5924_v19  ;;  %v5989_v19 = vcombine.high %v228_v12, %v232_v14  ;;  %v7448_v28 = vshrl.u32 %v540_v17, 7  ;;  %v444_v5 = vld [vmem:[#allocation3 + $0x9d0] sm:$0xff] }
 0x13b   :  { %3053 = vmatpush1.bf16.msra.mxu1 %v6052_v21  ;;  %3011 = vmatprep.subr.bf16.mxu0 %v5917_v22  ;;  %v6117_v21 = vcombine.high %v356_v15, %v360_v16  ;;  %v220_v22 = vld [vmem:[#allocation3 + $0x2d0] sm:$0xff] }
 0x13c   :  { %3054 = vmatprep.subr.bf16.mxu1 %v6045_v27  ;;  %v5988_v27 = vcombine.low %v228_v12, %v232_v14  ;;  %v5980_v37 = vcombine.low %v220_v22, %v224_v23  ;;  %v448_v6 = vld [vmem:[#allocation3 + $0x9f0] sm:$0xff] }
 0x13d   :  { %v532_v13 = vld [vmem:[#allocation3 + $0xc90] sm:$0xff]  ;;  %v6205_v14 = vcombine.high %v444_v5, %v448_v6 }
 0x13e   :  { %3012 = vmatpush1.bf16.msra.mxu0 %v5916_v29  ;;  %v6116_v29 = vcombine.low %v356_v15, %v360_v16  ;;  %v440_v17 = vld [vmem:[#allocation3 + $0x9b0] sm:$0xff] }
 0x13f   :  { %3055 = vmatpush1.bf16.msra.mxu1 %v6044_v31  ;;  %3013 = vmatprep.subr.bf16.mxu0 %v5909_v32  ;;  %v5981_v31 = vcombine.high %v220_v22, %v224_v23  ;;  %v6109_v32 = vcombine.high %v348_v24, %v352_v26 }
 0x140   :  { %3056 = vmatprep.subr.bf16.mxu1 %v6037_v36  ;;  %v344_v36 = vld [vmem:[#allocation3 + $0x6b0] sm:$0xff] }
 0x141   :  { %v6101_v43 = vcombine.high %v340_v35, %v344_v36  ;;  %v6100_v50 = vcombine.low %v340_v35, %v344_v36 }
 0x142   :  { %3014 = vmatpush1.bf16.msra.mxu0 %v5908_v38  ;;  %v7451_v38 = vsub.s32 0, %v7448_v28 }
 0x143   :  { %3057 = vmatpush1.bf16.msra.mxu1 %v6036_v39  ;;  %3015 = vmatprep.subr.bf16.mxu0 %v5901_v40  ;;  %v6108_v39 = vcombine.low %v348_v24, %v352_v26  ;;  %v7453_v40 = vld [vmem:[#allocation5] sm:$0xff]  ;;  %v428_v26 = vld [vmem:[#allocation3 + $0x950] sm:$0xff] }
 0x144   :  { %3058 = vmatprep.subr.bf16.mxu1 %v6029_v45  ;;  %v208_v45 = vld [vmem:[#allocation3 + $0x270] sm:$0xff] }
 0x145   :  { %v5965_v60 = vcombine.high %v204_v44, %v208_v45  ;;  %v5964_v61 = vcombine.low %v204_v44, %v208_v45  ;;  %v7476_v44 = vld [vmem:[%s7603_s0 + $0x14] ss:$28 sps:$4 sm:$0xff]  }
 0x146   :  { %3016 = vmatpush1.bf16.msra.mxu0 %v5900_v47  ;;  %v336_v47 = vld [vmem:[#allocation3 + $0x670] sm:$0xff] }
 0x147   :  { %3059 = vmatpush1.bf16.msra.mxu1 %v6028_v48  ;;  %3017 = vmatprep.subr.bf16.mxu0 %v5893_v49  ;;  %v543_v48 = vrot.slane %v7453_v40, %v7451_v38  ;;  %v5972_v49 = vcombine.low %v212_v33, %v216_v34  ;;  %v6093_v51 = vcombine.high %v332_v46, %v336_v47 }
 0x148   :  { %3060 = vmatprep.subr.bf16.mxu1 %v6021_v52  ;;  %v196_v52 = vld [vmem:[#allocation3 + $0x210] sm:$0xff]  ;;  %v6092_v63 = vcombine.low %v332_v46, %v336_v47 }
 0x14a   :  { %3018 = vmatpush1.bf16.msra.mxu0 %v5892_v54 }
 0x14b   :  { %3061 = vmatpush1.bf16.msra.mxu1 %v6020_v55  ;;  %3019 = vmatprep.subr.bf16.mxu0 %v6013_v56  ;;  %v324_v55 = vld [vmem:[#allocation3 + $0x610] sm:$0xff] }
 0x14c   :  { %3062 = vmatprep.subr.bf16.mxu1 %v6141_v58  ;;  %v328_v56 = vld [vmem:[#allocation3 + $0x630] sm:$0xff] }
 0x14d   :  { %v6084_v12 = vcombine.low %v324_v55, %v328_v56 }
 0x14e   :  { %3020 = vmatpush2.bf16.msra.mxu0 %v6012_v0  ;;  %v5957_v0 = vcombine.high %v196_v52, %v200_v53 }
 0x14f   :  { %3063 = vmatpush2.bf16.msra.mxu1 %v6140_v1  ;;  %3021 = vmatprep.subr.bf16.mxu0 %v6005_v2 }
 0x150   :  { %3064 = vmatprep.subr.bf16.mxu1 %v6133_v4  ;;  %v6085_v4 = vcombine.high %v324_v55, %v328_v56  ;;  %v404_v55 = vld [vmem:[#allocation3 + $0x890] sm:$0xff] }
 0x151   :  { %v408_v56 = vld [vmem:[#allocation3 + $0x8b0] sm:$0xff] }
 0x152   :  { %3022 = vmatpush2.bf16.msra.mxu0 %v6004_v8  ;;  %v536_v8 = vld [vmem:[#allocation3 + $0xcb0] sm:$0xff] }
 0x153   :  { %3065 = vmatpush2.bf16.msra.mxu1 %v6132_v9  ;;  %3023 = vmatprep.subr.bf16.mxu0 %v5997_v57  ;;  %v5956_v57 = vcombine.low %v196_v52, %v200_v53  ;;  %v6293_v16 = vcombine.high %v532_v13, %v536_v8  ;;  %v6292_v22 = vcombine.low %v532_v13, %v536_v8  ;;  %v169_v13 = vld [vmem:[#allocation3 + $0x138] sm:$0xff] }
 0x154   :  { %3066 = vmatprep.subr.bf16.mxu1 %v6125_v11  ;;  %v6164_v8 = vcombine.low %v404_v55, %v408_v56 }
 0x156   :  { %3024 = vmatpush2.bf16.msra.mxu0 %v5996_v25  ;;  %v436_v25 = vld [vmem:[#allocation3 + $0x990] sm:$0xff] }
 0x157   :  { %3067 = vmatpush2.bf16.msra.mxu1 %v6124_v18  ;;  %3025 = vmatprep.subr.bf16.mxu0 %v5989_v19  ;;  %v524_v18 = vld [vmem:[#allocation3 + $0xc50] sm:$0xff]  ;;  %v6197_v23 = vcombine.high %v436_v25, %v440_v17  ;;  %v6196_v33 = vcombine.low %v436_v25, %v440_v17 }
 0x158   :  { %3068 = vmatprep.subr.bf16.mxu1 %v6117_v21  ;;  %v528_v19 = vld [vmem:[#allocation3 + $0xc70] sm:$0xff]  ;;  %v6204_v21 = vcombine.low %v444_v5, %v448_v6 }
 0x159   :  { %v6285_v24 = vcombine.high %v524_v18, %v528_v19  ;;  %v6284_v34 = vcombine.low %v524_v18, %v528_v19  ;;  %v396_v5 = vld [vmem:[#allocation3 + $0x850] sm:$0xff] }
 0x15a   :  { %3026 = vmatpush2.bf16.msra.mxu0 %v5988_v27  ;;  %v432_v27 = vld [vmem:[#allocation3 + $0x970] sm:$0xff] }
 0x15b   :  { %3069 = vmatpush2.bf16.msra.mxu1 %v6116_v29  ;;  %3027 = vmatprep.subr.bf16.mxu0 %v5981_v31  ;;  %v7468_v29 = vld [vmem:[%s7603_s0] ss:$28 sps:$4 sm:$0xff]   ;;  %v516_v31 = vld [vmem:[#allocation3 + $0xc10] sm:$0xff]  ;;  %v6189_v35 = vcombine.high %v428_v26, %v432_v27 }
 0x15c   :  { %3070 = vmatprep.subr.bf16.mxu1 %v6109_v32  ;;  %v520_v32 = vld [vmem:[#allocation3 + $0xc30] sm:$0xff] }
 0x15d   :  { %v6277_v36 = vcombine.high %v516_v31, %v520_v32  ;;  %v6276_v45 = vcombine.low %v516_v31, %v520_v32  ;;  %v400_v6 = vld [vmem:[#allocation3 + $0x870] sm:$0xff] }
 0x15e   :  { %3028 = vmatpush2.bf16.msra.mxu0 %v5980_v37  ;;  %v420_v37 = vld [vmem:[#allocation3 + $0x910] sm:$0xff]  ;;  %v6156_v25 = vcombine.low %v396_v5, %v400_v6 }
 0x15f   :  { %3071 = vmatpush2.bf16.msra.mxu1 %v6108_v39  ;;  %3029 = vmatprep.subr.bf16.mxu0 %v5973_v42  ;;  %v424_v39 = vld [vmem:[#allocation3 + $0x930] sm:$0xff]  ;;  %v189_v42 = vld [vmem:[#allocation3 + $0x1d8] sm:$0xff] }
 0x160   :  { %3072 = vmatprep.subr.bf16.mxu1 %v6101_v43  ;;  %v193_v43 = vld [vmem:[#allocation3 + $0x1f8] sm:$0xff]  ;;  %v6181_v46 = vcombine.high %v420_v37, %v424_v39  ;;  %v508_v19 = vld [vmem:[#allocation3 + $0xbd0] sm:$0xff] }
 0x161   :  { %v2693_v54 = vpop.f32.mrf.mxu0  ;;  %v2736_v59 = vpop.f32.mrf.mxu1  ;;  %v5951_v47 = vcombine.high %v189_v42, %v193_v43  ;;  %v5950_v52 = vcombine.low %v189_v42, %v193_v43  ;;  %v500_v32 = vld [vmem:[#allocation3 + $0xb90] sm:$0xff] }
 0x162   :  { %v2694_v58 = vadd.f32 %v2693_v54, %v543_v48  ;;  %3030 = vmatpush2.bf16.msra.mxu0 %v5972_v49  ;;  %v416_v49 = vld [vmem:[#allocation3 + $0x8f0] sm:$0xff] }
 0x163   :  { %3073 = vmatpush2.bf16.msra.mxu1 %v6100_v50  ;;  %v7457_v62 = vpop.f32.mrf.mxu0  ;;  %3031 = vmatprep.subr.bf16.mxu0 %v5965_v60  ;;  %v7461_v2 = vpop.f32.mrf.mxu1  ;;  %v181_v50 = vld [vmem:[#allocation3 + $0x198] sm:$0xff]  ;;  %v492_v43 = vld [vmem:[#allocation3 + $0xb50] sm:$0xff] }
 0x164   :  { %v7459_v1 = vadd.f32 %v2736_v59, %v2694_v58  ;;  %3074 = vmatprep.subr.bf16.mxu1 %v6093_v51  ;;  %v185_v60 = vld [vmem:[#allocation3 + $0x1b8] sm:$0xff]  ;;  %v6180_v51 = vcombine.low %v420_v37, %v424_v39 }
 0x165   :  { %v2697_v7 = vpop.f32.mrf.mxu0  ;;  %v2740_v11 = vpop.f32.mrf.mxu1  ;;  %v5943_v54 = vcombine.high %v181_v50, %v185_v60  ;;  %v173_v58 = vld [vmem:[#allocation3 + $0x158] sm:$0xff] }
 0x166   :  { %v2698_v9 = vadd.f32 %v2697_v7, %v543_v48  ;;  %3032 = vmatpush2.bf16.msra.mxu0 %v5964_v61  ;;  %v412_v48 = vld [vmem:[#allocation3 + $0x8d0] sm:$0xff]  ;;  %v177_v59 = vld [vmem:[#allocation3 + $0x178] sm:$0xff] }
 0x167   :  { %3075 = vmatpush2.bf16.msra.mxu1 %v6092_v63  ;;  %3033 = vmatprep.subr.bf16.mxu0 %v5957_v0  ;;  %v6173_v53 = vcombine.high %v412_v48, %v416_v49  ;;  %v6172_v61 = vcombine.low %v412_v48, %v416_v49  ;;  %v5942_v63 = vcombine.low %v181_v50, %v185_v60  ;;  %v165_v7 = vld [vmem:[#allocation3 + $0x118] sm:$0xff]  ;;  %v484_v60 = vld [vmem:[#allocation3 + $0xb10] sm:$0xff] }
 0x168   :  { %v7463_v15 = vadd.f32 %v2740_v11, %v2698_v9  ;;  %3076 = vmatprep.subr.bf16.mxu1 %v6085_v4  ;;  %v6165_v0 = vcombine.high %v404_v55, %v408_v56  ;;  %v5935_v4 = vcombine.high %v173_v58, %v177_v59  ;;  %v5934_v9 = vcombine.low %v173_v58, %v177_v59  ;;  %v388_v11 = vld [vmem:[#allocation3 + $0x810] sm:$0xff] }
 0x169   :  { %v5926_v17 = vcombine.low %v165_v7, %v169_v13  ;;  %v476_v59 = vld [vmem:[#allocation3 + $0xad0] sm:$0xff] }
 0x16a   :  { %3034 = vmatpush2.bf16.msra.mxu0 %v5956_v57  ;;  %v5927_v57 = vcombine.high %v165_v7, %v169_v13  ;;  %v468_v13 = vld [vmem:[#allocation3 + $0xa90] sm:$0xff] }
 0x16b   :  { %3077 = vmatpush2.bf16.msra.mxu1 %v6084_v12  ;;  %3089 = vmatprep.subr.bf16.mxu0 %v6205_v14  ;;  %v392_v12 = vld [vmem:[#allocation3 + $0x830] sm:$0xff]  ;;  %v157_v14 = vld [vmem:[#allocation3 + $0xd8] sm:$0xff] }
 0x16c   :  { %3142 = vmatprep.subr.bf16.mxu1 %v6293_v16  ;;  %v161_v16 = vld [vmem:[#allocation3 + $0xf8] sm:$0xff] }
 0x16d   :  { %3036 = vmatmul.mubr.bf16.vlgmr.msra.gmra.mxu0 %v7468_v29  ;;  %v5919_v18 = vcombine.high %v157_v14, %v161_v16 }
 0x16e   :  { %3079 = vmatmul.mubr.bf16.vlgmr.msra.gmra.mxu1 %v7424_v41  ;;  %3090 = vmatpush1.bf16.msra.mxu0 %v6204_v21  ;;  %v6188_v41 = vcombine.low %v428_v26, %v432_v27  ;;  %v512_v21 = vld [vmem:[#allocation3 + $0xbf0] sm:$0xff]  ;;  %v5918_v26 = vcombine.low %v157_v14, %v161_v16 }
 0x16f   :  { %3143 = vmatpush1.bf16.msra.mxu1 %v6292_v22  ;;  %3091 = vmatprep.subr.bf16.mxu0 %v6197_v23  ;;  %v149_v22 = vld [vmem:[#allocation3 + $0x98] sm:$0xff]  ;;  %v6269_v27 = vcombine.high %v508_v19, %v512_v21  ;;  %v460_v16 = vld [vmem:[#allocation3 + $0xa50] sm:$0xff] }
 0x170   :  { %3144 = vmatprep.subr.bf16.mxu1 %v6285_v24  ;;  %3164 = vmatprep.mubr.bf16.mxu1 %v7304_v30  ;;  %v153_v23 = vld [vmem:[#allocation3 + $0xb8] sm:$0xff]  ;;  %v6148_v24 = vcombine.low %v388_v11, %v392_v12 }
 0x171   :  { %3121 = vmatprep.mubr.bf16.mxu0 %v7476_v44  ;;  %v5911_v31 = vcombine.high %v149_v22, %v153_v23  ;;  %v5910_v37 = vcombine.low %v149_v22, %v153_v23 }
 0x172   :  { %3092 = vmatpush1.bf16.msra.mxu0 %v6196_v33  ;;  %v504_v33 = vld [vmem:[#allocation3 + $0xbb0] sm:$0xff] }
 0x173   :  { %3145 = vmatpush1.bf16.msra.mxu1 %v6284_v34  ;;  %3093 = vmatprep.subr.bf16.mxu0 %v6189_v35  ;;  %v141_v34 = vld [vmem:[#allocation3 + $0x58] sm:$0xff]  ;;  %v6261_v39 = vcombine.high %v500_v32, %v504_v33 }
 0x174   :  { %3146 = vmatprep.subr.bf16.mxu1 %v6277_v36  ;;  %v145_v35 = vld [vmem:[#allocation3 + $0x78] sm:$0xff]  ;;  %v6268_v36 = vcombine.low %v508_v19, %v512_v21  ;;  %v7484_v21 = vpop.f32.mrf.mxu0 }
 0x175   :  { %v5903_v42 = vcombine.high %v141_v34, %v145_v35  ;;  %v5902_v48 = vcombine.low %v141_v34, %v145_v35  ;;  %v225_v34 = vld [vmem:[#allocation3 + $0x2f8] sm:$0xff] }
 0x176   :  { %3094 = vmatpush1.bf16.msra.mxu0 %v6188_v41  ;;  %v496_v41 = vld [vmem:[#allocation3 + $0xb70] sm:$0xff] }
 0x177   :  { %3147 = vmatpush1.bf16.msra.mxu1 %v6276_v45  ;;  %3095 = vmatprep.subr.bf16.mxu0 %v6181_v46  ;;  %v133_v45 = vld [vmem:[#allocation3 + $0x18] sm:$0xff]  ;;  %v6253_v49 = vcombine.high %v492_v43, %v496_v41 }
 0x178   :  { %3175 = vmatprep.subr.bf16.mxu1 %v5951_v47  ;;  %v137_v46 = vld [vmem:[#allocation3 + $0x38] sm:$0xff]  ;;  %v6260_v47 = vcombine.low %v500_v32, %v504_v33 }
 0x179   :  { %v5895_v50 = vcombine.high %v133_v45, %v137_v46  ;;  %v5894_v55 = vcombine.low %v133_v45, %v137_v46  ;;  %v221_v33 = vld [vmem:[#allocation3 + $0x2d8] sm:$0xff] }
 0x17a   :  { %6298 = vmatmul.mubr.msk.bf16.vlgmr.msra.gmra.mxu1 %vm2655_vm0, %v7431_v3  ;;  %3096 = vmatpush1.bf16.msra.mxu0 %v6180_v51  ;;  %v6157_v3 = vcombine.high %v396_v5, %v400_v6  ;;  %v488_v51 = vld [vmem:[#allocation3 + $0xb30] sm:$0xff]  ;;  %v5983_v45 = vcombine.high %v221_v33, %v225_v34  ;;  %v317_v46 = vld [vmem:[#allocation3 + $0x5d8] sm:$0xff] }
 0x17b   :  { %3176 = vmatpush1.bf16.msra.mxu1 %v5950_v52  ;;  %3097 = vmatprep.subr.bf16.mxu0 %v6173_v53  ;;  %v253_v52 = vld [vmem:[#allocation3 + $0x3d8] sm:$0xff]  ;;  %v6245_v56 = vcombine.high %v484_v60, %v488_v51 }
 0x17c   :  { %3177 = vmatprep.subr.bf16.mxu1 %v5943_v54  ;;  %3207 = vmatprep.mubr.bf16.mxu1 %v7439_v10  ;;  %v6149_v10 = vcombine.high %v388_v11, %v392_v12  ;;  %v257_v53 = vld [vmem:[#allocation3 + $0x3f8] sm:$0xff]  ;;  %v6252_v54 = vcombine.low %v492_v43, %v496_v41 }
 0x17d   :  { %v6015_v58 = vcombine.high %v253_v52, %v257_v53  ;;  %v6014_v5 = vcombine.low %v253_v52, %v257_v53  ;;  %v5982_v52 = vcombine.low %v221_v33, %v225_v34  ;;  %v437_v33 = vld [vmem:[#allocation3 + $0x998] sm:$0xff] }
 0x17e   :  { %3098 = vmatpush1.bf16.msra.mxu0 %v6172_v61  ;;  %v480_v61 = vld [vmem:[#allocation3 + $0xaf0] sm:$0xff]  ;;  %v441_v34 = vld [vmem:[#allocation3 + $0x9b8] sm:$0xff] }
 0x17f   :  { %3178 = vmatpush1.bf16.msra.mxu1 %v5942_v63  ;;  %3099 = vmatprep.subr.bf16.mxu0 %v6165_v0  ;;  %v245_v63 = vld [vmem:[#allocation3 + $0x398] sm:$0xff]  ;;  %v6237_v6 = vcombine.high %v476_v59, %v480_v61 }
 0x180   :  { %3179 = vmatprep.subr.bf16.mxu1 %v5935_v4  ;;  %v249_v0 = vld [vmem:[#allocation3 + $0x3b8] sm:$0xff]  ;;  %v6244_v4 = vcombine.low %v484_v60, %v488_v51 }
 0x181   :  { %v6007_v7 = vcombine.high %v245_v63, %v249_v0  ;;  %v6006_v11 = vcombine.low %v245_v63, %v249_v0  ;;  %v209_v63 = vld [vmem:[#allocation3 + $0x278] sm:$0xff] }
 0x182   :  { %3100 = vmatpush1.bf16.msra.mxu0 %v6164_v8  ;;  %v472_v8 = vld [vmem:[#allocation3 + $0xab0] sm:$0xff] }
 0x183   :  { %3180 = vmatpush1.bf16.msra.mxu1 %v5934_v9  ;;  %3101 = vmatprep.subr.bf16.mxu0 %v6157_v3  ;;  %v237_v9 = vld [vmem:[#allocation3 + $0x358] sm:$0xff]  ;;  %v6229_v12 = vcombine.high %v468_v13, %v472_v8  ;;  %v6228_v19 = vcombine.low %v468_v13, %v472_v8 }
 0x184   :  { %3181 = vmatprep.subr.bf16.mxu1 %v5927_v57  ;;  %v241_v3 = vld [vmem:[#allocation3 + $0x378] sm:$0xff]  ;;  %v6236_v57 = vcombine.low %v476_v59, %v480_v61 }
 0x185   :  { %v5999_v14 = vcombine.high %v237_v9, %v241_v3  ;;  %v5998_v23 = vcombine.low %v237_v9, %v241_v3  ;;  %v313_v59 = vld [vmem:[#allocation3 + $0x5b8] sm:$0xff]  ;;  %v7495_v3 = vld [vmem:[%s7603_s0 + $0x10] ss:$28 sps:$4 sm:$0xff]  }
 0x186   :  { %3102 = vmatpush1.bf16.msra.mxu0 %v6156_v25  ;;  %v464_v25 = vld [vmem:[#allocation3 + $0xa70] sm:$0xff]  ;;  %v205_v61 = vld [vmem:[#allocation3 + $0x258] sm:$0xff] }
 0x187   :  { %3182 = vmatpush1.bf16.msra.mxu1 %v5926_v17  ;;  %3103 = vmatprep.subr.bf16.mxu0 %v6149_v10  ;;  %v7482_v17 = vpop.f32.mrf.mxu1  ;;  %v229_v10 = vld [vmem:[#allocation3 + $0x318] sm:$0xff]  ;;  %v5967_v13 = vcombine.high %v205_v61, %v209_v63 }
 0x188   :  { %3183 = vmatprep.subr.bf16.mxu1 %v5919_v18  ;;  %v233_v18 = vld [vmem:[#allocation3 + $0x338] sm:$0xff] }
 0x189   :  { %v2822_v22 = vpop.f32.mrf.mxu1  ;;  %v301_v8 = vld [vmem:[#allocation3 + $0x558] sm:$0xff] }
 0x18a   :  { %3104 = vmatpush1.bf16.msra.mxu0 %v6148_v24  ;;  %v6221_v24 = vcombine.high %v460_v16, %v464_v25  ;;  %v305_v9 = vld [vmem:[#allocation3 + $0x578] sm:$0xff] }
 0x18b   :  { %3184 = vmatpush1.bf16.msra.mxu1 %v5918_v26  ;;  %3105 = vmatprep.subr.bf16.mxu0 %v6269_v27  ;;  %v5991_v26 = vcombine.high %v229_v10, %v233_v18  ;;  %v452_v27 = vld [vmem:[#allocation3 + $0xa10] sm:$0xff] }
 0x18c   :  { %3185 = vmatprep.subr.bf16.mxu1 %v5911_v31  ;;  %v456_v31 = vld [vmem:[#allocation3 + $0xa30] sm:$0xff] }
 0x18d   :  { %v6213_v43 = vcombine.high %v452_v27, %v456_v31  ;;  %v6212_v60 = vcombine.low %v452_v27, %v456_v31 }
 0x18e   :  { %3106 = vmatpush2.bf16.msra.mxu0 %v6268_v36  ;;  %v6220_v36 = vcombine.low %v460_v16, %v464_v25  ;;  %v5966_v16 = vcombine.low %v205_v61, %v209_v63  ;;  %v6063_v25 = vcombine.high %v301_v8, %v305_v9  ;;  %v413_v61 = vld [vmem:[#allocation3 + $0x8d8] sm:$0xff] }
 0x18f   :  { %3186 = vmatpush1.bf16.msra.mxu1 %v5910_v37  ;;  %3107 = vmatprep.subr.bf16.mxu0 %v6261_v39  ;;  %v7487_v37 = vpop.f32.mrf.mxu1  ;;  %v417_v63 = vld [vmem:[#allocation3 + $0x8f8] sm:$0xff] }
 0x190   :  { %3187 = vmatprep.subr.bf16.mxu1 %v5903_v42  ;;  %v5990_v42 = vcombine.low %v229_v10, %v233_v18  ;;  %v293_v18 = vld [vmem:[#allocation3 + $0x518] sm:$0xff] }
 0x191   :  { %v2826_v51 = vpop.f32.mrf.mxu1 }
 0x192   :  { %3108 = vmatpush2.bf16.msra.mxu0 %v6260_v47  ;;  %v321_v47 = vld [vmem:[#allocation3 + $0x5f8] sm:$0xff] }
 0x193   :  { %3188 = vmatpush1.bf16.msra.mxu1 %v5902_v48  ;;  %3109 = vmatprep.subr.bf16.mxu0 %v6253_v49  ;;  %v213_v49 = vld [vmem:[#allocation3 + $0x298] sm:$0xff]  ;;  %v6079_v53 = vcombine.high %v317_v46, %v321_v47 }
 0x194   :  { %3189 = vmatprep.subr.bf16.mxu1 %v5895_v50  ;;  %v217_v50 = vld [vmem:[#allocation3 + $0x2b8] sm:$0xff] }
 0x196   :  { %3110 = vmatpush2.bf16.msra.mxu0 %v6252_v54 }
 0x197   :  { %3190 = vmatpush1.bf16.msra.mxu1 %v5894_v55  ;;  %3111 = vmatprep.subr.bf16.mxu0 %v6245_v56  ;;  %v5975_v56 = vcombine.high %v213_v49, %v217_v50 }
 0x198   :  { %3191 = vmatprep.subr.bf16.mxu1 %v6015_v58  ;;  %v309_v58 = vld [vmem:[#allocation3 + $0x598] sm:$0xff] }
 0x19a   :  { %3112 = vmatpush2.bf16.msra.mxu0 %v6244_v4  ;;  %v5974_v4 = vcombine.low %v213_v49, %v217_v50  ;;  %v6198_v49 = vcombine.low %v437_v33, %v441_v34 }
 0x19b   :  { %3192 = vmatpush2.bf16.msra.mxu1 %v6014_v5  ;;  %3113 = vmatprep.subr.bf16.mxu0 %v6237_v6  ;;  %v6071_v5 = vcombine.high %v309_v58, %v313_v59 }
 0x19c   :  { %3193 = vmatprep.subr.bf16.mxu1 %v6007_v7 }
 0x19e   :  { %3114 = vmatpush2.bf16.msra.mxu0 %v6236_v57  ;;  %v197_v57 = vld [vmem:[#allocation3 + $0x218] sm:$0xff] }
 0x19f   :  { %3194 = vmatpush2.bf16.msra.mxu1 %v6006_v11  ;;  %3115 = vmatprep.subr.bf16.mxu0 %v6229_v12  ;;  %v201_v11 = vld [vmem:[#allocation3 + $0x238] sm:$0xff] }
 0x1a0   :  { %3195 = vmatprep.subr.bf16.mxu1 %v5999_v14  ;;  %v6070_v14 = vcombine.low %v309_v58, %v313_v59  ;;  %v5959_v10 = vcombine.high %v197_v57, %v201_v11  ;;  %v261_v58 = vld [vmem:[#allocation3 + $0x418] sm:$0xff] }
 0x1a1   :  { %v2779_v32 = vpop.f32.mrf.mxu0  ;;  %v265_v59 = vld [vmem:[#allocation3 + $0x438] sm:$0xff] }
 0x1a2   :  { %v2780_v35 = vadd.f32 %v2779_v32, %v7459_v1  ;;  %3116 = vmatpush2.bf16.msra.mxu0 %v6228_v19  ;;  %v297_v19 = vld [vmem:[#allocation3 + $0x538] sm:$0xff] }
 0x1a3   :  { %3196 = vmatpush2.bf16.msra.mxu1 %v5998_v23  ;;  %v7489_v39 = vpop.f32.mrf.mxu0  ;;  %3117 = vmatprep.subr.bf16.mxu0 %v6221_v24  ;;  %v449_v23 = vld [vmem:[#allocation3 + $0x9f8] sm:$0xff]  ;;  %v6062_v24 = vcombine.low %v301_v8, %v305_v9  ;;  %v6055_v27 = vcombine.high %v293_v18, %v297_v19  ;;  %v6022_v8 = vcombine.low %v261_v58, %v265_v59 }
 0x1a4   :  { %v2823_v41 = vadd.f32 %v2822_v22, %v2780_v35  ;;  %3197 = vmatprep.subr.bf16.mxu1 %v5991_v26  ;;  %v445_v22 = vld [vmem:[#allocation3 + $0x9d8] sm:$0xff]  ;;  %v5958_v26 = vcombine.low %v197_v57, %v201_v11  ;;  %v6054_v35 = vcombine.low %v293_v18, %v297_v19  ;;  %v6174_v9 = vcombine.low %v413_v61, %v417_v63 }
 0x1a5   :  { %v2783_v48 = vpop.f32.mrf.mxu0  ;;  %v6207_v31 = vcombine.high %v445_v22, %v449_v23  ;;  %v285_v32 = vld [vmem:[#allocation3 + $0x4d8] sm:$0xff] }
 0x1a6   :  { %v2784_v1 = vadd.f32 %v2783_v48, %v7463_v15  ;;  %3118 = vmatpush2.bf16.msra.mxu0 %v6220_v36  ;;  %v3363_v54 = vmul.f32 0.2, %v2823_v41  ;;  %vm3347_vm1 = vcmp.gt.f32.partialorder %v2823_v41, 0.0  ;;  %v6078_v15 = vcombine.low %v317_v46, %v321_v47  ;;  %v429_v46 = vld [vmem:[#allocation3 + $0x958] sm:$0xff] }
 0x1a7   :  { %3198 = vmatpush2.bf16.msra.mxu1 %v5990_v42  ;;  %3119 = vmatprep.subr.bf16.mxu0 %v6213_v43  ;;  %v6206_v36 = vcombine.low %v445_v22, %v449_v23  ;;  %v6199_v43 = vcombine.high %v437_v33, %v441_v34  ;;  %v433_v47 = vld [vmem:[#allocation3 + $0x978] sm:$0xff] }
 0x1a8   :  { %v2827_v55 = vadd.f32 %v2826_v51, %v2784_v1  ;;  %3199 = vmatprep.subr.bf16.mxu1 %v5983_v45  ;;  %v3379_v6 = vsel %vm3347_vm1, %v2823_v41, %v3363_v54  ;;  %v277_v41 = vld [vmem:[#allocation3 + $0x498] sm:$0xff]  ;;  %v6191_v1 = vcombine.high %v429_v46, %v433_v47 }
 0x1a9   :  { %v281_v45 = vld [vmem:[#allocation3 + $0x4b8] sm:$0xff] }
 0x1aa   :  { %vm3355_vm2 = vcmp.gt.f32.partialorder %v2827_v55, 0.0  ;;  %v3371_v0 = vmul.f32 0.2, %v2827_v55  ;;  %3120 = vmatpush2.bf16.msra.mxu0 %v6212_v60  ;;  %v6039_v50 = vcombine.high %v277_v41, %v281_v45  ;;  %v269_v60 = vld [vmem:[#allocation3 + $0x458] sm:$0xff]  ;;  %v6038_v54 = vcombine.low %v277_v41, %v281_v45 }
 0x1ab   :  { %3200 = vmatpush2.bf16.msra.mxu1 %v5982_v52  ;;  %3218 = vmatprep.subr.bf16.mxu0 %v6079_v53  ;;  %v273_v51 = vld [vmem:[#allocation3 + $0x478] sm:$0xff] }
 0x1ac   :  { %v3387_v7 = vsel %vm3355_vm2, %v2827_v55, %v3371_v0  ;;  %3201 = vmatprep.subr.bf16.mxu1 %v5975_v56  ;;  %v421_v52 = vld [vmem:[#allocation3 + $0x918] sm:$0xff]  ;;  %v6190_v55 = vcombine.low %v429_v46, %v433_v47  ;;  %v6030_v0 = vcombine.low %v269_v60, %v273_v51 }
 0x1ad   :  { %3122 = vmatmul.mubr.bf16.vlgmr.msra.gmra.mxu0 %v7495_v3  ;;  %v7498_v12 = vpack.c.bf16 %v3387_v7, %v3379_v6  ;;  %v425_v53 = vld [vmem:[#allocation3 + $0x938] sm:$0xff] }
 0x1ae   :  { %3219 = vmatpush1.bf16.msra.mxu0 %v6078_v15  ;;  %3250 = vmatprep.mubr.bf16.mxu0 %v7445_v20  ;;  %v289_v20 = vld [vmem:[#allocation3 + $0x4f8] sm:$0xff]  ;;  %v6183_v56 = vcombine.high %v421_v52, %v425_v53  ;;  %v6182_v15 = vcombine.low %v421_v52, %v425_v53 }
 0x1af   :  { %3202 = vmatpush2.bf16.msra.mxu1 %v5974_v4  ;;  %3220 = vmatprep.subr.bf16.mxu0 %v6071_v5  ;;  %v6047_v42 = vcombine.high %v285_v32, %v289_v20  ;;  %v6046_v48 = vcombine.low %v285_v32, %v289_v20  ;;  %v6175_v4 = vcombine.high %v413_v61, %v417_v63  ;;  %v381_v5 = vld [vmem:[#allocation3 + $0x7d8] sm:$0xff] }
 0x1b0   :  { %3203 = vmatprep.subr.bf16.mxu1 %v5967_v13  ;;  %v385_v6 = vld [vmem:[#allocation3 + $0x7f8] sm:$0xff] }
 0x1b1   :  { %v405_v7 = vld [vmem:[#allocation3 + $0x898] sm:$0xff]  ;;  %v6143_v57 = vcombine.high %v381_v5, %v385_v6  ;;  %v6142_v18 = vcombine.low %v381_v5, %v385_v6 }
 0x1b2   :  { %3221 = vmatpush1.bf16.msra.mxu0 %v6070_v14  ;;  %v409_v13 = vld [vmem:[#allocation3 + $0x8b8] sm:$0xff] }
 0x1b3   :  { %3204 = vmatpush2.bf16.msra.mxu1 %v5966_v16  ;;  %3222 = vmatprep.subr.bf16.mxu0 %v6063_v25  ;;  %v6167_v11 = vcombine.high %v405_v7, %v409_v13  ;;  %v373_v14 = vld [vmem:[#allocation3 + $0x798] sm:$0xff]  ;;  %v6166_v19 = vcombine.low %v405_v7, %v409_v13 }
 0x1b4   :  { %3205 = vmatprep.subr.bf16.mxu1 %v5959_v10  ;;  %v377_v16 = vld [vmem:[#allocation3 + $0x7b8] sm:$0xff] }
 0x1b5   :  { %v397_v25 = vld [vmem:[#allocation3 + $0x858] sm:$0xff]  ;;  %v6135_v22 = vcombine.high %v373_v14, %v377_v16  ;;  %v6134_v32 = vcombine.low %v373_v14, %v377_v16 }
 0x1b6   :  { %3223 = vmatpush1.bf16.msra.mxu0 %v6062_v24  ;;  %v401_v10 = vld [vmem:[#allocation3 + $0x878] sm:$0xff] }
 0x1b7   :  { %3206 = vmatpush2.bf16.msra.mxu1 %v5958_v26  ;;  %3224 = vmatprep.subr.bf16.mxu0 %v6055_v27  ;;  %v6159_v23 = vcombine.high %v397_v25, %v401_v10  ;;  %v365_v24 = vld [vmem:[#allocation3 + $0x758] sm:$0xff]  ;;  %v6158_v20 = vcombine.low %v397_v25, %v401_v10 }
 0x1b8   :  { %3261 = vmatprep.subr.bf16.mxu1 %v6207_v31  ;;  %v369_v26 = vld [vmem:[#allocation3 + $0x778] sm:$0xff] }
 0x1b9   :  { %v389_v27 = vld [vmem:[#allocation3 + $0x818] sm:$0xff]  ;;  %v6127_v33 = vcombine.high %v365_v24, %v369_v26  ;;  %v6126_v41 = vcombine.low %v365_v24, %v369_v26 }
 0x1ba   :  { %3208 = vmatmul.mubr.bf16.vlgmr.msra.gmra.mxu1 %v7468_v29  ;;  %3225 = vmatpush1.bf16.msra.mxu0 %v6054_v35  ;;  %v6031_v29 = vcombine.high %v269_v60, %v273_v51  ;;  %v393_v31 = vld [vmem:[#allocation3 + $0x838] sm:$0xff]  ;;  %v7503_v51 = vpop.f32.mrf.mxu1 }
 0x1bb   :  { %3262 = vmatpush1.bf16.msra.mxu1 %v6206_v36  ;;  %3226 = vmatprep.subr.bf16.mxu0 %v6047_v42  ;;  %v6151_v34 = vcombine.high %v389_v27, %v393_v31  ;;  %v357_v35 = vld [vmem:[#allocation3 + $0x718] sm:$0xff]  ;;  %v6150_v45 = vcombine.low %v389_v27, %v393_v31 }
 0x1bc   :  { %3263 = vmatprep.subr.bf16.mxu1 %v6199_v43  ;;  %3293 = vmatprep.mubr.bf16.mxu1 %v7476_v44  ;;  %v6023_v44 = vcombine.high %v261_v58, %v265_v59  ;;  %v361_v36 = vld [vmem:[#allocation3 + $0x738] sm:$0xff]  ;;  %v2865_v58 = vpop.f32.mrf.mxu1 }
 0x1bd   :  { %v509_v42 = vld [vmem:[#allocation3 + $0xbd8] sm:$0xff]  ;;  %v6119_v46 = vcombine.high %v357_v35, %v361_v36  ;;  %v6118_v60 = vcombine.low %v357_v35, %v361_v36 }
 0x1be   :  { %3227 = vmatpush1.bf16.msra.mxu0 %v6046_v48  ;;  %v513_v43 = vld [vmem:[#allocation3 + $0xbf8] sm:$0xff]  ;;  %v7509_v7 = vpop.f32.mrf.mxu1 }
 0x1bf   :  { %3264 = vmatpush1.bf16.msra.mxu1 %v6198_v49  ;;  %3228 = vmatprep.subr.bf16.mxu0 %v6039_v50  ;;  %v6271_v47 = vcombine.high %v509_v42, %v513_v43  ;;  %v349_v48 = vld [vmem:[#allocation3 + $0x6d8] sm:$0xff]  ;;  %v6270_v52 = vcombine.low %v509_v42, %v513_v43 }
 0x1c0   :  { %3265 = vmatprep.subr.bf16.mxu1 %v6191_v1  ;;  %v353_v49 = vld [vmem:[#allocation3 + $0x6f8] sm:$0xff] }
 0x1c1   :  { %v501_v50 = vld [vmem:[#allocation3 + $0xb98] sm:$0xff]  ;;  %v6111_v53 = vcombine.high %v349_v48, %v353_v49  ;;  %v6110_v63 = vcombine.low %v349_v48, %v353_v49 }
 0x1c2   :  { %3229 = vmatpush1.bf16.msra.mxu0 %v6038_v54  ;;  %v505_v1 = vld [vmem:[#allocation3 + $0xbb8] sm:$0xff]  ;;  %v550_v54 = vsub.s32 2, %v7448_v28 }
 0x1c3   :  { %3266 = vmatpush1.bf16.msra.mxu1 %v6190_v55  ;;  %3230 = vmatprep.subr.bf16.mxu0 %v6031_v29  ;;  %v6263_v55 = vcombine.high %v501_v50, %v505_v1  ;;  %v341_v29 = vld [vmem:[#allocation3 + $0x698] sm:$0xff] }
 0x1c4   :  { %3267 = vmatprep.subr.bf16.mxu1 %v6183_v56  ;;  %v345_v56 = vld [vmem:[#allocation3 + $0x6b8] sm:$0xff] }
 0x1c5   :  { %v493_v59 = vld [vmem:[#allocation3 + $0xb58] sm:$0xff] }
 0x1c6   :  { %3231 = vmatpush1.bf16.msra.mxu0 %v6030_v0  ;;  %v497_v61 = vld [vmem:[#allocation3 + $0xb78] sm:$0xff]  ;;  %v6262_v0 = vcombine.low %v501_v50, %v505_v1 }
 0x1c7   :  { %3268 = vmatpush1.bf16.msra.mxu1 %v6182_v15  ;;  %3232 = vmatprep.subr.bf16.mxu0 %v6023_v44  ;;  %v6103_v15 = vcombine.high %v341_v29, %v345_v56  ;;  %v551_v44 = vrot.slane %v7453_v40, %v550_v54  ;;  %v333_v5 = vld [vmem:[#allocation3 + $0x658] sm:$0xff]  ;;  %v6254_v14 = vcombine.low %v493_v59, %v497_v61 }
 0x1c8   :  { %3269 = vmatprep.subr.bf16.mxu1 %v6175_v4  ;;  %v6255_v4 = vcombine.high %v493_v59, %v497_v61  ;;  %v337_v6 = vld [vmem:[#allocation3 + $0x678] sm:$0xff] }
 0x1c9   :  { %v485_v13 = vld [vmem:[#allocation3 + $0xb18] sm:$0xff]  ;;  %v6095_v16 = vcombine.high %v333_v5, %v337_v6  ;;  %v2866_v25 = vadd.f32 %v2865_v58, %v551_v44 }
 0x1ca   :  { %3233 = vmatpush1.bf16.msra.mxu0 %v6022_v8  ;;  %v489_v8 = vld [vmem:[#allocation3 + $0xb38] sm:$0xff] }
 0x1cb   :  { %3270 = vmatpush1.bf16.msra.mxu1 %v6174_v9  ;;  %3234 = vmatprep.subr.bf16.mxu0 %v6143_v57  ;;  %v7512_v9 = vsub.s32 1, %v7448_v28  ;;  %v6102_v57 = vcombine.low %v341_v29, %v345_v56  ;;  %v6247_v10 = vcombine.high %v485_v13, %v489_v8  ;;  %v477_v24 = vld [vmem:[#allocation3 + $0xad8] sm:$0xff] }
 0x1cc   :  { %3271 = vmatprep.subr.bf16.mxu1 %v6167_v11  ;;  %v2785_v11 = vpop.f32.mrf.mxu0  ;;  %v481_v26 = vld [vmem:[#allocation3 + $0xaf8] sm:$0xff] }
 0x1cd   :  { %v547_v27 = vrot.slane %v7453_v40, %v7512_v9  ;;  %v6239_v42 = vcombine.high %v477_v24, %v481_v26  ;;  %v533_v43 = vld [vmem:[#allocation3 + $0xc98] sm:$0xff] }
 0x1ce   :  { %3235 = vmatpush2.bf16.msra.mxu0 %v6142_v18  ;;  %v325_v18 = vld [vmem:[#allocation3 + $0x618] sm:$0xff] }
 0x1cf   :  { %3272 = vmatpush1.bf16.msra.mxu1 %v6166_v19  ;;  %3236 = vmatprep.subr.bf16.mxu0 %v6135_v22  ;;  %v329_v19 = vld [vmem:[#allocation3 + $0x638] sm:$0xff]  ;;  %v2869_v22 = vpop.f32.mrf.mxu1  ;;  %v2700_v35 = vadd.f32 %v7484_v21, %v547_v27  ;;  %v2696_v49 = vadd.f32 %v7457_v62, %v547_v27 }
 0x1d0   :  { %3273 = vmatprep.subr.bf16.mxu1 %v6159_v23  ;;  %v2870_v36 = vadd.f32 %v2869_v22, %v551_v44  ;;  %v473_v48 = vld [vmem:[#allocation3 + $0xab8] sm:$0xff]  ;;  %v6086_v1 = vcombine.low %v325_v18, %v329_v19 }
 0x1d1   :  { %v2743_v21 = vadd.f32 %v7482_v17, %v2700_v35  ;;  %v529_v29 = vld [vmem:[#allocation3 + $0xc78] sm:$0xff]  ;;  %v2739_v62 = vadd.f32 %v7461_v2, %v2696_v49  ;;  %v7140_v2 = vld [vmem:[%s7603_s0 + $0x8] ss:$28 sps:$4 sm:$0xff]  }
 0x1d2   :  { %3237 = vmatpush2.bf16.msra.mxu0 %v6134_v32  ;;  %v6094_v32 = vcombine.low %v333_v5, %v337_v6  ;;  %v461_v58 = vld [vmem:[#allocation3 + $0xa58] sm:$0xff] }
 0x1d3   :  { %3274 = vmatpush1.bf16.msra.mxu1 %v6158_v20  ;;  %3238 = vmatprep.subr.bf16.mxu0 %v6127_v33  ;;  %v6246_v33 = vcombine.low %v485_v13, %v489_v8  ;;  %v465_v59 = vld [vmem:[#allocation3 + $0xa78] sm:$0xff]  ;;  %v2786_v61 = vadd.f32 %v2785_v11, %v2743_v21  ;;  %v2782_v44 = vadd.f32 %v7489_v39, %v2739_v62 }
 0x1d4   :  { %3275 = vmatprep.subr.bf16.mxu1 %v6151_v34  ;;  %v6087_v34 = vcombine.high %v325_v18, %v329_v19  ;;  %v6223_v5 = vcombine.high %v461_v58, %v465_v59  ;;  %v517_v6 = vld [vmem:[#allocation3 + $0xc18] sm:$0xff]  ;;  %v6222_v39 = vcombine.low %v461_v58, %v465_v59 }
 0x1d5   :  { %v521_v13 = vld [vmem:[#allocation3 + $0xc38] sm:$0xff]  ;;  %v2825_v22 = vadd.f32 %v7487_v37, %v2782_v44 }
 0x1d6   :  { %3239 = vmatpush2.bf16.msra.mxu0 %v6126_v41  ;;  %v537_v41 = vld [vmem:[#allocation3 + $0xcb8] sm:$0xff]  ;;  %v6279_v19 = vcombine.high %v517_v6, %v521_v13 }
 0x1d7   :  { %3276 = vmatpush1.bf16.msra.mxu1 %v6150_v45  ;;  %3240 = vmatprep.subr.bf16.mxu0 %v6119_v46  ;;  %v554_v45 = vsub.s32 3, %v7448_v28  ;;  %v457_v11 = vld [vmem:[#allocation3 + $0xa38] sm:$0xff]  ;;  %vm3348_vm4 = vcmp.gt.f32.partialorder %v2825_v22, 0.0 }
 0x1d8   :  { %3277 = vmatprep.subr.bf16.mxu1 %v6271_v47  ;;  %v469_v47 = vld [vmem:[#allocation3 + $0xa98] sm:$0xff] }
 0x1d9   :  { %v555_v56 = vrot.slane %v7453_v40, %v554_v45  ;;  %v6647_v35 = vld [vmem:[#allocation7 + $0xe4] ss:$16 sps:$4 sm:$0xff]   ;;  %v6645_v49 = vld [vmem:[#allocation7 + $0xe0] ss:$16 sps:$4 sm:$0xff]  }
 0x1da   :  { %3241 = vmatpush2.bf16.msra.mxu0 %v6118_v60  ;;  %v6238_v60 = vcombine.low %v477_v24, %v481_v26  ;;  %v7141_v62 = vld [vmem:[%s7603_s0 + $0x18] ss:$28 sps:$4 sm:$0xff]  }
 0x1db   :  { %3278 = vmatpush2.bf16.msra.mxu1 %v6270_v52  ;;  %3242 = vmatprep.subr.bf16.mxu0 %v6111_v53  ;;  %v6295_v52 = vcombine.high %v533_v43, %v537_v41  ;;  %v6231_v53 = vcombine.high %v469_v47, %v473_v48  ;;  %v2868_v40 = vadd.f32 %v7509_v7, %v555_v56 }
 0x1dc   :  { %3279 = vmatprep.subr.bf16.mxu1 %v6263_v55  ;;  %v525_v55 = vld [vmem:[#allocation3 + $0xc58] sm:$0xff] }
 0x1dd   :  { %v6287_v17 = vcombine.high %v525_v55, %v529_v29 }
 0x1de   :  { %3243 = vmatpush2.bf16.msra.mxu0 %v6110_v63  ;;  %v6294_v63 = vcombine.low %v533_v43, %v537_v41  ;;  %v6650_v41 = vld [vmem:[#allocation7 + $0x2e4] ss:$16 sps:$4 sm:$0xff]  }
 0x1df   :  { %3280 = vmatpush2.bf16.msra.mxu1 %v6262_v0  ;;  %3244 = vmatprep.subr.bf16.mxu0 %v6103_v15  ;;  %v6230_v15 = vcombine.low %v469_v47, %v473_v48 }
 0x1e0   :  { %3281 = vmatprep.subr.bf16.mxu1 %v6255_v4  ;;  %v2871_v4 = vpop.f32.mrf.mxu1 }
 0x1e1   :  { %v2908_v23 = vpop.f32.mrf.mxu0 }
 0x1e2   :  { %v2909_v31 = vadd.f32 %v2908_v23, %v2866_v25  ;;  %3245 = vmatpush2.bf16.msra.mxu0 %v6102_v57  ;;  %v453_v57 = vld [vmem:[#allocation3 + $0xa18] sm:$0xff]  ;;  %v6286_v25 = vcombine.low %v525_v55, %v529_v29 }
 0x1e3   :  { %3282 = vmatpush2.bf16.msra.mxu1 %v6254_v14  ;;  %v2910_v20 = vpop.f32.mrf.mxu0  ;;  %3246 = vmatprep.subr.bf16.mxu0 %v6095_v16  ;;  %v2829_v14 = vadd.f32 %v7503_v51, %v2786_v61  ;;  %v6215_v24 = vcombine.high %v453_v57, %v457_v11  ;;  %v6653_v29 = vld [vmem:[#allocation7 + $0xc4] ss:$16 sps:$4 sm:$0xff]  }
 0x1e4   :  { %3283 = vmatprep.subr.bf16.mxu1 %v6247_v10  ;;  %v2911_v10 = vadd.f32 %v2910_v20, %v2868_v40  ;;  %v6657_v40 = vld [vmem:[#allocation7 + $0xa0] ss:$16 sps:$4 sm:$0xff]  }
 0x1e5   :  { %v2912_v46 = vpop.f32.mrf.mxu0  ;;  %v3372_v51 = vmul.f32 0.2, %v2829_v14  ;;  %vm3356_vm3 = vcmp.gt.f32.partialorder %v2829_v14, 0.0 }
 0x1e6   :  { %v2913_v50 = vadd.f32 %v2912_v46, %v2870_v36  ;;  %3247 = vmatpush2.bf16.msra.mxu0 %v6094_v32  ;;  %v2872_v32 = vadd.f32 %v2871_v4, %v555_v56  ;;  %v3364_v36 = vmul.f32 0.2, %v2825_v22  ;;  %v6656_v56 = vld [vmem:[#allocation7 + $0x2c4] ss:$16 sps:$4 sm:$0xff]  }
 0x1e7   :  { %3284 = vmatpush2.bf16.msra.mxu1 %v6246_v33  ;;  %3248 = vmatprep.subr.bf16.mxu0 %v6087_v34  ;;  %v2914_v0 = vpop.f32.mrf.mxu0  ;;  %v6278_v34 = vcombine.low %v517_v6, %v521_v13  ;;  %v6662_v6 = vld [vmem:[#allocation7 + $0x2a4] ss:$16 sps:$4 sm:$0xff]  }
 0x1e8   :  { %3285 = vmatprep.subr.bf16.mxu1 %v6239_v42  ;;  %v2915_v42 = vadd.f32 %v2914_v0, %v2872_v32  ;;  %v3380_v55 = vsel %vm3348_vm4, %v2825_v22, %v3364_v36  ;;  %v6683_v22 = vld [vmem:[#allocation7 + $0x24] ss:$16 sps:$4 sm:$0xff]   ;;  %v6687_v32 = vld [vmem:[#allocation7] ss:$16 sps:$4 sm:$0xff]  }
 0x1e9   :  { %v6704_v36 = vld [vmem:[#allocation7 + $0x3c4] ss:$16 sps:$4 sm:$0xff]  }
 0x1ea   :  { %3249 = vmatpush2.bf16.msra.mxu0 %v6086_v1 }
 0x1eb   :  { %3286 = vmatpush2.bf16.msra.mxu1 %v6238_v60  ;;  %3314 = vmatprep.subr.bf16.mxu0 %v6295_v52  ;;  %v6648_v52 = vld [vmem:[#allocation7 + $0x2e0] ss:$16 sps:$4 sm:$0xff]  }
 0x1ec   :  { %3287 = vmatprep.subr.bf16.mxu1 %v6231_v53 }
 0x1ed   :  { %v2994_v8 = vpop.f32.mrf.mxu0  ;;  %3251 = vmatmul.mubr.bf16.vlgmr.msra.gmra.mxu0 %v7140_v2  ;;  %v6668_v2 = vld [vmem:[#allocation7 + $0x284] ss:$16 sps:$4 sm:$0xff]  }
 0x1ee   :  { %v2951_v16 = vpop.f32.mrf.mxu1  ;;  %3315 = vmatpush1.bf16.msra.mxu0 %v6294_v63  ;;  %3336 = vmatprep.mubr.bf16.mxu0 %v7304_v30 }
 0x1ef   :  { %v2952_v18 = vadd.f32 %v2951_v16, %v2909_v31  ;;  %3288 = vmatpush2.bf16.msra.mxu1 %v6230_v15  ;;  %v2996_v7 = vpop.f32.mrf.mxu0  ;;  %3316 = vmatprep.subr.bf16.mxu0 %v6287_v17  ;;  %v6214_v31 = vcombine.low %v453_v57, %v457_v11  ;;  %v6651_v15 = vld [vmem:[#allocation7 + $0xc0] ss:$16 sps:$4 sm:$0xff]   ;;  %v6674_v16 = vld [vmem:[#allocation7 + $0x264] ss:$16 sps:$4 sm:$0xff]  }
 0x1f0   :  { %v2953_v23 = vpop.f32.mrf.mxu1  ;;  %3289 = vmatprep.subr.bf16.mxu1 %v6223_v5  ;;  %v6654_v17 = vld [vmem:[#allocation7 + $0x2c0] ss:$16 sps:$4 sm:$0xff]   ;;  %v6659_v5 = vld [vmem:[#allocation7 + $0xa4] ss:$16 sps:$4 sm:$0xff]  }
 0x1f1   :  { %v2995_v26 = vadd.f32 %v2994_v8, %v2952_v18  ;;  %v2954_v27 = vadd.f32 %v2953_v23, %v2911_v10  ;;  %v2998_v20 = vpop.f32.mrf.mxu0  ;;  %v6665_v8 = vld [vmem:[#allocation7 + $0x84] ss:$16 sps:$4 sm:$0xff]   ;;  %v6663_v57 = vld [vmem:[#allocation7 + $0x80] ss:$16 sps:$4 sm:$0xff]  }
 0x1f2   :  { %v2955_v33 = vpop.f32.mrf.mxu1  ;;  %3317 = vmatpush1.bf16.msra.mxu0 %v6286_v25  ;;  %v6666_v11 = vld [vmem:[#allocation7 + $0x280] ss:$16 sps:$4 sm:$0xff]   ;;  %v6677_v10 = vld [vmem:[#allocation7 + $0x44] ss:$16 sps:$4 sm:$0xff]  }
 0x1f3   :  { %v2956_v30 = vadd.f32 %v2955_v33, %v2913_v50  ;;  %3290 = vmatpush2.bf16.msra.mxu1 %v6222_v39  ;;  %3318 = vmatprep.subr.bf16.mxu0 %v6279_v19  ;;  %v2997_v37 = vadd.f32 %v2996_v7, %v2954_v27  ;;  %v3365_v46 = vmul.f32 0.2, %v2995_v26  ;;  %vm3349_vm5 = vcmp.gt.f32.partialorder %v2995_v26, 0.0  ;;  %v3000_v60 = vpop.f32.mrf.mxu0  ;;  %v6669_v39 = vld [vmem:[#allocation7 + $0x60] ss:$16 sps:$4 sm:$0xff]  }
 0x1f4   :  { %v2957_v43 = vpop.f32.mrf.mxu1  ;;  %3291 = vmatprep.subr.bf16.mxu1 %v6215_v24  ;;  %v3388_v50 = vsel %vm3356_vm3, %v2829_v14, %v3372_v51  ;;  %v6671_v14 = vld [vmem:[#allocation7 + $0x64] ss:$16 sps:$4 sm:$0xff]   ;;  %v6672_v25 = vld [vmem:[#allocation7 + $0x260] ss:$16 sps:$4 sm:$0xff]  }
 0x1f5   :  { %v2999_v47 = vadd.f32 %v2998_v20, %v2956_v30  ;;  %v2958_v48 = vadd.f32 %v2957_v43, %v2915_v42  ;;  %v3366_v21 = vmul.f32 0.2, %v2997_v37  ;;  %v3381_v58 = vsel %vm3349_vm5, %v2995_v26, %v3365_v46  ;;  %v6680_v18 = vld [vmem:[#allocation7 + $0x244] ss:$16 sps:$4 sm:$0xff]   ;;  %v6675_v7 = vld [vmem:[#allocation7 + $0x40] ss:$16 sps:$4 sm:$0xff]  }
 0x1f6   :  { %3319 = vmatpush1.bf16.msra.mxu0 %v6278_v34  ;;  %vm3350_vm7 = vcmp.gt.f32.partialorder %v2997_v37, 0.0  ;;  %v7539_v61 = vpack.c.bf16 %v3388_v50, %v3380_v55  ;;  %v6678_v19 = vld [vmem:[#allocation7 + $0x240] ss:$16 sps:$4 sm:$0xff]   ;;  %v6686_v23 = vld [vmem:[#allocation7 + $0x224] ss:$16 sps:$4 sm:$0xff]  }
 0x1f7   :  { %vm3357_vm6 = vcmp.gt.f32.partialorder %v2999_v47, 0.0  ;;  %v3373_v1 = vmul.f32 0.2, %v2999_v47  ;;  %3292 = vmatpush2.bf16.msra.mxu1 %v6214_v31  ;;  %4961 = vmatprep.subr.bf16.mxu0 %v6647_v35  ;;  %v3001_v53 = vadd.f32 %v3000_v60, %v2958_v48  ;;  %v3382_v44 = vsel %vm3350_vm7, %v2997_v37, %v3366_v21  ;;  %v6681_v24 = vld [vmem:[#allocation7 + $0x20] ss:$16 sps:$4 sm:$0xff]  }
 0x1f8   :  { %5004 = vmatprep.subr.bf16.mxu1 %v6650_v41  ;;  %v6684_v26 = vld [vmem:[#allocation7 + $0x220] ss:$16 sps:$4 sm:$0xff]   ;;  %v6689_v27 = vld [vmem:[#allocation7 + $0x4] ss:$16 sps:$4 sm:$0xff]  }
 0x1f9   :  { %v3389_v59 = vsel %vm3357_vm6, %v2999_v47, %v3373_v1  ;;  %6299 = vmatmul.mubr.msk.bf16.vlgmr.msra.gmra.mxu0 %vm2655_vm0, %v7141_v62  ;;  %vm3358_vm8 = vcmp.gt.f32.partialorder %v3001_v53, 0.0  ;;  %v3374_v0 = vmul.f32 0.2, %v3001_v53  ;;  %v6692_v51 = vld [vmem:[#allocation7 + $0x204] ss:$16 sps:$4 sm:$0xff]  }
 0x1fa   :  { %v7541_v63 = vpack.c.bf16 %v3389_v59, %v3381_v58  ;;  %3294 = vmatmul.mubr.bf16.vlgmr.msra.gmra.mxu1 %v7495_v3  ;;  %4962 = vmatpush1.bf16.msra.mxu0 %v6645_v49  ;;  %v6660_v3 = vld [vmem:[#allocation7 + $0x2a0] ss:$16 sps:$4 sm:$0xff]   ;;  %v6695_v34 = vld [vmem:[#allocation7 + $0x1e4] ss:$16 sps:$4 sm:$0xff]  }
 0x1fb   :  { %4993 = vmatprep.mubr.bf16.mxu0 %v7539_v61  ;;  %5005 = vmatpush1.bf16.msra.mxu1 %v6648_v52  ;;  %v3390_v4 = vsel %vm3358_vm8, %v3001_v53, %v3374_v0  ;;  %v6690_v33 = vld [vmem:[#allocation7 + $0x200] ss:$16 sps:$4 sm:$0xff]   ;;  %v6698_v30 = vld [vmem:[#allocation7 + $0x3e4] ss:$16 sps:$4 sm:$0xff]  }
 0x1fc   :  { %4963 = vmatprep.subr.bf16.mxu0 %v6653_v29  ;;  %5006 = vmatprep.subr.bf16.mxu1 %v6656_v56  ;;  %v7546_v13 = vpack.c.bf16 %v3390_v4, %v3382_v44  ;;  %v6693_v20 = vld [vmem:[#allocation7 + $0x1e0] ss:$16 sps:$4 sm:$0xff]   ;;  %v6701_v35 = vld [vmem:[#allocation7 + $0x1c4] ss:$16 sps:$4 sm:$0xff]  }
 0x1fd   :  { %v6696_v31 = vld [vmem:[#allocation7 + $0x3e0] ss:$16 sps:$4 sm:$0xff]   ;;  %v6707_v43 = vld [vmem:[#allocation7 + $0x1a4] ss:$16 sps:$4 sm:$0xff]  }
 0x1fe   :  { %4964 = vmatpush1.bf16.msra.mxu0 %v6651_v15  ;;  %5036 = vmatprep.mubr.bf16.mxu1 %v7546_v13  ;;  %v6699_v42 = vld [vmem:[#allocation7 + $0x1c0] ss:$16 sps:$4 sm:$0xff]   ;;  %v6710_v41 = vld [vmem:[#allocation7 + $0x3a4] ss:$16 sps:$4 sm:$0xff]  }
 0x1ff   :  { %5007 = vmatpush1.bf16.msra.mxu1 %v6654_v17  ;;  %4965 = vmatprep.subr.bf16.mxu0 %v6659_v5  ;;  %v6702_v37 = vld [vmem:[#allocation7 + $0x3c0] ss:$16 sps:$4 sm:$0xff]   ;;  %v6713_v48 = vld [vmem:[#allocation7 + $0x184] ss:$16 sps:$4 sm:$0xff]  }
 0x200   :  { %5008 = vmatprep.subr.bf16.mxu1 %v6662_v6  ;;  %v6705_v46 = vld [vmem:[#allocation7 + $0x1a0] ss:$16 sps:$4 sm:$0xff]   ;;  %v6716_v49 = vld [vmem:[#allocation7 + $0x384] ss:$16 sps:$4 sm:$0xff]  }
 0x201   :  { %v6708_v47 = vld [vmem:[#allocation7 + $0x3a0] ss:$16 sps:$4 sm:$0xff]   ;;  %v6719_v60 = vld [vmem:[#allocation7 + $0x164] ss:$16 sps:$4 sm:$0xff]  }
 0x202   :  { %4966 = vmatpush1.bf16.msra.mxu0 %v6657_v40  ;;  %v6711_v50 = vld [vmem:[#allocation7 + $0x180] ss:$16 sps:$4 sm:$0xff]   ;;  %v6722_v52 = vld [vmem:[#allocation7 + $0x364] ss:$16 sps:$4 sm:$0xff]  }
 0x203   :  { %5009 = vmatpush1.bf16.msra.mxu1 %v6660_v3  ;;  %4967 = vmatprep.subr.bf16.mxu0 %v6665_v8  ;;  %v6714_v1 = vld [vmem:[#allocation7 + $0x380] ss:$16 sps:$4 sm:$0xff]   ;;  %v6725_v55 = vld [vmem:[#allocation7 + $0x144] ss:$16 sps:$4 sm:$0xff]  }
 0x204   :  { %5010 = vmatprep.subr.bf16.mxu1 %v6668_v2  ;;  %v6717_v21 = vld [vmem:[#allocation7 + $0x160] ss:$16 sps:$4 sm:$0xff]   ;;  %v6728_v29 = vld [vmem:[#allocation7 + $0x344] ss:$16 sps:$4 sm:$0xff]  }
 0x205   :  { %v6720_v53 = vld [vmem:[#allocation7 + $0x360] ss:$16 sps:$4 sm:$0xff]   ;;  %v6731_v59 = vld [vmem:[#allocation7 + $0x124] ss:$16 sps:$4 sm:$0xff]  }
 0x206   :  { %4968 = vmatpush1.bf16.msra.mxu0 %v6663_v57  ;;  %v6723_v56 = vld [vmem:[#allocation7 + $0x140] ss:$16 sps:$4 sm:$0xff]   ;;  %v6734_v62 = vld [vmem:[#allocation7 + $0x324] ss:$16 sps:$4 sm:$0xff]  }
 0x207   :  { %5011 = vmatpush1.bf16.msra.mxu1 %v6666_v11  ;;  %4969 = vmatprep.subr.bf16.mxu0 %v6671_v14  ;;  %v6726_v58 = vld [vmem:[#allocation7 + $0x340] ss:$16 sps:$4 sm:$0xff]   ;;  %v6737_v17 = vld [vmem:[#allocation7 + $0x104] ss:$16 sps:$4 sm:$0xff]  }
 0x208   :  { %5012 = vmatprep.subr.bf16.mxu1 %v6674_v16  ;;  %v6729_v0 = vld [vmem:[#allocation7 + $0x120] ss:$16 sps:$4 sm:$0xff]   ;;  %v6740_v44 = vld [vmem:[#allocation7 + $0x304] ss:$16 sps:$4 sm:$0xff]  }
 0x209   :  { %v6732_v15 = vld [vmem:[#allocation7 + $0x320] ss:$16 sps:$4 sm:$0xff]   ;;  %v6743_v6 = vld [vmem:[#allocation7 + $0x4e4] ss:$16 sps:$4 sm:$0xff]  }
 0x20a   :  { %4970 = vmatpush1.bf16.msra.mxu0 %v6669_v39  ;;  %v6735_v4 = vld [vmem:[#allocation7 + $0x100] ss:$16 sps:$4 sm:$0xff]   ;;  %v6800_v40 = vld [vmem:[#allocation7 + $0x6e4] ss:$16 sps:$4 sm:$0xff]  }
 0x20b   :  { %5013 = vmatpush1.bf16.msra.mxu1 %v6672_v25  ;;  %4971 = vmatprep.subr.bf16.mxu0 %v6677_v10  ;;  %v6738_v5 = vld [vmem:[#allocation7 + $0x300] ss:$16 sps:$4 sm:$0xff]   ;;  %v6746_v8 = vld [vmem:[#allocation7 + $0x4c4] ss:$16 sps:$4 sm:$0xff]  }
 0x20c   :  { %5014 = vmatprep.subr.bf16.mxu1 %v6680_v18  ;;  %v6741_v3 = vld [vmem:[#allocation7 + $0x4e0] ss:$16 sps:$4 sm:$0xff]   ;;  %v6806_v57 = vld [vmem:[#allocation7 + $0x6c4] ss:$16 sps:$4 sm:$0xff]  }
 0x20d   :  { %v6798_v2 = vld [vmem:[#allocation7 + $0x6e0] ss:$16 sps:$4 sm:$0xff]   ;;  %v6749_v14 = vld [vmem:[#allocation7 + $0x4a4] ss:$16 sps:$4 sm:$0xff]  }
 0x20e   :  { %4972 = vmatpush1.bf16.msra.mxu0 %v6675_v7  ;;  %v6744_v11 = vld [vmem:[#allocation7 + $0x4c0] ss:$16 sps:$4 sm:$0xff]   ;;  %v6812_v39 = vld [vmem:[#allocation7 + $0x6a4] ss:$16 sps:$4 sm:$0xff]  }
 0x20f   :  { %5015 = vmatpush1.bf16.msra.mxu1 %v6678_v19  ;;  %4973 = vmatprep.subr.bf16.mxu0 %v6683_v22  ;;  %v6804_v16 = vld [vmem:[#allocation7 + $0x6c0] ss:$16 sps:$4 sm:$0xff]   ;;  %v6752_v10 = vld [vmem:[#allocation7 + $0x484] ss:$16 sps:$4 sm:$0xff]  }
 0x210   :  { %5016 = vmatprep.subr.bf16.mxu1 %v6686_v23  ;;  %v6747_v25 = vld [vmem:[#allocation7 + $0x4a0] ss:$16 sps:$4 sm:$0xff]   ;;  %v6818_v7 = vld [vmem:[#allocation7 + $0x684] ss:$16 sps:$4 sm:$0xff]  }
 0x211   :  { %v6810_v18 = vld [vmem:[#allocation7 + $0x6a0] ss:$16 sps:$4 sm:$0xff]   ;;  %v6755_v22 = vld [vmem:[#allocation7 + $0x464] ss:$16 sps:$4 sm:$0xff]  }
 0x212   :  { %4974 = vmatpush1.bf16.msra.mxu0 %v6681_v24  ;;  %v6750_v19 = vld [vmem:[#allocation7 + $0x480] ss:$16 sps:$4 sm:$0xff]   ;;  %v6824_v24 = vld [vmem:[#allocation7 + $0x664] ss:$16 sps:$4 sm:$0xff]  }
 0x213   :  { %5017 = vmatpush1.bf16.msra.mxu1 %v6684_v26  ;;  %4975 = vmatprep.subr.bf16.mxu0 %v6689_v27  ;;  %v6816_v23 = vld [vmem:[#allocation7 + $0x680] ss:$16 sps:$4 sm:$0xff]   ;;  %v6758_v27 = vld [vmem:[#allocation7 + $0x444] ss:$16 sps:$4 sm:$0xff]  }
 0x214   :  { %5018 = vmatprep.subr.bf16.mxu1 %v6692_v51  ;;  %v6753_v26 = vld [vmem:[#allocation7 + $0x460] ss:$16 sps:$4 sm:$0xff]  }
 0x215   :  { %v6822_v51 = vld [vmem:[#allocation7 + $0x660] ss:$16 sps:$4 sm:$0xff]  }
 0x216   :  { %4976 = vmatpush1.bf16.msra.mxu0 %v6687_v32  ;;  %v6830_v32 = vld [vmem:[#allocation7 + $0x644] ss:$16 sps:$4 sm:$0xff]  }
 0x217   :  { %5019 = vmatpush1.bf16.msra.mxu1 %v6690_v33  ;;  %4977 = vmatprep.subr.bf16.mxu0 %v6695_v34  ;;  %v6756_v33 = vld [vmem:[#allocation7 + $0x440] ss:$16 sps:$4 sm:$0xff]   ;;  %v6761_v34 = vld [vmem:[#allocation7 + $0x424] ss:$16 sps:$4 sm:$0xff]  }
 0x218   :  { %5020 = vmatprep.subr.bf16.mxu1 %v6698_v30  ;;  %v6828_v30 = vld [vmem:[#allocation7 + $0x640] ss:$16 sps:$4 sm:$0xff]  }
 0x21a   :  { %4978 = vmatpush2.bf16.msra.mxu0 %v6693_v20  ;;  %v6836_v20 = vld [vmem:[#allocation7 + $0x624] ss:$16 sps:$4 sm:$0xff]  }
 0x21b   :  { %5021 = vmatpush2.bf16.msra.mxu1 %v6696_v31  ;;  %4979 = vmatprep.subr.bf16.mxu0 %v6701_v35  ;;  %v6759_v31 = vld [vmem:[#allocation7 + $0x420] ss:$16 sps:$4 sm:$0xff]   ;;  %v6764_v35 = vld [vmem:[#allocation7 + $0x404] ss:$16 sps:$4 sm:$0xff]  }
 0x21c   :  { %5022 = vmatprep.subr.bf16.mxu1 %v6704_v36  ;;  %v6834_v36 = vld [vmem:[#allocation7 + $0x620] ss:$16 sps:$4 sm:$0xff]  }
 0x21e   :  { %4980 = vmatpush2.bf16.msra.mxu0 %v6699_v42  ;;  %v6842_v42 = vld [vmem:[#allocation7 + $0x604] ss:$16 sps:$4 sm:$0xff]  }
 0x21f   :  { %5023 = vmatpush2.bf16.msra.mxu1 %v6702_v37  ;;  %4981 = vmatprep.subr.bf16.mxu0 %v6707_v43  ;;  %v6762_v37 = vld [vmem:[#allocation7 + $0x400] ss:$16 sps:$4 sm:$0xff]   ;;  %v6767_v43 = vld [vmem:[#allocation7 + $0x5e4] ss:$16 sps:$4 sm:$0xff]  }
 0x220   :  { %5024 = vmatprep.subr.bf16.mxu1 %v6710_v41  ;;  %v6840_v41 = vld [vmem:[#allocation7 + $0x600] ss:$16 sps:$4 sm:$0xff]  }
 0x222   :  { %4982 = vmatpush2.bf16.msra.mxu0 %v6705_v46  ;;  %v6848_v46 = vld [vmem:[#allocation7 + $0x7e4] ss:$16 sps:$4 sm:$0xff]  }
 0x223   :  { %5025 = vmatpush2.bf16.msra.mxu1 %v6708_v47  ;;  %4983 = vmatprep.subr.bf16.mxu0 %v6713_v48  ;;  %v6765_v47 = vld [vmem:[#allocation7 + $0x5e0] ss:$16 sps:$4 sm:$0xff]   ;;  %v6770_v48 = vld [vmem:[#allocation7 + $0x5c4] ss:$16 sps:$4 sm:$0xff]  }
 0x224   :  { %5026 = vmatprep.subr.bf16.mxu1 %v6716_v49  ;;  %v6846_v49 = vld [vmem:[#allocation7 + $0x7e0] ss:$16 sps:$4 sm:$0xff]  }
 0x226   :  { %4984 = vmatpush2.bf16.msra.mxu0 %v6711_v50  ;;  %v6854_v50 = vld [vmem:[#allocation7 + $0x7c4] ss:$16 sps:$4 sm:$0xff]  }
 0x227   :  { %5027 = vmatpush2.bf16.msra.mxu1 %v6714_v1  ;;  %4985 = vmatprep.subr.bf16.mxu0 %v6719_v60  ;;  %v6768_v1 = vld [vmem:[#allocation7 + $0x5c0] ss:$16 sps:$4 sm:$0xff]   ;;  %v6773_v60 = vld [vmem:[#allocation7 + $0x5a4] ss:$16 sps:$4 sm:$0xff]  }
 0x228   :  { %5028 = vmatprep.subr.bf16.mxu1 %v6722_v52  ;;  %v6852_v52 = vld [vmem:[#allocation7 + $0x7c0] ss:$16 sps:$4 sm:$0xff]  }
 0x22a   :  { %4986 = vmatpush2.bf16.msra.mxu0 %v6717_v21 }
 0x22b   :  { %5029 = vmatpush2.bf16.msra.mxu1 %v6720_v53  ;;  %4987 = vmatprep.subr.bf16.mxu0 %v6725_v55  ;;  %v6860_v53 = vld [vmem:[#allocation7 + $0x7a4] ss:$16 sps:$4 sm:$0xff]   ;;  %v6771_v55 = vld [vmem:[#allocation7 + $0x5a0] ss:$16 sps:$4 sm:$0xff]  }
 0x22c   :  { %5030 = vmatprep.subr.bf16.mxu1 %v6728_v29 }
 0x22d   :  { %v3037_v29 = vpop.f32.mrf.mxu0 }
 0x22e   :  { %4988 = vmatpush2.bf16.msra.mxu0 %v6723_v56  ;;  %v3080_v21 = vpop.f32.mrf.mxu1  ;;  %v6776_v56 = vld [vmem:[#allocation7 + $0x584] ss:$16 sps:$4 sm:$0xff]  }
 0x22f   :  { %5031 = vmatpush2.bf16.msra.mxu1 %v6726_v58  ;;  %4989 = vmatprep.subr.bf16.mxu0 %v6731_v59  ;;  %v6858_v58 = vld [vmem:[#allocation7 + $0x7a0] ss:$16 sps:$4 sm:$0xff]  }
 0x230   :  { %5032 = vmatprep.subr.bf16.mxu1 %v6734_v62  ;;  %v3082_v59 = vpop.f32.mrf.mxu1  ;;  %v6866_v62 = vld [vmem:[#allocation7 + $0x784] ss:$16 sps:$4 sm:$0xff]  }
 0x232   :  { %4990 = vmatpush2.bf16.msra.mxu0 %v6729_v0  ;;  %v558_v0 = vsub.s32 4, %v7448_v28 }
 0x233   :  { %5033 = vmatpush2.bf16.msra.mxu1 %v6732_v15  ;;  %4991 = vmatprep.subr.bf16.mxu0 %v6737_v17  ;;  %v562_v15 = vsub.s32 5, %v7448_v28  ;;  %v6774_v17 = vld [vmem:[#allocation7 + $0x580] ss:$16 sps:$4 sm:$0xff]  }
 0x234   :  { %5034 = vmatprep.subr.bf16.mxu1 %v6740_v44  ;;  %v3039_v44 = vpop.f32.mrf.mxu0 }
 0x236   :  { %4992 = vmatpush2.bf16.msra.mxu0 %v6735_v4  ;;  %v6779_v4 = vld [vmem:[#allocation7 + $0x564] ss:$16 sps:$4 sm:$0xff]  }
 0x237   :  { %5035 = vmatpush2.bf16.msra.mxu1 %v6738_v5  ;;  %5047 = vmatprep.subr.bf16.mxu0 %v6743_v6  ;;  %v6864_v5 = vld [vmem:[#allocation7 + $0x780] ss:$16 sps:$4 sm:$0xff]   ;;  %v3084_v6 = vpop.f32.mrf.mxu1 }
 0x238   :  { %5090 = vmatprep.subr.bf16.mxu1 %v6800_v40  ;;  %v6872_v40 = vld [vmem:[#allocation7 + $0x764] ss:$16 sps:$4 sm:$0xff]  }
 0x239   :  { %4994 = vmatmul.mubr.bf16.vlgmr.msra.gmra.mxu0 %v7498_v12 }
 0x23a   :  { %5037 = vmatmul.mubr.bf16.vlgmr.msra.gmra.mxu1 %v7541_v63  ;;  %5048 = vmatpush1.bf16.msra.mxu0 %v6741_v3  ;;  %v7553_v3 = vld [vmem:[#allocation5] sm:$0xff] }
 0x23b   :  { %5049 = vmatprep.subr.bf16.mxu0 %v6746_v8  ;;  %5091 = vmatpush1.bf16.msra.mxu1 %v6798_v2  ;;  %v559_v8 = vrot.slane %v7553_v3, %v558_v0  ;;  %v563_v2 = vrot.slane %v7553_v3, %v562_v15 }
 0x23c   :  { %5092 = vmatprep.subr.bf16.mxu1 %v6806_v57  ;;  %v6777_v57 = vld [vmem:[#allocation7 + $0x560] ss:$16 sps:$4 sm:$0xff]  }
 0x23e   :  { %5050 = vmatpush1.bf16.msra.mxu0 %v6744_v11  ;;  %v3041_v11 = vpop.f32.mrf.mxu0 }
 0x23f   :  { %5051 = vmatprep.subr.bf16.mxu0 %v6749_v14  ;;  %5093 = vmatpush1.bf16.msra.mxu1 %v6804_v16  ;;  %v6782_v14 = vld [vmem:[#allocation7 + $0x544] ss:$16 sps:$4 sm:$0xff]   ;;  %v6870_v16 = vld [vmem:[#allocation7 + $0x760] ss:$16 sps:$4 sm:$0xff]  }
 0x240   :  { %5094 = vmatprep.subr.bf16.mxu1 %v6812_v39  ;;  %v3086_v39 = vpop.f32.mrf.mxu1 }
 0x242   :  { %5052 = vmatpush1.bf16.msra.mxu0 %v6747_v25  ;;  %v6878_v25 = vld [vmem:[#allocation7 + $0x744] ss:$16 sps:$4 sm:$0xff]  }
 0x243   :  { %5053 = vmatprep.subr.bf16.mxu0 %v6752_v10  ;;  %5095 = vmatpush1.bf16.msra.mxu1 %v6810_v18  ;;  %v3038_v10 = vadd.f32 %v3037_v29, %v559_v8  ;;  %v3040_v18 = vadd.f32 %v3039_v44, %v563_v2  ;;  %v6896_v29 = vld [vmem:[#allocation7 + $0x2ec] ss:$16 sps:$4 sm:$0xff]  }
 0x244   :  { %5096 = vmatprep.subr.bf16.mxu1 %v6818_v7  ;;  %v3166_v7 = vpop.f32.mrf.mxu1 }
 0x246   :  { %5054 = vmatpush1.bf16.msra.mxu0 %v6750_v19  ;;  %v6780_v19 = vld [vmem:[#allocation7 + $0x540] ss:$16 sps:$4 sm:$0xff]  }
 0x247   :  { %5055 = vmatprep.subr.bf16.mxu0 %v6755_v22  ;;  %5097 = vmatpush1.bf16.msra.mxu1 %v6816_v23  ;;  %v3043_v22 = vpop.f32.mrf.mxu0  ;;  %v6785_v23 = vld [vmem:[#allocation7 + $0x524] ss:$16 sps:$4 sm:$0xff]  }
 0x248   :  { %5098 = vmatprep.subr.bf16.mxu1 %v6824_v24  ;;  %v6876_v24 = vld [vmem:[#allocation7 + $0x740] ss:$16 sps:$4 sm:$0xff]  }
 0x24a   :  { %5056 = vmatpush1.bf16.msra.mxu0 %v6753_v26  ;;  %v3042_v26 = vadd.f32 %v3041_v11, %v559_v8  ;;  %v6789_v8 = vld [vmem:[#allocation7 + $0xe8] ss:$16 sps:$4 sm:$0xff]  }
 0x24b   :  { %5057 = vmatprep.subr.bf16.mxu0 %v6758_v27  ;;  %5099 = vmatpush1.bf16.msra.mxu1 %v6822_v51  ;;  %v6884_v27 = vld [vmem:[#allocation7 + $0x724] ss:$16 sps:$4 sm:$0xff]   ;;  %v6792_v11 = vld [vmem:[#allocation7 + $0xc8] ss:$16 sps:$4 sm:$0xff]  }
 0x24c   :  { %5100 = vmatprep.subr.bf16.mxu1 %v6830_v32  ;;  %v3081_v32 = vadd.f32 %v3080_v21, %v3038_v10  ;;  %v6888_v21 = vld [vmem:[#allocation7 + $0x700] ss:$16 sps:$4 sm:$0xff]   ;;  %v6809_v10 = vld [vmem:[#allocation7 + $0x6c] ss:$16 sps:$4 sm:$0xff]  }
 0x24e   :  { %5058 = vmatpush1.bf16.msra.mxu0 %v6756_v33  ;;  %v3083_v33 = vadd.f32 %v3082_v59, %v3040_v18  ;;  %v6807_v18 = vld [vmem:[#allocation7 + $0x68] ss:$16 sps:$4 sm:$0xff]  }
 0x24f   :  { %5059 = vmatprep.subr.bf16.mxu0 %v6761_v34  ;;  %5101 = vmatpush1.bf16.msra.mxu1 %v6828_v30  ;;  %v3168_v34 = vpop.f32.mrf.mxu1  ;;  %v6783_v30 = vld [vmem:[#allocation7 + $0x520] ss:$16 sps:$4 sm:$0xff]  }
 0x250   :  { %5102 = vmatprep.subr.bf16.mxu1 %v6836_v20  ;;  %v3044_v20 = vadd.f32 %v3043_v22, %v563_v2  ;;  %v6821_v22 = vld [vmem:[#allocation7 + $0x2c] ss:$16 sps:$4 sm:$0xff]  }
 0x252   :  { %5060 = vmatpush1.bf16.msra.mxu0 %v6759_v31 }
 0x253   :  { %5061 = vmatprep.subr.bf16.mxu0 %v6764_v35  ;;  %5103 = vmatpush1.bf16.msra.mxu1 %v6834_v36  ;;  %v6788_v35 = vld [vmem:[#allocation7 + $0x504] ss:$16 sps:$4 sm:$0xff]   ;;  %v6882_v36 = vld [vmem:[#allocation7 + $0x720] ss:$16 sps:$4 sm:$0xff]  }
 0x254   :  { %5104 = vmatprep.subr.bf16.mxu1 %v6842_v42  ;;  %v3085_v42 = vadd.f32 %v3084_v6, %v3042_v26  ;;  %v6833_v26 = vld [vmem:[#allocation7 + $0x1ec] ss:$16 sps:$4 sm:$0xff]  }
 0x256   :  { %5062 = vmatpush1.bf16.msra.mxu0 %v6762_v37 }
 0x257   :  { %5063 = vmatprep.subr.bf16.mxu0 %v6767_v43  ;;  %5105 = vmatpush1.bf16.msra.mxu1 %v6840_v41  ;;  %v6890_v41 = vld [vmem:[#allocation7 + $0x704] ss:$16 sps:$4 sm:$0xff]  }
 0x258   :  { %5106 = vmatprep.subr.bf16.mxu1 %v6848_v46 }
 0x25a   :  { %5064 = vmatpush2.bf16.msra.mxu0 %v6765_v47  ;;  %v3170_v47 = vpop.f32.mrf.mxu1 }
 0x25b   :  { %5065 = vmatprep.subr.bf16.mxu0 %v6770_v48  ;;  %5107 = vmatpush2.bf16.msra.mxu1 %v6846_v49  ;;  %v6786_v49 = vld [vmem:[#allocation7 + $0x500] ss:$16 sps:$4 sm:$0xff]  }
 0x25c   :  { %5108 = vmatprep.subr.bf16.mxu1 %v6854_v50  ;;  %v3087_v50 = vadd.f32 %v3086_v39, %v3044_v20  ;;  %v6803_v39 = vld [vmem:[#allocation7 + $0x8c] ss:$16 sps:$4 sm:$0xff]   ;;  %v6849_v20 = vld [vmem:[#allocation7 + $0x188] ss:$16 sps:$4 sm:$0xff]  }
 0x25e   :  { %5066 = vmatpush2.bf16.msra.mxu0 %v6768_v1 }
 0x25f   :  { %5067 = vmatprep.subr.bf16.mxu0 %v6773_v60  ;;  %5109 = vmatpush2.bf16.msra.mxu1 %v6852_v52  ;;  %v6791_v52 = vld [vmem:[#allocation7 + $0xec] ss:$16 sps:$4 sm:$0xff]  }
 0x260   :  { %5110 = vmatprep.subr.bf16.mxu1 %v6860_v53 }
 0x262   :  { %5068 = vmatpush2.bf16.msra.mxu0 %v6771_v55 }
 0x263   :  { %5069 = vmatprep.subr.bf16.mxu0 %v6776_v56  ;;  %5111 = vmatpush2.bf16.msra.mxu1 %v6858_v58  ;;  %v3172_v58 = vpop.f32.mrf.mxu1 }
 0x264   :  { %5112 = vmatprep.subr.bf16.mxu1 %v6866_v62 }
 0x266   :  { %5070 = vmatpush2.bf16.msra.mxu0 %v6774_v17 }
 0x267   :  { %5071 = vmatprep.subr.bf16.mxu0 %v6779_v4  ;;  %5113 = vmatpush2.bf16.msra.mxu1 %v6864_v5 }
 0x268   :  { %5114 = vmatprep.subr.bf16.mxu1 %v6872_v40 }
 0x26a   :  { %5072 = vmatpush2.bf16.msra.mxu0 %v6777_v57  ;;  %v6794_v57 = vld [vmem:[#allocation7 + $0xcc] ss:$16 sps:$4 sm:$0xff]  }
 0x26b   :  { %5073 = vmatprep.subr.bf16.mxu0 %v6782_v14  ;;  %5115 = vmatpush2.bf16.msra.mxu1 %v6870_v16  ;;  %v6797_v14 = vld [vmem:[#allocation7 + $0xac] ss:$16 sps:$4 sm:$0xff]   ;;  %v6795_v16 = vld [vmem:[#allocation7 + $0xa8] ss:$16 sps:$4 sm:$0xff]  }
 0x26c   :  { %5116 = vmatprep.subr.bf16.mxu1 %v6878_v25  ;;  %v6801_v25 = vld [vmem:[#allocation7 + $0x88] ss:$16 sps:$4 sm:$0xff]  }
 0x26d   :  { %v3123_v51 = vpop.f32.mrf.mxu0 }
 0x26e   :  { %5074 = vmatpush2.bf16.msra.mxu0 %v6780_v19  ;;  %v3124_v37 = vadd.f32 %v3123_v51, %v3081_v32  ;;  %v6813_v19 = vld [vmem:[#allocation7 + $0x48] ss:$16 sps:$4 sm:$0xff]   ;;  %v6839_v51 = vld [vmem:[#allocation7 + $0x1cc] ss:$16 sps:$4 sm:$0xff]  }
 0x26f   :  { %v3125_v31 = vpop.f32.mrf.mxu0  ;;  %5075 = vmatprep.subr.bf16.mxu0 %v6785_v23  ;;  %5117 = vmatpush2.bf16.msra.mxu1 %v6876_v24  ;;  %v6827_v23 = vld [vmem:[#allocation7 + $0xc] ss:$16 sps:$4 sm:$0xff]   ;;  %v6825_v24 = vld [vmem:[#allocation7 + $0x8] ss:$16 sps:$4 sm:$0xff]  }
 0x270   :  { %v3126_v43 = vadd.f32 %v3125_v31, %v3083_v33  ;;  %5118 = vmatprep.subr.bf16.mxu1 %v6884_v27  ;;  %v3167_v53 = vadd.f32 %v3166_v7, %v3124_v37  ;;  %v6815_v7 = vld [vmem:[#allocation7 + $0x4c] ss:$16 sps:$4 sm:$0xff]   ;;  %v6831_v27 = vld [vmem:[#allocation7 + $0x1e8] ss:$16 sps:$4 sm:$0xff]  }
 0x271   :  { %v3127_v46 = vpop.f32.mrf.mxu0  ;;  %v6837_v32 = vld [vmem:[#allocation7 + $0x1c8] ss:$16 sps:$4 sm:$0xff]   ;;  %v6845_v33 = vld [vmem:[#allocation7 + $0x1ac] ss:$16 sps:$4 sm:$0xff]  }
 0x272   :  { %v3128_v48 = vadd.f32 %v3127_v46, %v3085_v42  ;;  %5076 = vmatpush2.bf16.msra.mxu0 %v6783_v30  ;;  %v3169_v1 = vadd.f32 %v3168_v34, %v3126_v43  ;;  %v3367_v15 = vmul.f32 0.2, %v3167_v53  ;;  %vm3351_vm11 = vcmp.gt.f32.partialorder %v3167_v53, 0.0  ;;  %v6843_v34 = vld [vmem:[#allocation7 + $0x1a8] ss:$16 sps:$4 sm:$0xff]  }
 0x273   :  { %v3129_v60 = vpop.f32.mrf.mxu0  ;;  %5077 = vmatprep.subr.bf16.mxu0 %v6788_v35  ;;  %5119 = vmatpush2.bf16.msra.mxu1 %v6882_v36  ;;  %v6851_v30 = vld [vmem:[#allocation7 + $0x18c] ss:$16 sps:$4 sm:$0xff]   ;;  %v6855_v36 = vld [vmem:[#allocation7 + $0x168] ss:$16 sps:$4 sm:$0xff]  }
 0x274   :  { %v3171_v55 = vadd.f32 %v3170_v47, %v3128_v48  ;;  %5120 = vmatprep.subr.bf16.mxu1 %v6890_v41  ;;  %v3130_v56 = vadd.f32 %v3129_v60, %v3087_v50  ;;  %v3368_v62 = vmul.f32 0.2, %v3169_v1  ;;  %vm3352_vm10 = vcmp.gt.f32.partialorder %v3169_v1, 0.0  ;;  %v6857_v31 = vld [vmem:[#allocation7 + $0x16c] ss:$16 sps:$4 sm:$0xff]  }
 0x275   :  { %v3383_v6 = vsel %vm3351_vm11, %v3167_v53, %v3367_v15  ;;  %v6863_v37 = vld [vmem:[#allocation7 + $0x14c] ss:$16 sps:$4 sm:$0xff]   ;;  %v6861_v46 = vld [vmem:[#allocation7 + $0x148] ss:$16 sps:$4 sm:$0xff]   ;;  %v566_v47 = vsub.s32 6, %v7448_v28  ;;  %v570_v48 = vsub.s32 7, %v7448_v28 }
 0x276   :  { %v3375_v59 = vmul.f32 0.2, %v3171_v55  ;;  %5078 = vmatpush2.bf16.msra.mxu0 %v6786_v49  ;;  %vm3359_vm9 = vcmp.gt.f32.partialorder %v3171_v55, 0.0  ;;  %v3173_v0 = vadd.f32 %v3172_v58, %v3130_v56  ;;  %v3384_v4 = vsel %vm3352_vm10, %v3169_v1, %v3368_v62  ;;  %v6869_v49 = vld [vmem:[#allocation7 + $0x12c] ss:$16 sps:$4 sm:$0xff]  }
 0x277   :  { %5133 = vmatprep.subr.bf16.mxu0 %v6791_v52  ;;  %5121 = vmatpush2.bf16.msra.mxu1 %v6888_v21  ;;  %v6867_v60 = vld [vmem:[#allocation7 + $0x128] ss:$16 sps:$4 sm:$0xff]   ;;  %v567_v52 = vrot.slane %v7553_v3, %v566_v47  ;;  %v571_v21 = vrot.slane %v7553_v3, %v570_v48  ;;  %v6875_v53 = vld [vmem:[#allocation7 + $0x10c] ss:$16 sps:$4 sm:$0xff]  }
 0x278   :  { %5176 = vmatprep.subr.bf16.mxu1 %v6896_v29  ;;  %vm3360_vm12 = vcmp.gt.f32.partialorder %v3173_v0, 0.0  ;;  %v3376_v17 = vmul.f32 0.2, %v3173_v0  ;;  %v3391_v44 = vsel %vm3359_vm9, %v3171_v55, %v3375_v59  ;;  %v6873_v56 = vld [vmem:[#allocation7 + $0x108] ss:$16 sps:$4 sm:$0xff]  }
 0x279   :  { %v7559_v2 = vpack.c.bf16 %v3391_v44, %v3383_v6  ;;  %v6905_v47 = vld [vmem:[#allocation7 + $0x46c] ss:$16 sps:$4 sm:$0xff]   ;;  %v6903_v48 = vld [vmem:[#allocation7 + $0x468] ss:$16 sps:$4 sm:$0xff]  }
 0x27a   :  { %v3392_v5 = vsel %vm3360_vm12, %v3173_v0, %v3376_v17  ;;  %v3209_v35 = vpop.f32.mrf.mxu1  ;;  %v6881_v0 = vld [vmem:[#allocation7 + $0x4ec] ss:$16 sps:$4 sm:$0xff]  }
 0x27b   :  { %v7557_v40 = vpack.c.bf16 %v3392_v5, %v3384_v4  ;;  %v3210_v58 = vadd.f32 %v3209_v35, %v567_v52 }
 0x27c   :  { %v3211_v41 = vpop.f32.mrf.mxu1 }
 0x27d   :  { %5079 = vmatprep.mubr.bf16.mxu0 %v7557_v40  ;;  %v3212_v59 = vadd.f32 %v3211_v41, %v571_v21 }
 0x27e   :  { %5080 = vmatmul.mubr.bf16.vlgmr.msra.gmra.mxu0 %v7559_v2  ;;  %v3213_v1 = vpop.f32.mrf.mxu1 }
 0x27f   :  { %5134 = vmatpush1.bf16.msra.mxu0 %v6789_v8  ;;  %5165 = vmatprep.mubr.bf16.mxu0 %v7539_v61  ;;  %v6819_v61 = vld [vmem:[#allocation7 + $0x28] ss:$16 sps:$4 sm:$0xff]   ;;  %v3214_v17 = vadd.f32 %v3213_v1, %v567_v52  ;;  %v6908_v1 = vld [vmem:[#allocation7 + $0x2ac] ss:$16 sps:$4 sm:$0xff]  }
 0x280   :  { %5135 = vmatprep.subr.bf16.mxu0 %v6794_v57  ;;  %v3215_v29 = vpop.f32.mrf.mxu1  ;;  %v6879_v8 = vld [vmem:[#allocation7 + $0x4e8] ss:$16 sps:$4 sm:$0xff]  }
 0x281   :  { %v6906_v52 = vld [vmem:[#allocation7 + $0x2a8] ss:$16 sps:$4 sm:$0xff]  }
 0x283   :  { %5136 = vmatpush1.bf16.msra.mxu0 %v6792_v11 }
 0x284   :  { %5137 = vmatprep.subr.bf16.mxu0 %v6797_v14  ;;  %v6887_v14 = vld [vmem:[#allocation7 + $0x4cc] ss:$16 sps:$4 sm:$0xff]  }
 0x287   :  { %5138 = vmatpush1.bf16.msra.mxu0 %v6795_v16  ;;  %v3216_v16 = vadd.f32 %v3215_v29, %v571_v21  ;;  %v6917_v21 = vld [vmem:[#allocation7 + $0x42c] ss:$16 sps:$4 sm:$0xff]   ;;  %v6912_v29 = vld [vmem:[#allocation7 + $0x288] ss:$16 sps:$4 sm:$0xff]  }
 0x288   :  { %5139 = vmatprep.subr.bf16.mxu0 %v6803_v39 }
 0x28b   :  { %5140 = vmatpush1.bf16.msra.mxu0 %v6801_v25 }
 0x28c   :  { %5141 = vmatprep.subr.bf16.mxu0 %v6809_v10 }
 0x28f   :  { %5142 = vmatpush1.bf16.msra.mxu0 %v6807_v18 }
 0x290   :  { %5143 = vmatprep.subr.bf16.mxu0 %v6815_v7 }
 0x293   :  { %5144 = vmatpush1.bf16.msra.mxu0 %v6813_v19 }
 0x294   :  { %5145 = vmatprep.subr.bf16.mxu0 %v6821_v22  ;;  %v6885_v22 = vld [vmem:[#allocation7 + $0x4c8] ss:$16 sps:$4 sm:$0xff]  }
 0x297   :  { %5146 = vmatpush1.bf16.msra.mxu0 %v6819_v61 }
 0x298   :  { %5147 = vmatprep.subr.bf16.mxu0 %v6827_v23 }
 0x29b   :  { %5148 = vmatpush1.bf16.msra.mxu0 %v6825_v24  ;;  %v6893_v24 = vld [vmem:[#allocation7 + $0x4ac] ss:$16 sps:$4 sm:$0xff]  }
 0x29c   :  { %5149 = vmatprep.subr.bf16.mxu0 %v6833_v26 }
 0x29f   :  { %5150 = vmatpush2.bf16.msra.mxu0 %v6831_v27 }
 0x2a0   :  { %5151 = vmatprep.subr.bf16.mxu0 %v6839_v51 }
 0x2a3   :  { %5152 = vmatpush2.bf16.msra.mxu0 %v6837_v32 }
 0x2a4   :  { %5153 = vmatprep.subr.bf16.mxu0 %v6845_v33 }
 0x2a7   :  { %5154 = vmatpush2.bf16.msra.mxu0 %v6843_v34  ;;  %v6891_v34 = vld [vmem:[#allocation7 + $0x4a8] ss:$16 sps:$4 sm:$0xff]  }
 0x2a8   :  { %5155 = vmatprep.subr.bf16.mxu0 %v6851_v30  ;;  %v6899_v30 = vld [vmem:[#allocation7 + $0x48c] ss:$16 sps:$4 sm:$0xff]  }
 0x2ab   :  { %5156 = vmatpush2.bf16.msra.mxu0 %v6849_v20 }
 0x2ac   :  { %5157 = vmatprep.subr.bf16.mxu0 %v6857_v31 }
 0x2ad   :  { %v3252_v42 = vpop.f32.mrf.mxu0 }
 0x2ae   :  { %v3253_v44 = vadd.f32 %v3252_v42, %v3210_v58  ;;  %v6921_v58 = vld [vmem:[#allocation7 + $0x408] ss:$16 sps:$4 sm:$0xff]  }
 0x2af   :  { %v3254_v43 = vpop.f32.mrf.mxu0  ;;  %5158 = vmatpush2.bf16.msra.mxu0 %v6855_v36  ;;  %v6897_v36 = vld [vmem:[#allocation7 + $0x488] ss:$16 sps:$4 sm:$0xff]  }
 0x2b0   :  { %5159 = vmatprep.subr.bf16.mxu0 %v6863_v37  ;;  %v3255_v4 = vadd.f32 %v3254_v43, %v3212_v59  ;;  %v6894_v43 = vld [vmem:[#allocation7 + $0x2e8] ss:$16 sps:$4 sm:$0xff]  }
 0x2b1   :  { %v3256_v50 = vpop.f32.mrf.mxu0  ;;  %v6918_v59 = vld [vmem:[#allocation7 + $0x268] ss:$16 sps:$4 sm:$0xff]  }
 0x2b2   :  { %v3257_v3 = vadd.f32 %v3256_v50, %v3214_v17  ;;  %v6911_v50 = vld [vmem:[#allocation7 + $0x44c] ss:$16 sps:$4 sm:$0xff]   ;;  %v6924_v17 = vld [vmem:[#allocation7 + $0x248] ss:$16 sps:$4 sm:$0xff]  }
 0x2b3   :  { %5160 = vmatpush2.bf16.msra.mxu0 %v6861_v46  ;;  %v3258_v55 = vpop.f32.mrf.mxu0  ;;  %v6902_v46 = vld [vmem:[#allocation7 + $0x2cc] ss:$16 sps:$4 sm:$0xff]  }
 0x2b4   :  { %5161 = vmatprep.subr.bf16.mxu0 %v6869_v49  ;;  %v3259_v18 = vadd.f32 %v3258_v55, %v3216_v16  ;;  %v6900_v49 = vld [vmem:[#allocation7 + $0x2c8] ss:$16 sps:$4 sm:$0xff]   ;;  %v6944_v16 = vld [vmem:[#allocation7 + $0x3ec] ss:$16 sps:$4 sm:$0xff]  }
 0x2b5   :  { %v6915_v55 = vld [vmem:[#allocation7 + $0x428] ss:$16 sps:$4 sm:$0xff]  }
 0x2b7   :  { %5162 = vmatpush2.bf16.msra.mxu0 %v6867_v60  ;;  %v6909_v60 = vld [vmem:[#allocation7 + $0x448] ss:$16 sps:$4 sm:$0xff]  }
 0x2b8   :  { %5163 = vmatprep.subr.bf16.mxu0 %v6875_v53  ;;  %v6914_v53 = vld [vmem:[#allocation7 + $0x28c] ss:$16 sps:$4 sm:$0xff]  }
 0x2b9   :  { %v3338_v62 = vpop.f32.mrf.mxu0 }
 0x2ba   :  { %v3295_v15 = vpop.f32.mrf.mxu1 }
 0x2bb   :  { %v3340_v5 = vpop.f32.mrf.mxu0  ;;  %5164 = vmatpush2.bf16.msra.mxu0 %v6873_v56  ;;  %v3296_v57 = vadd.f32 %v3295_v15, %v3253_v44  ;;  %v6923_v56 = vld [vmem:[#allocation7 + $0x40c] ss:$16 sps:$4 sm:$0xff]   ;;  %v6927_v15 = vld [vmem:[#allocation7 + $0x5e8] ss:$16 sps:$4 sm:$0xff]  }
 0x2bc   :  { %v3297_v6 = vpop.f32.mrf.mxu1  ;;  %5219 = vmatprep.subr.bf16.mxu0 %v6881_v0  ;;  %v6926_v0 = vld [vmem:[#allocation7 + $0x24c] ss:$16 sps:$4 sm:$0xff]  }
 0x2bd   :  { %v3298_v11 = vadd.f32 %v3297_v6, %v3255_v4  ;;  %v3342_v10 = vpop.f32.mrf.mxu0  ;;  %v3339_v61 = vadd.f32 %v3338_v62, %v3296_v57  ;;  %v6929_v62 = vld [vmem:[#allocation7 + $0x5ec] ss:$16 sps:$4 sm:$0xff]   ;;  %v6930_v6 = vld [vmem:[#allocation7 + $0x228] ss:$16 sps:$4 sm:$0xff]  }
 0x2be   :  { %v3299_v39 = vpop.f32.mrf.mxu1  ;;  %5166 = vmatmul.mubr.bf16.vlgmr.msra.gmra.mxu0 %v7498_v12  ;;  %v6935_v44 = vld [vmem:[#allocation7 + $0x5cc] ss:$16 sps:$4 sm:$0xff]   ;;  %v6939_v57 = vld [vmem:[#allocation7 + $0x5a8] ss:$16 sps:$4 sm:$0xff]  }
 0x2bf   :  { %v3300_v25 = vadd.f32 %v3299_v39, %v3257_v3  ;;  %v3341_v7 = vadd.f32 %v3340_v5, %v3298_v11  ;;  %5220 = vmatpush1.bf16.msra.mxu0 %v6879_v8  ;;  %5251 = vmatprep.mubr.bf16.mxu0 %v7557_v40  ;;  %v3344_v51 = vpop.f32.mrf.mxu0  ;;  %v3369_v12 = vmul.f32 0.2, %v3339_v61  ;;  %vm3353_vm15 = vcmp.gt.f32.partialorder %v3339_v61, 0.0  ;;  %v6932_v4 = vld [vmem:[#allocation7 + $0x22c] ss:$16 sps:$4 sm:$0xff]  }
 0x2c0   :  { %v3301_v19 = vpop.f32.mrf.mxu1  ;;  %5221 = vmatprep.subr.bf16.mxu0 %v6887_v14  ;;  %v6933_v5 = vld [vmem:[#allocation7 + $0x5c8] ss:$16 sps:$4 sm:$0xff]   ;;  %v6941_v8 = vld [vmem:[#allocation7 + $0x5ac] ss:$16 sps:$4 sm:$0xff]  }
 0x2c1   :  { %v3343_v23 = vadd.f32 %v3342_v10, %v3300_v25  ;;  %v3302_v26 = vadd.f32 %v3301_v19, %v3259_v18  ;;  %v3370_v32 = vmul.f32 0.2, %v3341_v7  ;;  %vm3354_vm14 = vcmp.gt.f32.partialorder %v3341_v7, 0.0  ;;  %v6938_v3 = vld [vmem:[#allocation7 + $0x20c] ss:$16 sps:$4 sm:$0xff]  }
 0x2c2   :  { %v3385_v42 = vsel %vm3353_vm15, %v3339_v61, %v3369_v12  ;;  %v6936_v11 = vld [vmem:[#allocation7 + $0x208] ss:$16 sps:$4 sm:$0xff]   ;;  %v6947_v14 = vld [vmem:[#allocation7 + $0x58c] ss:$16 sps:$4 sm:$0xff]  }
 0x2c3   :  { %v3377_v27 = vmul.f32 0.2, %v3343_v23  ;;  %vm3361_vm13 = vcmp.gt.f32.partialorder %v3343_v23, 0.0  ;;  %v3345_v33 = vadd.f32 %v3344_v51, %v3302_v26  ;;  %5222 = vmatpush1.bf16.msra.mxu0 %v6885_v22  ;;  %v3386_v31 = vsel %vm3354_vm14, %v3341_v7, %v3370_v32  ;;  %v6945_v39 = vld [vmem:[#allocation7 + $0x588] ss:$16 sps:$4 sm:$0xff]  }
 0x2c4   :  { %5223 = vmatprep.subr.bf16.mxu0 %v6893_v24  ;;  %v6942_v25 = vld [vmem:[#allocation7 + $0x3e8] ss:$16 sps:$4 sm:$0xff]   ;;  %v6953_v10 = vld [vmem:[#allocation7 + $0x56c] ss:$16 sps:$4 sm:$0xff]  }
 0x2c5   :  { %vm3362_vm0 = vcmp.gt.f32.partialorder %v3345_v33, 0.0  ;;  %v3378_v40 = vmul.f32 0.2, %v3345_v33  ;;  %v3393_v20 = vsel %vm3361_vm13, %v3343_v23, %v3377_v27  ;;  %v6950_v18 = vld [vmem:[#allocation7 + $0x3cc] ss:$16 sps:$4 sm:$0xff]   ;;  %vm5870_vm13 = vcmask 7168  }
 0x2c6   :  { %v7572_v41 = vpack.c.bf16 %v3393_v20, %v3385_v42  ;;  %v6951_v7 = vld [vmem:[#allocation7 + $0x568] ss:$16 sps:$4 sm:$0xff]   ;;  %v6959_v22 = vld [vmem:[#allocation7 + $0x54c] ss:$16 sps:$4 sm:$0xff]  }
 0x2c7   :  { %5224 = vmatpush1.bf16.msra.mxu0 %v6891_v34  ;;  %v3394_v35 = vsel %vm3362_vm0, %v3345_v33, %v3378_v40  ;;  %v6948_v19 = vld [vmem:[#allocation7 + $0x3c8] ss:$16 sps:$4 sm:$0xff]   ;;  %v6956_v61 = vld [vmem:[#allocation7 + $0x3ac] ss:$16 sps:$4 sm:$0xff]  }
 0x2c8   :  { %v7570_v37 = vpack.c.bf16 %v3394_v35, %v3386_v31  ;;  %5225 = vmatprep.subr.bf16.mxu0 %v6899_v30  ;;  %v6957_v23 = vld [vmem:[#allocation7 + $0x548] ss:$16 sps:$4 sm:$0xff]   ;;  %v6965_v26 = vld [vmem:[#allocation7 + $0x52c] ss:$16 sps:$4 sm:$0xff]  }
 0x2c9   :  { %v6954_v24 = vld [vmem:[#allocation7 + $0x3a8] ss:$16 sps:$4 sm:$0xff]   ;;  %v6962_v27 = vld [vmem:[#allocation7 + $0x38c] ss:$16 sps:$4 sm:$0xff]  }
 0x2ca   :  { %5122 = vmatprep.mubr.bf16.mxu1 %v7570_v37  ;;  %v6963_v51 = vld [vmem:[#allocation7 + $0x528] ss:$16 sps:$4 sm:$0xff]   ;;  %v6971_v33 = vld [vmem:[#allocation7 + $0x50c] ss:$16 sps:$4 sm:$0xff]  }
 0x2cb   :  { %5123 = vmatmul.mubr.bf16.vlgmr.msra.gmra.mxu1 %v7572_v41  ;;  %5226 = vmatpush1.bf16.msra.mxu0 %v6897_v36  ;;  %v6960_v32 = vld [vmem:[#allocation7 + $0x388] ss:$16 sps:$4 sm:$0xff]   ;;  %v6968_v34 = vld [vmem:[#allocation7 + $0x36c] ss:$16 sps:$4 sm:$0xff]  }
 0x2cc   :  { %5177 = vmatpush1.bf16.msra.mxu1 %v6894_v43  ;;  %5208 = vmatprep.mubr.bf16.mxu1 %v7546_v13  ;;  %v6920_v13 = vld [vmem:[#allocation7 + $0x26c] ss:$16 sps:$4 sm:$0xff]   ;;  %v6969_v12 = vld [vmem:[#allocation7 + $0x508] ss:$16 sps:$4 sm:$0xff]  }
 0x2cd   :  { %5178 = vmatprep.subr.bf16.mxu1 %v6902_v46  ;;  %5227 = vmatprep.subr.bf16.mxu0 %v6905_v47  ;;  %v6966_v30 = vld [vmem:[#allocation7 + $0x368] ss:$16 sps:$4 sm:$0xff]   ;;  %v6974_v20 = vld [vmem:[#allocation7 + $0x34c] ss:$16 sps:$4 sm:$0xff]  }
 0x2ce   :  { %v7031_v40 = vld [vmem:[#allocation10 + $0x74] ss:$8 sps:$4 sm:$0xff]   ;;  %v7029_v31 = vld [vmem:[#allocation10 + $0x70] ss:$8 sps:$4 sm:$0xff]   ;;  %v7034_v36 = vld [vmem:[#allocation10 + $0x64] ss:$8 sps:$4 sm:$0xff]  }
 0x2cf   :  { %5228 = vmatpush1.bf16.msra.mxu0 %v6903_v48  ;;  %v6972_v35 = vld [vmem:[#allocation7 + $0x348] ss:$16 sps:$4 sm:$0xff]   ;;  %v6977_v42 = vld [vmem:[#allocation7 + $0x32c] ss:$16 sps:$4 sm:$0xff]  }
 0x2d0   :  { %5179 = vmatpush1.bf16.msra.mxu1 %v6900_v49  ;;  %5229 = vmatprep.subr.bf16.mxu0 %v6911_v50  ;;  %v7032_v43 = vld [vmem:[#allocation10 + $0x60] ss:$8 sps:$4 sm:$0xff]   ;;  %v6975_v46 = vld [vmem:[#allocation7 + $0x328] ss:$16 sps:$4 sm:$0xff]   ;;  %v7035_v49 = vld [vmem:[#allocation10 + $0x50] ss:$8 sps:$4 sm:$0xff]  }
 0x2d1   :  { %5180 = vmatprep.subr.bf16.mxu1 %v6908_v1  ;;  %v7037_v47 = vld [vmem:[#allocation10 + $0x54] ss:$8 sps:$4 sm:$0xff]   ;;  %v6980_v48 = vld [vmem:[#allocation7 + $0x30c] ss:$16 sps:$4 sm:$0xff]   ;;  %v7040_v1 = vld [vmem:[#allocation10 + $0x44] ss:$8 sps:$4 sm:$0xff]  }
 0x2d2   :  { %v6978_v50 = vld [vmem:[#allocation7 + $0x308] ss:$16 sps:$4 sm:$0xff]  }
 0x2d3   :  { %5230 = vmatpush1.bf16.msra.mxu0 %v6909_v60  ;;  %v6983_v60 = vld [vmem:[#allocation7 + $0x6ec] ss:$16 sps:$4 sm:$0xff]  }
 0x2d4   :  { %5181 = vmatpush1.bf16.msra.mxu1 %v6906_v52  ;;  %5231 = vmatprep.subr.bf16.mxu0 %v6917_v21  ;;  %v7038_v52 = vld [vmem:[#allocation10 + $0x40] ss:$8 sps:$4 sm:$0xff]  }
 0x2d5   :  { %5182 = vmatprep.subr.bf16.mxu1 %v6914_v53  ;;  %v6986_v21 = vld [vmem:[#allocation7 + $0x6cc] ss:$16 sps:$4 sm:$0xff]   ;;  %v7043_v53 = vld [vmem:[#allocation10 + $0x34] ss:$8 sps:$4 sm:$0xff]  }
 0x2d7   :  { %5232 = vmatpush1.bf16.msra.mxu0 %v6915_v55  ;;  %v7041_v55 = vld [vmem:[#allocation10 + $0x30] ss:$8 sps:$4 sm:$0xff]  }
 0x2d8   :  { %5183 = vmatpush1.bf16.msra.mxu1 %v6912_v29  ;;  %5233 = vmatprep.subr.bf16.mxu0 %v6923_v56  ;;  %v6984_v29 = vld [vmem:[#allocation7 + $0x6c8] ss:$16 sps:$4 sm:$0xff]  }
 0x2d9   :  { %5184 = vmatprep.subr.bf16.mxu1 %v6920_v13  ;;  %v7046_v56 = vld [vmem:[#allocation10 + $0x24] ss:$8 sps:$4 sm:$0xff]   ;;  %v6989_v13 = vld [vmem:[#allocation7 + $0x6ac] ss:$16 sps:$4 sm:$0xff]  }
 0x2db   :  { %5234 = vmatpush1.bf16.msra.mxu0 %v6921_v58  ;;  %v7044_v58 = vld [vmem:[#allocation10 + $0x20] ss:$8 sps:$4 sm:$0xff]  }
 0x2dc   :  { %5185 = vmatpush1.bf16.msra.mxu1 %v6918_v59  ;;  %5235 = vmatprep.subr.bf16.mxu0 %v6929_v62  ;;  %v6987_v59 = vld [vmem:[#allocation7 + $0x6a8] ss:$16 sps:$4 sm:$0xff]  }
 0x2dd   :  { %5186 = vmatprep.subr.bf16.mxu1 %v6926_v0  ;;  %v7049_v62 = vld [vmem:[#allocation10 + $0x14] ss:$8 sps:$4 sm:$0xff]   ;;  %v6992_v0 = vld [vmem:[#allocation7 + $0x68c] ss:$16 sps:$4 sm:$0xff]  }
 0x2df   :  { %5236 = vmatpush2.bf16.msra.mxu0 %v6927_v15  ;;  %v6990_v15 = vld [vmem:[#allocation7 + $0x688] ss:$16 sps:$4 sm:$0xff]  }
 0x2e0   :  { %5187 = vmatpush1.bf16.msra.mxu1 %v6924_v17  ;;  %5237 = vmatprep.subr.bf16.mxu0 %v6935_v44  ;;  %v7052_v17 = vld [vmem:[#allocation10 + $0x4] ss:$8 sps:$4 sm:$0xff]   ;;  %v7050_v44 = vld [vmem:[#allocation10] ss:$8 sps:$4 sm:$0xff]  }
 0x2e1   :  { %5188 = vmatprep.subr.bf16.mxu1 %v6932_v4  ;;  %v6993_v4 = vld [vmem:[#allocation7 + $0x668] ss:$16 sps:$4 sm:$0xff]  }
 0x2e3   :  { %5238 = vmatpush2.bf16.msra.mxu0 %v6933_v5  ;;  %v7055_v5 = vld [vmem:[#allocation10 + $0xf4] ss:$8 sps:$4 sm:$0xff]  }
 0x2e4   :  { %5189 = vmatpush1.bf16.msra.mxu1 %v6930_v6  ;;  %5239 = vmatprep.subr.bf16.mxu0 %v6941_v8  ;;  %v6998_v6 = vld [vmem:[#allocation7 + $0x64c] ss:$16 sps:$4 sm:$0xff]  }
 0x2e5   :  { %5190 = vmatprep.subr.bf16.mxu1 %v6938_v3  ;;  %v7053_v8 = vld [vmem:[#allocation10 + $0xf0] ss:$8 sps:$4 sm:$0xff]   ;;  %v6996_v3 = vld [vmem:[#allocation7 + $0x648] ss:$16 sps:$4 sm:$0xff]  }
 0x2e7   :  { %5240 = vmatpush2.bf16.msra.mxu0 %v6939_v57  ;;  %v7058_v57 = vld [vmem:[#allocation10 + $0xe4] ss:$8 sps:$4 sm:$0xff]  }
 0x2e8   :  { %5191 = vmatpush1.bf16.msra.mxu1 %v6936_v11  ;;  %5241 = vmatprep.subr.bf16.mxu0 %v6947_v14  ;;  %v7001_v11 = vld [vmem:[#allocation7 + $0x62c] ss:$16 sps:$4 sm:$0xff]  }
 0x2e9   :  { %5192 = vmatprep.subr.bf16.mxu1 %v6944_v16  ;;  %v7056_v14 = vld [vmem:[#allocation10 + $0xe0] ss:$8 sps:$4 sm:$0xff]   ;;  %v6999_v16 = vld [vmem:[#allocation7 + $0x628] ss:$16 sps:$4 sm:$0xff]  }
 0x2eb   :  { %5242 = vmatpush2.bf16.msra.mxu0 %v6945_v39  ;;  %v7061_v39 = vld [vmem:[#allocation10 + $0xd4] ss:$8 sps:$4 sm:$0xff]  }
 0x2ec   :  { %5193 = vmatpush2.bf16.msra.mxu1 %v6942_v25  ;;  %5243 = vmatprep.subr.bf16.mxu0 %v6953_v10  ;;  %v7004_v25 = vld [vmem:[#allocation7 + $0x60c] ss:$16 sps:$4 sm:$0xff]  }
 0x2ed   :  { %5194 = vmatprep.subr.bf16.mxu1 %v6950_v18  ;;  %v7059_v10 = vld [vmem:[#allocation10 + $0xd0] ss:$8 sps:$4 sm:$0xff]   ;;  %v7002_v18 = vld [vmem:[#allocation7 + $0x608] ss:$16 sps:$4 sm:$0xff]  }
 0x2ef   :  { %5244 = vmatpush2.bf16.msra.mxu0 %v6951_v7  ;;  %v7064_v7 = vld [vmem:[#allocation10 + $0xc4] ss:$8 sps:$4 sm:$0xff]  }
 0x2f0   :  { %5195 = vmatpush2.bf16.msra.mxu1 %v6948_v19  ;;  %5245 = vmatprep.subr.bf16.mxu0 %v6959_v22  ;;  %v7007_v19 = vld [vmem:[#allocation7 + $0x7ec] ss:$16 sps:$4 sm:$0xff]  }
 0x2f1   :  { %5196 = vmatprep.subr.bf16.mxu1 %v6956_v61  ;;  %v7062_v22 = vld [vmem:[#allocation10 + $0xc0] ss:$8 sps:$4 sm:$0xff]   ;;  %v7005_v61 = vld [vmem:[#allocation7 + $0x7e8] ss:$16 sps:$4 sm:$0xff]  }
 0x2f3   :  { %5246 = vmatpush2.bf16.msra.mxu0 %v6957_v23  ;;  %v7067_v23 = vld [vmem:[#allocation10 + $0xb4] ss:$8 sps:$4 sm:$0xff]  }
 0x2f4   :  { %5197 = vmatpush2.bf16.msra.mxu1 %v6954_v24  ;;  %5247 = vmatprep.subr.bf16.mxu0 %v6965_v26  ;;  %v7010_v24 = vld [vmem:[#allocation7 + $0x7cc] ss:$16 sps:$4 sm:$0xff]  }
 0x2f5   :  { %5198 = vmatprep.subr.bf16.mxu1 %v6962_v27  ;;  %v7065_v26 = vld [vmem:[#allocation10 + $0xb0] ss:$8 sps:$4 sm:$0xff]   ;;  %v7008_v27 = vld [vmem:[#allocation7 + $0x7c8] ss:$16 sps:$4 sm:$0xff]  }
 0x2f7   :  { %5248 = vmatpush2.bf16.msra.mxu0 %v6963_v51  ;;  %v7070_v51 = vld [vmem:[#allocation10 + $0xa4] ss:$8 sps:$4 sm:$0xff]  }
 0x2f8   :  { %5199 = vmatpush2.bf16.msra.mxu1 %v6960_v32  ;;  %5249 = vmatprep.subr.bf16.mxu0 %v6971_v33  ;;  %v7013_v32 = vld [vmem:[#allocation7 + $0x7ac] ss:$16 sps:$4 sm:$0xff]  }
 0x2f9   :  { %5200 = vmatprep.subr.bf16.mxu1 %v6968_v34  ;;  %v7068_v33 = vld [vmem:[#allocation10 + $0xa0] ss:$8 sps:$4 sm:$0xff]   ;;  %v7011_v34 = vld [vmem:[#allocation7 + $0x7a8] ss:$16 sps:$4 sm:$0xff]  }
 0x2fb   :  { %5250 = vmatpush2.bf16.msra.mxu0 %v6969_v12  ;;  %v7073_v12 = vld [vmem:[#allocation10 + $0x94] ss:$8 sps:$4 sm:$0xff]  }
 0x2fc   :  { %5201 = vmatpush2.bf16.msra.mxu1 %v6966_v30  ;;  %5729 = vmatprep.subr.bf16.mxu0 %v7031_v40  ;;  %v7016_v30 = vld [vmem:[#allocation7 + $0x78c] ss:$16 sps:$4 sm:$0xff]  }
 0x2fd   :  { %5202 = vmatprep.subr.bf16.mxu1 %v6974_v20  ;;  %v7071_v40 = vld [vmem:[#allocation10 + $0x90] ss:$8 sps:$4 sm:$0xff]   ;;  %v7014_v20 = vld [vmem:[#allocation7 + $0x788] ss:$16 sps:$4 sm:$0xff]  }
 0x2fe   :  { %5252 = vmatmul.mubr.bf16.vlgmr.msra.gmra.mxu0 %v7559_v2  ;;  %v6981_v2 = vld [vmem:[#allocation7 + $0x6e8] ss:$16 sps:$4 sm:$0xff]  }
 0x2ff   :  { %5730 = vmatpush1.bf16.msra.mxu0 %v7029_v31  ;;  %v7076_v31 = vld [vmem:[#allocation10 + $0x84] ss:$8 sps:$4 sm:$0xff]  }
 0x300   :  { %5203 = vmatpush2.bf16.msra.mxu1 %v6972_v35  ;;  %5731 = vmatprep.subr.bf16.mxu0 %v7034_v36  ;;  %v7019_v35 = vld [vmem:[#allocation7 + $0x76c] ss:$16 sps:$4 sm:$0xff]  }
 0x301   :  { %5204 = vmatprep.subr.bf16.mxu1 %v6977_v42  ;;  %v7074_v36 = vld [vmem:[#allocation10 + $0x80] ss:$8 sps:$4 sm:$0xff]   ;;  %v7017_v42 = vld [vmem:[#allocation7 + $0x768] ss:$16 sps:$4 sm:$0xff]  }
 0x303   :  { %5732 = vmatpush1.bf16.msra.mxu0 %v7032_v43  ;;  %v7022_v43 = vld [vmem:[#allocation7 + $0x74c] ss:$16 sps:$4 sm:$0xff]  }
 0x304   :  { %5205 = vmatpush2.bf16.msra.mxu1 %v6975_v46  ;;  %5733 = vmatprep.subr.bf16.mxu0 %v7037_v47  ;;  %v7020_v46 = vld [vmem:[#allocation7 + $0x748] ss:$16 sps:$4 sm:$0xff]   ;;  %v7025_v47 = vld [vmem:[#allocation7 + $0x72c] ss:$16 sps:$4 sm:$0xff]  }
 0x305   :  { %5206 = vmatprep.subr.bf16.mxu1 %v6980_v48  ;;  %v7023_v48 = vld [vmem:[#allocation7 + $0x728] ss:$16 sps:$4 sm:$0xff]  }
 0x307   :  { %5734 = vmatpush1.bf16.msra.mxu0 %v7035_v49  ;;  %v7028_v49 = vld [vmem:[#allocation7 + $0x70c] ss:$16 sps:$4 sm:$0xff]  }
 0x308   :  { %5207 = vmatpush2.bf16.msra.mxu1 %v6978_v50  ;;  %5735 = vmatprep.subr.bf16.mxu0 %v7040_v1  ;;  %v7026_v50 = vld [vmem:[#allocation7 + $0x708] ss:$16 sps:$4 sm:$0xff]   ;;  %v7077_v1 = vld [vmem:[#allocation10 + $0x170] ss:$8 sps:$4 sm:$0xff]  }
 0x309   :  { %5262 = vmatprep.subr.bf16.mxu1 %v6983_v60  ;;  %v7079_v60 = vld [vmem:[#allocation10 + $0x174] ss:$8 sps:$4 sm:$0xff]  }
 0x30b   :  { %5209 = vmatmul.mubr.bf16.vlgmr.msra.gmra.mxu1 %v7541_v63  ;;  %5736 = vmatpush1.bf16.msra.mxu0 %v7038_v52  ;;  %v7047_v63 = vld [vmem:[#allocation10 + $0x10] ss:$8 sps:$4 sm:$0xff]   ;;  %v7082_v52 = vld [vmem:[#allocation10 + $0x164] ss:$8 sps:$4 sm:$0xff]  }
 0x30c   :  { %5263 = vmatpush1.bf16.msra.mxu1 %v6981_v2  ;;  %5294 = vmatprep.mubr.bf16.mxu1 %v7570_v37  ;;  %v6995_v37 = vld [vmem:[#allocation7 + $0x66c] ss:$16 sps:$4 sm:$0xff]  }
 0x30d   :  { %5264 = vmatprep.subr.bf16.mxu1 %v6986_v21  ;;  %5737 = vmatprep.subr.bf16.mxu0 %v7043_v53  ;;  %v7080_v2 = vld [vmem:[#allocation10 + $0x160] ss:$8 sps:$4 sm:$0xff]   ;;  %v7085_v21 = vld [vmem:[#allocation10 + $0x154] ss:$8 sps:$4 sm:$0xff]   ;;  %v7083_v53 = vld [vmem:[#allocation10 + $0x150] ss:$8 sps:$4 sm:$0xff]  }
 0x30f   :  { %5738 = vmatpush1.bf16.msra.mxu0 %v7041_v55  ;;  %v7088_v55 = vld [vmem:[#allocation10 + $0x144] ss:$8 sps:$4 sm:$0xff]  }
 0x310   :  { %5265 = vmatpush1.bf16.msra.mxu1 %v6984_v29  ;;  %5739 = vmatprep.subr.bf16.mxu0 %v7046_v56  ;;  %v7086_v29 = vld [vmem:[#allocation10 + $0x140] ss:$8 sps:$4 sm:$0xff]   ;;  %v7091_v56 = vld [vmem:[#allocation10 + $0x134] ss:$8 sps:$4 sm:$0xff]  }
 0x311   :  { %5266 = vmatprep.subr.bf16.mxu1 %v6989_v13  ;;  %v7089_v13 = vld [vmem:[#allocation10 + $0x130] ss:$8 sps:$4 sm:$0xff]  }
 0x313   :  { %5740 = vmatpush1.bf16.msra.mxu0 %v7044_v58  ;;  %v7092_v58 = vld [vmem:[#allocation10 + $0x120] ss:$8 sps:$4 sm:$0xff]  }
 0x314   :  { %5267 = vmatpush1.bf16.msra.mxu1 %v6987_v59  ;;  %5741 = vmatprep.subr.bf16.mxu0 %v7049_v62  ;;  %v7097_v59 = vld [vmem:[#allocation10 + $0x114] ss:$8 sps:$4 sm:$0xff]   ;;  %v7095_v62 = vld [vmem:[#allocation10 + $0x110] ss:$8 sps:$4 sm:$0xff]  }
 0x315   :  { %5268 = vmatprep.subr.bf16.mxu1 %v6992_v0  ;;  %v7100_v0 = vld [vmem:[#allocation10 + $0x104] ss:$8 sps:$4 sm:$0xff]  }
 0x317   :  { %5742 = vmatpush1.bf16.msra.mxu0 %v7047_v63  ;;  %v7098_v63 = vld [vmem:[#allocation10 + $0x100] ss:$8 sps:$4 sm:$0xff]  }
 0x318   :  { %5269 = vmatpush1.bf16.msra.mxu1 %v6990_v15  ;;  %5743 = vmatprep.subr.bf16.mxu0 %v7052_v17  ;;  %v7103_v15 = vld [vmem:[#allocation10 + $0x1f4] ss:$8 sps:$4 sm:$0xff]   ;;  %v7101_v17 = vld [vmem:[#allocation10 + $0x1f0] ss:$8 sps:$4 sm:$0xff]  }
 0x319   :  { %5270 = vmatprep.subr.bf16.mxu1 %v6995_v37  ;;  %v7106_v37 = vld [vmem:[#allocation10 + $0x1e4] ss:$8 sps:$4 sm:$0xff]  }
 0x31b   :  { %5744 = vmatpush1.bf16.msra.mxu0 %v7050_v44  ;;  %v4995_v44 = vpop.f32.mrf.mxu0 }
 0x31c   :  { %5271 = vmatpush1.bf16.msra.mxu1 %v6993_v4  ;;  %5745 = vmatprep.subr.bf16.mxu0 %v7055_v5  ;;  %v7104_v4 = vld [vmem:[#allocation10 + $0x1e0] ss:$8 sps:$4 sm:$0xff]   ;;  %v7109_v5 = vld [vmem:[#allocation10 + $0x1d4] ss:$8 sps:$4 sm:$0xff]  }
 0x31d   :  { %5272 = vmatprep.subr.bf16.mxu1 %v6998_v6  ;;  %v4997_v6 = vpop.f32.mrf.mxu0 }
 0x31f   :  { %5746 = vmatpush2.bf16.msra.mxu0 %v7053_v8  ;;  %v7107_v8 = vld [vmem:[#allocation10 + $0x1d0] ss:$8 sps:$4 sm:$0xff]  }
 0x320   :  { %5273 = vmatpush1.bf16.msra.mxu1 %v6996_v3  ;;  %5747 = vmatprep.subr.bf16.mxu0 %v7058_v57  ;;  %v7112_v3 = vld [vmem:[#allocation10 + $0x1c4] ss:$8 sps:$4 sm:$0xff]   ;;  %v4999_v57 = vpop.f32.mrf.mxu0 }
 0x321   :  { %5274 = vmatprep.subr.bf16.mxu1 %v7001_v11  ;;  %v5038_v11 = vpop.f32.mrf.mxu1 }
 0x323   :  { %5748 = vmatpush2.bf16.msra.mxu0 %v7056_v14  ;;  %v7110_v14 = vld [vmem:[#allocation10 + $0x1c0] ss:$8 sps:$4 sm:$0xff]  }
 0x324   :  { %5275 = vmatpush1.bf16.msra.mxu1 %v6999_v16  ;;  %5749 = vmatprep.subr.bf16.mxu0 %v7061_v39  ;;  %v7115_v16 = vld [vmem:[#allocation10 + $0x1b4] ss:$8 sps:$4 sm:$0xff]   ;;  %v5001_v39 = vpop.f32.mrf.mxu0 }
 0x325   :  { %5276 = vmatprep.subr.bf16.mxu1 %v7004_v25  ;;  %v7581_v25 = vld [vmem:[#allocation8] sm:$0xf] }
 0x327   :  { %5750 = vmatpush2.bf16.msra.mxu0 %v7059_v10  ;;  %v5040_v10 = vpop.f32.mrf.mxu1 }
 0x328   :  { %5277 = vmatpush1.bf16.msra.mxu1 %v7002_v18  ;;  %5751 = vmatprep.subr.bf16.mxu0 %v7064_v7  ;;  %v7113_v7 = vld [vmem:[#allocation10 + $0x1b0] ss:$8 sps:$4 sm:$0xff]  }
 0x329   :  { %5278 = vmatprep.subr.bf16.mxu1 %v7007_v19  ;;  %v3668_v19 = vrot.slane %v7581_v25, %v7512_v9 }
 0x32b   :  { %5752 = vmatpush2.bf16.msra.mxu0 %v7062_v22  ;;  %v3664_v22 = vrot.slane %v7581_v25, %v7451_v38 }
 0x32c   :  { %5279 = vmatpush2.bf16.msra.mxu1 %v7005_v61  ;;  %5753 = vmatprep.subr.bf16.mxu0 %v7067_v23  ;;  %v5042_v61 = vpop.f32.mrf.mxu1 }
 0x32d   :  { %5280 = vmatprep.subr.bf16.mxu1 %v7010_v24  ;;  %v4998_v24 = vadd.f32 %v4997_v6, %v3668_v19 }
 0x32f   :  { %5754 = vmatpush2.bf16.msra.mxu0 %v7065_v26  ;;  %v4996_v26 = vadd.f32 %v4995_v44, %v3664_v22 }
 0x330   :  { %5281 = vmatpush2.bf16.msra.mxu1 %v7008_v27  ;;  %5755 = vmatprep.subr.bf16.mxu0 %v7070_v51  ;;  %v5000_v27 = vadd.f32 %v4999_v57, %v3664_v22  ;;  %v5044_v51 = vpop.f32.mrf.mxu1  ;;  %v3672_v57 = vrot.slane %v7581_v25, %v550_v54 }
 0x331   :  { %5282 = vmatprep.subr.bf16.mxu1 %v7013_v32 }
 0x333   :  { %5756 = vmatpush2.bf16.msra.mxu0 %v7068_v33  ;;  %v5041_v33 = vadd.f32 %v5040_v10, %v4998_v24 }
 0x334   :  { %5283 = vmatpush2.bf16.msra.mxu1 %v7011_v34  ;;  %5757 = vmatprep.subr.bf16.mxu0 %v7073_v12  ;;  %v5002_v34 = vadd.f32 %v5001_v39, %v3668_v19  ;;  %v5039_v12 = vadd.f32 %v5038_v11, %v4996_v26 }
 0x335   :  { %5284 = vmatprep.subr.bf16.mxu1 %v7016_v30 }
 0x337   :  { %5758 = vmatpush2.bf16.msra.mxu0 %v7071_v40  ;;  %v5043_v40 = vadd.f32 %v5042_v61, %v5000_v27 }
 0x338   :  { %5285 = vmatpush2.bf16.msra.mxu1 %v7014_v20  ;;  %5759 = vmatprep.subr.bf16.mxu0 %v7076_v31  ;;  %v7118_v31 = vld [vmem:[#allocation10 + $0x1a4] ss:$8 sps:$4 sm:$0xff]  }
 0x339   :  { %5286 = vmatprep.subr.bf16.mxu1 %v7019_v35 }
 0x33b   :  { %5760 = vmatpush2.bf16.msra.mxu0 %v7074_v36 }
 0x33c   :  { %5287 = vmatpush2.bf16.msra.mxu1 %v7017_v42 }
 0x33d   :  { %5288 = vmatprep.subr.bf16.mxu1 %v7022_v43  ;;  %v7116_v43 = vld [vmem:[#allocation10 + $0x1a0] ss:$8 sps:$4 sm:$0xff]  }
 0x33e   :  { %v5081_v18 = vpop.f32.mrf.mxu0 }
 0x33f   :  { %v5082_v35 = vadd.f32 %v5081_v18, %v5039_v12 }
 0x340   :  { %5289 = vmatpush2.bf16.msra.mxu1 %v7020_v46  ;;  %v5083_v23 = vpop.f32.mrf.mxu0  ;;  %v5045_v46 = vadd.f32 %v5044_v51, %v5002_v34 }
 0x341   :  { %5290 = vmatprep.subr.bf16.mxu1 %v7025_v47  ;;  %v5084_v20 = vadd.f32 %v5083_v23, %v5041_v33 }
 0x342   :  { %v5085_v32 = vpop.f32.mrf.mxu0 }
 0x343   :  { %v5086_v47 = vadd.f32 %v5085_v32, %v5043_v40 }
 0x344   :  { %5291 = vmatpush2.bf16.msra.mxu1 %v7023_v48  ;;  %v5087_v36 = vpop.f32.mrf.mxu0 }
 0x345   :  { %5292 = vmatprep.subr.bf16.mxu1 %v7028_v49 }
 0x348   :  { %5293 = vmatpush2.bf16.msra.mxu1 %v7026_v50 }
 0x349   :  { %5772 = vmatprep.subr.bf16.mxu1 %v7079_v60 }
 0x34b   :  { %5295 = vmatmul.mubr.bf16.vlgmr.msra.gmra.mxu1 %v7572_v41  ;;  %v7094_v41 = vld [vmem:[#allocation10 + $0x124] ss:$8 sps:$4 sm:$0xff]  }
 0x34c   :  { %5773 = vmatpush1.bf16.msra.mxu1 %v7077_v1  ;;  %v5088_v1 = vadd.f32 %v5087_v36, %v5045_v46 }
 0x34d   :  { %5774 = vmatprep.subr.bf16.mxu1 %v7082_v52  ;;  %v7121_v52 = vld [vmem:[#allocation10 + $0x194] ss:$8 sps:$4 sm:$0xff]  }
 0x350   :  { %5775 = vmatpush1.bf16.msra.mxu1 %v7080_v2 }
 0x351   :  { %5776 = vmatprep.subr.bf16.mxu1 %v7085_v21  ;;  %v7119_v21 = vld [vmem:[#allocation10 + $0x190] ss:$8 sps:$4 sm:$0xff]  }
 0x354   :  { %5777 = vmatpush1.bf16.msra.mxu1 %v7083_v53 }
 0x355   :  { %5778 = vmatprep.subr.bf16.mxu1 %v7088_v55 }
 0x358   :  { %5779 = vmatpush1.bf16.msra.mxu1 %v7086_v29 }
 0x359   :  { %5780 = vmatprep.subr.bf16.mxu1 %v7091_v56 }
 0x35c   :  { %5781 = vmatpush1.bf16.msra.mxu1 %v7089_v13 }
 0x35d   :  { %5782 = vmatprep.subr.bf16.mxu1 %v7094_v41  ;;  %v7124_v41 = vld [vmem:[#allocation10 + $0x184] ss:$8 sps:$4 sm:$0xff]  }
 0x360   :  { %5783 = vmatpush1.bf16.msra.mxu1 %v7092_v58 }
 0x361   :  { %5784 = vmatprep.subr.bf16.mxu1 %v7097_v59  ;;  %v7122_v59 = vld [vmem:[#allocation10 + $0x180] ss:$8 sps:$4 sm:$0xff]  }
 0x364   :  { %5785 = vmatpush1.bf16.msra.mxu1 %v7095_v62 }
 0x365   :  { %5786 = vmatprep.subr.bf16.mxu1 %v7100_v0 }
 0x368   :  { %5787 = vmatpush1.bf16.msra.mxu1 %v7098_v63 }
 0x369   :  { %5788 = vmatprep.subr.bf16.mxu1 %v7103_v15 }
 0x36c   :  { %5789 = vmatpush2.bf16.msra.mxu1 %v7101_v17 }
 0x36d   :  { %5790 = vmatprep.subr.bf16.mxu1 %v7106_v37 }
 0x370   :  { %5791 = vmatpush2.bf16.msra.mxu1 %v7104_v4 }
 0x371   :  { %5792 = vmatprep.subr.bf16.mxu1 %v7109_v5 }
 0x374   :  { %5793 = vmatpush2.bf16.msra.mxu1 %v7107_v8 }
 0x375   :  { %5794 = vmatprep.subr.bf16.mxu1 %v7112_v3  ;;  %v3676_v3 = vrot.slane %v7581_v25, %v554_v45 }
 0x378   :  { %5795 = vmatpush2.bf16.msra.mxu1 %v7110_v14 }
 0x379   :  { %5796 = vmatprep.subr.bf16.mxu1 %v7115_v16 }
 0x37c   :  { %5797 = vmatpush2.bf16.msra.mxu1 %v7113_v7 }
 0x37d   :  { %5798 = vmatprep.subr.bf16.mxu1 %v7118_v31 }
 0x37e   :  { %v5167_v37 = vpop.f32.mrf.mxu0 }
 0x37f   :  { %v5168_v39 = vadd.f32 %v5167_v37, %v3672_v57 }
 0x380   :  { %5799 = vmatpush2.bf16.msra.mxu1 %v7116_v43  ;;  %v5169_v44 = vpop.f32.mrf.mxu0 }
 0x381   :  { %5800 = vmatprep.subr.bf16.mxu1 %v7121_v52  ;;  %v5170_v16 = vadd.f32 %v5169_v44, %v3676_v3 }
 0x382   :  { %v5171_v4 = vpop.f32.mrf.mxu0 }
 0x383   :  { %v5172_v18 = vadd.f32 %v5171_v4, %v3672_v57 }
 0x384   :  { %5801 = vmatpush2.bf16.msra.mxu1 %v7119_v21  ;;  %v5173_v6 = vpop.f32.mrf.mxu0 }
 0x385   :  { %5802 = vmatprep.subr.bf16.mxu1 %v7124_v41  ;;  %v5174_v61 = vadd.f32 %v5173_v6, %v3676_v3 }
 0x388   :  { %5803 = vmatpush2.bf16.msra.mxu1 %v7122_v59 }
 0x38b   :  { %v5124_v30 = vpop.f32.mrf.mxu1 }
 0x38c   :  { %v5125_v49 = vadd.f32 %v5124_v30, %v5082_v35 }
 0x38d   :  { %v5126_v42 = vpop.f32.mrf.mxu1 }
 0x38e   :  { %v5127_v48 = vadd.f32 %v5126_v42, %v5084_v20  ;;  %v5313_v56 = vmul.f32 0.2, %v5125_v49  ;;  %vm5305_vm3 = vcmp.gt.f32.partialorder %v5125_v49, 0.0 }
 0x38f   :  { %v5128_v50 = vpop.f32.mrf.mxu1 }
 0x390   :  { %v5129_v60 = vadd.f32 %v5128_v50, %v5086_v47  ;;  %v5314_v53 = vmul.f32 0.2, %v5127_v48  ;;  %vm5306_vm2 = vcmp.gt.f32.partialorder %v5127_v48, 0.0  ;;  %v5321_v63 = vsel %vm5305_vm3, %v5125_v49, %v5313_v56 }
 0x391   :  { %v5130_v2 = vpop.f32.mrf.mxu1 }
 0x392   :  { %vm5309_vm1 = vcmp.gt.f32.partialorder %v5129_v60, 0.0  ;;  %v5317_v55 = vmul.f32 0.2, %v5129_v60  ;;  %v5131_v29 = vadd.f32 %v5130_v2, %v5088_v1  ;;  %v5322_v62 = vsel %vm5306_vm2, %v5127_v48, %v5314_v53 }
 0x394   :  { %vm5310_vm4 = vcmp.gt.f32.partialorder %v5131_v29, 0.0  ;;  %v5318_v13 = vmul.f32 0.2, %v5131_v29  ;;  %v5325_v58 = vsel %vm5309_vm1, %v5129_v60, %v5317_v55  ;;  %v5397_v60 = vld [vmem:[#allocation11] sm:$0x3] }
 0x395   :  { %v5329_v17 = vpack.c.bf16 %v5325_v58, %v5321_v63  ;;  %v5402_v2 = vrot.slane %v5397_v60, %v7451_v38  ;;  %v5406_v21 = vrot.slane %v5397_v60, %v7512_v9  ;;  %v5827_v58 = vld [vmem:[#allocation13] sm:$0x3] }
 0x396   :  { %v5326_v0 = vsel %vm5310_vm4, %v5131_v29, %v5318_v13  ;;  %v5832_v37 = vrot.slane %v5827_v58, %v7451_v38  ;;  %v5836_v44 = vrot.slane %v5827_v58, %v7512_v9 }
 0x397   :  { %v5330_v15 = vpack.c.bf16 %v5326_v0, %v5322_v62 }
 0x399   :  { %5761 = vmatprep.mubr.bf16.mxu0 %v5330_v15 }
 0x39a   :  { %5762 = vmatmul.mubr.bf16.vlgmr.msra.gmra.mxu0 %v5329_v17 }
 0x3be   :  { %v5253_v11 = vpop.f32.mrf.mxu0 }
 0x3c0   :  { %v5255_v10 = vpop.f32.mrf.mxu0 }
 0x3c2   :  { %v5257_v24 = vpop.f32.mrf.mxu0 }
 0x3c4   :  { %v5259_v54 = vpop.f32.mrf.mxu0 }
 0x3cb   :  { %v5210_v5 = vpop.f32.mrf.mxu1 }
 0x3cc   :  { %v5211_v19 = vadd.f32 %v5210_v5, %v5168_v39 }
 0x3cd   :  { %v5212_v8 = vpop.f32.mrf.mxu1 }
 0x3ce   :  { %v5213_v7 = vadd.f32 %v5212_v8, %v5170_v16  ;;  %v5254_v45 = vadd.f32 %v5253_v11, %v5211_v19 }
 0x3cf   :  { %v5214_v14 = vpop.f32.mrf.mxu1 }
 0x3d0   :  { %v5215_v23 = vadd.f32 %v5214_v14, %v5172_v18  ;;  %v5256_v51 = vadd.f32 %v5255_v10, %v5213_v7 }
 0x3d1   :  { %v5216_v22 = vpop.f32.mrf.mxu1 }
 0x3d2   :  { %v5217_v27 = vadd.f32 %v5216_v22, %v5174_v61  ;;  %v5258_v33 = vadd.f32 %v5257_v24, %v5215_v23  ;;  %v6620_v22 = vld [vmem:[#allocation2] ss:$0 sm:$0xff] }
 0x3d4   :  { %v5260_v30 = vadd.f32 %v5259_v54, %v5217_v27 }
 0x40b   :  { %v5296_v26 = vpop.f32.mrf.mxu1 }
 0x40c   :  { %v5297_v25 = vadd.f32 %v5296_v26, %v5254_v45 }
 0x40d   :  { %v5298_v32 = vpop.f32.mrf.mxu1 }
 0x40e   :  { %v5299_v28 = vadd.f32 %v5298_v32, %v5256_v51  ;;  %v5315_v36 = vmul.f32 0.2, %v5297_v25  ;;  %vm5307_vm7 = vcmp.gt.f32.partialorder %v5297_v25, 0.0 }
 0x40f   :  { %v5300_v34 = vpop.f32.mrf.mxu1 }
 0x410   :  { %v5301_v12 = vadd.f32 %v5300_v34, %v5258_v33  ;;  %v5316_v20 = vmul.f32 0.2, %v5299_v28  ;;  %vm5308_vm6 = vcmp.gt.f32.partialorder %v5299_v28, 0.0  ;;  %v5323_v48 = vsel %vm5307_vm7, %v5297_v25, %v5315_v36 }
 0x411   :  { %v5302_v40 = vpop.f32.mrf.mxu1 }
 0x412   :  { %vm5311_vm5 = vcmp.gt.f32.partialorder %v5301_v12, 0.0  ;;  %v5319_v31 = vmul.f32 0.2, %v5301_v12  ;;  %v5303_v35 = vadd.f32 %v5302_v40, %v5260_v30  ;;  %v5324_v46 = vsel %vm5308_vm6, %v5299_v28, %v5316_v20 }
 0x414   :  { %vm5312_vm8 = vcmp.gt.f32.partialorder %v5303_v35, 0.0  ;;  %v5320_v42 = vmul.f32 0.2, %v5303_v35  ;;  %v5327_v43 = vsel %vm5311_vm5, %v5301_v12, %v5319_v31 }
 0x415   :  { %v5331_v50 = vpack.c.bf16 %v5327_v43, %v5323_v48 }
 0x416   :  { %v5328_v47 = vsel %vm5312_vm8, %v5303_v35, %v5320_v42 }
 0x417   :  { %v5332_v49 = vpack.c.bf16 %v5328_v47, %v5324_v46 }
 0x419   :  { %5804 = vmatprep.mubr.bf16.mxu1 %v5332_v49 }
 0x41a   :  { %5805 = vmatmul.mubr.bf16.vlgmr.msra.gmra.mxu1 %v5331_v50 }
 0x45a   :  { %v5763_v1 = vpop.f32.mrf.mxu0 }
 0x45b   :  { %v5764_v55 = vadd.f32 %v5763_v1, %v5402_v2 }
 0x45c   :  { %v5765_v52 = vpop.f32.mrf.mxu0 }
 0x45d   :  { %v5766_v56 = vadd.f32 %v5765_v52, %v5406_v21 }
 0x45e   :  { %v5767_v53 = vpop.f32.mrf.mxu0 }
 0x45f   :  { %v5768_v62 = vadd.f32 %v5767_v53, %v5402_v2 }
 0x460   :  { %v5769_v13 = vpop.f32.mrf.mxu0 }
 0x461   :  { %v5770_v15 = vadd.f32 %v5769_v13, %v5406_v21 }
 0x4da   :  { %v5806_v29 = vpop.f32.mrf.mxu1 }
 0x4db   :  { %v5807_v41 = vadd.f32 %v5806_v29, %v5764_v55 }
 0x4dc   :  { %v5808_v59 = vpop.f32.mrf.mxu1 }
 0x4dd   :  { %vm5815_vm9 = vcmp.gt.f32.partialorder %v5807_v41, 0.0  ;;  %v5819_v0 = vmul.f32 0.2, %v5807_v41  ;;  %v5809_v63 = vadd.f32 %v5808_v59, %v5766_v56 }
 0x4de   :  { %v5810_v17 = vpop.f32.mrf.mxu1 }
 0x4df   :  { %vm5816_vm10 = vcmp.gt.f32.partialorder %v5809_v63, 0.0  ;;  %v5820_v4 = vmul.f32 0.2, %v5809_v63  ;;  %v5811_v5 = vadd.f32 %v5810_v17, %v5768_v62  ;;  %v5823_v6 = vsel %vm5815_vm9, %v5807_v41, %v5819_v0 }
 0x4e0   :  { %v5812_v8 = vpop.f32.mrf.mxu1  ;;  %v5839_v14 = vmul.f32 %v5832_v37, %v5823_v6 }
 0x4e1   :  { %vm5817_vm11 = vcmp.gt.f32.partialorder %v5811_v5, 0.0  ;;  %v5821_v3 = vmul.f32 0.2, %v5811_v5  ;;  %v5813_v57 = vadd.f32 %v5812_v8, %v5770_v15  ;;  %v5824_v11 = vsel %vm5816_vm10, %v5809_v63, %v5820_v4 }
 0x4e2   :  { %v5840_v16 = vmul.f32 %v5836_v44, %v5824_v11 }
 0x4e3   :  { %vm5818_vm12 = vcmp.gt.f32.partialorder %v5813_v57, 0.0  ;;  %v5822_v39 = vmul.f32 0.2, %v5813_v57  ;;  %v5825_v10 = vsel %vm5817_vm11, %v5811_v5, %v5821_v3 }
 0x4e4   :  { %v5843_v18 = vadd.f32 %v5840_v16, %v5839_v14  ;;  %v5841_v38 = vmul.f32 %v5832_v37, %v5825_v10 }
 0x4e5   :  { %v5826_v7 = vsel %vm5818_vm12, %v5813_v57, %v5822_v39 }
 0x4e6   :  { %5844 = vadd.xlane.f32.xlu0 %v5843_v18  ;;  %v5842_v19 = vmul.f32 %v5836_v44, %v5826_v7 }
 0x4e8   :  { %v5846_v9 = vadd.f32 %v5842_v19, %v5841_v38 }
 0x4ea   :  { %5847 = vadd.xlane.f32.xlu0 %v5846_v9 }
 0x56f   :  { %v5845_v61 = vpop.xlane.xlu0 %5844 }
 0x570   :  { %v5856_v23 = vadd.f32 %v6620_v22, %v5845_v61 }
 0x572   :  { %v5858_v24 = vsub.f32 0.0, %v5856_v23 }
 0x573   :  { %v5848_v26 = vpop.xlane.xlu0 %5847 }
 0x574   :  { %v5860_v27 = vmul.f32 1.442695, %v5858_v24  ;;  %v5857_v51 = vadd.f32 %v6620_v22, %v5848_v26 }
 0x576   :  { %7125 = vpow2.f32 %v5860_v27  ;;  %v5859_v45 = vsub.f32 0.0, %v5857_v51 }
 0x578   :  { %v5862_v32 = vmul.f32 1.442695, %v5859_v45 }
 0x57a   :  { %7127 = vpow2.f32 %v5862_v32 }
 0x583   :  { %v7126_v28 = vpop.eup %7125 }
 0x584   :  { %v5864_v33 = vadd.f32 1.0, %v7126_v28 }
 0x586   :  { %7129 = vrcp.f32 %v5864_v33 }
 0x587   :  { %v7128_v54 = vpop.eup %7127 }
 0x588   :  { %v5865_v25 = vadd.f32 1.0, %v7128_v54 }
 0x58a   :  { %7131 = vrcp.f32 %v5865_v25 }
 0x593   :  { %v7130_v34 = vpop.eup %7129 }
 0x594   :  { %5871 = vst.msk [vmem:[%s7612_s9] sm:$0xff] %vm5870_vm13, %v7130_v34 }
 0x597   :  { %v7132_v12 = vpop.eup %7131 }
 0x598   :  { %5872 = vst.msk [vmem:[%s7612_s9 + $0x8] sm:$0xff] %vm5870_vm13, %v7132_v12 }
 0x599   :  { %5877 = vsyncpa [#allocation4], 1 }
 0x59a   :  { %5878 = vsyncpa [#allocation6], 1 }
 0x59b   :  { %5879 = vsyncpa [#allocation9], 1 }
 0x59c   :  { %5880 = vsyncpa [#allocation12], 1 }

</bundles_post_ra>
